<compile_context>
chip_gen: v7x
topology: tpu7x:2x2x1
jax: 0.10.0
libtpu: 0.0.40
codegen_flags: <defaults>
</compile_context>

<pallas_src>
import functools

import jax
import jax.numpy as jnp
from jax.experimental import pallas as pl
from jax.experimental.pallas import tpu as pltpu


# Phase-tap table for stride-2 ConvTranspose2d(k=3, p=1, output_padding=1):
#   out[2i+dr, 2j+dc] = sum over ((ky,kx),(di,dj)) of in_pad[i+di, j+dj] @ W[:, :, ky, kx]
# (input padded with one zero row/col at the bottom/right).
_DECONV_PHASE_TAPS = {
    (0, 0): (((1, 1), (0, 0)),),
    (0, 1): (((1, 2), (0, 0)), ((1, 0), (0, 1))),
    (1, 0): (((2, 1), (0, 0)), ((0, 1), (1, 0))),
    (1, 1): (((2, 2), (0, 0)), ((2, 0), (0, 1)), ((0, 2), (1, 0)), ((0, 0), (1, 1))),
}


def _offset_groups():
    """Group the deconv taps by input offset (di, dj) -> [(phase_idx, ky, kx), ...]."""
    groups = {(di, dj): [] for di in range(2) for dj in range(2)}
    for dr in range(2):
        for dc in range(2):
            for (ky, kx), (di, dj) in _DECONV_PHASE_TAPS[(dr, dc)]:
                groups[(di, dj)].append((2 * dr + dc, ky, kx))
    order = ((0, 0), (0, 1), (1, 0), (1, 1))
    return tuple((off, tuple(groups[off])) for off in order)


_OFFSET_GROUPS = _offset_groups()


def _deconv_meta(cout):
    """Static column layout of the packed per-offset deconv weight slab."""
    metas = []
    col = 0
    for (di, dj), entries in _OFFSET_GROUPS:
        ent = []
        for (g, _ky, _kx) in entries:
            ent.append((g, col, col + cout))
            col += cout
        metas.append((di, dj, tuple(ent)))
    return tuple(metas), col


def _pack_deconv(dwk):
    """dwk: (3,3,Cin,Cout) -> (Cin, 9*Cout) with taps grouped by input offset."""
    blocks = []
    for (_off, entries) in _OFFSET_GROUPS:
        for (_g, ky, kx) in entries:
            blocks.append(dwk[ky, kx])
    return jnp.concatenate(blocks, axis=1)


# ------------------------------ in-kernel helpers ----------------------------

def _gather4(scr, dh, dw, H4, W4, C):
    """Concat over (p,q) in {0,1}^2 of the phase-split padded slice at (p+dh, q+dw).

    scr: (2, 2, H4+1, W4+1, C) VMEM scratch holding a parity-split, zero-padded
    image.  Returns a (4*H4*W4, C) bf16 LHS whose rows are ordered (p, q, u, v).
    """
    M4 = H4 * W4
    parts = []
    for p in range(2):
        for q in range(2):
            tr, tc = p + dh, q + dw
            sl = scr[tr % 2, tc % 2,
                     tr // 2: tr // 2 + H4,
                     tc // 2: tc // 2 + W4, :]
            parts.append(sl.reshape(M4, C))
    return jnp.concatenate(parts, axis=0)


def _deconv_phases(gather_fn, w_all, meta, M, cout):
    """4-phase transposed conv: one matmul per input offset, taps packed in w_all."""
    accs = [jnp.zeros((M, cout), jnp.float32) for _ in range(4)]
    for (di, dj, entries) in meta:
        lo, hi = entries[0][1], entries[-1][2]
        res = jnp.dot(gather_fn(di, dj), w_all[:, lo:hi],
                      preferred_element_type=jnp.float32)
        for (g, c0, c1) in entries:
            accs[g] = accs[g] + res[:, c0 - lo: c1 - lo]
    return accs


# --------------------------------- the kernel --------------------------------

def _attention_kernel(
    # per-batch inputs
    lhs1_ref, inq_ref,
    # stage-1 weights
    w0_ref, sc0_ref, sh0_ref,
    # stage-2 weights
    w1_ref, sc1_ref, sh1_ref,
    # composed fc
    wc_ref, bc_ref,
    # stage-3 weights
    dw1_ref, db1_ref, w11_ref, b11_ref, scp_ref, shp_ref,
    # stage-4 weights
    dw2_ref, db2_ref,
    # outputs
    att_ref, out_ref,
    # VMEM scratch
    x0q_pad, fp_pad, scq_pad,
    *, H4, W4, nc, K, meta1, meta2):
  M4 = H4 * W4          # spatial positions at H4 x W4
  M2 = 4 * M4           # spatial positions at H2 x W2

  # ---- stage 1: conv0 + BN + ReLU + 2x2 maxpool (single im2col matmul) ------
  # lhs1 rows are ordered (pool_r, pool_s, parity_a, parity_b, i, j).
  s1 = jnp.dot(lhs1_ref[0], w0_ref[...], preferred_element_type=jnp.float32)
  s1 = jnp.maximum(s1 * sc0_ref[...] + sh0_ref[...], 0.0)          # (16*M4, 256)
  x0q = jnp.maximum(jnp.maximum(s1[0:M2], s1[M2:2 * M2]),
                    jnp.maximum(s1[2 * M2:3 * M2], s1[3 * M2:4 * M2]))
  x0q_bf = x0q.astype(jnp.bfloat16)                                # (M2, 256) rows (a,b,i,j)

  # parity-split + zero-padded copy of x0 for the stage-2 conv reads
  x0q_pad[...] = jnp.zeros_like(x0q_pad)
  for a in range(2):
    for b in range(2):
      g = 2 * a + b
      x0q_pad[1 - a, 1 - b, a:a + H4, b:b + W4, :] = (
          x0q_bf[g * M4:(g + 1) * M4].reshape(H4, W4, 256))

  # ---- stage 2: conv1 + BN + ReLU + 2x2 maxpool (pool phases batched in M) --
  acc2 = jnp.zeros((M2, 128), jnp.float32)
  for kh in range(3):
    for kw in range(3):
      acc2 = acc2 + jnp.dot(_gather4(x0q_pad, kh, kw, H4, W4, 256),
                            w1_ref[kh, kw], preferred_element_type=jnp.float32)
  s2 = jnp.maximum(acc2 * sc1_ref[...] + sh1_ref[...], 0.0)        # (4*M4, 128)
  x1 = jnp.maximum(jnp.maximum(s2[0:M4], s2[M4:2 * M4]),
                   jnp.maximum(s2[2 * M4:3 * M4], s2[3 * M4:4 * M4]))  # (M4, 128)

  # ---- composed fc (fc2 o fc1) acting on the flattened spatial dim ----------
  fc = jnp.dot(wc_ref[...], x1.astype(jnp.bfloat16),
               preferred_element_type=jnp.float32) + bc_ref[...]    # (M4, 128)

  # ---- stage 3: deconv1 (4-phase) + ReLU + 1x1 skip + add + BN ---------------
  fp_pad[...] = jnp.zeros_like(fp_pad)
  fp_pad[0:H4, 0:W4, :] = fc.astype(jnp.bfloat16).reshape(H4, W4, 128)

  def read_fp(di, dj):
    return fp_pad[di:di + H4, dj:dj + W4, :].reshape(M4, 128)

  acc3 = _deconv_phases(read_fp, dw1_ref[...], meta1, M4, 64)

  skip = jnp.dot(x0q_bf, w11_ref[...],
                 preferred_element_type=jnp.float32) + b11_ref[...]  # (M2, 64)

  scq_pad[...] = jnp.zeros_like(scq_pad)
  for dr in range(2):
    for dc in range(2):
      g = 2 * dr + dc
      d = jnp.maximum(acc3[g] + db1_ref[...], 0.0)                   # relu(deconv1)
      sq = (d + skip[g * M4:(g + 1) * M4]) * scp_ref[...] + shp_ref[...]
      scq_pad[dr, dc, 0:H4, 0:W4, :] = sq.astype(jnp.bfloat16).reshape(H4, W4, 64)

  # ---- stage 4: deconv2 (4-phase) + sigmoid + final contraction --------------
  def read_score(di, dj):
    return _gather4(scq_pad, di, dj, H4, W4, 64)                     # (M2, 64)

  acc4 = _deconv_phases(read_score, dw2_ref[...], meta2, M2, K)

  out_acc = jnp.zeros((K, nc), jnp.float32)
  for dr in range(2):
    for dc in range(2):
      g = 2 * dr + dc
      att_t = jax.nn.sigmoid(acc4[g] + db2_ref[...]).T.astype(jnp.bfloat16)  # (K, M2)
      att_ref[0, g] = att_t                                          # lane-dense store
      out_acc = out_acc + jnp.dot(att_t, inq_ref[0, g],
                                  preferred_element_type=jnp.float32)
  out_ref[0] = out_acc


# ------------------------------- host-side glue ------------------------------

def bn_fold(gamma, beta, mean, var, pre_bias, eps=1e-5):
    """Fold inference BatchNorm (+ preceding bias) into per-channel (scale, shift)."""
    s = gamma / jnp.sqrt(var + eps)
    return (s.reshape(1, -1).astype(jnp.float32),
            ((pre_bias - mean) * s + beta).reshape(1, -1).astype(jnp.float32))


def _build_stage1_im2col(x_nhwc, H4, W4, nc):
    """(N,H,W,nc) -> (N, 16*H4*W4, 9*nc) bf16; rows (r,s,a,b,i,j), cols (kh,kw,c)."""
    xpad = jnp.pad(x_nhwc, ((0, 0), (1, 1), (1, 1), (0, 0)))
    groups = []
    for r in range(2):
        for s in range(2):
            for a in range(2):
                for b in range(2):
                    taps = []
                    for kh in range(3):
                        for kw in range(3):
                            r0 = 2 * a + r + kh
                            c0 = 2 * b + s + kw
                            taps.append(xpad[:, r0: r0 + 4 * (H4 - 1) + 1: 4,
                                             c0: c0 + 4 * (W4 - 1) + 1: 4, :])
                    groups.append(jnp.concatenate(taps, axis=-1))    # (N,H4,W4,9nc)
    lhs = jnp.stack(groups, axis=1)                                   # (N,16,H4,W4,9nc)
    n = x_nhwc.shape[0]
    return lhs.reshape(n, 16 * H4 * W4, 9 * nc).astype(jnp.bfloat16)


def _build_input_phases(x_nhwc, H4, W4):
    """(N,H,W,nc) -> (N, 4, 4*H4*W4, nc) bf16; phase (dr,dc), rows (e,f,u,m)."""
    n, _, _, nc = x_nhwc.shape
    xr = x_nhwc.reshape(n, H4, 2, 2, W4, 2, 2, nc)     # (N, u, e, dr, m, f, dc, c)
    xr = jnp.transpose(xr, (0, 3, 6, 2, 5, 1, 4, 7))   # (N, dr, dc, e, f, u, m, c)
    return xr.reshape(n, 4, 4 * H4 * W4, nc).astype(jnp.bfloat16)


def _assemble_attention_map(att_q, H4, W4, K):
    """(N, 4, K, 4*H4*W4) phase-major, rows (e,f,u,m) -> (N, K, H, W)."""
    n = att_q.shape[0]
    a = att_q.reshape(n, 2, 2, K, 2, 2, H4, W4)        # (N, dr, dc, K, e, f, u, m)
    a = jnp.transpose(a, (0, 3, 6, 4, 1, 7, 5, 2))     # (N, K, u, e, dr, m, f, dc)
    return a.reshape(n, K, 4 * H4, 4 * W4)


# ------------------------------- parameters ----------------------------------

def init_params(key, nc, K=8, fc_dim=12):
    nm0, nm1 = 256, 128
    ks = jax.random.split(key, 26)

    def nrm(k, shape, s=0.05):
        return jax.random.normal(k, shape, jnp.float32) * s

    p = {
        # atten_0
        "w0": nrm(ks[0], (nm0, nc, 3, 3)), "b0": nrm(ks[1], (nm0,)),
        "bn0_g": 1.0 + nrm(ks[2], (nm0,)), "bn0_b": nrm(ks[3], (nm0,)),
        "bn0_m": nrm(ks[4], (nm0,)), "bn0_v": 1.0 + jnp.abs(nrm(ks[5], (nm0,))),
        # atten_1
        "w1": nrm(ks[6], (nm1, nm0, 3, 3)), "b1": nrm(ks[7], (nm1,)),
        "bn1_g": 1.0 + nrm(ks[8], (nm1,)), "bn1_b": nrm(ks[9], (nm1,)),
        "bn1_m": nrm(ks[10], (nm1,)), "bn1_v": 1.0 + jnp.abs(nrm(ks[11], (nm1,))),
        # fc layers
        "fc1_w": nrm(ks[12], (fc_dim, fc_dim), 0.2), "fc1_b": nrm(ks[13], (fc_dim,), 0.2),
        "fc2_w": nrm(ks[14], (fc_dim, fc_dim), 0.2), "fc2_b": nrm(ks[15], (fc_dim,), 0.2),
        # cnn_1_1 (1x1 conv, stored as (Cout, Cin))
        "cnn11_w": nrm(ks[16], (64, nm0)), "cnn11_b": nrm(ks[17], (64,)),
        # deconv1 / deconv2 (ConvTranspose2d weight layout: (Cin, Cout, kH, kW))
        "dc1_w": nrm(ks[18], (nm1, 64, 3, 3)), "dc1_b": nrm(ks[19], (64,)),
        "dc2_w": nrm(ks[20], (64, K, 3, 3)), "dc2_b": nrm(ks[21], (K,)),
        # bn1 (post residual-add)
        "bnp_g": 1.0 + nrm(ks[22], (64,)), "bnp_b": nrm(ks[23], (64,)),
        "bnp_m": nrm(ks[24], (64,)), "bnp_v": 1.0 + jnp.abs(nrm(ks[25], (64,))),
    }
    return p


# --------------------------------- forward -----------------------------------

def attention_forward(params, inputs_nchw, K=8):
    p = params
    N, nc, H, W = inputs_nchw.shape
    assert H % 4 == 0 and W % 4 == 0, "spatial dims must be divisible by 4"
    H4, W4 = H // 4, W // 4
    M4 = H4 * W4
    M2 = 4 * M4
    fc_dim = M4
    assert p["fc1_w"].shape == (fc_dim, fc_dim), "fc_dim must equal (H/4)*(W/4)"

    x_nhwc = jnp.transpose(inputs_nchw, (0, 2, 3, 1)).astype(jnp.float32)

    # Host prep touches only the tiny raw input; everything downstream is in VMEM.
    lhs1 = _build_stage1_im2col(x_nhwc, H4, W4, nc)          # (N, 16*M4, 9*nc)
    inq = _build_input_phases(x_nhwc, H4, W4)                # (N, 4, M2, nc)

    # Parameter transforms (folded BN, reshaped / packed weights).
    sc0, sh0 = bn_fold(p["bn0_g"], p["bn0_b"], p["bn0_m"], p["bn0_v"], p["b0"])
    sc1, sh1 = bn_fold(p["bn1_g"], p["bn1_b"], p["bn1_m"], p["bn1_v"], p["b1"])
    scp, shp = bn_fold(p["bnp_g"], p["bnp_b"], p["bnp_m"], p["bnp_v"],
                       jnp.zeros((64,), jnp.float32))

    w0cat = jnp.transpose(p["w0"], (2, 3, 1, 0)).reshape(9 * nc, 256).astype(jnp.bfloat16)
    w1k = jnp.transpose(p["w1"], (2, 3, 1, 0)).astype(jnp.bfloat16)          # (3,3,256,128)
    wc = jnp.dot(p["fc2_w"], p["fc1_w"]).astype(jnp.bfloat16)                # (fc_dim, fc_dim)
    bc = (jnp.dot(p["fc2_w"], p["fc1_b"]) + p["fc2_b"]).reshape(fc_dim, 1).astype(jnp.float32)
    w11 = jnp.transpose(p["cnn11_w"], (1, 0)).astype(jnp.bfloat16)           # (256, 64)

    meta1, tot1 = _deconv_meta(64)
    meta2, tot2 = _deconv_meta(K)
    dw1_packed = _pack_deconv(jnp.transpose(p["dc1_w"], (2, 3, 0, 1))).astype(jnp.bfloat16)
    dw2_packed = _pack_deconv(jnp.transpose(p["dc2_w"], (2, 3, 0, 1))).astype(jnp.bfloat16)
    assert dw1_packed.shape == (128, tot1) and dw2_packed.shape == (64, tot2)

    db1 = p["dc1_b"].reshape(1, -1).astype(jnp.float32)
    b11 = p["cnn11_b"].reshape(1, -1).astype(jnp.float32)
    db2 = p["dc2_b"].reshape(1, -1).astype(jnp.float32)

    def bcast0(*shape):
        nd = len(shape)
        return pl.BlockSpec(shape, lambda n, _nd=nd: (0,) * _nd)

    in_specs = [
        pl.BlockSpec((1, 16 * M4, 9 * nc), lambda n: (n, 0, 0)),      # lhs1
        pl.BlockSpec((1, 4, M2, nc), lambda n: (n, 0, 0, 0)),         # inq
        bcast0(9 * nc, 256),                                           # w0cat
        bcast0(1, 256), bcast0(1, 256),                                # sc0, sh0
        bcast0(3, 3, 256, 128),                                        # w1k
        bcast0(1, 128), bcast0(1, 128),                                # sc1, sh1
        bcast0(fc_dim, fc_dim), bcast0(fc_dim, 1),                     # wc, bc
        bcast0(128, tot1), bcast0(1, 64),                              # dw1, db1
        bcast0(256, 64), bcast0(1, 64),                                # w11, b11
        bcast0(1, 64), bcast0(1, 64),                                  # scp, shp
        bcast0(64, tot2), bcast0(1, K),                                # dw2, db2
    ]
    out_specs = (
        pl.BlockSpec((1, 4, K, M2), lambda n: (n, 0, 0, 0)),
        pl.BlockSpec((1, K, nc), lambda n: (n, 0, 0)),
    )
    out_shape = (
        jax.ShapeDtypeStruct((N, 4, K, M2), jnp.bfloat16),             # attention map
        jax.ShapeDtypeStruct((N, K, nc), jnp.float32),                 # atten @ inputs
    )
    scratch_shapes = [
        pltpu.VMEM((2, 2, H4 + 1, W4 + 1, 256), jnp.bfloat16),         # x0 parity split (padded)
        pltpu.VMEM((H4 + 1, W4 + 1, 128), jnp.bfloat16),               # fc_atten (padded)
        pltpu.VMEM((2, 2, H4 + 1, W4 + 1, 64), jnp.bfloat16),          # score parity split (padded)
    ]

    kernel = functools.partial(_attention_kernel, H4=H4, W4=W4, nc=nc, K=K,
                               meta1=meta1, meta2=meta2)

    att_q, atten = pl.pallas_call(
        kernel,
        out_shape=out_shape,
        grid=(N,),
        in_specs=in_specs,
        out_specs=out_specs,
        scratch_shapes=scratch_shapes,
        compiler_params=pltpu.CompilerParams(dimension_semantics=("parallel",)),
    )(lhs1, inq, w0cat, sc0, sh0, w1k, sc1, sh1, wc, bc,
      dw1_packed, db1, w11, b11, scp, shp, dw2_packed, db2)

    atten_img = _assemble_attention_map(att_q.astype(jnp.float32), H4, W4, K)  # (N,K,H,W)
    atten_list = tuple(atten_img[:, k:k + 1, :, :] for k in range(K))
    return atten_list, atten


# ----------------------------------- main -------------------------------------

if __name__ == "__main__":
    # fc_dim = 12 requires (H/4)*(W/4) == 12 -> the implied 24 x 8 input
    # (original 96 x 32 image downsampled by 4).
    N, nc, H, W, K = 2, 4, 24, 8, 8

    key = jax.random.PRNGKey(0)
    k_param, k_input = jax.random.split(key)
    params = init_params(k_param, nc, K=K, fc_dim=(H // 4) * (W // 4))
    x = jax.random.normal(k_input, (N, nc, H, W), jnp.float32)

    fwd = jax.jit(functools.partial(attention_forward, K=K))
    atten_list, atten = fwd(params, x)

    jax.block_until_ready(atten)
    for a in atten_list:
        jax.block_until_ready(a)

    assert atten.shape == (N, K, nc)
    assert len(atten_list) == K and atten_list[0].shape == (N, 1, H, W)
    assert bool(jnp.all(jnp.isfinite(atten)))
    assert bool(jnp.all(jnp.isfinite(atten_list[0])))
    print("KERNEL_OK")
</pallas_src>

<mosaic_0001>
module attributes {stable_mosaic.version = 11 : i64} {
  func.func @_attention_kernel(%arg0: i32, %arg1: memref<1x192x36xbf16, #tpu.memory_space<vmem>>, %arg2: memref<1x4x48x4xbf16, #tpu.memory_space<vmem>>, %arg3: memref<36x256xbf16, #tpu.memory_space<vmem>>, %arg4: memref<1x256xf32, #tpu.memory_space<vmem>>, %arg5: memref<1x256xf32, #tpu.memory_space<vmem>>, %arg6: memref<3x3x256x128xbf16, #tpu.memory_space<vmem>>, %arg7: memref<1x128xf32, #tpu.memory_space<vmem>>, %arg8: memref<1x128xf32, #tpu.memory_space<vmem>>, %arg9: memref<12x12xbf16, #tpu.memory_space<vmem>>, %arg10: memref<12x1xf32, #tpu.memory_space<vmem>>, %arg11: memref<128x576xbf16, #tpu.memory_space<vmem>>, %arg12: memref<1x64xf32, #tpu.memory_space<vmem>>, %arg13: memref<256x64xbf16, #tpu.memory_space<vmem>>, %arg14: memref<1x64xf32, #tpu.memory_space<vmem>>, %arg15: memref<1x64xf32, #tpu.memory_space<vmem>>, %arg16: memref<1x64xf32, #tpu.memory_space<vmem>>, %arg17: memref<64x72xbf16, #tpu.memory_space<vmem>>, %arg18: memref<1x8xf32, #tpu.memory_space<vmem>>, %arg19: memref<1x4x8x48xbf16, #tpu.memory_space<vmem>>, %arg20: memref<1x8x4xf32, #tpu.memory_space<vmem>>, %arg21: memref<2x2x7x3x256xbf16, #tpu.memory_space<vmem>>, %arg22: memref<7x3x128xbf16, #tpu.memory_space<vmem>>, %arg23: memref<2x2x7x3x64xbf16, #tpu.memory_space<vmem>>) attributes {dimension_semantics = [#tpu.dimension_semantics<parallel>], iteration_bounds = array<i64: 2>, scalar_prefetch = 0 : i64, scratch_operands = 3 : i64, tpu.core_type = #tpu.core_type<tc>, window_params = [{transform_indices = @transform_0, window_bounds = array<i64: 1, 192, 36>}, {transform_indices = @transform_1, window_bounds = array<i64: 1, 4, 48, 4>}, {pipeline_mode = #tpu.pipeline_mode<synchronous>, transform_indices = @transform_2, window_bounds = array<i64: 36, 256>}, {pipeline_mode = #tpu.pipeline_mode<synchronous>, transform_indices = @transform_3, window_bounds = array<i64: 1, 256>}, {pipeline_mode = #tpu.pipeline_mode<synchronous>, transform_indices = @transform_4, window_bounds = array<i64: 1, 256>}, {pipeline_mode = #tpu.pipeline_mode<synchronous>, transform_indices = @transform_5, window_bounds = array<i64: 3, 3, 256, 128>}, {pipeline_mode = #tpu.pipeline_mode<synchronous>, transform_indices = @transform_6, window_bounds = array<i64: 1, 128>}, {pipeline_mode = #tpu.pipeline_mode<synchronous>, transform_indices = @transform_7, window_bounds = array<i64: 1, 128>}, {pipeline_mode = #tpu.pipeline_mode<synchronous>, transform_indices = @transform_8, window_bounds = array<i64: 12, 12>}, {pipeline_mode = #tpu.pipeline_mode<synchronous>, transform_indices = @transform_9, window_bounds = array<i64: 12, 1>}, {pipeline_mode = #tpu.pipeline_mode<synchronous>, transform_indices = @transform_10, window_bounds = array<i64: 128, 576>}, {pipeline_mode = #tpu.pipeline_mode<synchronous>, transform_indices = @transform_11, window_bounds = array<i64: 1, 64>}, {pipeline_mode = #tpu.pipeline_mode<synchronous>, transform_indices = @transform_12, window_bounds = array<i64: 256, 64>}, {pipeline_mode = #tpu.pipeline_mode<synchronous>, transform_indices = @transform_13, window_bounds = array<i64: 1, 64>}, {pipeline_mode = #tpu.pipeline_mode<synchronous>, transform_indices = @transform_14, window_bounds = array<i64: 1, 64>}, {pipeline_mode = #tpu.pipeline_mode<synchronous>, transform_indices = @transform_15, window_bounds = array<i64: 1, 64>}, {pipeline_mode = #tpu.pipeline_mode<synchronous>, transform_indices = @transform_16, window_bounds = array<i64: 64, 72>}, {pipeline_mode = #tpu.pipeline_mode<synchronous>, transform_indices = @transform_17, window_bounds = array<i64: 1, 8>}, {transform_indices = @transform_18, window_bounds = array<i64: 1, 4, 8, 48>}, {transform_indices = @transform_19, window_bounds = array<i64: 1, 8, 4>}]} {
    %c0 = arith.constant 0 : index
    %c0_0 = arith.constant 0 : index
    %c0_1 = arith.constant 0 : index
    %0 = vector.load %arg1[%c0, %c0_0, %c0_1] : memref<1x192x36xbf16, #tpu.memory_space<vmem>>, vector<1x192x36xbf16>
    %1 = vector.shape_cast %0 : vector<1x192x36xbf16> to vector<192x36xbf16>
    %c0_2 = arith.constant 0 : index
    %c0_3 = arith.constant 0 : index
    %2 = vector.load %arg3[%c0_2, %c0_3] : memref<36x256xbf16, #tpu.memory_space<vmem>>, vector<36x256xbf16>
    %cst = arith.constant dense<0.000000e+00> : vector<192x256xf32>
    %3 = tpu.matmul %1, %2, %cst {dimension_numbers = #tpu.dot_dimension_numbers<[1], [0], [0], [1], [0, 0, 1, 1], [], []>} : vector<192x36xbf16>, vector<36x256xbf16>, vector<192x256xf32> -> vector<192x256xf32>
    %c0_4 = arith.constant 0 : index
    %c0_5 = arith.constant 0 : index
    %4 = vector.load %arg4[%c0_4, %c0_5] : memref<1x256xf32, #tpu.memory_space<vmem>>, vector<1x256xf32>
    %5 = vector.broadcast %4 : vector<1x256xf32> to vector<192x256xf32>
    %6 = arith.mulf %3, %5 : vector<192x256xf32>
    %c0_6 = arith.constant 0 : index
    %c0_7 = arith.constant 0 : index
    %7 = vector.load %arg5[%c0_6, %c0_7] : memref<1x256xf32, #tpu.memory_space<vmem>>, vector<1x256xf32>
    %8 = vector.broadcast %7 : vector<1x256xf32> to vector<192x256xf32>
    %9 = arith.addf %6, %8 : vector<192x256xf32>
    %cst_8 = arith.constant 0.000000e+00 : f32
    %10 = vector.broadcast %cst_8 : f32 to vector<192x256xf32>
    %11 = arith.maximumf %9, %10 : vector<192x256xf32>
    %12 = vector.extract_strided_slice %11 {offsets = [0, 0], sizes = [48, 256], strides = [1, 1]} : vector<192x256xf32> to vector<48x256xf32>
    %13 = vector.extract_strided_slice %11 {offsets = [48, 0], sizes = [48, 256], strides = [1, 1]} : vector<192x256xf32> to vector<48x256xf32>
    %14 = arith.maximumf %12, %13 : vector<48x256xf32>
    %15 = vector.extract_strided_slice %11 {offsets = [96, 0], sizes = [48, 256], strides = [1, 1]} : vector<192x256xf32> to vector<48x256xf32>
    %16 = vector.extract_strided_slice %11 {offsets = [144, 0], sizes = [48, 256], strides = [1, 1]} : vector<192x256xf32> to vector<48x256xf32>
    %17 = arith.maximumf %15, %16 : vector<48x256xf32>
    %18 = arith.maximumf %14, %17 : vector<48x256xf32>
    %19 = arith.truncf %18 : vector<48x256xf32> to vector<48x256xbf16>
    %cst_9 = arith.constant 0.000000e+00 : bf16
    %20 = vector.broadcast %cst_9 : bf16 to vector<2x2x7x3x256xbf16>
    %c0_10 = arith.constant 0 : index
    %c0_11 = arith.constant 0 : index
    %c0_12 = arith.constant 0 : index
    %c0_13 = arith.constant 0 : index
    %c0_14 = arith.constant 0 : index
    %21 = vector.load %arg21[%c0_10, %c0_11, %c0_12, %c0_13, %c0_14] : memref<2x2x7x3x256xbf16, #tpu.memory_space<vmem>>, vector<2x2x7x3x256xbf16>
    tpu.vector_store %arg21[%c0_10, %c0_11, %c0_12, %c0_13, %c0_14], %20 {strides = array<i32>} : memref<2x2x7x3x256xbf16, #tpu.memory_space<vmem>>, vector<2x2x7x3x256xbf16>,
    %22 = vector.extract_strided_slice %19 {offsets = [0, 0], sizes = [12, 256], strides = [1, 1]} : vector<48x256xbf16> to vector<12x256xbf16>
    %23 = vector.shape_cast %22 : vector<12x256xbf16> to vector<6x2x256xbf16>
    %c1 = arith.constant 1 : index
    %c1_15 = arith.constant 1 : index
    %c0_16 = arith.constant 0 : index
    %c0_17 = arith.constant 0 : index
    %c0_18 = arith.constant 0 : index
    %24 = vector.load %arg21[%c1, %c1_15, %c0_16, %c0_17, %c0_18] : memref<2x2x7x3x256xbf16, #tpu.memory_space<vmem>>, vector<1x1x6x2x256xbf16>
    %25 = vector.shape_cast %24 : vector<1x1x6x2x256xbf16> to vector<6x2x256xbf16>
    %26 = vector.shape_cast %23 : vector<6x2x256xbf16> to vector<1x1x6x2x256xbf16>
    tpu.vector_store %arg21[%c1, %c1_15, %c0_16, %c0_17, %c0_18], %26 {strides = array<i32>} : memref<2x2x7x3x256xbf16, #tpu.memory_space<vmem>>, vector<1x1x6x2x256xbf16>,
    %27 = vector.extract_strided_slice %19 {offsets = [12, 0], sizes = [12, 256], strides = [1, 1]} : vector<48x256xbf16> to vector<12x256xbf16>
    %28 = vector.shape_cast %27 : vector<12x256xbf16> to vector<6x2x256xbf16>
    %c1_19 = arith.constant 1 : index
    %c0_20 = arith.constant 0 : index
    %c0_21 = arith.constant 0 : index
    %c1_22 = arith.constant 1 : index
    %c0_23 = arith.constant 0 : index
    %29 = vector.load %arg21[%c1_19, %c0_20, %c0_21, %c1_22, %c0_23] : memref<2x2x7x3x256xbf16, #tpu.memory_space<vmem>>, vector<1x1x6x2x256xbf16>
    %30 = vector.shape_cast %29 : vector<1x1x6x2x256xbf16> to vector<6x2x256xbf16>
    %31 = vector.shape_cast %28 : vector<6x2x256xbf16> to vector<1x1x6x2x256xbf16>
    tpu.vector_store %arg21[%c1_19, %c0_20, %c0_21, %c1_22, %c0_23], %31 {strides = array<i32>} : memref<2x2x7x3x256xbf16, #tpu.memory_space<vmem>>, vector<1x1x6x2x256xbf16>,
    %32 = vector.extract_strided_slice %19 {offsets = [24, 0], sizes = [12, 256], strides = [1, 1]} : vector<48x256xbf16> to vector<12x256xbf16>
    %33 = vector.shape_cast %32 : vector<12x256xbf16> to vector<6x2x256xbf16>
    %c0_24 = arith.constant 0 : index
    %c1_25 = arith.constant 1 : index
    %c1_26 = arith.constant 1 : index
    %c0_27 = arith.constant 0 : index
    %c0_28 = arith.constant 0 : index
    %34 = vector.load %arg21[%c0_24, %c1_25, %c1_26, %c0_27, %c0_28] : memref<2x2x7x3x256xbf16, #tpu.memory_space<vmem>>, vector<1x1x6x2x256xbf16>
    %35 = vector.shape_cast %34 : vector<1x1x6x2x256xbf16> to vector<6x2x256xbf16>
    %36 = vector.shape_cast %33 : vector<6x2x256xbf16> to vector<1x1x6x2x256xbf16>
    tpu.vector_store %arg21[%c0_24, %c1_25, %c1_26, %c0_27, %c0_28], %36 {strides = array<i32>} : memref<2x2x7x3x256xbf16, #tpu.memory_space<vmem>>, vector<1x1x6x2x256xbf16>,
    %37 = vector.extract_strided_slice %19 {offsets = [36, 0], sizes = [12, 256], strides = [1, 1]} : vector<48x256xbf16> to vector<12x256xbf16>
    %38 = vector.shape_cast %37 : vector<12x256xbf16> to vector<6x2x256xbf16>
    %c0_29 = arith.constant 0 : index
    %c0_30 = arith.constant 0 : index
    %c1_31 = arith.constant 1 : index
    %c1_32 = arith.constant 1 : index
    %c0_33 = arith.constant 0 : index
    %39 = vector.load %arg21[%c0_29, %c0_30, %c1_31, %c1_32, %c0_33] : memref<2x2x7x3x256xbf16, #tpu.memory_space<vmem>>, vector<1x1x6x2x256xbf16>
    %40 = vector.shape_cast %39 : vector<1x1x6x2x256xbf16> to vector<6x2x256xbf16>
    %41 = vector.shape_cast %38 : vector<6x2x256xbf16> to vector<1x1x6x2x256xbf16>
    tpu.vector_store %arg21[%c0_29, %c0_30, %c1_31, %c1_32, %c0_33], %41 {strides = array<i32>} : memref<2x2x7x3x256xbf16, #tpu.memory_space<vmem>>, vector<1x1x6x2x256xbf16>,
    %cst_34 = arith.constant 0.000000e+00 : f32
    %42 = vector.broadcast %cst_34 : f32 to vector<48x128xf32>
    %c0_35 = arith.constant 0 : index
    %c0_36 = arith.constant 0 : index
    %c0_37 = arith.constant 0 : index
    %c0_38 = arith.constant 0 : index
    %c0_39 = arith.constant 0 : index
    %43 = vector.load %arg21[%c0_35, %c0_36, %c0_37, %c0_38, %c0_39] : memref<2x2x7x3x256xbf16, #tpu.memory_space<vmem>>, vector<1x1x6x2x256xbf16>
    %44 = vector.shape_cast %43 : vector<1x1x6x2x256xbf16> to vector<6x2x256xbf16>
    %45 = vector.shape_cast %44 : vector<6x2x256xbf16> to vector<12x256xbf16>
    %c0_40 = arith.constant 0 : index
    %c1_41 = arith.constant 1 : index
    %c0_42 = arith.constant 0 : index
    %c0_43 = arith.constant 0 : index
    %c0_44 = arith.constant 0 : index
    %46 = vector.load %arg21[%c0_40, %c1_41, %c0_42, %c0_43, %c0_44] : memref<2x2x7x3x256xbf16, #tpu.memory_space<vmem>>, vector<1x1x6x2x256xbf16>
    %47 = vector.shape_cast %46 : vector<1x1x6x2x256xbf16> to vector<6x2x256xbf16>
    %48 = vector.shape_cast %47 : vector<6x2x256xbf16> to vector<12x256xbf16>
    %c1_45 = arith.constant 1 : index
    %c0_46 = arith.constant 0 : index
    %c0_47 = arith.constant 0 : index
    %c0_48 = arith.constant 0 : index
    %c0_49 = arith.constant 0 : index
    %49 = vector.load %arg21[%c1_45, %c0_46, %c0_47, %c0_48, %c0_49] : memref<2x2x7x3x256xbf16, #tpu.memory_space<vmem>>, vector<1x1x6x2x256xbf16>
    %50 = vector.shape_cast %49 : vector<1x1x6x2x256xbf16> to vector<6x2x256xbf16>
    %51 = vector.shape_cast %50 : vector<6x2x256xbf16> to vector<12x256xbf16>
    %c1_50 = arith.constant 1 : index
    %c1_51 = arith.constant 1 : index
    %c0_52 = arith.constant 0 : index
    %c0_53 = arith.constant 0 : index
    %c0_54 = arith.constant 0 : index
    %52 = vector.load %arg21[%c1_50, %c1_51, %c0_52, %c0_53, %c0_54] : memref<2x2x7x3x256xbf16, #tpu.memory_space<vmem>>, vector<1x1x6x2x256xbf16>
    %53 = vector.shape_cast %52 : vector<1x1x6x2x256xbf16> to vector<6x2x256xbf16>
    %54 = vector.shape_cast %53 : vector<6x2x256xbf16> to vector<12x256xbf16>
    %55 = tpu.concatenate %45, %48, %51, %54 in 0 : vector<12x256xbf16>, vector<12x256xbf16>, vector<12x256xbf16>, vector<12x256xbf16> -> vector<48x256xbf16>
    %c0_55 = arith.constant 0 : index
    %c0_56 = arith.constant 0 : index
    %c0_57 = arith.constant 0 : index
    %c0_58 = arith.constant 0 : index
    %56 = vector.load %arg6[%c0_55, %c0_56, %c0_57, %c0_58] : memref<3x3x256x128xbf16, #tpu.memory_space<vmem>>, vector<1x1x256x128xbf16>
    %57 = vector.shape_cast %56 : vector<1x1x256x128xbf16> to vector<256x128xbf16>
    %cst_59 = arith.constant dense<0.000000e+00> : vector<48x128xf32>
    %58 = tpu.matmul %55, %57, %cst_59 {dimension_numbers = #tpu.dot_dimension_numbers<[1], [0], [0], [1], [0, 0, 1, 1], [], []>} : vector<48x256xbf16>, vector<256x128xbf16>, vector<48x128xf32> -> vector<48x128xf32>
    %59 = arith.addf %42, %58 : vector<48x128xf32>
    %c0_60 = arith.constant 0 : index
    %c1_61 = arith.constant 1 : index
    %c0_62 = arith.constant 0 : index
    %c0_63 = arith.constant 0 : index
    %c0_64 = arith.constant 0 : index
    %60 = vector.load %arg21[%c0_60, %c1_61, %c0_62, %c0_63, %c0_64] : memref<2x2x7x3x256xbf16, #tpu.memory_space<vmem>>, vector<1x1x6x2x256xbf16>
    %61 = vector.shape_cast %60 : vector<1x1x6x2x256xbf16> to vector<6x2x256xbf16>
    %62 = vector.shape_cast %61 : vector<6x2x256xbf16> to vector<12x256xbf16>
    %c0_65 = arith.constant 0 : index
    %c0_66 = arith.constant 0 : index
    %c0_67 = arith.constant 0 : index
    %c1_68 = arith.constant 1 : index
    %c0_69 = arith.constant 0 : index
    %63 = vector.load %arg21[%c0_65, %c0_66, %c0_67, %c1_68, %c0_69] : memref<2x2x7x3x256xbf16, #tpu.memory_space<vmem>>, vector<1x1x6x2x256xbf16>
    %64 = vector.shape_cast %63 : vector<1x1x6x2x256xbf16> to vector<6x2x256xbf16>
    %65 = vector.shape_cast %64 : vector<6x2x256xbf16> to vector<12x256xbf16>
    %c1_70 = arith.constant 1 : index
    %c1_71 = arith.constant 1 : index
    %c0_72 = arith.constant 0 : index
    %c0_73 = arith.constant 0 : index
    %c0_74 = arith.constant 0 : index
    %66 = vector.load %arg21[%c1_70, %c1_71, %c0_72, %c0_73, %c0_74] : memref<2x2x7x3x256xbf16, #tpu.memory_space<vmem>>, vector<1x1x6x2x256xbf16>
    %67 = vector.shape_cast %66 : vector<1x1x6x2x256xbf16> to vector<6x2x256xbf16>
    %68 = vector.shape_cast %67 : vector<6x2x256xbf16> to vector<12x256xbf16>
    %c1_75 = arith.constant 1 : index
    %c0_76 = arith.constant 0 : index
    %c0_77 = arith.constant 0 : index
    %c1_78 = arith.constant 1 : index
    %c0_79 = arith.constant 0 : index
    %69 = vector.load %arg21[%c1_75, %c0_76, %c0_77, %c1_78, %c0_79] : memref<2x2x7x3x256xbf16, #tpu.memory_space<vmem>>, vector<1x1x6x2x256xbf16>
    %70 = vector.shape_cast %69 : vector<1x1x6x2x256xbf16> to vector<6x2x256xbf16>
    %71 = vector.shape_cast %70 : vector<6x2x256xbf16> to vector<12x256xbf16>
    %72 = tpu.concatenate %62, %65, %68, %71 in 0 : vector<12x256xbf16>, vector<12x256xbf16>, vector<12x256xbf16>, vector<12x256xbf16> -> vector<48x256xbf16>
    %c0_80 = arith.constant 0 : index
    %c1_81 = arith.constant 1 : index
    %c0_82 = arith.constant 0 : index
    %c0_83 = arith.constant 0 : index
    %73 = vector.load %arg6[%c0_80, %c1_81, %c0_82, %c0_83] : memref<3x3x256x128xbf16, #tpu.memory_space<vmem>>, vector<1x1x256x128xbf16>
    %74 = vector.shape_cast %73 : vector<1x1x256x128xbf16> to vector<256x128xbf16>
    %cst_84 = arith.constant dense<0.000000e+00> : vector<48x128xf32>
    %75 = tpu.matmul %72, %74, %cst_84 {dimension_numbers = #tpu.dot_dimension_numbers<[1], [0], [0], [1], [0, 0, 1, 1], [], []>} : vector<48x256xbf16>, vector<256x128xbf16>, vector<48x128xf32> -> vector<48x128xf32>
    %76 = arith.addf %59, %75 : vector<48x128xf32>
    %c0_85 = arith.constant 0 : index
    %c0_86 = arith.constant 0 : index
    %c0_87 = arith.constant 0 : index
    %c1_88 = arith.constant 1 : index
    %c0_89 = arith.constant 0 : index
    %77 = vector.load %arg21[%c0_85, %c0_86, %c0_87, %c1_88, %c0_89] : memref<2x2x7x3x256xbf16, #tpu.memory_space<vmem>>, vector<1x1x6x2x256xbf16>
    %78 = vector.shape_cast %77 : vector<1x1x6x2x256xbf16> to vector<6x2x256xbf16>
    %79 = vector.shape_cast %78 : vector<6x2x256xbf16> to vector<12x256xbf16>
    %c0_90 = arith.constant 0 : index
    %c1_91 = arith.constant 1 : index
    %c0_92 = arith.constant 0 : index
    %c1_93 = arith.constant 1 : index
    %c0_94 = arith.constant 0 : index
    %80 = vector.load %arg21[%c0_90, %c1_91, %c0_92, %c1_93, %c0_94] : memref<2x2x7x3x256xbf16, #tpu.memory_space<vmem>>, vector<1x1x6x2x256xbf16>
    %81 = vector.shape_cast %80 : vector<1x1x6x2x256xbf16> to vector<6x2x256xbf16>
    %82 = vector.shape_cast %81 : vector<6x2x256xbf16> to vector<12x256xbf16>
    %c1_95 = arith.constant 1 : index
    %c0_96 = arith.constant 0 : index
    %c0_97 = arith.constant 0 : index
    %c1_98 = arith.constant 1 : index
    %c0_99 = arith.constant 0 : index
    %83 = vector.load %arg21[%c1_95, %c0_96, %c0_97, %c1_98, %c0_99] : memref<2x2x7x3x256xbf16, #tpu.memory_space<vmem>>, vector<1x1x6x2x256xbf16>
    %84 = vector.shape_cast %83 : vector<1x1x6x2x256xbf16> to vector<6x2x256xbf16>
    %85 = vector.shape_cast %84 : vector<6x2x256xbf16> to vector<12x256xbf16>
    %c1_100 = arith.constant 1 : index
    %c1_101 = arith.constant 1 : index
    %c0_102 = arith.constant 0 : index
    %c1_103 = arith.constant 1 : index
    %c0_104 = arith.constant 0 : index
    %86 = vector.load %arg21[%c1_100, %c1_101, %c0_102, %c1_103, %c0_104] : memref<2x2x7x3x256xbf16, #tpu.memory_space<vmem>>, vector<1x1x6x2x256xbf16>
    %87 = vector.shape_cast %86 : vector<1x1x6x2x256xbf16> to vector<6x2x256xbf16>
    %88 = vector.shape_cast %87 : vector<6x2x256xbf16> to vector<12x256xbf16>
    %89 = tpu.concatenate %79, %82, %85, %88 in 0 : vector<12x256xbf16>, vector<12x256xbf16>, vector<12x256xbf16>, vector<12x256xbf16> -> vector<48x256xbf16>
    %c0_105 = arith.constant 0 : index
    %c2 = arith.constant 2 : index
    %c0_106 = arith.constant 0 : index
    %c0_107 = arith.constant 0 : index
    %90 = vector.load %arg6[%c0_105, %c2, %c0_106, %c0_107] : memref<3x3x256x128xbf16, #tpu.memory_space<vmem>>, vector<1x1x256x128xbf16>
    %91 = vector.shape_cast %90 : vector<1x1x256x128xbf16> to vector<256x128xbf16>
    %cst_108 = arith.constant dense<0.000000e+00> : vector<48x128xf32>
    %92 = tpu.matmul %89, %91, %cst_108 {dimension_numbers = #tpu.dot_dimension_numbers<[1], [0], [0], [1], [0, 0, 1, 1], [], []>} : vector<48x256xbf16>, vector<256x128xbf16>, vector<48x128xf32> -> vector<48x128xf32>
    %93 = arith.addf %76, %92 : vector<48x128xf32>
    %c1_109 = arith.constant 1 : index
    %c0_110 = arith.constant 0 : index
    %c0_111 = arith.constant 0 : index
    %c0_112 = arith.constant 0 : index
    %c0_113 = arith.constant 0 : index
    %94 = vector.load %arg21[%c1_109, %c0_110, %c0_111, %c0_112, %c0_113] : memref<2x2x7x3x256xbf16, #tpu.memory_space<vmem>>, vector<1x1x6x2x256xbf16>
    %95 = vector.shape_cast %94 : vector<1x1x6x2x256xbf16> to vector<6x2x256xbf16>
    %96 = vector.shape_cast %95 : vector<6x2x256xbf16> to vector<12x256xbf16>
    %c1_114 = arith.constant 1 : index
    %c1_115 = arith.constant 1 : index
    %c0_116 = arith.constant 0 : index
    %c0_117 = arith.constant 0 : index
    %c0_118 = arith.constant 0 : index
    %97 = vector.load %arg21[%c1_114, %c1_115, %c0_116, %c0_117, %c0_118] : memref<2x2x7x3x256xbf16, #tpu.memory_space<vmem>>, vector<1x1x6x2x256xbf16>
    %98 = vector.shape_cast %97 : vector<1x1x6x2x256xbf16> to vector<6x2x256xbf16>
    %99 = vector.shape_cast %98 : vector<6x2x256xbf16> to vector<12x256xbf16>
    %c0_119 = arith.constant 0 : index
    %c0_120 = arith.constant 0 : index
    %c1_121 = arith.constant 1 : index
    %c0_122 = arith.constant 0 : index
    %c0_123 = arith.constant 0 : index
    %100 = vector.load %arg21[%c0_119, %c0_120, %c1_121, %c0_122, %c0_123] : memref<2x2x7x3x256xbf16, #tpu.memory_space<vmem>>, vector<1x1x6x2x256xbf16>
    %101 = vector.shape_cast %100 : vector<1x1x6x2x256xbf16> to vector<6x2x256xbf16>
    %102 = vector.shape_cast %101 : vector<6x2x256xbf16> to vector<12x256xbf16>
    %c0_124 = arith.constant 0 : index
    %c1_125 = arith.constant 1 : index
    %c1_126 = arith.constant 1 : index
    %c0_127 = arith.constant 0 : index
    %c0_128 = arith.constant 0 : index
    %103 = vector.load %arg21[%c0_124, %c1_125, %c1_126, %c0_127, %c0_128] : memref<2x2x7x3x256xbf16, #tpu.memory_space<vmem>>, vector<1x1x6x2x256xbf16>
    %104 = vector.shape_cast %103 : vector<1x1x6x2x256xbf16> to vector<6x2x256xbf16>
    %105 = vector.shape_cast %104 : vector<6x2x256xbf16> to vector<12x256xbf16>
    %106 = tpu.concatenate %96, %99, %102, %105 in 0 : vector<12x256xbf16>, vector<12x256xbf16>, vector<12x256xbf16>, vector<12x256xbf16> -> vector<48x256xbf16>
    %c1_129 = arith.constant 1 : index
    %c0_130 = arith.constant 0 : index
    %c0_131 = arith.constant 0 : index
    %c0_132 = arith.constant 0 : index
    %107 = vector.load %arg6[%c1_129, %c0_130, %c0_131, %c0_132] : memref<3x3x256x128xbf16, #tpu.memory_space<vmem>>, vector<1x1x256x128xbf16>
    %108 = vector.shape_cast %107 : vector<1x1x256x128xbf16> to vector<256x128xbf16>
    %cst_133 = arith.constant dense<0.000000e+00> : vector<48x128xf32>
    %109 = tpu.matmul %106, %108, %cst_133 {dimension_numbers = #tpu.dot_dimension_numbers<[1], [0], [0], [1], [0, 0, 1, 1], [], []>} : vector<48x256xbf16>, vector<256x128xbf16>, vector<48x128xf32> -> vector<48x128xf32>
    %110 = arith.addf %93, %109 : vector<48x128xf32>
    %c1_134 = arith.constant 1 : index
    %c1_135 = arith.constant 1 : index
    %c0_136 = arith.constant 0 : index
    %c0_137 = arith.constant 0 : index
    %c0_138 = arith.constant 0 : index
    %111 = vector.load %arg21[%c1_134, %c1_135, %c0_136, %c0_137, %c0_138] : memref<2x2x7x3x256xbf16, #tpu.memory_space<vmem>>, vector<1x1x6x2x256xbf16>
    %112 = vector.shape_cast %111 : vector<1x1x6x2x256xbf16> to vector<6x2x256xbf16>
    %113 = vector.shape_cast %112 : vector<6x2x256xbf16> to vector<12x256xbf16>
    %c1_139 = arith.constant 1 : index
    %c0_140 = arith.constant 0 : index
    %c0_141 = arith.constant 0 : index
    %c1_142 = arith.constant 1 : index
    %c0_143 = arith.constant 0 : index
    %114 = vector.load %arg21[%c1_139, %c0_140, %c0_141, %c1_142, %c0_143] : memref<2x2x7x3x256xbf16, #tpu.memory_space<vmem>>, vector<1x1x6x2x256xbf16>
    %115 = vector.shape_cast %114 : vector<1x1x6x2x256xbf16> to vector<6x2x256xbf16>
    %116 = vector.shape_cast %115 : vector<6x2x256xbf16> to vector<12x256xbf16>
    %c0_144 = arith.constant 0 : index
    %c1_145 = arith.constant 1 : index
    %c1_146 = arith.constant 1 : index
    %c0_147 = arith.constant 0 : index
    %c0_148 = arith.constant 0 : index
    %117 = vector.load %arg21[%c0_144, %c1_145, %c1_146, %c0_147, %c0_148] : memref<2x2x7x3x256xbf16, #tpu.memory_space<vmem>>, vector<1x1x6x2x256xbf16>
    %118 = vector.shape_cast %117 : vector<1x1x6x2x256xbf16> to vector<6x2x256xbf16>
    %119 = vector.shape_cast %118 : vector<6x2x256xbf16> to vector<12x256xbf16>
    %c0_149 = arith.constant 0 : index
    %c0_150 = arith.constant 0 : index
    %c1_151 = arith.constant 1 : index
    %c1_152 = arith.constant 1 : index
    %c0_153 = arith.constant 0 : index
    %120 = vector.load %arg21[%c0_149, %c0_150, %c1_151, %c1_152, %c0_153] : memref<2x2x7x3x256xbf16, #tpu.memory_space<vmem>>, vector<1x1x6x2x256xbf16>
    %121 = vector.shape_cast %120 : vector<1x1x6x2x256xbf16> to vector<6x2x256xbf16>
    %122 = vector.shape_cast %121 : vector<6x2x256xbf16> to vector<12x256xbf16>
    %123 = tpu.concatenate %113, %116, %119, %122 in 0 : vector<12x256xbf16>, vector<12x256xbf16>, vector<12x256xbf16>, vector<12x256xbf16> -> vector<48x256xbf16>
    %c1_154 = arith.constant 1 : index
    %c1_155 = arith.constant 1 : index
    %c0_156 = arith.constant 0 : index
    %c0_157 = arith.constant 0 : index
    %124 = vector.load %arg6[%c1_154, %c1_155, %c0_156, %c0_157] : memref<3x3x256x128xbf16, #tpu.memory_space<vmem>>, vector<1x1x256x128xbf16>
    %125 = vector.shape_cast %124 : vector<1x1x256x128xbf16> to vector<256x128xbf16>
    %cst_158 = arith.constant dense<0.000000e+00> : vector<48x128xf32>
    %126 = tpu.matmul %123, %125, %cst_158 {dimension_numbers = #tpu.dot_dimension_numbers<[1], [0], [0], [1], [0, 0, 1, 1], [], []>} : vector<48x256xbf16>, vector<256x128xbf16>, vector<48x128xf32> -> vector<48x128xf32>
    %127 = arith.addf %110, %126 : vector<48x128xf32>
    %c1_159 = arith.constant 1 : index
    %c0_160 = arith.constant 0 : index
    %c0_161 = arith.constant 0 : index
    %c1_162 = arith.constant 1 : index
    %c0_163 = arith.constant 0 : index
    %128 = vector.load %arg21[%c1_159, %c0_160, %c0_161, %c1_162, %c0_163] : memref<2x2x7x3x256xbf16, #tpu.memory_space<vmem>>, vector<1x1x6x2x256xbf16>
    %129 = vector.shape_cast %128 : vector<1x1x6x2x256xbf16> to vector<6x2x256xbf16>
    %130 = vector.shape_cast %129 : vector<6x2x256xbf16> to vector<12x256xbf16>
    %c1_164 = arith.constant 1 : index
    %c1_165 = arith.constant 1 : index
    %c0_166 = arith.constant 0 : index
    %c1_167 = arith.constant 1 : index
    %c0_168 = arith.constant 0 : index
    %131 = vector.load %arg21[%c1_164, %c1_165, %c0_166, %c1_167, %c0_168] : memref<2x2x7x3x256xbf16, #tpu.memory_space<vmem>>, vector<1x1x6x2x256xbf16>
    %132 = vector.shape_cast %131 : vector<1x1x6x2x256xbf16> to vector<6x2x256xbf16>
    %133 = vector.shape_cast %132 : vector<6x2x256xbf16> to vector<12x256xbf16>
    %c0_169 = arith.constant 0 : index
    %c0_170 = arith.constant 0 : index
    %c1_171 = arith.constant 1 : index
    %c1_172 = arith.constant 1 : index
    %c0_173 = arith.constant 0 : index
    %134 = vector.load %arg21[%c0_169, %c0_170, %c1_171, %c1_172, %c0_173] : memref<2x2x7x3x256xbf16, #tpu.memory_space<vmem>>, vector<1x1x6x2x256xbf16>
    %135 = vector.shape_cast %134 : vector<1x1x6x2x256xbf16> to vector<6x2x256xbf16>
    %136 = vector.shape_cast %135 : vector<6x2x256xbf16> to vector<12x256xbf16>
    %c0_174 = arith.constant 0 : index
    %c1_175 = arith.constant 1 : index
    %c1_176 = arith.constant 1 : index
    %c1_177 = arith.constant 1 : index
    %c0_178 = arith.constant 0 : index
    %137 = vector.load %arg21[%c0_174, %c1_175, %c1_176, %c1_177, %c0_178] : memref<2x2x7x3x256xbf16, #tpu.memory_space<vmem>>, vector<1x1x6x2x256xbf16>
    %138 = vector.shape_cast %137 : vector<1x1x6x2x256xbf16> to vector<6x2x256xbf16>
    %139 = vector.shape_cast %138 : vector<6x2x256xbf16> to vector<12x256xbf16>
    %140 = tpu.concatenate %130, %133, %136, %139 in 0 : vector<12x256xbf16>, vector<12x256xbf16>, vector<12x256xbf16>, vector<12x256xbf16> -> vector<48x256xbf16>
    %c1_179 = arith.constant 1 : index
    %c2_180 = arith.constant 2 : index
    %c0_181 = arith.constant 0 : index
    %c0_182 = arith.constant 0 : index
    %141 = vector.load %arg6[%c1_179, %c2_180, %c0_181, %c0_182] : memref<3x3x256x128xbf16, #tpu.memory_space<vmem>>, vector<1x1x256x128xbf16>
    %142 = vector.shape_cast %141 : vector<1x1x256x128xbf16> to vector<256x128xbf16>
    %cst_183 = arith.constant dense<0.000000e+00> : vector<48x128xf32>
    %143 = tpu.matmul %140, %142, %cst_183 {dimension_numbers = #tpu.dot_dimension_numbers<[1], [0], [0], [1], [0, 0, 1, 1], [], []>} : vector<48x256xbf16>, vector<256x128xbf16>, vector<48x128xf32> -> vector<48x128xf32>
    %144 = arith.addf %127, %143 : vector<48x128xf32>
    %c0_184 = arith.constant 0 : index
    %c0_185 = arith.constant 0 : index
    %c1_186 = arith.constant 1 : index
    %c0_187 = arith.constant 0 : index
    %c0_188 = arith.constant 0 : index
    %145 = vector.load %arg21[%c0_184, %c0_185, %c1_186, %c0_187, %c0_188] : memref<2x2x7x3x256xbf16, #tpu.memory_space<vmem>>, vector<1x1x6x2x256xbf16>
    %146 = vector.shape_cast %145 : vector<1x1x6x2x256xbf16> to vector<6x2x256xbf16>
    %147 = vector.shape_cast %146 : vector<6x2x256xbf16> to vector<12x256xbf16>
    %c0_189 = arith.constant 0 : index
    %c1_190 = arith.constant 1 : index
    %c1_191 = arith.constant 1 : index
    %c0_192 = arith.constant 0 : index
    %c0_193 = arith.constant 0 : index
    %148 = vector.load %arg21[%c0_189, %c1_190, %c1_191, %c0_192, %c0_193] : memref<2x2x7x3x256xbf16, #tpu.memory_space<vmem>>, vector<1x1x6x2x256xbf16>
    %149 = vector.shape_cast %148 : vector<1x1x6x2x256xbf16> to vector<6x2x256xbf16>
    %150 = vector.shape_cast %149 : vector<6x2x256xbf16> to vector<12x256xbf16>
    %c1_194 = arith.constant 1 : index
    %c0_195 = arith.constant 0 : index
    %c1_196 = arith.constant 1 : index
    %c0_197 = arith.constant 0 : index
    %c0_198 = arith.constant 0 : index
    %151 = vector.load %arg21[%c1_194, %c0_195, %c1_196, %c0_197, %c0_198] : memref<2x2x7x3x256xbf16, #tpu.memory_space<vmem>>, vector<1x1x6x2x256xbf16>
    %152 = vector.shape_cast %151 : vector<1x1x6x2x256xbf16> to vector<6x2x256xbf16>
    %153 = vector.shape_cast %152 : vector<6x2x256xbf16> to vector<12x256xbf16>
    %c1_199 = arith.constant 1 : index
    %c1_200 = arith.constant 1 : index
    %c1_201 = arith.constant 1 : index
    %c0_202 = arith.constant 0 : index
    %c0_203 = arith.constant 0 : index
    %154 = vector.load %arg21[%c1_199, %c1_200, %c1_201, %c0_202, %c0_203] : memref<2x2x7x3x256xbf16, #tpu.memory_space<vmem>>, vector<1x1x6x2x256xbf16>
    %155 = vector.shape_cast %154 : vector<1x1x6x2x256xbf16> to vector<6x2x256xbf16>
    %156 = vector.shape_cast %155 : vector<6x2x256xbf16> to vector<12x256xbf16>
    %157 = tpu.concatenate %147, %150, %153, %156 in 0 : vector<12x256xbf16>, vector<12x256xbf16>, vector<12x256xbf16>, vector<12x256xbf16> -> vector<48x256xbf16>
    %c2_204 = arith.constant 2 : index
    %c0_205 = arith.constant 0 : index
    %c0_206 = arith.constant 0 : index
    %c0_207 = arith.constant 0 : index
    %158 = vector.load %arg6[%c2_204, %c0_205, %c0_206, %c0_207] : memref<3x3x256x128xbf16, #tpu.memory_space<vmem>>, vector<1x1x256x128xbf16>
    %159 = vector.shape_cast %158 : vector<1x1x256x128xbf16> to vector<256x128xbf16>
    %cst_208 = arith.constant dense<0.000000e+00> : vector<48x128xf32>
    %160 = tpu.matmul %157, %159, %cst_208 {dimension_numbers = #tpu.dot_dimension_numbers<[1], [0], [0], [1], [0, 0, 1, 1], [], []>} : vector<48x256xbf16>, vector<256x128xbf16>, vector<48x128xf32> -> vector<48x128xf32>
    %161 = arith.addf %144, %160 : vector<48x128xf32>
    %c0_209 = arith.constant 0 : index
    %c1_210 = arith.constant 1 : index
    %c1_211 = arith.constant 1 : index
    %c0_212 = arith.constant 0 : index
    %c0_213 = arith.constant 0 : index
    %162 = vector.load %arg21[%c0_209, %c1_210, %c1_211, %c0_212, %c0_213] : memref<2x2x7x3x256xbf16, #tpu.memory_space<vmem>>, vector<1x1x6x2x256xbf16>
    %163 = vector.shape_cast %162 : vector<1x1x6x2x256xbf16> to vector<6x2x256xbf16>
    %164 = vector.shape_cast %163 : vector<6x2x256xbf16> to vector<12x256xbf16>
    %c0_214 = arith.constant 0 : index
    %c0_215 = arith.constant 0 : index
    %c1_216 = arith.constant 1 : index
    %c1_217 = arith.constant 1 : index
    %c0_218 = arith.constant 0 : index
    %165 = vector.load %arg21[%c0_214, %c0_215, %c1_216, %c1_217, %c0_218] : memref<2x2x7x3x256xbf16, #tpu.memory_space<vmem>>, vector<1x1x6x2x256xbf16>
    %166 = vector.shape_cast %165 : vector<1x1x6x2x256xbf16> to vector<6x2x256xbf16>
    %167 = vector.shape_cast %166 : vector<6x2x256xbf16> to vector<12x256xbf16>
    %c1_219 = arith.constant 1 : index
    %c1_220 = arith.constant 1 : index
    %c1_221 = arith.constant 1 : index
    %c0_222 = arith.constant 0 : index
    %c0_223 = arith.constant 0 : index
    %168 = vector.load %arg21[%c1_219, %c1_220, %c1_221, %c0_222, %c0_223] : memref<2x2x7x3x256xbf16, #tpu.memory_space<vmem>>, vector<1x1x6x2x256xbf16>
    %169 = vector.shape_cast %168 : vector<1x1x6x2x256xbf16> to vector<6x2x256xbf16>
    %170 = vector.shape_cast %169 : vector<6x2x256xbf16> to vector<12x256xbf16>
    %c1_224 = arith.constant 1 : index
    %c0_225 = arith.constant 0 : index
    %c1_226 = arith.constant 1 : index
    %c1_227 = arith.constant 1 : index
    %c0_228 = arith.constant 0 : index
    %171 = vector.load %arg21[%c1_224, %c0_225, %c1_226, %c1_227, %c0_228] : memref<2x2x7x3x256xbf16, #tpu.memory_space<vmem>>, vector<1x1x6x2x256xbf16>
    %172 = vector.shape_cast %171 : vector<1x1x6x2x256xbf16> to vector<6x2x256xbf16>
    %173 = vector.shape_cast %172 : vector<6x2x256xbf16> to vector<12x256xbf16>
    %174 = tpu.concatenate %164, %167, %170, %173 in 0 : vector<12x256xbf16>, vector<12x256xbf16>, vector<12x256xbf16>, vector<12x256xbf16> -> vector<48x256xbf16>
    %c2_229 = arith.constant 2 : index
    %c1_230 = arith.constant 1 : index
    %c0_231 = arith.constant 0 : index
    %c0_232 = arith.constant 0 : index
    %175 = vector.load %arg6[%c2_229, %c1_230, %c0_231, %c0_232] : memref<3x3x256x128xbf16, #tpu.memory_space<vmem>>, vector<1x1x256x128xbf16>
    %176 = vector.shape_cast %175 : vector<1x1x256x128xbf16> to vector<256x128xbf16>
    %cst_233 = arith.constant dense<0.000000e+00> : vector<48x128xf32>
    %177 = tpu.matmul %174, %176, %cst_233 {dimension_numbers = #tpu.dot_dimension_numbers<[1], [0], [0], [1], [0, 0, 1, 1], [], []>} : vector<48x256xbf16>, vector<256x128xbf16>, vector<48x128xf32> -> vector<48x128xf32>
    %178 = arith.addf %161, %177 : vector<48x128xf32>
    %c0_234 = arith.constant 0 : index
    %c0_235 = arith.constant 0 : index
    %c1_236 = arith.constant 1 : index
    %c1_237 = arith.constant 1 : index
    %c0_238 = arith.constant 0 : index
    %179 = vector.load %arg21[%c0_234, %c0_235, %c1_236, %c1_237, %c0_238] : memref<2x2x7x3x256xbf16, #tpu.memory_space<vmem>>, vector<1x1x6x2x256xbf16>
    %180 = vector.shape_cast %179 : vector<1x1x6x2x256xbf16> to vector<6x2x256xbf16>
    %181 = vector.shape_cast %180 : vector<6x2x256xbf16> to vector<12x256xbf16>
    %c0_239 = arith.constant 0 : index
    %c1_240 = arith.constant 1 : index
    %c1_241 = arith.constant 1 : index
    %c1_242 = arith.constant 1 : index
    %c0_243 = arith.constant 0 : index
    %182 = vector.load %arg21[%c0_239, %c1_240, %c1_241, %c1_242, %c0_243] : memref<2x2x7x3x256xbf16, #tpu.memory_space<vmem>>, vector<1x1x6x2x256xbf16>
    %183 = vector.shape_cast %182 : vector<1x1x6x2x256xbf16> to vector<6x2x256xbf16>
    %184 = vector.shape_cast %183 : vector<6x2x256xbf16> to vector<12x256xbf16>
    %c1_244 = arith.constant 1 : index
    %c0_245 = arith.constant 0 : index
    %c1_246 = arith.constant 1 : index
    %c1_247 = arith.constant 1 : index
    %c0_248 = arith.constant 0 : index
    %185 = vector.load %arg21[%c1_244, %c0_245, %c1_246, %c1_247, %c0_248] : memref<2x2x7x3x256xbf16, #tpu.memory_space<vmem>>, vector<1x1x6x2x256xbf16>
    %186 = vector.shape_cast %185 : vector<1x1x6x2x256xbf16> to vector<6x2x256xbf16>
    %187 = vector.shape_cast %186 : vector<6x2x256xbf16> to vector<12x256xbf16>
    %c1_249 = arith.constant 1 : index
    %c1_250 = arith.constant 1 : index
    %c1_251 = arith.constant 1 : index
    %c1_252 = arith.constant 1 : index
    %c0_253 = arith.constant 0 : index
    %188 = vector.load %arg21[%c1_249, %c1_250, %c1_251, %c1_252, %c0_253] : memref<2x2x7x3x256xbf16, #tpu.memory_space<vmem>>, vector<1x1x6x2x256xbf16>
    %189 = vector.shape_cast %188 : vector<1x1x6x2x256xbf16> to vector<6x2x256xbf16>
    %190 = vector.shape_cast %189 : vector<6x2x256xbf16> to vector<12x256xbf16>
    %191 = tpu.concatenate %181, %184, %187, %190 in 0 : vector<12x256xbf16>, vector<12x256xbf16>, vector<12x256xbf16>, vector<12x256xbf16> -> vector<48x256xbf16>
    %c2_254 = arith.constant 2 : index
    %c2_255 = arith.constant 2 : index
    %c0_256 = arith.constant 0 : index
    %c0_257 = arith.constant 0 : index
    %192 = vector.load %arg6[%c2_254, %c2_255, %c0_256, %c0_257] : memref<3x3x256x128xbf16, #tpu.memory_space<vmem>>, vector<1x1x256x128xbf16>
    %193 = vector.shape_cast %192 : vector<1x1x256x128xbf16> to vector<256x128xbf16>
    %cst_258 = arith.constant dense<0.000000e+00> : vector<48x128xf32>
    %194 = tpu.matmul %191, %193, %cst_258 {dimension_numbers = #tpu.dot_dimension_numbers<[1], [0], [0], [1], [0, 0, 1, 1], [], []>} : vector<48x256xbf16>, vector<256x128xbf16>, vector<48x128xf32> -> vector<48x128xf32>
    %195 = arith.addf %178, %194 : vector<48x128xf32>
    %c0_259 = arith.constant 0 : index
    %c0_260 = arith.constant 0 : index
    %196 = vector.load %arg7[%c0_259, %c0_260] : memref<1x128xf32, #tpu.memory_space<vmem>>, vector<1x128xf32>
    %197 = vector.broadcast %196 : vector<1x128xf32> to vector<48x128xf32>
    %198 = arith.mulf %195, %197 : vector<48x128xf32>
    %c0_261 = arith.constant 0 : index
    %c0_262 = arith.constant 0 : index
    %199 = vector.load %arg8[%c0_261, %c0_262] : memref<1x128xf32, #tpu.memory_space<vmem>>, vector<1x128xf32>
    %200 = vector.broadcast %199 : vector<1x128xf32> to vector<48x128xf32>
    %201 = arith.addf %198, %200 : vector<48x128xf32>
    %cst_263 = arith.constant 0.000000e+00 : f32
    %202 = vector.broadcast %cst_263 : f32 to vector<48x128xf32>
    %203 = arith.maximumf %201, %202 : vector<48x128xf32>
    %204 = vector.extract_strided_slice %203 {offsets = [0, 0], sizes = [12, 128], strides = [1, 1]} : vector<48x128xf32> to vector<12x128xf32>
    %205 = vector.extract_strided_slice %203 {offsets = [12, 0], sizes = [12, 128], strides = [1, 1]} : vector<48x128xf32> to vector<12x128xf32>
    %206 = arith.maximumf %204, %205 : vector<12x128xf32>
    %207 = vector.extract_strided_slice %203 {offsets = [24, 0], sizes = [12, 128], strides = [1, 1]} : vector<48x128xf32> to vector<12x128xf32>
    %208 = vector.extract_strided_slice %203 {offsets = [36, 0], sizes = [12, 128], strides = [1, 1]} : vector<48x128xf32> to vector<12x128xf32>
    %209 = arith.maximumf %207, %208 : vector<12x128xf32>
    %210 = arith.maximumf %206, %209 : vector<12x128xf32>
    %c0_264 = arith.constant 0 : index
    %c0_265 = arith.constant 0 : index
    %211 = vector.load %arg9[%c0_264, %c0_265] : memref<12x12xbf16, #tpu.memory_space<vmem>>, vector<12x12xbf16>
    %212 = arith.truncf %210 : vector<12x128xf32> to vector<12x128xbf16>
    %cst_266 = arith.constant dense<0.000000e+00> : vector<12x128xf32>
    %213 = tpu.matmul %211, %212, %cst_266 {dimension_numbers = #tpu.dot_dimension_numbers<[1], [0], [0], [1], [0, 0, 1, 1], [], []>} : vector<12x12xbf16>, vector<12x128xbf16>, vector<12x128xf32> -> vector<12x128xf32>
    %c0_267 = arith.constant 0 : index
    %c0_268 = arith.constant 0 : index
    %214 = vector.load %arg10[%c0_267, %c0_268] : memref<12x1xf32, #tpu.memory_space<vmem>>, vector<12x1xf32>
    %215 = vector.broadcast %214 : vector<12x1xf32> to vector<12x128xf32>
    %216 = arith.addf %213, %215 : vector<12x128xf32>
    %cst_269 = arith.constant 0.000000e+00 : bf16
    %217 = vector.broadcast %cst_269 : bf16 to vector<7x3x128xbf16>
    %c0_270 = arith.constant 0 : index
    %c0_271 = arith.constant 0 : index
    %c0_272 = arith.constant 0 : index
    %218 = vector.load %arg22[%c0_270, %c0_271, %c0_272] : memref<7x3x128xbf16, #tpu.memory_space<vmem>>, vector<7x3x128xbf16>
    tpu.vector_store %arg22[%c0_270, %c0_271, %c0_272], %217 {strides = array<i32>} : memref<7x3x128xbf16, #tpu.memory_space<vmem>>, vector<7x3x128xbf16>,
    %219 = arith.truncf %216 : vector<12x128xf32> to vector<12x128xbf16>
    %220 = vector.shape_cast %219 : vector<12x128xbf16> to vector<6x2x128xbf16>
    %c0_273 = arith.constant 0 : index
    %c0_274 = arith.constant 0 : index
    %c0_275 = arith.constant 0 : index
    %221 = vector.load %arg22[%c0_273, %c0_274, %c0_275] : memref<7x3x128xbf16, #tpu.memory_space<vmem>>, vector<6x2x128xbf16>
    tpu.vector_store %arg22[%c0_273, %c0_274, %c0_275], %220 {strides = array<i32>} : memref<7x3x128xbf16, #tpu.memory_space<vmem>>, vector<6x2x128xbf16>,
    %c0_276 = arith.constant 0 : index
    %c0_277 = arith.constant 0 : index
    %222 = vector.load %arg11[%c0_276, %c0_277] : memref<128x576xbf16, #tpu.memory_space<vmem>>, vector<128x576xbf16>
    %cst_278 = arith.constant 0.000000e+00 : f32
    %223 = vector.broadcast %cst_278 : f32 to vector<12x64xf32>
    %cst_279 = arith.constant 0.000000e+00 : f32
    %224 = vector.broadcast %cst_279 : f32 to vector<12x64xf32>
    %cst_280 = arith.constant 0.000000e+00 : f32
    %225 = vector.broadcast %cst_280 : f32 to vector<12x64xf32>
    %cst_281 = arith.constant 0.000000e+00 : f32
    %226 = vector.broadcast %cst_281 : f32 to vector<12x64xf32>
    %c0_282 = arith.constant 0 : index
    %c0_283 = arith.constant 0 : index
    %c0_284 = arith.constant 0 : index
    %227 = vector.load %arg22[%c0_282, %c0_283, %c0_284] : memref<7x3x128xbf16, #tpu.memory_space<vmem>>, vector<6x2x128xbf16>
    %228 = vector.shape_cast %227 : vector<6x2x128xbf16> to vector<12x128xbf16>
    %229 = vector.extract_strided_slice %222 {offsets = [0, 0], sizes = [128, 256], strides = [1, 1]} : vector<128x576xbf16> to vector<128x256xbf16>
    %cst_285 = arith.constant dense<0.000000e+00> : vector<12x256xf32>
    %230 = tpu.matmul %228, %229, %cst_285 {dimension_numbers = #tpu.dot_dimension_numbers<[1], [0], [0], [1], [0, 0, 1, 1], [], []>} : vector<12x128xbf16>, vector<128x256xbf16>, vector<12x256xf32> -> vector<12x256xf32>
    %231 = vector.extract_strided_slice %230 {offsets = [0, 0], sizes = [12, 64], strides = [1, 1]} : vector<12x256xf32> to vector<12x64xf32>
    %232 = arith.addf %223, %231 : vector<12x64xf32>
    %233 = vector.extract_strided_slice %230 {offsets = [0, 64], sizes = [12, 64], strides = [1, 1]} : vector<12x256xf32> to vector<12x64xf32>
    %234 = arith.addf %224, %233 : vector<12x64xf32>
    %235 = vector.extract_strided_slice %230 {offsets = [0, 128], sizes = [12, 64], strides = [1, 1]} : vector<12x256xf32> to vector<12x64xf32>
    %236 = arith.addf %225, %235 : vector<12x64xf32>
    %237 = vector.extract_strided_slice %230 {offsets = [0, 192], sizes = [12, 64], strides = [1, 1]} : vector<12x256xf32> to vector<12x64xf32>
    %238 = arith.addf %226, %237 : vector<12x64xf32>
    %c0_286 = arith.constant 0 : index
    %c1_287 = arith.constant 1 : index
    %c0_288 = arith.constant 0 : index
    %239 = vector.load %arg22[%c0_286, %c1_287, %c0_288] : memref<7x3x128xbf16, #tpu.memory_space<vmem>>, vector<6x2x128xbf16>
    %240 = vector.shape_cast %239 : vector<6x2x128xbf16> to vector<12x128xbf16>
    %241 = vector.extract_strided_slice %222 {offsets = [0, 256], sizes = [128, 128], strides = [1, 1]} : vector<128x576xbf16> to vector<128x128xbf16>
    %cst_289 = arith.constant dense<0.000000e+00> : vector<12x128xf32>
    %242 = tpu.matmul %240, %241, %cst_289 {dimension_numbers = #tpu.dot_dimension_numbers<[1], [0], [0], [1], [0, 0, 1, 1], [], []>} : vector<12x128xbf16>, vector<128x128xbf16>, vector<12x128xf32> -> vector<12x128xf32>
    %243 = vector.extract_strided_slice %242 {offsets = [0, 0], sizes = [12, 64], strides = [1, 1]} : vector<12x128xf32> to vector<12x64xf32>
    %244 = arith.addf %234, %243 : vector<12x64xf32>
    %245 = vector.extract_strided_slice %242 {offsets = [0, 64], sizes = [12, 64], strides = [1, 1]} : vector<12x128xf32> to vector<12x64xf32>
    %246 = arith.addf %238, %245 : vector<12x64xf32>
    %c1_290 = arith.constant 1 : index
    %c0_291 = arith.constant 0 : index
    %c0_292 = arith.constant 0 : index
    %247 = vector.load %arg22[%c1_290, %c0_291, %c0_292] : memref<7x3x128xbf16, #tpu.memory_space<vmem>>, vector<6x2x128xbf16>
    %248 = vector.shape_cast %247 : vector<6x2x128xbf16> to vector<12x128xbf16>
    %249 = vector.extract_strided_slice %222 {offsets = [0, 384], sizes = [128, 128], strides = [1, 1]} : vector<128x576xbf16> to vector<128x128xbf16>
    %cst_293 = arith.constant dense<0.000000e+00> : vector<12x128xf32>
    %250 = tpu.matmul %248, %249, %cst_293 {dimension_numbers = #tpu.dot_dimension_numbers<[1], [0], [0], [1], [0, 0, 1, 1], [], []>} : vector<12x128xbf16>, vector<128x128xbf16>, vector<12x128xf32> -> vector<12x128xf32>
    %251 = vector.extract_strided_slice %250 {offsets = [0, 0], sizes = [12, 64], strides = [1, 1]} : vector<12x128xf32> to vector<12x64xf32>
    %252 = arith.addf %236, %251 : vector<12x64xf32>
    %253 = vector.extract_strided_slice %250 {offsets = [0, 64], sizes = [12, 64], strides = [1, 1]} : vector<12x128xf32> to vector<12x64xf32>
    %254 = arith.addf %246, %253 : vector<12x64xf32>
    %c1_294 = arith.constant 1 : index
    %c1_295 = arith.constant 1 : index
    %c0_296 = arith.constant 0 : index
    %255 = vector.load %arg22[%c1_294, %c1_295, %c0_296] : memref<7x3x128xbf16, #tpu.memory_space<vmem>>, vector<6x2x128xbf16>
    %256 = vector.shape_cast %255 : vector<6x2x128xbf16> to vector<12x128xbf16>
    %257 = vector.extract_strided_slice %222 {offsets = [0, 512], sizes = [128, 64], strides = [1, 1]} : vector<128x576xbf16> to vector<128x64xbf16>
    %cst_297 = arith.constant dense<0.000000e+00> : vector<12x64xf32>
    %258 = tpu.matmul %256, %257, %cst_297 {dimension_numbers = #tpu.dot_dimension_numbers<[1], [0], [0], [1], [0, 0, 1, 1], [], []>} : vector<12x128xbf16>, vector<128x64xbf16>, vector<12x64xf32> -> vector<12x64xf32>
    %259 = arith.addf %254, %258 : vector<12x64xf32>
    %c0_298 = arith.constant 0 : index
    %c0_299 = arith.constant 0 : index
    %260 = vector.load %arg13[%c0_298, %c0_299] : memref<256x64xbf16, #tpu.memory_space<vmem>>, vector<256x64xbf16>
    %cst_300 = arith.constant dense<0.000000e+00> : vector<48x64xf32>
    %261 = tpu.matmul %19, %260, %cst_300 {dimension_numbers = #tpu.dot_dimension_numbers<[1], [0], [0], [1], [0, 0, 1, 1], [], []>} : vector<48x256xbf16>, vector<256x64xbf16>, vector<48x64xf32> -> vector<48x64xf32>
    %c0_301 = arith.constant 0 : index
    %c0_302 = arith.constant 0 : index
    %262 = vector.load %arg14[%c0_301, %c0_302] : memref<1x64xf32, #tpu.memory_space<vmem>>, vector<1x64xf32>
    %263 = vector.broadcast %262 : vector<1x64xf32> to vector<48x64xf32>
    %264 = arith.addf %261, %263 : vector<48x64xf32>
    %cst_303 = arith.constant 0.000000e+00 : bf16
    %265 = vector.broadcast %cst_303 : bf16 to vector<2x2x7x3x64xbf16>
    %c0_304 = arith.constant 0 : index
    %c0_305 = arith.constant 0 : index
    %c0_306 = arith.constant 0 : index
    %c0_307 = arith.constant 0 : index
    %c0_308 = arith.constant 0 : index
    %266 = vector.load %arg23[%c0_304, %c0_305, %c0_306, %c0_307, %c0_308] : memref<2x2x7x3x64xbf16, #tpu.memory_space<vmem>>, vector<2x2x7x3x64xbf16>
    tpu.vector_store %arg23[%c0_304, %c0_305, %c0_306, %c0_307, %c0_308], %265 {strides = array<i32>} : memref<2x2x7x3x64xbf16, #tpu.memory_space<vmem>>, vector<2x2x7x3x64xbf16>,
    %c0_309 = arith.constant 0 : index
    %c0_310 = arith.constant 0 : index
    %267 = vector.load %arg12[%c0_309, %c0_310] : memref<1x64xf32, #tpu.memory_space<vmem>>, vector<1x64xf32>
    %268 = vector.broadcast %267 : vector<1x64xf32> to vector<12x64xf32>
    %269 = arith.addf %232, %268 : vector<12x64xf32>
    %cst_311 = arith.constant 0.000000e+00 : f32
    %270 = vector.broadcast %cst_311 : f32 to vector<12x64xf32>
    %271 = arith.maximumf %269, %270 : vector<12x64xf32>
    %272 = vector.extract_strided_slice %264 {offsets = [0, 0], sizes = [12, 64], strides = [1, 1]} : vector<48x64xf32> to vector<12x64xf32>
    %273 = arith.addf %271, %272 : vector<12x64xf32>
    %c0_312 = arith.constant 0 : index
    %c0_313 = arith.constant 0 : index
    %274 = vector.load %arg15[%c0_312, %c0_313] : memref<1x64xf32, #tpu.memory_space<vmem>>, vector<1x64xf32>
    %275 = vector.broadcast %274 : vector<1x64xf32> to vector<12x64xf32>
    %276 = arith.mulf %273, %275 : vector<12x64xf32>
    %c0_314 = arith.constant 0 : index
    %c0_315 = arith.constant 0 : index
    %277 = vector.load %arg16[%c0_314, %c0_315] : memref<1x64xf32, #tpu.memory_space<vmem>>, vector<1x64xf32>
    %278 = vector.broadcast %277 : vector<1x64xf32> to vector<12x64xf32>
    %279 = arith.addf %276, %278 : vector<12x64xf32>
    %280 = arith.truncf %279 : vector<12x64xf32> to vector<12x64xbf16>
    %281 = vector.shape_cast %280 : vector<12x64xbf16> to vector<6x2x64xbf16>
    %c0_316 = arith.constant 0 : index
    %c0_317 = arith.constant 0 : index
    %c0_318 = arith.constant 0 : index
    %c0_319 = arith.constant 0 : index
    %c0_320 = arith.constant 0 : index
    %282 = vector.load %arg23[%c0_316, %c0_317, %c0_318, %c0_319, %c0_320] : memref<2x2x7x3x64xbf16, #tpu.memory_space<vmem>>, vector<1x1x6x2x64xbf16>
    %283 = vector.shape_cast %282 : vector<1x1x6x2x64xbf16> to vector<6x2x64xbf16>
    %284 = vector.shape_cast %281 : vector<6x2x64xbf16> to vector<1x1x6x2x64xbf16>
    tpu.vector_store %arg23[%c0_316, %c0_317, %c0_318, %c0_319, %c0_320], %284 {strides = array<i32>} : memref<2x2x7x3x64xbf16, #tpu.memory_space<vmem>>, vector<1x1x6x2x64xbf16>,
    %c0_321 = arith.constant 0 : index
    %c0_322 = arith.constant 0 : index
    %285 = vector.load %arg12[%c0_321, %c0_322] : memref<1x64xf32, #tpu.memory_space<vmem>>, vector<1x64xf32>
    %286 = vector.broadcast %285 : vector<1x64xf32> to vector<12x64xf32>
    %287 = arith.addf %244, %286 : vector<12x64xf32>
    %cst_323 = arith.constant 0.000000e+00 : f32
    %288 = vector.broadcast %cst_323 : f32 to vector<12x64xf32>
    %289 = arith.maximumf %287, %288 : vector<12x64xf32>
    %290 = vector.extract_strided_slice %264 {offsets = [12, 0], sizes = [12, 64], strides = [1, 1]} : vector<48x64xf32> to vector<12x64xf32>
    %291 = arith.addf %289, %290 : vector<12x64xf32>
    %c0_324 = arith.constant 0 : index
    %c0_325 = arith.constant 0 : index
    %292 = vector.load %arg15[%c0_324, %c0_325] : memref<1x64xf32, #tpu.memory_space<vmem>>, vector<1x64xf32>
    %293 = vector.broadcast %292 : vector<1x64xf32> to vector<12x64xf32>
    %294 = arith.mulf %291, %293 : vector<12x64xf32>
    %c0_326 = arith.constant 0 : index
    %c0_327 = arith.constant 0 : index
    %295 = vector.load %arg16[%c0_326, %c0_327] : memref<1x64xf32, #tpu.memory_space<vmem>>, vector<1x64xf32>
    %296 = vector.broadcast %295 : vector<1x64xf32> to vector<12x64xf32>
    %297 = arith.addf %294, %296 : vector<12x64xf32>
    %298 = arith.truncf %297 : vector<12x64xf32> to vector<12x64xbf16>
    %299 = vector.shape_cast %298 : vector<12x64xbf16> to vector<6x2x64xbf16>
    %c0_328 = arith.constant 0 : index
    %c1_329 = arith.constant 1 : index
    %c0_330 = arith.constant 0 : index
    %c0_331 = arith.constant 0 : index
    %c0_332 = arith.constant 0 : index
    %300 = vector.load %arg23[%c0_328, %c1_329, %c0_330, %c0_331, %c0_332] : memref<2x2x7x3x64xbf16, #tpu.memory_space<vmem>>, vector<1x1x6x2x64xbf16>
    %301 = vector.shape_cast %300 : vector<1x1x6x2x64xbf16> to vector<6x2x64xbf16>
    %302 = vector.shape_cast %299 : vector<6x2x64xbf16> to vector<1x1x6x2x64xbf16>
    tpu.vector_store %arg23[%c0_328, %c1_329, %c0_330, %c0_331, %c0_332], %302 {strides = array<i32>} : memref<2x2x7x3x64xbf16, #tpu.memory_space<vmem>>, vector<1x1x6x2x64xbf16>,
    %c0_333 = arith.constant 0 : index
    %c0_334 = arith.constant 0 : index
    %303 = vector.load %arg12[%c0_333, %c0_334] : memref<1x64xf32, #tpu.memory_space<vmem>>, vector<1x64xf32>
    %304 = vector.broadcast %303 : vector<1x64xf32> to vector<12x64xf32>
    %305 = arith.addf %252, %304 : vector<12x64xf32>
    %cst_335 = arith.constant 0.000000e+00 : f32
    %306 = vector.broadcast %cst_335 : f32 to vector<12x64xf32>
    %307 = arith.maximumf %305, %306 : vector<12x64xf32>
    %308 = vector.extract_strided_slice %264 {offsets = [24, 0], sizes = [12, 64], strides = [1, 1]} : vector<48x64xf32> to vector<12x64xf32>
    %309 = arith.addf %307, %308 : vector<12x64xf32>
    %c0_336 = arith.constant 0 : index
    %c0_337 = arith.constant 0 : index
    %310 = vector.load %arg15[%c0_336, %c0_337] : memref<1x64xf32, #tpu.memory_space<vmem>>, vector<1x64xf32>
    %311 = vector.broadcast %310 : vector<1x64xf32> to vector<12x64xf32>
    %312 = arith.mulf %309, %311 : vector<12x64xf32>
    %c0_338 = arith.constant 0 : index
    %c0_339 = arith.constant 0 : index
    %313 = vector.load %arg16[%c0_338, %c0_339] : memref<1x64xf32, #tpu.memory_space<vmem>>, vector<1x64xf32>
    %314 = vector.broadcast %313 : vector<1x64xf32> to vector<12x64xf32>
    %315 = arith.addf %312, %314 : vector<12x64xf32>
    %316 = arith.truncf %315 : vector<12x64xf32> to vector<12x64xbf16>
    %317 = vector.shape_cast %316 : vector<12x64xbf16> to vector<6x2x64xbf16>
    %c1_340 = arith.constant 1 : index
    %c0_341 = arith.constant 0 : index
    %c0_342 = arith.constant 0 : index
    %c0_343 = arith.constant 0 : index
    %c0_344 = arith.constant 0 : index
    %318 = vector.load %arg23[%c1_340, %c0_341, %c0_342, %c0_343, %c0_344] : memref<2x2x7x3x64xbf16, #tpu.memory_space<vmem>>, vector<1x1x6x2x64xbf16>
    %319 = vector.shape_cast %318 : vector<1x1x6x2x64xbf16> to vector<6x2x64xbf16>
    %320 = vector.shape_cast %317 : vector<6x2x64xbf16> to vector<1x1x6x2x64xbf16>
    tpu.vector_store %arg23[%c1_340, %c0_341, %c0_342, %c0_343, %c0_344], %320 {strides = array<i32>} : memref<2x2x7x3x64xbf16, #tpu.memory_space<vmem>>, vector<1x1x6x2x64xbf16>,
    %c0_345 = arith.constant 0 : index
    %c0_346 = arith.constant 0 : index
    %321 = vector.load %arg12[%c0_345, %c0_346] : memref<1x64xf32, #tpu.memory_space<vmem>>, vector<1x64xf32>
    %322 = vector.broadcast %321 : vector<1x64xf32> to vector<12x64xf32>
    %323 = arith.addf %259, %322 : vector<12x64xf32>
    %cst_347 = arith.constant 0.000000e+00 : f32
    %324 = vector.broadcast %cst_347 : f32 to vector<12x64xf32>
    %325 = arith.maximumf %323, %324 : vector<12x64xf32>
    %326 = vector.extract_strided_slice %264 {offsets = [36, 0], sizes = [12, 64], strides = [1, 1]} : vector<48x64xf32> to vector<12x64xf32>
    %327 = arith.addf %325, %326 : vector<12x64xf32>
    %c0_348 = arith.constant 0 : index
    %c0_349 = arith.constant 0 : index
    %328 = vector.load %arg15[%c0_348, %c0_349] : memref<1x64xf32, #tpu.memory_space<vmem>>, vector<1x64xf32>
    %329 = vector.broadcast %328 : vector<1x64xf32> to vector<12x64xf32>
    %330 = arith.mulf %327, %329 : vector<12x64xf32>
    %c0_350 = arith.constant 0 : index
    %c0_351 = arith.constant 0 : index
    %331 = vector.load %arg16[%c0_350, %c0_351] : memref<1x64xf32, #tpu.memory_space<vmem>>, vector<1x64xf32>
    %332 = vector.broadcast %331 : vector<1x64xf32> to vector<12x64xf32>
    %333 = arith.addf %330, %332 : vector<12x64xf32>
    %334 = arith.truncf %333 : vector<12x64xf32> to vector<12x64xbf16>
    %335 = vector.shape_cast %334 : vector<12x64xbf16> to vector<6x2x64xbf16>
    %c1_352 = arith.constant 1 : index
    %c1_353 = arith.constant 1 : index
    %c0_354 = arith.constant 0 : index
    %c0_355 = arith.constant 0 : index
    %c0_356 = arith.constant 0 : index
    %336 = vector.load %arg23[%c1_352, %c1_353, %c0_354, %c0_355, %c0_356] : memref<2x2x7x3x64xbf16, #tpu.memory_space<vmem>>, vector<1x1x6x2x64xbf16>
    %337 = vector.shape_cast %336 : vector<1x1x6x2x64xbf16> to vector<6x2x64xbf16>
    %338 = vector.shape_cast %335 : vector<6x2x64xbf16> to vector<1x1x6x2x64xbf16>
    tpu.vector_store %arg23[%c1_352, %c1_353, %c0_354, %c0_355, %c0_356], %338 {strides = array<i32>} : memref<2x2x7x3x64xbf16, #tpu.memory_space<vmem>>, vector<1x1x6x2x64xbf16>,
    %c0_357 = arith.constant 0 : index
    %c0_358 = arith.constant 0 : index
    %339 = vector.load %arg17[%c0_357, %c0_358] : memref<64x72xbf16, #tpu.memory_space<vmem>>, vector<64x72xbf16>
    %cst_359 = arith.constant 0.000000e+00 : f32
    %340 = vector.broadcast %cst_359 : f32 to vector<48x8xf32>
    %cst_360 = arith.constant 0.000000e+00 : f32
    %341 = vector.broadcast %cst_360 : f32 to vector<48x8xf32>
    %cst_361 = arith.constant 0.000000e+00 : f32
    %342 = vector.broadcast %cst_361 : f32 to vector<48x8xf32>
    %cst_362 = arith.constant 0.000000e+00 : f32
    %343 = vector.broadcast %cst_362 : f32 to vector<48x8xf32>
    %c0_363 = arith.constant 0 : index
    %c0_364 = arith.constant 0 : index
    %c0_365 = arith.constant 0 : index
    %c0_366 = arith.constant 0 : index
    %c0_367 = arith.constant 0 : index
    %344 = vector.load %arg23[%c0_363, %c0_364, %c0_365, %c0_366, %c0_367] : memref<2x2x7x3x64xbf16, #tpu.memory_space<vmem>>, vector<1x1x6x2x64xbf16>
    %345 = vector.shape_cast %344 : vector<1x1x6x2x64xbf16> to vector<6x2x64xbf16>
    %346 = vector.shape_cast %345 : vector<6x2x64xbf16> to vector<12x64xbf16>
    %c0_368 = arith.constant 0 : index
    %c1_369 = arith.constant 1 : index
    %c0_370 = arith.constant 0 : index
    %c0_371 = arith.constant 0 : index
    %c0_372 = arith.constant 0 : index
    %347 = vector.load %arg23[%c0_368, %c1_369, %c0_370, %c0_371, %c0_372] : memref<2x2x7x3x64xbf16, #tpu.memory_space<vmem>>, vector<1x1x6x2x64xbf16>
    %348 = vector.shape_cast %347 : vector<1x1x6x2x64xbf16> to vector<6x2x64xbf16>
    %349 = vector.shape_cast %348 : vector<6x2x64xbf16> to vector<12x64xbf16>
    %c1_373 = arith.constant 1 : index
    %c0_374 = arith.constant 0 : index
    %c0_375 = arith.constant 0 : index
    %c0_376 = arith.constant 0 : index
    %c0_377 = arith.constant 0 : index
    %350 = vector.load %arg23[%c1_373, %c0_374, %c0_375, %c0_376, %c0_377] : memref<2x2x7x3x64xbf16, #tpu.memory_space<vmem>>, vector<1x1x6x2x64xbf16>
    %351 = vector.shape_cast %350 : vector<1x1x6x2x64xbf16> to vector<6x2x64xbf16>
    %352 = vector.shape_cast %351 : vector<6x2x64xbf16> to vector<12x64xbf16>
    %c1_378 = arith.constant 1 : index
    %c1_379 = arith.constant 1 : index
    %c0_380 = arith.constant 0 : index
    %c0_381 = arith.constant 0 : index
    %c0_382 = arith.constant 0 : index
    %353 = vector.load %arg23[%c1_378, %c1_379, %c0_380, %c0_381, %c0_382] : memref<2x2x7x3x64xbf16, #tpu.memory_space<vmem>>, vector<1x1x6x2x64xbf16>
    %354 = vector.shape_cast %353 : vector<1x1x6x2x64xbf16> to vector<6x2x64xbf16>
    %355 = vector.shape_cast %354 : vector<6x2x64xbf16> to vector<12x64xbf16>
    %356 = tpu.concatenate %346, %349, %352, %355 in 0 : vector<12x64xbf16>, vector<12x64xbf16>, vector<12x64xbf16>, vector<12x64xbf16> -> vector<48x64xbf16>
    %357 = vector.extract_strided_slice %339 {offsets = [0, 0], sizes = [64, 32], strides = [1, 1]} : vector<64x72xbf16> to vector<64x32xbf16>
    %cst_383 = arith.constant dense<0.000000e+00> : vector<48x32xf32>
    %358 = tpu.matmul %356, %357, %cst_383 {dimension_numbers = #tpu.dot_dimension_numbers<[1], [0], [0], [1], [0, 0, 1, 1], [], []>} : vector<48x64xbf16>, vector<64x32xbf16>, vector<48x32xf32> -> vector<48x32xf32>
    %359 = vector.extract_strided_slice %358 {offsets = [0, 0], sizes = [48, 8], strides = [1, 1]} : vector<48x32xf32> to vector<48x8xf32>
    %360 = arith.addf %340, %359 : vector<48x8xf32>
    %361 = vector.extract_strided_slice %358 {offsets = [0, 8], sizes = [48, 8], strides = [1, 1]} : vector<48x32xf32> to vector<48x8xf32>
    %362 = arith.addf %341, %361 : vector<48x8xf32>
    %363 = vector.extract_strided_slice %358 {offsets = [0, 16], sizes = [48, 8], strides = [1, 1]} : vector<48x32xf32> to vector<48x8xf32>
    %364 = arith.addf %342, %363 : vector<48x8xf32>
    %365 = vector.extract_strided_slice %358 {offsets = [0, 24], sizes = [48, 8], strides = [1, 1]} : vector<48x32xf32> to vector<48x8xf32>
    %366 = arith.addf %343, %365 : vector<48x8xf32>
    %c0_384 = arith.constant 0 : index
    %c1_385 = arith.constant 1 : index
    %c0_386 = arith.constant 0 : index
    %c0_387 = arith.constant 0 : index
    %c0_388 = arith.constant 0 : index
    %367 = vector.load %arg23[%c0_384, %c1_385, %c0_386, %c0_387, %c0_388] : memref<2x2x7x3x64xbf16, #tpu.memory_space<vmem>>, vector<1x1x6x2x64xbf16>
    %368 = vector.shape_cast %367 : vector<1x1x6x2x64xbf16> to vector<6x2x64xbf16>
    %369 = vector.shape_cast %368 : vector<6x2x64xbf16> to vector<12x64xbf16>
    %c0_389 = arith.constant 0 : index
    %c0_390 = arith.constant 0 : index
    %c0_391 = arith.constant 0 : index
    %c1_392 = arith.constant 1 : index
    %c0_393 = arith.constant 0 : index
    %370 = vector.load %arg23[%c0_389, %c0_390, %c0_391, %c1_392, %c0_393] : memref<2x2x7x3x64xbf16, #tpu.memory_space<vmem>>, vector<1x1x6x2x64xbf16>
    %371 = vector.shape_cast %370 : vector<1x1x6x2x64xbf16> to vector<6x2x64xbf16>
    %372 = vector.shape_cast %371 : vector<6x2x64xbf16> to vector<12x64xbf16>
    %c1_394 = arith.constant 1 : index
    %c1_395 = arith.constant 1 : index
    %c0_396 = arith.constant 0 : index
    %c0_397 = arith.constant 0 : index
    %c0_398 = arith.constant 0 : index
    %373 = vector.load %arg23[%c1_394, %c1_395, %c0_396, %c0_397, %c0_398] : memref<2x2x7x3x64xbf16, #tpu.memory_space<vmem>>, vector<1x1x6x2x64xbf16>
    %374 = vector.shape_cast %373 : vector<1x1x6x2x64xbf16> to vector<6x2x64xbf16>
    %375 = vector.shape_cast %374 : vector<6x2x64xbf16> to vector<12x64xbf16>
    %c1_399 = arith.constant 1 : index
    %c0_400 = arith.constant 0 : index
    %c0_401 = arith.constant 0 : index
    %c1_402 = arith.constant 1 : index
    %c0_403 = arith.constant 0 : index
    %376 = vector.load %arg23[%c1_399, %c0_400, %c0_401, %c1_402, %c0_403] : memref<2x2x7x3x64xbf16, #tpu.memory_space<vmem>>, vector<1x1x6x2x64xbf16>
    %377 = vector.shape_cast %376 : vector<1x1x6x2x64xbf16> to vector<6x2x64xbf16>
    %378 = vector.shape_cast %377 : vector<6x2x64xbf16> to vector<12x64xbf16>
    %379 = tpu.concatenate %369, %372, %375, %378 in 0 : vector<12x64xbf16>, vector<12x64xbf16>, vector<12x64xbf16>, vector<12x64xbf16> -> vector<48x64xbf16>
    %380 = vector.extract_strided_slice %339 {offsets = [0, 32], sizes = [64, 16], strides = [1, 1]} : vector<64x72xbf16> to vector<64x16xbf16>
    %cst_404 = arith.constant dense<0.000000e+00> : vector<48x16xf32>
    %381 = tpu.matmul %379, %380, %cst_404 {dimension_numbers = #tpu.dot_dimension_numbers<[1], [0], [0], [1], [0, 0, 1, 1], [], []>} : vector<48x64xbf16>, vector<64x16xbf16>, vector<48x16xf32> -> vector<48x16xf32>
    %382 = vector.extract_strided_slice %381 {offsets = [0, 0], sizes = [48, 8], strides = [1, 1]} : vector<48x16xf32> to vector<48x8xf32>
    %383 = arith.addf %362, %382 : vector<48x8xf32>
    %384 = vector.extract_strided_slice %381 {offsets = [0, 8], sizes = [48, 8], strides = [1, 1]} : vector<48x16xf32> to vector<48x8xf32>
    %385 = arith.addf %366, %384 : vector<48x8xf32>
    %c1_405 = arith.constant 1 : index
    %c0_406 = arith.constant 0 : index
    %c0_407 = arith.constant 0 : index
    %c0_408 = arith.constant 0 : index
    %c0_409 = arith.constant 0 : index
    %386 = vector.load %arg23[%c1_405, %c0_406, %c0_407, %c0_408, %c0_409] : memref<2x2x7x3x64xbf16, #tpu.memory_space<vmem>>, vector<1x1x6x2x64xbf16>
    %387 = vector.shape_cast %386 : vector<1x1x6x2x64xbf16> to vector<6x2x64xbf16>
    %388 = vector.shape_cast %387 : vector<6x2x64xbf16> to vector<12x64xbf16>
    %c1_410 = arith.constant 1 : index
    %c1_411 = arith.constant 1 : index
    %c0_412 = arith.constant 0 : index
    %c0_413 = arith.constant 0 : index
    %c0_414 = arith.constant 0 : index
    %389 = vector.load %arg23[%c1_410, %c1_411, %c0_412, %c0_413, %c0_414] : memref<2x2x7x3x64xbf16, #tpu.memory_space<vmem>>, vector<1x1x6x2x64xbf16>
    %390 = vector.shape_cast %389 : vector<1x1x6x2x64xbf16> to vector<6x2x64xbf16>
    %391 = vector.shape_cast %390 : vector<6x2x64xbf16> to vector<12x64xbf16>
    %c0_415 = arith.constant 0 : index
    %c0_416 = arith.constant 0 : index
    %c1_417 = arith.constant 1 : index
    %c0_418 = arith.constant 0 : index
    %c0_419 = arith.constant 0 : index
    %392 = vector.load %arg23[%c0_415, %c0_416, %c1_417, %c0_418, %c0_419] : memref<2x2x7x3x64xbf16, #tpu.memory_space<vmem>>, vector<1x1x6x2x64xbf16>
    %393 = vector.shape_cast %392 : vector<1x1x6x2x64xbf16> to vector<6x2x64xbf16>
    %394 = vector.shape_cast %393 : vector<6x2x64xbf16> to vector<12x64xbf16>
    %c0_420 = arith.constant 0 : index
    %c1_421 = arith.constant 1 : index
    %c1_422 = arith.constant 1 : index
    %c0_423 = arith.constant 0 : index
    %c0_424 = arith.constant 0 : index
    %395 = vector.load %arg23[%c0_420, %c1_421, %c1_422, %c0_423, %c0_424] : memref<2x2x7x3x64xbf16, #tpu.memory_space<vmem>>, vector<1x1x6x2x64xbf16>
    %396 = vector.shape_cast %395 : vector<1x1x6x2x64xbf16> to vector<6x2x64xbf16>
    %397 = vector.shape_cast %396 : vector<6x2x64xbf16> to vector<12x64xbf16>
    %398 = tpu.concatenate %388, %391, %394, %397 in 0 : vector<12x64xbf16>, vector<12x64xbf16>, vector<12x64xbf16>, vector<12x64xbf16> -> vector<48x64xbf16>
    %399 = vector.extract_strided_slice %339 {offsets = [0, 48], sizes = [64, 16], strides = [1, 1]} : vector<64x72xbf16> to vector<64x16xbf16>
    %cst_425 = arith.constant dense<0.000000e+00> : vector<48x16xf32>
    %400 = tpu.matmul %398, %399, %cst_425 {dimension_numbers = #tpu.dot_dimension_numbers<[1], [0], [0], [1], [0, 0, 1, 1], [], []>} : vector<48x64xbf16>, vector<64x16xbf16>, vector<48x16xf32> -> vector<48x16xf32>
    %401 = vector.extract_strided_slice %400 {offsets = [0, 0], sizes = [48, 8], strides = [1, 1]} : vector<48x16xf32> to vector<48x8xf32>
    %402 = arith.addf %364, %401 : vector<48x8xf32>
    %403 = vector.extract_strided_slice %400 {offsets = [0, 8], sizes = [48, 8], strides = [1, 1]} : vector<48x16xf32> to vector<48x8xf32>
    %404 = arith.addf %385, %403 : vector<48x8xf32>
    %c1_426 = arith.constant 1 : index
    %c1_427 = arith.constant 1 : index
    %c0_428 = arith.constant 0 : index
    %c0_429 = arith.constant 0 : index
    %c0_430 = arith.constant 0 : index
    %405 = vector.load %arg23[%c1_426, %c1_427, %c0_428, %c0_429, %c0_430] : memref<2x2x7x3x64xbf16, #tpu.memory_space<vmem>>, vector<1x1x6x2x64xbf16>
    %406 = vector.shape_cast %405 : vector<1x1x6x2x64xbf16> to vector<6x2x64xbf16>
    %407 = vector.shape_cast %406 : vector<6x2x64xbf16> to vector<12x64xbf16>
    %c1_431 = arith.constant 1 : index
    %c0_432 = arith.constant 0 : index
    %c0_433 = arith.constant 0 : index
    %c1_434 = arith.constant 1 : index
    %c0_435 = arith.constant 0 : index
    %408 = vector.load %arg23[%c1_431, %c0_432, %c0_433, %c1_434, %c0_435] : memref<2x2x7x3x64xbf16, #tpu.memory_space<vmem>>, vector<1x1x6x2x64xbf16>
    %409 = vector.shape_cast %408 : vector<1x1x6x2x64xbf16> to vector<6x2x64xbf16>
    %410 = vector.shape_cast %409 : vector<6x2x64xbf16> to vector<12x64xbf16>
    %c0_436 = arith.constant 0 : index
    %c1_437 = arith.constant 1 : index
    %c1_438 = arith.constant 1 : index
    %c0_439 = arith.constant 0 : index
    %c0_440 = arith.constant 0 : index
    %411 = vector.load %arg23[%c0_436, %c1_437, %c1_438, %c0_439, %c0_440] : memref<2x2x7x3x64xbf16, #tpu.memory_space<vmem>>, vector<1x1x6x2x64xbf16>
    %412 = vector.shape_cast %411 : vector<1x1x6x2x64xbf16> to vector<6x2x64xbf16>
    %413 = vector.shape_cast %412 : vector<6x2x64xbf16> to vector<12x64xbf16>
    %c0_441 = arith.constant 0 : index
    %c0_442 = arith.constant 0 : index
    %c1_443 = arith.constant 1 : index
    %c1_444 = arith.constant 1 : index
    %c0_445 = arith.constant 0 : index
    %414 = vector.load %arg23[%c0_441, %c0_442, %c1_443, %c1_444, %c0_445] : memref<2x2x7x3x64xbf16, #tpu.memory_space<vmem>>, vector<1x1x6x2x64xbf16>
    %415 = vector.shape_cast %414 : vector<1x1x6x2x64xbf16> to vector<6x2x64xbf16>
    %416 = vector.shape_cast %415 : vector<6x2x64xbf16> to vector<12x64xbf16>
    %417 = tpu.concatenate %407, %410, %413, %416 in 0 : vector<12x64xbf16>, vector<12x64xbf16>, vector<12x64xbf16>, vector<12x64xbf16> -> vector<48x64xbf16>
    %418 = vector.extract_strided_slice %339 {offsets = [0, 64], sizes = [64, 8], strides = [1, 1]} : vector<64x72xbf16> to vector<64x8xbf16>
    %cst_446 = arith.constant dense<0.000000e+00> : vector<48x8xf32>
    %419 = tpu.matmul %417, %418, %cst_446 {dimension_numbers = #tpu.dot_dimension_numbers<[1], [0], [0], [1], [0, 0, 1, 1], [], []>} : vector<48x64xbf16>, vector<64x8xbf16>, vector<48x8xf32> -> vector<48x8xf32>
    %420 = arith.addf %404, %419 : vector<48x8xf32>
    %cst_447 = arith.constant 0.000000e+00 : f32
    %421 = vector.broadcast %cst_447 : f32 to vector<8x4xf32>
    %c0_448 = arith.constant 0 : index
    %c0_449 = arith.constant 0 : index
    %422 = vector.load %arg18[%c0_448, %c0_449] : memref<1x8xf32, #tpu.memory_space<vmem>>, vector<1x8xf32>
    %423 = vector.broadcast %422 : vector<1x8xf32> to vector<48x8xf32>
    %424 = arith.addf %360, %423 : vector<48x8xf32>
    %425 = arith.negf %424 : vector<48x8xf32>
    %426 = math.exp %425 : vector<48x8xf32>
    %cst_450 = arith.constant 1.000000e+00 : f32
    %427 = vector.broadcast %cst_450 : f32 to vector<48x8xf32>
    %428 = arith.addf %427, %426 : vector<48x8xf32>
    %429 = arith.divf %427, %428 : vector<48x8xf32>
    %430 = tpu.transpose %429, [1, 0] : vector<48x8xf32> -> vector<8x48xf32>
    %431 = arith.truncf %430 : vector<8x48xf32> to vector<8x48xbf16>
    %c0_451 = arith.constant 0 : index
    %c0_452 = arith.constant 0 : index
    %c0_453 = arith.constant 0 : index
    %c0_454 = arith.constant 0 : index
    %432 = vector.load %arg19[%c0_451, %c0_452, %c0_453, %c0_454] : memref<1x4x8x48xbf16, #tpu.memory_space<vmem>>, vector<1x1x8x48xbf16>
    %433 = vector.shape_cast %432 : vector<1x1x8x48xbf16> to vector<8x48xbf16>
    %434 = vector.shape_cast %431 : vector<8x48xbf16> to vector<1x1x8x48xbf16>
    tpu.vector_store %arg19[%c0_451, %c0_452, %c0_453, %c0_454], %434 {strides = array<i32>} : memref<1x4x8x48xbf16, #tpu.memory_space<vmem>>, vector<1x1x8x48xbf16>,
    %c0_455 = arith.constant 0 : index
    %c0_456 = arith.constant 0 : index
    %c0_457 = arith.constant 0 : index
    %c0_458 = arith.constant 0 : index
    %435 = vector.load %arg2[%c0_455, %c0_456, %c0_457, %c0_458] : memref<1x4x48x4xbf16, #tpu.memory_space<vmem>>, vector<1x1x48x4xbf16>
    %436 = vector.shape_cast %435 : vector<1x1x48x4xbf16> to vector<48x4xbf16>
    %cst_459 = arith.constant dense<0.000000e+00> : vector<8x4xf32>
    %437 = tpu.matmul %431, %436, %cst_459 {dimension_numbers = #tpu.dot_dimension_numbers<[1], [0], [0], [1], [0, 0, 1, 1], [], []>} : vector<8x48xbf16>, vector<48x4xbf16>, vector<8x4xf32> -> vector<8x4xf32>
    %438 = arith.addf %421, %437 : vector<8x4xf32>
    %c0_460 = arith.constant 0 : index
    %c0_461 = arith.constant 0 : index
    %439 = vector.load %arg18[%c0_460, %c0_461] : memref<1x8xf32, #tpu.memory_space<vmem>>, vector<1x8xf32>
    %440 = vector.broadcast %439 : vector<1x8xf32> to vector<48x8xf32>
    %441 = arith.addf %383, %440 : vector<48x8xf32>
    %442 = arith.negf %441 : vector<48x8xf32>
    %443 = math.exp %442 : vector<48x8xf32>
    %cst_462 = arith.constant 1.000000e+00 : f32
    %444 = vector.broadcast %cst_462 : f32 to vector<48x8xf32>
    %445 = arith.addf %444, %443 : vector<48x8xf32>
    %446 = arith.divf %444, %445 : vector<48x8xf32>
    %447 = tpu.transpose %446, [1, 0] : vector<48x8xf32> -> vector<8x48xf32>
    %448 = arith.truncf %447 : vector<8x48xf32> to vector<8x48xbf16>
    %c0_463 = arith.constant 0 : index
    %c1_464 = arith.constant 1 : index
    %c0_465 = arith.constant 0 : index
    %c0_466 = arith.constant 0 : index
    %449 = vector.load %arg19[%c0_463, %c1_464, %c0_465, %c0_466] : memref<1x4x8x48xbf16, #tpu.memory_space<vmem>>, vector<1x1x8x48xbf16>
    %450 = vector.shape_cast %449 : vector<1x1x8x48xbf16> to vector<8x48xbf16>
    %451 = vector.shape_cast %448 : vector<8x48xbf16> to vector<1x1x8x48xbf16>
    tpu.vector_store %arg19[%c0_463, %c1_464, %c0_465, %c0_466], %451 {strides = array<i32>} : memref<1x4x8x48xbf16, #tpu.memory_space<vmem>>, vector<1x1x8x48xbf16>,
    %c0_467 = arith.constant 0 : index
    %c1_468 = arith.constant 1 : index
    %c0_469 = arith.constant 0 : index
    %c0_470 = arith.constant 0 : index
    %452 = vector.load %arg2[%c0_467, %c1_468, %c0_469, %c0_470] : memref<1x4x48x4xbf16, #tpu.memory_space<vmem>>, vector<1x1x48x4xbf16>
    %453 = vector.shape_cast %452 : vector<1x1x48x4xbf16> to vector<48x4xbf16>
    %cst_471 = arith.constant dense<0.000000e+00> : vector<8x4xf32>
    %454 = tpu.matmul %448, %453, %cst_471 {dimension_numbers = #tpu.dot_dimension_numbers<[1], [0], [0], [1], [0, 0, 1, 1], [], []>} : vector<8x48xbf16>, vector<48x4xbf16>, vector<8x4xf32> -> vector<8x4xf32>
    %455 = arith.addf %438, %454 : vector<8x4xf32>
    %c0_472 = arith.constant 0 : index
    %c0_473 = arith.constant 0 : index
    %456 = vector.load %arg18[%c0_472, %c0_473] : memref<1x8xf32, #tpu.memory_space<vmem>>, vector<1x8xf32>
    %457 = vector.broadcast %456 : vector<1x8xf32> to vector<48x8xf32>
    %458 = arith.addf %402, %457 : vector<48x8xf32>
    %459 = arith.negf %458 : vector<48x8xf32>
    %460 = math.exp %459 : vector<48x8xf32>
    %cst_474 = arith.constant 1.000000e+00 : f32
    %461 = vector.broadcast %cst_474 : f32 to vector<48x8xf32>
    %462 = arith.addf %461, %460 : vector<48x8xf32>
    %463 = arith.divf %461, %462 : vector<48x8xf32>
    %464 = tpu.transpose %463, [1, 0] : vector<48x8xf32> -> vector<8x48xf32>
    %465 = arith.truncf %464 : vector<8x48xf32> to vector<8x48xbf16>
    %c0_475 = arith.constant 0 : index
    %c2_476 = arith.constant 2 : index
    %c0_477 = arith.constant 0 : index
    %c0_478 = arith.constant 0 : index
    %466 = vector.load %arg19[%c0_475, %c2_476, %c0_477, %c0_478] : memref<1x4x8x48xbf16, #tpu.memory_space<vmem>>, vector<1x1x8x48xbf16>
    %467 = vector.shape_cast %466 : vector<1x1x8x48xbf16> to vector<8x48xbf16>
    %468 = vector.shape_cast %465 : vector<8x48xbf16> to vector<1x1x8x48xbf16>
    tpu.vector_store %arg19[%c0_475, %c2_476, %c0_477, %c0_478], %468 {strides = array<i32>} : memref<1x4x8x48xbf16, #tpu.memory_space<vmem>>, vector<1x1x8x48xbf16>,
    %c0_479 = arith.constant 0 : index
    %c2_480 = arith.constant 2 : index
    %c0_481 = arith.constant 0 : index
    %c0_482 = arith.constant 0 : index
    %469 = vector.load %arg2[%c0_479, %c2_480, %c0_481, %c0_482] : memref<1x4x48x4xbf16, #tpu.memory_space<vmem>>, vector<1x1x48x4xbf16>
    %470 = vector.shape_cast %469 : vector<1x1x48x4xbf16> to vector<48x4xbf16>
    %cst_483 = arith.constant dense<0.000000e+00> : vector<8x4xf32>
    %471 = tpu.matmul %465, %470, %cst_483 {dimension_numbers = #tpu.dot_dimension_numbers<[1], [0], [0], [1], [0, 0, 1, 1], [], []>} : vector<8x48xbf16>, vector<48x4xbf16>, vector<8x4xf32> -> vector<8x4xf32>
    %472 = arith.addf %455, %471 : vector<8x4xf32>
    %c0_484 = arith.constant 0 : index
    %c0_485 = arith.constant 0 : index
    %473 = vector.load %arg18[%c0_484, %c0_485] : memref<1x8xf32, #tpu.memory_space<vmem>>, vector<1x8xf32>
    %474 = vector.broadcast %473 : vector<1x8xf32> to vector<48x8xf32>
    %475 = arith.addf %420, %474 : vector<48x8xf32>
    %476 = arith.negf %475 : vector<48x8xf32>
    %477 = math.exp %476 : vector<48x8xf32>
    %cst_486 = arith.constant 1.000000e+00 : f32
    %478 = vector.broadcast %cst_486 : f32 to vector<48x8xf32>
    %479 = arith.addf %478, %477 : vector<48x8xf32>
    %480 = arith.divf %478, %479 : vector<48x8xf32>
    %481 = tpu.transpose %480, [1, 0] : vector<48x8xf32> -> vector<8x48xf32>
    %482 = arith.truncf %481 : vector<8x48xf32> to vector<8x48xbf16>
    %c0_487 = arith.constant 0 : index
    %c3 = arith.constant 3 : index
    %c0_488 = arith.constant 0 : index
    %c0_489 = arith.constant 0 : index
    %483 = vector.load %arg19[%c0_487, %c3, %c0_488, %c0_489] : memref<1x4x8x48xbf16, #tpu.memory_space<vmem>>, vector<1x1x8x48xbf16>
    %484 = vector.shape_cast %483 : vector<1x1x8x48xbf16> to vector<8x48xbf16>
    %485 = vector.shape_cast %482 : vector<8x48xbf16> to vector<1x1x8x48xbf16>
    tpu.vector_store %arg19[%c0_487, %c3, %c0_488, %c0_489], %485 {strides = array<i32>} : memref<1x4x8x48xbf16, #tpu.memory_space<vmem>>, vector<1x1x8x48xbf16>,
    %c0_490 = arith.constant 0 : index
    %c3_491 = arith.constant 3 : index
    %c0_492 = arith.constant 0 : index
    %c0_493 = arith.constant 0 : index
    %486 = vector.load %arg2[%c0_490, %c3_491, %c0_492, %c0_493] : memref<1x4x48x4xbf16, #tpu.memory_space<vmem>>, vector<1x1x48x4xbf16>
    %487 = vector.shape_cast %486 : vector<1x1x48x4xbf16> to vector<48x4xbf16>
    %cst_494 = arith.constant dense<0.000000e+00> : vector<8x4xf32>
    %488 = tpu.matmul %482, %487, %cst_494 {dimension_numbers = #tpu.dot_dimension_numbers<[1], [0], [0], [1], [0, 0, 1, 1], [], []>} : vector<8x48xbf16>, vector<48x4xbf16>, vector<8x4xf32> -> vector<8x4xf32>
    %489 = arith.addf %472, %488 : vector<8x4xf32>
    %c0_495 = arith.constant 0 : index
    %c0_496 = arith.constant 0 : index
    %c0_497 = arith.constant 0 : index
    %490 = vector.load %arg20[%c0_495, %c0_496, %c0_497] : memref<1x8x4xf32, #tpu.memory_space<vmem>>, vector<1x8x4xf32>
    %491 = vector.shape_cast %490 : vector<1x8x4xf32> to vector<8x4xf32>
    %492 = vector.shape_cast %489 : vector<8x4xf32> to vector<1x8x4xf32>
    tpu.vector_store %arg20[%c0_495, %c0_496, %c0_497], %492 {strides = array<i32>} : memref<1x8x4xf32, #tpu.memory_space<vmem>>, vector<1x8x4xf32>,
    return
  }
  func.func @transform_0(%arg0: i32) -> (i32, i32, i32) {
    %c0_i32 = arith.constant 0 : i32
    %c0_i32_0 = arith.constant 0 : i32
    %c0_i32_1 = arith.constant 0 : i32
    return %arg0, %c0_i32, %c0_i32_0 : i32, i32, i32
  }
  func.func @transform_1(%arg0: i32) -> (i32, i32, i32, i32) {
    %c0_i32 = arith.constant 0 : i32
    %c0_i32_0 = arith.constant 0 : i32
    %c0_i32_1 = arith.constant 0 : i32
    %c0_i32_2 = arith.constant 0 : i32
    return %arg0, %c0_i32, %c0_i32_0, %c0_i32_1 : i32, i32, i32, i32
  }
  func.func @transform_2(%arg0: i32) -> (i32, i32) {
    %c0_i32 = arith.constant 0 : i32
    %c0_i32_0 = arith.constant 0 : i32
    %c0_i32_1 = arith.constant 0 : i32
    return %c0_i32, %c0_i32_0 : i32, i32
  }
  func.func @transform_3(%arg0: i32) -> (i32, i32) {
    %c0_i32 = arith.constant 0 : i32
    %c0_i32_0 = arith.constant 0 : i32
    %c0_i32_1 = arith.constant 0 : i32
    return %c0_i32, %c0_i32_0 : i32, i32
  }
  func.func @transform_4(%arg0: i32) -> (i32, i32) {
    %c0_i32 = arith.constant 0 : i32
    %c0_i32_0 = arith.constant 0 : i32
    %c0_i32_1 = arith.constant 0 : i32
    return %c0_i32, %c0_i32_0 : i32, i32
  }
  func.func @transform_5(%arg0: i32) -> (i32, i32, i32, i32) {
    %c0_i32 = arith.constant 0 : i32
    %c0_i32_0 = arith.constant 0 : i32
    %c0_i32_1 = arith.constant 0 : i32
    %c0_i32_2 = arith.constant 0 : i32
    %c0_i32_3 = arith.constant 0 : i32
    return %c0_i32, %c0_i32_0, %c0_i32_1, %c0_i32_2 : i32, i32, i32, i32
  }
  func.func @transform_6(%arg0: i32) -> (i32, i32) {
    %c0_i32 = arith.constant 0 : i32
    %c0_i32_0 = arith.constant 0 : i32
    %c0_i32_1 = arith.constant 0 : i32
    return %c0_i32, %c0_i32_0 : i32, i32
  }
  func.func @transform_7(%arg0: i32) -> (i32, i32) {
    %c0_i32 = arith.constant 0 : i32
    %c0_i32_0 = arith.constant 0 : i32
    %c0_i32_1 = arith.constant 0 : i32
    return %c0_i32, %c0_i32_0 : i32, i32
  }
  func.func @transform_8(%arg0: i32) -> (i32, i32) {
    %c0_i32 = arith.constant 0 : i32
    %c0_i32_0 = arith.constant 0 : i32
    %c0_i32_1 = arith.constant 0 : i32
    return %c0_i32, %c0_i32_0 : i32, i32
  }
  func.func @transform_9(%arg0: i32) -> (i32, i32) {
    %c0_i32 = arith.constant 0 : i32
    %c0_i32_0 = arith.constant 0 : i32
    %c0_i32_1 = arith.constant 0 : i32
    return %c0_i32, %c0_i32_0 : i32, i32
  }
  func.func @transform_10(%arg0: i32) -> (i32, i32) {
    %c0_i32 = arith.constant 0 : i32
    %c0_i32_0 = arith.constant 0 : i32
    %c0_i32_1 = arith.constant 0 : i32
    return %c0_i32, %c0_i32_0 : i32, i32
  }
  func.func @transform_11(%arg0: i32) -> (i32, i32) {
    %c0_i32 = arith.constant 0 : i32
    %c0_i32_0 = arith.constant 0 : i32
    %c0_i32_1 = arith.constant 0 : i32
    return %c0_i32, %c0_i32_0 : i32, i32
  }
  func.func @transform_12(%arg0: i32) -> (i32, i32) {
    %c0_i32 = arith.constant 0 : i32
    %c0_i32_0 = arith.constant 0 : i32
    %c0_i32_1 = arith.constant 0 : i32
    return %c0_i32, %c0_i32_0 : i32, i32
  }
  func.func @transform_13(%arg0: i32) -> (i32, i32) {
    %c0_i32 = arith.constant 0 : i32
    %c0_i32_0 = arith.constant 0 : i32
    %c0_i32_1 = arith.constant 0 : i32
    return %c0_i32, %c0_i32_0 : i32, i32
  }
  func.func @transform_14(%arg0: i32) -> (i32, i32) {
    %c0_i32 = arith.constant 0 : i32
    %c0_i32_0 = arith.constant 0 : i32
    %c0_i32_1 = arith.constant 0 : i32
    return %c0_i32, %c0_i32_0 : i32, i32
  }
  func.func @transform_15(%arg0: i32) -> (i32, i32) {
    %c0_i32 = arith.constant 0 : i32
    %c0_i32_0 = arith.constant 0 : i32
    %c0_i32_1 = arith.constant 0 : i32
    return %c0_i32, %c0_i32_0 : i32, i32
  }
  func.func @transform_16(%arg0: i32) -> (i32, i32) {
    %c0_i32 = arith.constant 0 : i32
    %c0_i32_0 = arith.constant 0 : i32
    %c0_i32_1 = arith.constant 0 : i32
    return %c0_i32, %c0_i32_0 : i32, i32
  }
  func.func @transform_17(%arg0: i32) -> (i32, i32) {
    %c0_i32 = arith.constant 0 : i32
    %c0_i32_0 = arith.constant 0 : i32
    %c0_i32_1 = arith.constant 0 : i32
    return %c0_i32, %c0_i32_0 : i32, i32
  }
  func.func @transform_18(%arg0: i32) -> (i32, i32, i32, i32) {
    %c0_i32 = arith.constant 0 : i32
    %c0_i32_0 = arith.constant 0 : i32
    %c0_i32_1 = arith.constant 0 : i32
    %c0_i32_2 = arith.constant 0 : i32
    return %arg0, %c0_i32, %c0_i32_0, %c0_i32_1 : i32, i32, i32, i32
  }
  func.func @transform_19(%arg0: i32) -> (i32, i32, i32) {
    %c0_i32 = arith.constant 0 : i32
    %c0_i32_0 = arith.constant 0 : i32
    %c0_i32_1 = arith.constant 0 : i32
    return %arg0, %c0_i32, %c0_i32_0 : i32, i32, i32
  }
}

</mosaic_0001>

<bundles_post_ra>
// kernel: attention_forward.1
= control target key start
LH: loop header
LB: loop body
LE: loop exit
PB: predicated region body
PF: predicated region fallthrough
CT: control target
= control target key end

     0   :  { %s15042_s0 = inlined_call_operand.vmem [shape: bf16[2,192,36], index: 0, kind: input, shape index: {}]   ;;  %s15043_s1 = inlined_call_operand.vmem [shape: bf16[2,4,48,4], index: 1, kind: input, shape index: {}]   ;;  %s15044_s2 = inlined_call_operand.vmem [shape: bf16[36,256], index: 2, kind: input, shape index: {}]   ;;  %s15045_s3 = inlined_call_operand.vmem [shape: f32[1,256], index: 3, kind: input, shape index: {}]   ;;  %s15046_s4 = inlined_call_operand.vmem [shape: f32[1,256], index: 4, kind: input, shape index: {}]   ;;  %s15047_s5 = inlined_call_operand.vmem [shape: bf16[3,3,256,128], index: 5, kind: input, shape index: {}]   ;;  %s15048_s6 = inlined_call_operand.vmem [shape: f32[1,128], index: 6, kind: input, shape index: {}]   ;;  %s15049_s7 = inlined_call_operand.vmem [shape: f32[1,128], index: 7, kind: input, shape index: {}]   ;;  %s15050_s8 = inlined_call_operand.vmem [shape: bf16[12,12], index: 8, kind: input, shape index: {}]   ;;  %s15051_s9 = inlined_call_operand.vmem [shape: f32[12,1], index: 9, kind: input, shape index: {}]   ;;  %s15052_s10 = inlined_call_operand.vmem [shape: bf16[128,576], index: 10, kind: input, shape index: {}]   ;;  %s15053_s11 = inlined_call_operand.vmem [shape: f32[1,64], index: 11, kind: input, shape index: {}]   ;;  %s15054_s12 = inlined_call_operand.vmem [shape: bf16[256,64], index: 12, kind: input, shape index: {}]   ;;  %s15055_s13 = inlined_call_operand.vmem [shape: f32[1,64], index: 13, kind: input, shape index: {}]   ;;  %s15056_s14 = inlined_call_operand.vmem [shape: f32[1,64], index: 14, kind: input, shape index: {}]   ;;  %s15057_s15 = inlined_call_operand.vmem [shape: f32[1,64], index: 15, kind: input, shape index: {}]   ;;  %s15058_s16 = inlined_call_operand.vmem [shape: bf16[64,72], index: 16, kind: input, shape index: {}]   ;;  %s15059_s17 = inlined_call_operand.vmem [shape: f32[1,8], index: 17, kind: input, shape index: {}]   ;;  %s15060_s18 = inlined_call_operand.vmem [shape: bf16[2,4,8,48], index: 18, kind: output, shape index: {0}]   ;;  %s15061_s19 = inlined_call_operand.vmem [shape: f32[2,8,4], index: 19, kind: output, shape index: {1}]  }
   0x1   :  { %15097 = sst [smem:[#allocation36_spill]] %s15042_s0  ;;  %s12210_s0 = smov 0  }
   0x2   :  { %15098 = sst [smem:[#allocation37_spill]] %s15043_s1 }
   0x3   :  { %15099 = sst [smem:[#allocation38_spill]] %s15044_s2 }
   0x4   :  { %15100 = sst [smem:[#allocation39_spill]] %s15045_s3 }
   0x5 LB: > { %s10199_s30 = sadd.s32 4294967295, %s12094_s0   ;;  %p10203_p0 = scmp.ge.s32.totalorder %s12094_s0, 1  ;;  %s12094_s0 = sphi %s12210_s0, %s30_s0  }
   0x6   : > { %p550_p1 = scmp.lt.s32.totalorder %s12094_s0, 3 }
   0x8   : > { %p551_p2 = pnand %p10203_p0, %p550_p1 }
   0xa   : > { %554 = sbr.rel (%p551_p2) target bundleno = 2530 (0x9e2), region = 92 }
  0x11   : > { %s15101_s1 = sld [smem:[#allocation38_spill]]  ;;  %v15063_v2 = vmov 0   ;;  %p615_p3 = scmp.lt.s32.totalorder %s10199_s30, 1  ;;  %vm786_vm0 = vcmask 1041408   ;;  %vm749_vm1 = vcmask 293888   ;;  %vm1159_vm3 = vcmask 1043458  }
  0x12   : > { %825 = vmatprep.mubr.bf16.mxu0 %v15063_v2  ;;  %11659 = vset.pattern.permute.xlu0 %v15063_v2  ;;  %s15102_s21 = sld [smem:[#allocation36_spill]]  ;;  %vm1157_vm2 = vsmask.f32 1280  ;;  %vm1160_vm4 = vsmask.f32 3328  ;;  %v15103_v21 = vmov 0 }
  0x13   : > { %s15190_s30 = smov (!%p615_p3, %s10199_s30), 1  ;;  %vm12284_vm5 = vmand %vm786_vm0, %vm1157_vm2  ;;  %v1226_v22 = vld [vmem:[#allocation2 + $0x54] sm:$0xf]  ;;  %v1229_v23 = vld [vmem:[#allocation2 + $0x58] sm:$0xf]  ;;  %s15108_s29 = sld [smem:[#allocation39_spill]] }
  0x14   : > { %s11636_s28 = smul.u32 96, %s15190_s30  ;;  %v15104_v21 = vsel %vm12284_vm5, 4294967295, %v15103_v21  ;;  %vm1161_vm6 = vmand %vm1159_vm3, %vm1160_vm4  ;;  %v1232_v24 = vld [vmem:[#allocation2 + $0x5c] sm:$0xf]  ;;  %v1235_v25 = vld [vmem:[#allocation2 + $0x60] sm:$0xf] }
  0x15   : > { %15105 = vst [vmem:[#allocation5_spill] sm:$0xff] %v15104_v21  ;;  %vm12291_vm7 = vmor %vm1161_vm6, %vm12284_vm5  ;;  %v1238_v31 = vld [vmem:[#allocation2 + $0x64] sm:$0xf]  ;;  %v1241_v33 = vld [vmem:[#allocation2 + $0x68] sm:$0xf]  ;;  %s12102_s3 = smov 96  }
  0x16   : > { %v1227_v27 = vsel %vm12291_vm7, 0, %v1226_v22  ;;  %v1230_v28 = vsel %vm12291_vm7, 0, %v1229_v23  ;;  %v1233_v29 = vsel %vm12291_vm7, 0, %v1232_v24  ;;  %v1236_v30 = vsel %vm12291_vm7, 0, %v1235_v25  ;;  %v1205_v34 = vld [vmem:[#allocation2 + $0x38] sm:$0xf] }
  0x17   : > { %v11739_v0 = vld [vmem:[%s15101_s1 + $0x4] ss:$8 sps:$4 sm:$0xff]   ;;  %v11741_v1 = vld [vmem:[%s15101_s1] ss:$8 sps:$4 sm:$0xff]   ;;  %v11742_v3 = vld [vmem:[%s15101_s1 + $0x14] ss:$8 sps:$4 sm:$0xff]  }
  0x18   : > { %793 = vmatprep.subr.bf16.mxu0 %v11739_v0  ;;  %v11744_v4 = vld [vmem:[%s15101_s1 + $0x10] ss:$8 sps:$4 sm:$0xff]   ;;  %v663_v5 = vld [vmem:[%s15101_s1 + $0x20] sm:$0x33]  ;;  %s12243_s22 = scalar_lea.vmem %s15102_s21, %s11636_s28  ;;  %1228 = vst [vmem:[#allocation2 + $0x54] sm:$0xf] %v1227_v27 }
  0x19   : > { %794 = vmatpush1.bf16.msra.mxu0 %v11741_v1  ;;  %v10226_v6 = vcombine.high %v663_v5, %v663_v5  ;;  %v10225_v7 = vcombine.low %v663_v5, %v663_v5  ;;  %v11747_v9 = vld [vmem:[%s12243_s22] sm:$0xff]   ;;  %v11748_v10 = vld [vmem:[%s12243_s22 + $0x8] sm:$0xff]   ;;  %v11749_v11 = vld [vmem:[%s12243_s22 + $0x10] sm:$0xff]   ;;  %1231 = vst [vmem:[#allocation2 + $0x58] sm:$0xf] %v1230_v28  ;;  %v1239_v32 = vsel %vm12291_vm7, 0, %v1238_v31 }
  0x1a   : > { %795 = vmatprep.subr.bf16.mxu0 %v11742_v3  ;;  %v11750_v12 = vld [vmem:[%s12243_s22 + $0x18] sm:$0xff]   ;;  %v11751_v13 = vld [vmem:[%s12243_s22 + $0x20] sm:$0xff]   ;;  %v11752_v14 = vld [vmem:[%s12243_s22 + $0x28] sm:$0xff]   ;;  %1234 = vst [vmem:[#allocation2 + $0x5c] sm:$0xf] %v1233_v29  ;;  %v1242_v35 = vsel %vm12291_vm7, 0, %v1241_v33 }
  0x1b   : > { %v788_v8 = vsel %vm786_vm0, %v10225_v7, 0  ;;  %v11753_v15 = vld [vmem:[%s12243_s22 + $0x30] sm:$0xff]   ;;  %v11754_v16 = vld [vmem:[%s12243_s22 + $0x38] sm:$0xff]   ;;  %v11755_v17 = vld [vmem:[%s12243_s22 + $0x40] sm:$0xff]   ;;  %1237 = vst [vmem:[#allocation2 + $0x60] sm:$0xf] %v1236_v30 }
  0x1c   : > { %v11756_v18 = vld [vmem:[%s12243_s22 + $0x48] sm:$0xff]   ;;  %v11757_v19 = vld [vmem:[%s12243_s22 + $0x50] sm:$0xff]   ;;  %v11758_v20 = vld [vmem:[%s12243_s22 + $0x58] sm:$0xff]   ;;  %1240 = vst [vmem:[#allocation2 + $0x64] sm:$0xf] %v1239_v32  ;;  %v1206_v36 = vsel %vm12291_vm7, 0, %v1205_v34 }
  0x1d   : > { %796 = vmatpush1.bf16.msra.mxu0 %v11744_v4  ;;  %1243 = vst [vmem:[#allocation2 + $0x68] sm:$0xf] %v1242_v35  ;;  %1207 = vst [vmem:[#allocation2 + $0x38] sm:$0xf] %v1206_v36  ;;  %v1208_v37 = vld [vmem:[#allocation2 + $0x3c] sm:$0xf] }
  0x1e   : > { %10227 = vmatprep.subr.msk.bf16.mxu0 %vm786_vm0, %v10226_v6  ;;  %v1209_v38 = vsel %vm12291_vm7, 0, %v1208_v37  ;;  %v1211_v39 = vld [vmem:[#allocation2 + $0x40] sm:$0xf]  ;;  %v1214_v41 = vld [vmem:[#allocation2 + $0x44] sm:$0xf]  ;;  %v11761_v4 = vld [vmem:[%s15047_s5 + $0x1c8] sm:$0xff]   ;;  %v948_v37 = vlaneseq }
  0x1f   : > { %1210 = vst [vmem:[#allocation2 + $0x3c] sm:$0xf] %v1209_v38  ;;  %v1212_v40 = vsel %vm12291_vm7, 0, %v1211_v39  ;;  %v1215_v42 = vsel %vm12291_vm7, 0, %v1214_v41  ;;  %v1217_v43 = vld [vmem:[#allocation2 + $0x48] sm:$0xf] }
  0x20   : > { %1213 = vst [vmem:[#allocation2 + $0x40] sm:$0xf] %v1212_v40  ;;  %v1187_v44 = vld [vmem:[#allocation2 + $0x20] sm:$0xf]  ;;  %1216 = vst [vmem:[#allocation2 + $0x44] sm:$0xf] %v1215_v42 }
  0x21   : > { %798 = vmatpush1.bf16.msra.mxu0 %v788_v8  ;;  %v1218_v45 = vsel %vm12291_vm7, 0, %v1217_v43  ;;  %v1220_v46 = vld [vmem:[#allocation2 + $0x4c] sm:$0xf]  ;;  %v1188_v47 = vsel %vm12291_vm7, 0, %v1187_v44  ;;  %v1190_v49 = vld [vmem:[#allocation2 + $0x24] sm:$0xf] }
  0x22   : > { %1219 = vst [vmem:[#allocation2 + $0x48] sm:$0xf] %v1218_v45  ;;  %v1221_v48 = vsel %vm12291_vm7, 0, %v1220_v46  ;;  %1189 = vst [vmem:[#allocation2 + $0x20] sm:$0xf] %v1188_v47  ;;  %v1191_v51 = vsel %vm12291_vm7, 0, %v1190_v49 }
  0x23   : > { %v1193_v50 = vld [vmem:[#allocation2 + $0x28] sm:$0xf]  ;;  %1222 = vst [vmem:[#allocation2 + $0x4c] sm:$0xf] %v1221_v48  ;;  %v1196_v53 = vld [vmem:[#allocation2 + $0x2c] sm:$0xf] }
  0x24   : > { %10228 = vmatmul.mubr.msk.bf16.vlgmr.msra.gmra.mrb[0].mxu0 %vm749_vm1, %v11747_v9  ;;  %v1194_v52 = vsel %vm12291_vm7, 0, %v1193_v50  ;;  %1192 = vst [vmem:[#allocation2 + $0x24] sm:$0xf] %v1191_v51  ;;  %v1197_v54 = vsel %vm12291_vm7, 0, %v1196_v53  ;;  %v1199_v55 = vld [vmem:[#allocation2 + $0x30] sm:$0xf] }
  0x25   : > { %835 = vmatprep.mubr.bf16.mxu0 %v15063_v2  ;;  %1195 = vst [vmem:[#allocation2 + $0x28] sm:$0xf] %v1194_v52  ;;  %1198 = vst [vmem:[#allocation2 + $0x2c] sm:$0xf] %v1197_v54  ;;  %v1200_v56 = vsel %vm12291_vm7, 0, %v1199_v55  ;;  %v11759_v60 = vld [vmem:[%s15047_s5 + $0x1c0] sm:$0xff]  }
  0x26   : > { %1201 = vst [vmem:[#allocation2 + $0x30] sm:$0xf] %v1200_v56  ;;  %v1202_v57 = vld [vmem:[#allocation2 + $0x34] sm:$0xf]  ;;  %v1166_v58 = vld [vmem:[#allocation2 + $0x4] sm:$0xf]  ;;  %11130 = vmatprep.subr.bf16.mxu0 %v11759_v60 }
  0x27   : > { %v1203_v59 = vsel %vm12291_vm7, 0, %v1202_v57  ;;  %v1167_v61 = vsel %vm12291_vm7, 0, %v1166_v58  ;;  %v11760_v62 = vld [vmem:[%s15047_s5 + $0x180] sm:$0xff]   ;;  %v1169_v63 = vld [vmem:[#allocation2 + $0x8] sm:$0xf]  ;;  %v11763_v6 = vld [vmem:[%s15047_s5 + $0x1d0] sm:$0xff]  }
  0x28   : > { %1204 = vst [vmem:[#allocation2 + $0x34] sm:$0xf] %v1203_v59  ;;  %1168 = vst [vmem:[#allocation2 + $0x4] sm:$0xf] %v1167_v61  ;;  %v1184_v0 = vld [vmem:[#allocation2 + $0x1c] sm:$0xf]  ;;  %11131 = vmatpush3.bf16.msra.mxu0 %v11760_v62 }
  0x29   : > { %v1170_v1 = vsel %vm12291_vm7, 0, %v1169_v63  ;;  %v1185_v3 = vsel %vm12291_vm7, 0, %v1184_v0  ;;  %v11762_v5 = vld [vmem:[%s15047_s5 + $0x188] sm:$0xff]   ;;  %11132 = vmatprep.subr.bf16.mxu0 %v11761_v4  ;;  %v11764_v8 = vld [vmem:[%s15047_s5 + $0x190] sm:$0xff]   ;;  %v11771_v23 = vld [vmem:[%s15047_s5 + $0x1e0] sm:$0xff]   ;;  %v12422_v45 = vshrl.u32 %v948_v37, 7 }
  0x2a   : > { %1171 = vst [vmem:[#allocation2 + $0x8] sm:$0xf] %v1170_v1  ;;  %1186 = vst [vmem:[#allocation2 + $0x1c] sm:$0xf] %v1185_v3  ;;  %v1172_v7 = vld [vmem:[#allocation2 + $0xc] sm:$0xf] }
  0x2b   : > { %v1173_v9 = vsel %vm12291_vm7, 0, %v1172_v7  ;;  %v11770_v22 = vld [vmem:[%s15047_s5 + $0x88] sm:$0xff]   ;;  %v11772_v24 = vld [vmem:[%s15047_s5 + $0x1a0] sm:$0xff]   ;;  %v11773_v27 = vld [vmem:[%s15047_s5 + $0xd0] sm:$0xff]   ;;  %v950_v53 = vsub.s32 0, %v12422_v45  ;;  %v954_v56 = vsub.s32 1, %v12422_v45 }
  0x2c   : > { %10229 = vmatmul.mubr.msk.bf16.gmra.mrb[4].mxu0 %vm749_vm1, %v11748_v10  ;;  %v11765_v10 = vld [vmem:[%s15047_s5 + $0xc0] sm:$0xff]   ;;  %1174 = vst [vmem:[#allocation2 + $0xc] sm:$0xf] %v1173_v9  ;;  %v11774_v29 = vld [vmem:[%s15047_s5 + $0x90] sm:$0xff]   ;;  %v11775_v32 = vld [vmem:[%s15047_s5 + $0x1e8] sm:$0xff]   ;;  %s12101_s22 = smov 64  }
  0x2d   : > { %845 = vmatprep.mubr.bf16.mxu0 %v15063_v2  ;;  %11133 = vmatpush3.bf16.msra.mxu0 %v11762_v5  ;;  %v1163_v30 = vld [vmem:[#allocation2] sm:$0xf]  ;;  %v11776_v35 = vld [vmem:[%s15047_s5 + $0x1a8] sm:$0xff]   ;;  %v11777_v36 = vld [vmem:[%s15047_s5 + $0xd8] sm:$0xff]   ;;  %vm2299_vm8 = vsmask.f32 256 }
  0x2e   : > { %11134 = vmatprep.subr.bf16.mxu0 %v11763_v6  ;;  %11028 = vmatprep.subr.bf16.mxu1 %v11765_v10  ;;  %v1164_v33 = vsel %vm12291_vm7, 0, %v1163_v30  ;;  %v11778_v38 = vld [vmem:[%s15047_s5 + $0x98] sm:$0xff]   ;;  %v11779_v39 = vld [vmem:[%s15047_s5 + $0x1f0] sm:$0xff]   ;;  %v11781_v41 = vld [vmem:[%s15047_s5 + $0xe0] sm:$0xff]   ;;  %vm2300_vm9 = vsmask.f32 1284 }
  0x2f   : > { %1165 = vst [vmem:[#allocation2] sm:$0xf] %v1164_v33  ;;  %v11780_v40 = vld [vmem:[%s15047_s5 + $0x1b0] sm:$0xff]   ;;  %v11783_v42 = vld [vmem:[%s15047_s5 + $0x1f8] sm:$0xff]   ;;  %v11782_v44 = vld [vmem:[%s15047_s5 + $0xa0] sm:$0xff]   ;;  %s12103_s26 = smov 80  }
  0x30   : > { %v11784_v47 = vld [vmem:[%s15047_s5 + $0x1b8] sm:$0xff]   ;;  %v11785_v48 = vld [vmem:[%s15047_s5 + $0xe8] sm:$0xff]   ;;  %v11787_v50 = vld [vmem:[%s15047_s5 + $0x2c0] sm:$0xff]   ;;  %vm2302_vm11 = vsmask.f32 2312  ;;  %s12105_s20 = smov 24  }
  0x31   : > { %11135 = vmatpush3.bf16.msra.mxu0 %v11764_v8  ;;  %v11786_v52 = vld [vmem:[%s15047_s5 + $0xa8] sm:$0xff]   ;;  %v11789_v54 = vld [vmem:[%s15047_s5 + $0xf0] sm:$0xff]   ;;  %v946_v55 = vld [vmem:[%s15108_s29] sm:$0x3]  ;;  %vm2304_vm13 = vsmask.f32 3340 }
  0x32   : > { %v11790_v58 = vld [vmem:[%s15047_s5 + $0xb0] sm:$0xff]   ;;  %v12449_v59 = vrot.slane %v946_v55, %v950_v53  ;;  %v11793_v61 = vld [vmem:[%s15047_s5 + $0xf8] sm:$0xff]   ;;  %v1006_v62 = vld [vmem:[%s15046_s4] sm:$0x3]  ;;  %v12459_v63 = vrot.slane %v946_v55, %v954_v56  ;;  %vm2306_vm15 = vsmask.f32 4368 }
  0x33   : > { %v11794_v3 = vld [vmem:[%s15047_s5 + $0xb8] sm:$0xff]   ;;  %v12469_v5 = vrot.slane %v1006_v62, %v950_v53  ;;  %v12472_v7 = vrot.slane %v1006_v62, %v954_v56  ;;  %vm2301_vm10 = vmor %vm2299_vm8, %vm2300_vm9  ;;  %vm2308_vm4 = vsmask.f32 5396  ;;  %vm2310_vm8 = vsmask.f32 6424  ;;  %s12104_s29 = smov 16  }
  0x34   : > { %10230 = vmatmul.mubr.msk.bf16.gmra.mrb[8].mxu0 %vm749_vm1, %v11749_v11  ;;  %v1175_v11 = vld [vmem:[#allocation2 + $0x10] sm:$0xf]  ;;  %vm2303_vm12 = vmor %vm2301_vm10, %vm2302_vm11  ;;  %vm2312_vm9 = vsmask.f32 7452  ;;  %s12106_s21 = smov 8   ;;  %s12107_s2 = smov 112  }
  0x35   : > { %855 = vmatprep.mubr.bf16.mxu0 %v15063_v2  ;;  %vm2305_vm14 = vmor %vm2303_vm12, %vm2304_vm13  ;;  %vm1472_vm12 = vsmask.f32 1282  ;;  %vm1474_vm13 = vsmask.f32 3338  ;;  %s12108_s23 = smov 120   ;;  %s12109_s24 = smov 104  }
  0x3c   : > { %10231 = vmatmul.mubr.msk.bf16.gmra.mrb[12].mxu0 %vm749_vm1, %v11750_v12  ;;  %v1178_v12 = vld [vmem:[#allocation2 + $0x14] sm:$0xf] }
  0x3d   : > { %865 = vmatprep.mubr.bf16.mxu0 %v15063_v2 }
  0x44   : > { %10232 = vmatmul.mubr.msk.bf16.gmra.mrb[16].mxu0 %vm749_vm1, %v11751_v13  ;;  %v1176_v13 = vsel %vm12291_vm7, 0, %v1175_v11  ;;  %v11797_v11 = vld [vmem:[%s15047_s5 + $0x40] sm:$0xff]  }
  0x45   : > { %875 = vmatprep.mubr.bf16.mxu0 %v15063_v2  ;;  %1177 = vst [vmem:[#allocation2 + $0x10] sm:$0xf] %v1176_v13 }
  0x4c   : > { %10233 = vmatmul.mubr.msk.bf16.gmra.mrb[20].mxu0 %vm749_vm1, %v11752_v14  ;;  %v1179_v14 = vsel %vm12291_vm7, 0, %v1178_v12 }
  0x4d   : > { %885 = vmatprep.mubr.bf16.mxu0 %v15063_v2  ;;  %1180 = vst [vmem:[#allocation2 + $0x14] sm:$0xf] %v1179_v14 }
  0x54   : > { %10234 = vmatmul.mubr.msk.bf16.gmra.mrb[24].mxu0 %vm749_vm1, %v11753_v15  ;;  %v11766_v15 = vld [vmem:[%s15047_s5 + $0x80] sm:$0xff]  }
  0x55   : > { %895 = vmatprep.mubr.bf16.mxu0 %v15063_v2  ;;  %11029 = vmatpush3.bf16.msra.mxu1 %v11766_v15 }
  0x5c   : > { %10235 = vmatmul.mubr.msk.bf16.gmra.mrb[28].mxu0 %vm749_vm1, %v11754_v16  ;;  %v11767_v16 = vld [vmem:[%s15047_s5 + $0x1d8] sm:$0xff]  }
  0x5d   : > { %905 = vmatprep.mubr.bf16.mxu0 %v15063_v2  ;;  %11136 = vmatprep.subr.bf16.mxu0 %v11767_v16 }
  0x64   : > { %10236 = vmatmul.mubr.msk.bf16.gmra.mrb[32].mxu0 %vm749_vm1, %v11755_v17  ;;  %v1181_v17 = vld [vmem:[#allocation2 + $0x18] sm:$0xf] }
  0x65   : > { %915 = vmatprep.mubr.bf16.mxu0 %v15063_v2 }
  0x6c   : > { %10237 = vmatmul.mubr.msk.bf16.gmra.mrb[36].mxu0 %vm749_vm1, %v11756_v18  ;;  %v11768_v18 = vld [vmem:[%s15047_s5 + $0x198] sm:$0xff]  }
  0x6d   : > { %925 = vmatprep.mubr.bf16.mxu0 %v15063_v2  ;;  %11137 = vmatpush3.bf16.msra.mxu0 %v11768_v18 }
  0x6e   : > { %11138 = vmatprep.subr.bf16.mxu0 %v11771_v23 }
  0x71   : > { %11139 = vmatpush3.bf16.msra.mxu0 %v11772_v24 }
  0x72   : > { %11140 = vmatprep.subr.bf16.mxu0 %v11775_v32 }
  0x74   : > { %10238 = vmatmul.mubr.msk.bf16.gmra.mrb[40].mxu0 %vm749_vm1, %v11757_v19  ;;  %v1182_v19 = vsel %vm12291_vm7, 0, %v1181_v17 }
  0x75   : > { %935 = vmatprep.mubr.bf16.mxu0 %v15063_v2  ;;  %1183 = vst [vmem:[#allocation2 + $0x18] sm:$0xf] %v1182_v19  ;;  %11141 = vmatpush3.bf16.msra.mxu0 %v11776_v35 }
  0x76   : > { %11142 = vmatprep.subr.bf16.mxu0 %v11779_v39 }
  0x79   : > { %11143 = vmatpush3.bf16.msra.mxu0 %v11780_v40 }
  0x7a   : > { %11144 = vmatprep.subr.bf16.mxu0 %v11783_v42 }
  0x7c   : > { %10239 = vmatmul.mubr.msk.bf16.gmra.mrb[44].mxu0 %vm749_vm1, %v11758_v20  ;;  %v11769_v20 = vld [vmem:[%s15047_s5 + $0xc8] sm:$0xff]   ;;  %vm2307_vm1 = vmor %vm2305_vm14, %vm2306_vm15 }
  0x7d   : > { %11030 = vmatprep.subr.bf16.mxu1 %v11769_v20  ;;  %11145 = vmatpush3.bf16.msra.mxu0 %v11784_v47  ;;  %vm2309_vm6 = vmor %vm2307_vm1, %vm2308_vm4  ;;  %vm2190_vm4 = vcmask 1043456  }
  0x7e   : > { %11031 = vmatpush3.bf16.msra.mxu1 %v11770_v22  ;;  %11198 = vmatprep.subr.bf16.mxu0 %v11787_v50  ;;  %vm2311_vm10 = vmor %vm2309_vm6, %vm2310_vm8  ;;  %vm6303_vm6 = vcmask 97280  }
  0x7f   : > { %11032 = vmatprep.subr.bf16.mxu1 %v11773_v27  ;;  %vm12572_vm11 = vmor %vm2311_vm10, %vm2312_vm9  ;;  %vm8345_vm9 = vcmask 523264   ;;  %vm9636_vm10 = vcmask 392192  }
  0x80   : > { %vm12684_vm14 = vmand %vm786_vm0, %vm1472_vm12 }
  0x81   : > { %vm1475_vm15 = vmand %vm1159_vm3, %vm1474_vm13  ;;  %vm2181_vm3 = vcmask 1045504  }
  0x82   : > { %11033 = vmatpush3.bf16.msra.mxu1 %v11774_v29  ;;  %vm12708_vm1 = vmor %vm1475_vm15, %vm12684_vm14 }
  0x83   : > { %11034 = vmatprep.subr.bf16.mxu1 %v11777_v36 }
  0x86   : > { %11035 = vmatpush3.bf16.msra.mxu1 %v11778_v38 }
  0x87   : > { %11036 = vmatprep.subr.bf16.mxu1 %v11781_v41 }
  0x8a   : > { %11037 = vmatpush3.bf16.msra.mxu1 %v11782_v44 }
  0x8b   : > { %11038 = vmatprep.subr.bf16.mxu1 %v11785_v48 }
  0x8e   : > { %11039 = vmatpush3.bf16.msra.mxu1 %v11786_v52 }
  0x8f   : > { %11040 = vmatprep.subr.bf16.mxu1 %v11789_v54 }
  0x92   : > { %11041 = vmatpush3.bf16.msra.mxu1 %v11790_v58 }
  0x93   : > { %11042 = vmatprep.subr.bf16.mxu1 %v11793_v61 }
  0x96   : > { %11043 = vmatpush3.bf16.msra.mxu1 %v11794_v3 }
  0x97   : > { %11062 = vmatprep.subr.bf16.mxu1 %v11797_v11 }
  0xf7   : > { %v827_v25 = vpop.f32.mrb[0].mxu0 }
  0xf8   : > { %v829_v28 = vpop.f32.mrb[1].mxu0  ;;  %v958_v4 = vmul.f32 %v12449_v59, %v827_v25 }
  0xf9   : > { %v831_v31 = vpop.f32.mrb[2].mxu0  ;;  %v959_v6 = vmul.f32 %v12459_v63, %v829_v28 }
  0xfa   : > { %v833_v34 = vpop.f32.mrb[3].mxu0  ;;  %v960_v8 = vmul.f32 %v12449_v59, %v831_v31  ;;  %v1018_v12 = vadd.f32 %v12469_v5, %v958_v4 }
  0xfb   : > { %v961_v9 = vmul.f32 %v12459_v63, %v833_v34  ;;  %v1019_v15 = vadd.f32 %v12472_v7, %v959_v6 }
  0xfc   : > { %v1020_v18 = vadd.f32 %v12469_v5, %v960_v8  ;;  %v1066_v27 = vmax.f32 %v1018_v12, 0.0 }
  0xfd   : > { %v1021_v23 = vadd.f32 %v12472_v7, %v961_v9  ;;  %v1067_v31 = vmax.f32 %v1019_v15, 0.0 }
  0xfe   : > { %v1068_v35 = vmax.f32 %v1020_v18, 0.0 }
  0xff   : > { %v837_v43 = vpop.f32.mrb[4].mxu0  ;;  %v1069_v39 = vmax.f32 %v1021_v23, 0.0 }
 0x100   : > { %v839_v46 = vpop.f32.mrb[5].mxu0  ;;  %v962_v28 = vmul.f32 %v12449_v59, %v837_v43 }
 0x101   : > { %v841_v49 = vpop.f32.mrb[6].mxu0  ;;  %v963_v32 = vmul.f32 %v12459_v63, %v839_v46 }
 0x102   : > { %v843_v51 = vpop.f32.mrb[7].mxu0  ;;  %v964_v36 = vmul.f32 %v12449_v59, %v841_v49  ;;  %v1022_v44 = vadd.f32 %v12469_v5, %v962_v28 }
 0x103   : > { %v965_v40 = vmul.f32 %v12459_v63, %v843_v51  ;;  %v1023_v50 = vadd.f32 %v12472_v7, %v963_v32 }
 0x104   : > { %v1024_v51 = vadd.f32 %v12469_v5, %v964_v36  ;;  %v1070_v3 = vmax.f32 %v1022_v44, 0.0 }
 0x105   : > { %v1025_v58 = vadd.f32 %v12472_v7, %v965_v40  ;;  %v1071_v9 = vmax.f32 %v1023_v50, 0.0 }
 0x107   : > { %v12444_v57 = vpop.f32.mrb[8].mxu0 }
 0x108   : > { %v12451_v60 = vpop.f32.mrb[9].mxu0  ;;  %v966_v4 = vmul.f32 %v12449_v59, %v12444_v57 }
 0x109   : > { %v12461_v0 = vpop.f32.mrb[10].mxu0 }
 0x10a   : > { %v12463_v1 = vpop.f32.mrb[11].mxu0 }
 0x10b   : > { %v969_v57 = vmul.f32 %v12459_v63, %v12463_v1 }
 0x10d   : > { %v1029_v32 = vadd.f32 %v12472_v7, %v969_v57 }
 0x10f   : > { %v857_v10 = vpop.f32.mrb[12].mxu0 }
 0x110   : > { %v970_v13 = vmul.f32 %v12449_v59, %v857_v10  ;;  %v859_v14 = vpop.f32.mrb[13].mxu0  ;;  %v967_v10 = vmul.f32 %v12459_v63, %v12451_v60  ;;  %v1026_v60 = vadd.f32 %v12469_v5, %v966_v4 }
 0x111   : > { %v971_v16 = vmul.f32 %v12459_v63, %v859_v14  ;;  %v861_v17 = vpop.f32.mrb[14].mxu0  ;;  %v968_v14 = vmul.f32 %v12449_v59, %v12461_v0 }
 0x112   : > { %v1030_v19 = vadd.f32 %v12469_v5, %v970_v13  ;;  %v972_v20 = vmul.f32 %v12449_v59, %v861_v17  ;;  %v863_v22 = vpop.f32.mrb[15].mxu0  ;;  %v1072_v13 = vmax.f32 %v1024_v51, 0.0  ;;  %v1073_v17 = vmax.f32 %v1025_v58, 0.0 }
 0x113   : > { %v1031_v24 = vadd.f32 %v12472_v7, %v971_v16  ;;  %v973_v25 = vmul.f32 %v12459_v63, %v863_v22  ;;  %v1027_v0 = vadd.f32 %v12472_v7, %v967_v10  ;;  %v1028_v1 = vadd.f32 %v12469_v5, %v968_v14 }
 0x114   : > { %v1078_v29 = vmax.f32 %v1030_v19, 0.0  ;;  %v1032_v30 = vadd.f32 %v12469_v5, %v972_v20  ;;  %v12098_v10 = vmov 1935823168  }
 0x115   : > { %v1079_v33 = vmax.f32 %v1031_v24, 0.0  ;;  %v1033_v34 = vadd.f32 %v12472_v7, %v973_v25 }
 0x116   : > { %v12494_v37 = vmax.f32 %v1066_v27, %v1078_v29  ;;  %v1080_v38 = vmax.f32 %v1032_v30, 0.0 }
 0x117   : > { %v12497_v41 = vmax.f32 %v1067_v31, %v1079_v33  ;;  %v1081_v42 = vmax.f32 %v1033_v34, 0.0  ;;  %v867_v43 = vpop.f32.mrb[16].mxu0 }
 0x118   : > { %v12500_v47 = vmax.f32 %v1068_v35, %v1080_v38  ;;  %v974_v46 = vmul.f32 %v12449_v59, %v867_v43  ;;  %v869_v48 = vpop.f32.mrb[17].mxu0  ;;  %v1074_v35 = vmax.f32 %v1026_v60, 0.0  ;;  %v1076_v43 = vmax.f32 %v1028_v1, 0.0 }
 0x119   : > { %v12504_v49 = vmax.f32 %v1069_v39, %v1081_v42  ;;  %v975_v52 = vmul.f32 %v12459_v63, %v869_v48  ;;  %v871_v53 = vpop.f32.mrb[18].mxu0  ;;  %v1075_v39 = vmax.f32 %v1027_v0, 0.0  ;;  %v1077_v48 = vmax.f32 %v1029_v32, 0.0 }
 0x11a   : > { %v1034_v54 = vadd.f32 %v12469_v5, %v974_v46  ;;  %v976_v55 = vmul.f32 %v12449_v59, %v871_v53  ;;  %v873_v56 = vpop.f32.mrb[19].mxu0 }
 0x11b   : > { %v1035_v61 = vadd.f32 %v12472_v7, %v975_v52  ;;  %v977_v62 = vmul.f32 %v12459_v63, %v873_v56 }
 0x11c   : > { %v1082_v6 = vmax.f32 %v1034_v54, 0.0  ;;  %v1036_v8 = vadd.f32 %v12469_v5, %v976_v55 }
 0x11d   : > { %v1083_v11 = vmax.f32 %v1035_v61, 0.0  ;;  %v1037_v12 = vadd.f32 %v12472_v7, %v977_v62 }
 0x11e   : > { %v12521_v15 = vmax.f32 %v1070_v3, %v1082_v6  ;;  %v1084_v16 = vmax.f32 %v1036_v8, 0.0  ;;  %v10282_v6 = vld.sshfl [vmem:[#allocation2] sm:$0x33 pattern:$0x75316420] }
 0x11f   : > { %v12525_v18 = vmax.f32 %v1071_v9, %v1083_v11  ;;  %v1085_v19 = vmax.f32 %v1037_v12, 0.0  ;;  %v877_v20 = vpop.f32.mrb[20].mxu0  ;;  %v12097_v8 = vmov 1966171168   ;;  %v1382_v11 = vunpack.c.l.s4 %v12098_v10 }
 0x120   : > { %v12528_v22 = vmax.f32 %v1072_v13, %v1084_v16  ;;  %v978_v23 = vmul.f32 %v12449_v59, %v877_v20  ;;  %v879_v24 = vpop.f32.mrb[21].mxu0  ;;  %v1252_v9 = vunpack.c.l.s4 %v12097_v8  ;;  %v2258_v16 = vcombine.high %v10282_v6, %v10282_v6 }
 0x121   : > { %v12532_v25 = vmax.f32 %v1073_v17, %v1085_v19  ;;  %v979_v27 = vmul.f32 %v12459_v63, %v879_v24  ;;  %v881_v28 = vpop.f32.mrb[22].mxu0  ;;  %v1383_v0 = vunpack.c.0.s8 %v1382_v11  ;;  %v2315_v1 = vshrl.u32 %v10282_v6, 16 }
 0x122   : > { %v1038_v29 = vadd.f32 %v12469_v5, %v978_v23  ;;  %v980_v30 = vmul.f32 %v12449_v59, %v881_v28  ;;  %v883_v31 = vpop.f32.mrb[23].mxu0  ;;  %v1253_v23 = vunpack.c.0.s8 %v1252_v9 }
 0x123   : > { %v1039_v33 = vadd.f32 %v12472_v7, %v979_v27  ;;  %v981_v34 = vmul.f32 %v12459_v63, %v883_v31 }
 0x124   : > { %v1086_v36 = vmax.f32 %v1038_v29, 0.0  ;;  %v1040_v38 = vadd.f32 %v12469_v5, %v980_v30  ;;  %v2320_v29 = vshll.u32 %v2258_v16, 16 }
 0x125   : > { %v1087_v40 = vmax.f32 %v1039_v33, 0.0  ;;  %v1041_v42 = vadd.f32 %v12472_v7, %v981_v34 }
 0x126   : > { %v12543_v44 = vmax.f32 %v1074_v35, %v1086_v36  ;;  %v1088_v46 = vmax.f32 %v1040_v38, 0.0  ;;  %v12567_v36 = vsub.s32 %v1253_v23, %v12422_v45  ;;  %v12570_v38 = vsub.s32 %v1383_v0, %v12422_v45 }
 0x127   : > { %v12545_v50 = vmax.f32 %v1075_v39, %v1087_v40  ;;  %v1089_v52 = vmax.f32 %v1041_v42, 0.0  ;;  %v887_v53 = vpop.f32.mrb[24].mxu0 }
 0x128   : > { %v12547_v51 = vmax.f32 %v1076_v43, %v1088_v46  ;;  %v889_v54 = vpop.f32.mrb[25].mxu0  ;;  %v982_v12 = vmul.f32 %v12449_v59, %v887_v53  ;;  %15109 = vst [vmem:[#allocation6_spill] sm:$0xff] %v12570_v38 }
 0x129   : > { %v12549_v55 = vmax.f32 %v1077_v48, %v1089_v52  ;;  %v891_v56 = vpop.f32.mrb[26].mxu0  ;;  %v983_v13 = vmul.f32 %v12459_v63, %v889_v54  ;;  %v12579_v48 = vsel %vm12572_vm11, %v2315_v1, %v2320_v29 }
 0x12a   : > { %v893_v58 = vpop.f32.mrb[27].mxu0  ;;  %v984_v17 = vmul.f32 %v12449_v59, %v891_v56  ;;  %v1042_v27 = vadd.f32 %v12469_v5, %v982_v12 }
 0x12b   : > { %v985_v57 = vmul.f32 %v12459_v63, %v893_v58  ;;  %v1043_v28 = vadd.f32 %v12472_v7, %v983_v13  ;;  %v1244_v58 = vld [vmem:[#allocation2 + $0x6c] sm:$0xf] }
 0x12c   : > { %v1044_v30 = vadd.f32 %v12469_v5, %v984_v17  ;;  %v1090_v40 = vmax.f32 %v1042_v27, 0.0  ;;  %v1245_v6 = vsel %vm12291_vm7, 0, %v1244_v58 }
 0x12d   : > { %v1045_v31 = vadd.f32 %v12472_v7, %v985_v57  ;;  %v1091_v42 = vmax.f32 %v1043_v28, 0.0  ;;  %1246 = vst [vmem:[#allocation2 + $0x6c] sm:$0xf] %v1245_v6 }
 0x12e   : > { %v1092_v52 = vmax.f32 %v1044_v30, 0.0  ;;  %v10370_v57 = vld.sshfl [vmem:[#allocation2 + $0x1c] sm:$0x33 pattern:$0x75316420] }
 0x12f   : > { %v897_v61 = vpop.f32.mrb[28].mxu0  ;;  %v1093_v53 = vmax.f32 %v1045_v31, 0.0 }
 0x130   : > { %v899_v62 = vpop.f32.mrb[29].mxu0  ;;  %v986_v60 = vmul.f32 %v12449_v59, %v897_v61 }
 0x131   : > { %v901_v3 = vpop.f32.mrb[30].mxu0  ;;  %v987_v32 = vmul.f32 %v12459_v63, %v899_v62 }
 0x132   : > { %v903_v4 = vpop.f32.mrb[31].mxu0  ;;  %v988_v33 = vmul.f32 %v12449_v59, %v901_v3  ;;  %v12564_v35 = vadd.f32 %v12469_v5, %v986_v60 }
 0x133   : > { %v989_v34 = vmul.f32 %v12459_v63, %v903_v4  ;;  %v12582_v54 = vadd.f32 %v12472_v7, %v987_v32  ;;  %v3044_v32 = vcombine.high %v10370_v57, %v10370_v57 }
 0x134   : > { %v12586_v61 = vadd.f32 %v12469_v5, %v988_v33  ;;  %v1094_v8 = vmax.f32 %v12564_v35, 0.0 }
 0x135   : > { %v12589_v62 = vadd.f32 %v12472_v7, %v989_v34  ;;  %v1095_v60 = vmax.f32 %v12582_v54, 0.0 }
 0x136   : > { %v1096_v27 = vmax.f32 %v12586_v61, 0.0 }
 0x137   : > { %v907_v14 = vpop.f32.mrb[32].mxu0  ;;  %v1097_v28 = vmax.f32 %v12589_v62, 0.0 }
 0x138   : > { %v909_v19 = vpop.f32.mrb[33].mxu0  ;;  %v990_v43 = vmul.f32 %v12449_v59, %v907_v14 }
 0x139   : > { %v911_v20 = vpop.f32.mrb[34].mxu0  ;;  %v991_v9 = vmul.f32 %v12459_v63, %v909_v19 }
 0x13a   : > { %v913_v24 = vpop.f32.mrb[35].mxu0  ;;  %v12599_v13 = vadd.f32 %v12469_v5, %v990_v43  ;;  %v992_v14 = vmul.f32 %v12449_v59, %v911_v20 }
 0x13b   : > { %v993_v19 = vmul.f32 %v12459_v63, %v913_v24  ;;  %v12611_v20 = vadd.f32 %v12472_v7, %v991_v9 }
 0x13c   : > { %v1098_v33 = vmax.f32 %v12599_v13, 0.0  ;;  %v12615_v24 = vadd.f32 %v12469_v5, %v992_v14 }
 0x13e   : > { %v1100_v14 = vmax.f32 %v12615_v24, 0.0 }
 0x13f   : > { %v917_v46 = vpop.f32.mrb[36].mxu0 }
 0x140   : > { %v994_v45 = vmul.f32 %v12449_v59, %v917_v46  ;;  %v919_v56 = vpop.f32.mrb[37].mxu0  ;;  %v12618_v46 = vadd.f32 %v12472_v7, %v993_v19 }
 0x141   : > { %v995_v3 = vmul.f32 %v12459_v63, %v919_v56  ;;  %v921_v4 = vpop.f32.mrb[38].mxu0 }
 0x142   : > { %v1054_v10 = vadd.f32 %v12469_v5, %v994_v45  ;;  %v996_v11 = vmul.f32 %v12449_v59, %v921_v4  ;;  %v923_v12 = vpop.f32.mrb[39].mxu0 }
 0x143   : > { %v1055_v16 = vadd.f32 %v12472_v7, %v995_v3  ;;  %v997_v17 = vmul.f32 %v12459_v63, %v923_v12 }
 0x144   : > { %v1102_v23 = vmax.f32 %v1054_v10, 0.0  ;;  %v1056_v0 = vadd.f32 %v12469_v5, %v996_v11 }
 0x145   : > { %v1103_v1 = vmax.f32 %v1055_v16, 0.0  ;;  %v1057_v29 = vadd.f32 %v12472_v7, %v997_v17 }
 0x146   : > { %v1126_v30 = vmax.f32 %v1090_v40, %v1102_v23  ;;  %v1104_v31 = vmax.f32 %v1056_v0, 0.0  ;;  %v1101_v0 = vmax.f32 %v12618_v46, 0.0 }
 0x147   : > { %v1127_v34 = vmax.f32 %v1091_v42, %v1103_v1  ;;  %v1105_v35 = vmax.f32 %v1057_v29, 0.0  ;;  %v927_v43 = vpop.f32.mrb[40].mxu0  ;;  %v3086_v42 = vshrl.u32 %v10370_v57, 16 }
 0x148   : > { %v12621_v54 = vmax.f32 %v12494_v37, %v1126_v30  ;;  %v1128_v45 = vmax.f32 %v1092_v52, %v1104_v31  ;;  %v998_v56 = vmul.f32 %v12449_v59, %v927_v43  ;;  %v929_v40 = vpop.f32.mrb[41].mxu0  ;;  %v3091_v52 = vshll.u32 %v3044_v32, 16 }
 0x149   : > { %v12625_v58 = vmax.f32 %v12497_v41, %v1127_v34  ;;  %v1129_v61 = vmax.f32 %v1093_v53, %v1105_v35  ;;  %v999_v3 = vmul.f32 %v12459_v63, %v929_v40  ;;  %v931_v4 = vpop.f32.mrb[42].mxu0 }
 0x14a   : > { %15112 = vst [vmem:[#allocation7_spill] sm:$0xff] %v12621_v54  ;;  %v12629_v6 = vmax.f32 %v12500_v47, %v1128_v45  ;;  %v1058_v9 = vadd.f32 %v12469_v5, %v998_v56  ;;  %v1000_v37 = vmul.f32 %v12449_v59, %v931_v4  ;;  %v933_v10 = vpop.f32.mrb[43].mxu0  ;;  %v1099_v47 = vmax.f32 %v12611_v20, 0.0 }
 0x14b   : > { %15113 = vst [vmem:[#allocation8_spill] sm:$0xff] %v12625_v58  ;;  %v10240_v11 = vpack.c.bf16 %v12625_v58, %v12621_v54  ;;  %v12636_v41 = vmax.f32 %v12504_v49, %v1129_v61  ;;  %v1059_v53 = vadd.f32 %v12472_v7, %v999_v3  ;;  %v1001_v12 = vmul.f32 %v12459_v63, %v933_v10 }
 0x14c   : > { %15114 = vst [vmem:[#allocation9_spill] sm:$0xff] %v12629_v6  ;;  %v1106_v16 = vmax.f32 %v1058_v9, 0.0  ;;  %v1060_v17 = vadd.f32 %v12469_v5, %v1000_v37  ;;  %v12650_v30 = vsel %vm12572_vm11, %v3086_v42, %v3091_v52 }
 0x14d   : > { %15115 = vst [vmem:[#allocation10_spill] sm:$0xff] %v12636_v41  ;;  %v1257_v57 = vrot.slane %v10240_v11, %v12567_v36  ;;  %v10241_v19 = vpack.c.bf16 %v12636_v41, %v12629_v6  ;;  %v1107_v49 = vmax.f32 %v1059_v53, 0.0  ;;  %v1061_v23 = vadd.f32 %v12472_v7, %v1001_v12  ;;  %15116 = vst [vmem:[#allocation11_spill] sm:$0xff] %v12650_v30  ;;  %v11808_v41 = vld [vmem:[%s15047_s5 + $0x2a8] sm:$0xff]  }
 0x14e   : > { %v1130_v1 = vmax.f32 %v1094_v8, %v1106_v16  ;;  %v1108_v29 = vmax.f32 %v1060_v17, 0.0 }
 0x14f   : > { %v1265_v31 = vcombine.high %v1257_v57, %v1257_v57  ;;  %v1273_v32 = vrot.slane %v1257_v57, %v12567_v36  ;;  %v1264_v34 = vrot.slane %v10241_v19, %v12567_v36  ;;  %v1131_v35 = vmax.f32 %v1095_v60, %v1107_v49  ;;  %v937_v43 = vpop.f32.mrb[44].mxu0 }
 0x150   : > { %v12655_v45 = vmax.f32 %v12521_v15, %v1130_v1  ;;  %v1132_v56 = vmax.f32 %v1096_v27, %v1108_v29  ;;  %v1109_v40 = vmax.f32 %v1061_v23, 0.0  ;;  %v1002_v61 = vmul.f32 %v12449_v59, %v937_v43  ;;  %v939_v8 = vpop.f32.mrb[45].mxu0  ;;  %v1483_v23 = vld [vmem:[#allocation2 + $0x40] sm:$0xf] }
 0x151   : > { %v1287_v3 = vrot.slane %v1265_v31, %v12567_v36  ;;  %v1295_v4 = vcombine.high %v1273_v32, %v1273_v32  ;;  %10242 = vst.sshfl [vmem:[#allocation2 + $0x54] sm:$0x3 pattern:$0x75316420] %v1273_v32  ;;  %v1266_v42 = vcombine.high %v1264_v34, %v1264_v34  ;;  %v1280_v9 = vrot.slane %v1264_v34, %v12567_v36  ;;  %v941_v37 = vpop.f32.mrb[46].mxu0 }
 0x152   : > { %15117 = vst [vmem:[#allocation12_spill] sm:$0xff] %v12655_v45  ;;  %v12661_v10 = vmax.f32 %v12525_v18, %v1131_v35  ;;  %v12664_v60 = vmax.f32 %v12528_v22, %v1132_v56  ;;  %v1133_v15 = vmax.f32 %v1097_v28, %v1109_v40  ;;  %v1062_v27 = vadd.f32 %v12469_v5, %v1002_v61  ;;  %v943_v52 = vpop.f32.mrb[47].mxu0 }
 0x153   : > { %v1296_v11 = vcombine.high %v1287_v3, %v1287_v3  ;;  %10243 = vst.sshfl [vmem:[#allocation2 + $0x58] sm:$0x3 pattern:$0x75316420] %v1287_v3  ;;  %v1294_v53 = vrot.slane %v1266_v42, %v12567_v36  ;;  %v1354_v12 = vcombine.high %v1280_v9, %v1280_v9  ;;  %v1003_v16 = vmul.f32 %v12459_v63, %v939_v8  ;;  %v1477_v3 = vld [vmem:[#allocation2 + $0x38] sm:$0xf] }
 0x154   : > { %15118 = vst [vmem:[#allocation13_spill] sm:$0xff] %v12661_v10  ;;  %15119 = vst [vmem:[#allocation14_spill] sm:$0xff] %v12664_v60  ;;  %v10248_v18 = vpack.c.bf16 %v12661_v10, %v12655_v45  ;;  %v12674_v22 = vmax.f32 %v12532_v25, %v1133_v15  ;;  %v1110_v62 = vmax.f32 %v1062_v27, 0.0  ;;  %v1004_v28 = vmul.f32 %v12449_v59, %v941_v37  ;;  %v11807_v10 = vld [vmem:[%s15047_s5 + $0x2e8] sm:$0xff]  }
 0x155   : > { %10244 = vst.sshfl [vmem:[#allocation2 + $0x5c] sm:$0x3 pattern:$0x75316420] %v1295_v4  ;;  %v1355_v17 = vcombine.high %v1294_v53, %v1294_v53  ;;  %v1387_v57 = vrot.slane %v1354_v12, %v12570_v38  ;;  %v1063_v19 = vadd.f32 %v12472_v7, %v1003_v16  ;;  %v12680_v49 = vmul.f32 %v12459_v63, %v943_v52 }
 0x156   : > { %10246 = vst.sshfl [vmem:[#allocation2 + $0x64] sm:$0x3 pattern:$0x75316420] %v1280_v9  ;;  %15120 = vst [vmem:[#allocation15_spill] sm:$0xff] %v12674_v22  ;;  %v1363_v25 = vrot.slane %v10248_v18, %v12567_v36  ;;  %v10249_v59 = vpack.c.bf16 %v12674_v22, %v12664_v60  ;;  %v1134_v1 = vmax.f32 %v1098_v33, %v1110_v62  ;;  %v11801_v22 = vld [vmem:[%s15047_s5 + $0x48] sm:$0xff]  }
 0x157   : > { %10245 = vst.sshfl [vmem:[#allocation2 + $0x60] sm:$0x3 pattern:$0x75316420] %v1296_v11  ;;  %v12694_v29 = vadd.f32 %v12469_v5, %v1004_v28  ;;  %v1394_v63 = vrot.slane %v1355_v17, %v12570_v38  ;;  %v1424_v31 = vshrl.u32 %v1387_v57, 16  ;;  %v1427_v32 = vshll.u32 %v1387_v57, 16 }
 0x158   : > { %10247 = vst.sshfl [vmem:[#allocation2 + $0x68] sm:$0x3 pattern:$0x75316420] %v1294_v53  ;;  %v1111_v34 = vmax.f32 %v1063_v19, 0.0  ;;  %v1364_v35 = vcombine.high %v1363_v25, %v1363_v25  ;;  %v1371_v43 = vrot.slane %v1363_v25, %v12567_v36  ;;  %v1504_v56 = vrot.slane %v10249_v59, %v12567_v36 }
 0x159   : > { %v12702_v40 = vmax.f32 %v12543_v44, %v1134_v1  ;;  %v1426_v13 = vrot.slane %v1424_v31, 7  ;;  %v1431_v33 = vshrl.u32 %v1394_v63, 16  ;;  %v1434_v5 = vshll.u32 %v1394_v63, 16  ;;  %v1486_v63 = vld [vmem:[#allocation2 + $0x44] sm:$0xf] }
 0x15a   : > { %v1135_v61 = vmax.f32 %v1099_v47, %v1111_v34  ;;  %v1378_v4 = vrot.slane %v1364_v35, %v12567_v36  ;;  %v1379_v42 = vcombine.high %v1371_v43, %v1371_v43  ;;  %v1401_v9 = vrot.slane %v1371_v43, %v12570_v38  ;;  %v1480_v47 = vld [vmem:[#allocation2 + $0x3c] sm:$0xf] }
 0x15b   : > { %15123 = vst [vmem:[#allocation16_spill] sm:$0xff] %v12702_v40  ;;  %v1505_v44 = vcombine.high %v1504_v56, %v1504_v56  ;;  %v1429_v37 = vor.u32 %v1427_v32, %v1426_v13  ;;  %v1433_v15 = vrot.slane %v1431_v33, 7  ;;  %v1512_v27 = vrot.slane %v1504_v56, %v12567_v36  ;;  %v10277_v32 = vld.sshfl [vmem:[#allocation2 + $0x58] sm:$0x3 pattern:$0x75316420] }
 0x15c   : > { %v12716_v20 = vmax.f32 %v12545_v50, %v1135_v61  ;;  %v1380_v52 = vcombine.high %v1378_v4, %v1378_v4  ;;  %v1408_v11 = vrot.slane %v1378_v4, %v12570_v38  ;;  %v1415_v53 = vrot.slane %v1379_v42, %v12570_v38  ;;  %v1489_v13 = vld [vmem:[#allocation2 + $0x48] sm:$0xf]  ;;  %v10276_v33 = vld.sshfl [vmem:[#allocation2 + $0x54] sm:$0x3 pattern:$0x75316420] }
 0x15d   : > { %v1438_v12 = vshrl.u32 %v1401_v9, 16  ;;  %v1436_v16 = vor.u32 %v1434_v5, %v1433_v15  ;;  %v1478_v18 = vsel %vm12708_vm1, %v1429_v37, %v1477_v3  ;;  %v1441_v62 = vshll.u32 %v1401_v9, 16  ;;  %10251 = vst.sshfl [vmem:[#allocation2 + $0x20] sm:$0x3 pattern:$0x75316420] %v1512_v27 }
 0x15e   : > { %15126 = vst [vmem:[#allocation17_spill] sm:$0xff] %v12716_v20  ;;  %v1519_v28 = vrot.slane %v1505_v44, %v12567_v36  ;;  %1479 = vst [vmem:[#allocation2 + $0x38] sm:$0xf] %v1478_v18  ;;  %v1422_v17 = vrot.slane %v1380_v52, %v12570_v38  ;;  %v1445_v57 = vshrl.u32 %v1408_v11, 16  ;;  %v1448_v19 = vshll.u32 %v1408_v11, 16 }
 0x15f   : > { %v1440_v50 = vrot.slane %v1438_v12, 7  ;;  %v1481_v25 = vsel %vm12708_vm1, %v1436_v16, %v1480_v47  ;;  %v1452_v59 = vshrl.u32 %v1415_v53, 16  ;;  %v1455_v1 = vshll.u32 %v1415_v53, 16  ;;  %v1492_v11 = vld [vmem:[#allocation2 + $0x4c] sm:$0xf] }
 0x160   : > { %v1520_v31 = vcombine.high %v1512_v27, %v1512_v27  ;;  %10252 = vst.sshfl [vmem:[#allocation2 + $0x24] sm:$0x3 pattern:$0x75316420] %v1519_v28  ;;  %1482 = vst [vmem:[#allocation2 + $0x3c] sm:$0xf] %v1481_v25  ;;  %v1521_v61 = vcombine.high %v1519_v28, %v1519_v28  ;;  %v10250_v3 = vpack.c.bf16 %v12716_v20, %v12702_v40 }
 0x161   : > { %v1443_v34 = vor.u32 %v1441_v62, %v1440_v50  ;;  %v1447_v35 = vrot.slane %v1445_v57, 7  ;;  %v1459_v43 = vshrl.u32 %v1422_v17, 16  ;;  %v1462_v56 = vshll.u32 %v1422_v17, 16 }
 0x162   : > { %v1454_v5 = vrot.slane %v1452_v59, 7  ;;  %10253 = vst.sshfl [vmem:[#allocation2 + $0x28] sm:$0x3 pattern:$0x75316420] %v1520_v31  ;;  %v1112_v4 = vmax.f32 %v12694_v29, 0.0  ;;  %v1065_v15 = vadd.f32 %v12472_v7, %v12680_v49  ;;  %v1529_v53 = vrot.slane %v10250_v3, %v12567_v36 }
 0x163   : > { %v10279_v42 = vld.sshfl [vmem:[#allocation2 + $0x60] sm:$0x3 pattern:$0x75316420]  ;;  %v1450_v9 = vor.u32 %v1448_v19, %v1447_v35  ;;  %v1461_v44 = vrot.slane %v1459_v43, 7  ;;  %v1484_v37 = vsel %vm12708_vm1, %v1443_v34, %v1483_v23  ;;  %v2124_v12 = vcombine.low %v10276_v33, %v10277_v32 }
 0x164   : > { %v10278_v27 = vld.sshfl [vmem:[#allocation2 + $0x5c] sm:$0x3 pattern:$0x75316420]  ;;  %v1457_v52 = vor.u32 %v1455_v1, %v1454_v5  ;;  %1485 = vst [vmem:[#allocation2 + $0x40] sm:$0xf] %v1484_v37  ;;  %v1136_v29 = vmax.f32 %v1100_v14, %v1112_v4  ;;  %v1530_v50 = vcombine.high %v1529_v53, %v1529_v53  ;;  %v1537_v57 = vrot.slane %v1529_v53, %v12567_v36 }
 0x165   : > { %v10264_v47 = vld.sshfl [vmem:[#allocation2 + $0x1c] sm:$0x3 pattern:$0x75316420]  ;;  %v1464_v18 = vor.u32 %v1462_v56, %v1461_v44  ;;  %v1487_v62 = vsel %vm12708_vm1, %v1450_v9, %v1486_v63  ;;  %v1113_v28 = vmax.f32 %v1065_v15, 0.0  ;;  %v2125_v17 = vcombine.low %v10278_v27, %v10279_v42 }
 0x166   : > { %10254 = vst.sshfl [vmem:[#allocation2 + $0x2c] sm:$0x3 pattern:$0x75316420] %v1521_v61  ;;  %1488 = vst [vmem:[#allocation2 + $0x44] sm:$0xf] %v1487_v62  ;;  %v1490_v49 = vsel %vm12708_vm1, %v1457_v52, %v1489_v13  ;;  %v12744_v24 = vmax.f32 %v12547_v51, %v1136_v29  ;;  %v12751_v59 = vrot.slane %v2124_v12, %v12567_v36 }
 0x167   : > { %v10281_v16 = vld.sshfl [vmem:[#allocation2 + $0x68] sm:$0x3 pattern:$0x75316420]  ;;  %1491 = vst [vmem:[#allocation2 + $0x48] sm:$0xf] %v1490_v49  ;;  %v1493_v19 = vsel %vm12708_vm1, %v1464_v18, %v1492_v11  ;;  %v1137_v23 = vmax.f32 %v1101_v0, %v1113_v28  ;;  %v1544_v63 = vrot.slane %v1530_v50, %v12567_v36  ;;  %v1623_v31 = vcombine.high %v1537_v57, %v1537_v57 }
 0x168   : > { %v12738_v7 = vld.sshfl [vmem:[#allocation2 + $0x20] sm:$0x3 pattern:$0x75316420]  ;;  %15127 = vst [vmem:[#allocation18_spill] sm:$0xff] %v12744_v24  ;;  %v12755_v32 = vrot.slane %v2125_v17, %v12567_v36  ;;  %v12763_v0 = vrot.slane %v12751_v59, %v12567_v36  ;;  %v2148_v43 = vcombine.low %v12751_v59, %v12751_v59 }
 0x169   : > { %v10280_v14 = vld.sshfl [vmem:[#allocation2 + $0x64] sm:$0x3 pattern:$0x75316420]  ;;  %1494 = vst [vmem:[#allocation2 + $0x4c] sm:$0xf] %v1493_v19  ;;  %v2010_v34 = vcombine.low %v10264_v47, %v12738_v7  ;;  %v12759_v35 = vmax.f32 %v12549_v55, %v1137_v23  ;;  %v1625_v13 = vcombine.high %v1544_v63, %v1544_v63  ;;  %v1633_v33 = vrot.slane %v1623_v31, %v12570_v38 }
 0x16a   : > { %v10270_v25 = vld.sshfl [vmem:[#allocation2 + $0x38] sm:$0x3 pattern:$0x75316420]  ;;  %v2126_v1 = vcombine.low %v10280_v14, %v10281_v16  ;;  %v3760_v42 = vcombine.low %v12763_v0, %v12763_v0  ;;  %v12784_v9 = vrot.slane %v2148_v43, %v12567_v36  ;;  %v1718_v17 = vld [vmem:[#allocation2 + $0x4] sm:$0xf] }
 0x16b   : > { %10255 = vst.sshfl [vmem:[#allocation2 + $0x30] sm:$0x3 pattern:$0x75316420] %v1537_v57  ;;  %15128 = vst [vmem:[#allocation19_spill] sm:$0xff] %v12759_v35  ;;  %v12776_v55 = vrot.slane %v2010_v34, %v12567_v36  ;;  %v10257_v3 = vpack.c.bf16 %v12759_v35, %v12744_v24  ;;  %v1640_v44 = vrot.slane %v1625_v13, %v12570_v38  ;;  %v1670_v37 = vshrl.u32 %v1633_v33, 16 }
 0x16c   : > { %v10271_v51 = vld.sshfl [vmem:[#allocation2 + $0x3c] sm:$0x3 pattern:$0x75316420]  ;;  %v12771_v5 = vrot.slane %v2126_v1, %v12567_v36  ;;  %v1673_v15 = vshll.u32 %v1633_v33, 16  ;;  %v3759_v53 = vcombine.low %v12784_v9, %v12784_v9 }
 0x16d   : > { %v2067_v46 = vcombine.low %v10270_v25, %v10271_v51  ;;  %v12767_v56 = vld.sshfl [vmem:[#allocation2 + $0x24] sm:$0x3 pattern:$0x75316420]  ;;  %v1607_v52 = vrot.slane %v10257_v3, %v12567_v36  ;;  %v1672_v16 = vrot.slane %v1670_v37, 7  ;;  %v1677_v18 = vshrl.u32 %v1640_v44, 16 }
 0x16e   : > { %10256 = vst.sshfl [vmem:[#allocation2 + $0x34] sm:$0x3 pattern:$0x75316420] %v1544_v63  ;;  %v2150_v47 = vcombine.high %v12755_v32, %v12771_v5  ;;  %v2149_v12 = vcombine.low %v12755_v32, %v12771_v5  ;;  %v1680_v62 = vshll.u32 %v1640_v44, 16 }
 0x16f   : > { %v12773_v61 = vld.sshfl [vmem:[#allocation2 + $0x28] sm:$0x3 pattern:$0x75316420]  ;;  %v2075_v4 = vrot.slane %v2067_v46, %v12567_v36  ;;  %v1608_v49 = vcombine.high %v1607_v52, %v1607_v52  ;;  %v1615_v50 = vrot.slane %v1607_v52, %v12567_v36  ;;  %v1675_v23 = vor.u32 %v1673_v15, %v1672_v16 }
 0x170   : > { %v10272_v27 = vld.sshfl [vmem:[#allocation2 + $0x40] sm:$0x3 pattern:$0x75316420]  ;;  %v2035_v29 = vcombine.low %v12767_v56, %v12773_v61  ;;  %v12798_v14 = vrot.slane %v2150_v47, %v12567_v36  ;;  %v1679_v25 = vrot.slane %v1677_v18, 7  ;;  %v12805_v31 = vrot.slane %v2149_v12, %v12567_v36 }
 0x171   : > { %v10273_v11 = vld.sshfl [vmem:[#allocation2 + $0x44] sm:$0x3 pattern:$0x75316420]  ;;  %v1721_v51 = vld [vmem:[#allocation2 + $0x8] sm:$0xf]  ;;  %v1622_v34 = vrot.slane %v1608_v49, %v12567_v36  ;;  %v1624_v46 = vcombine.high %v1615_v50, %v1615_v50  ;;  %v1647_v43 = vrot.slane %v1615_v50, %v12570_v38  ;;  %v1719_v3 = vsel %vm12708_vm1, %v1675_v23, %v1718_v17 }
 0x172   : > { %v2068_v28 = vcombine.low %v10272_v27, %v10273_v11  ;;  %v10274_v57 = vld.sshfl [vmem:[#allocation2 + $0x48] sm:$0x3 pattern:$0x75316420]  ;;  %v12801_v19 = vrot.slane %v2035_v29, %v12567_v36  ;;  %v1682_v33 = vor.u32 %v1680_v62, %v1679_v25  ;;  %1720 = vst [vmem:[#allocation2 + $0x4] sm:$0xf] %v1719_v3 }
 0x173   : > { %v10275_v1 = vld.sshfl [vmem:[#allocation2 + $0x4c] sm:$0x3 pattern:$0x75316420]  ;;  %v1626_v15 = vcombine.high %v1622_v34, %v1622_v34  ;;  %v1654_v27 = vrot.slane %v1622_v34, %v12570_v38  ;;  %v1661_v47 = vrot.slane %v1624_v46, %v12570_v38  ;;  %v1684_v52 = vshrl.u32 %v1647_v43, 16 }
 0x174   : > { %v2082_v63 = vrot.slane %v2068_v28, %v12567_v36  ;;  %v2101_v13 = vcombine.low %v10274_v57, %v10275_v1  ;;  %v1722_v11 = vsel %vm12708_vm1, %v1682_v33, %v1721_v51  ;;  %v1687_v29 = vshll.u32 %v1647_v43, 16  ;;  %v12819_v18 = vld.sshfl [vmem:[#allocation2 + $0x30] sm:$0x3 pattern:$0x75316420] }
 0x175   : > { %1723 = vst [vmem:[#allocation2 + $0x8] sm:$0xf] %v1722_v11  ;;  %v1686_v62 = vrot.slane %v1684_v52, 7  ;;  %v1691_v28 = vshrl.u32 %v1654_v27, 16  ;;  %v1694_v17 = vshll.u32 %v1654_v27, 16  ;;  %v1698_v50 = vshrl.u32 %v1661_v47, 16 }
 0x176   : > { %v2084_v44 = vcombine.high %v2075_v4, %v2082_v63  ;;  %v2083_v37 = vcombine.low %v2075_v4, %v2082_v63  ;;  %v2108_v16 = vrot.slane %v2101_v13, %v12567_v36  ;;  %v1668_v4 = vrot.slane %v1626_v15, %v12570_v38  ;;  %v1724_v49 = vld [vmem:[#allocation2 + $0xc] sm:$0xf]  ;;  %v1727_v13 = vld [vmem:[#allocation2 + $0x10] sm:$0xf]  ;;  %v1730_v33 = vld [vmem:[#allocation2 + $0x14] sm:$0xf] }
 0x177   : > { %v1701_v57 = vshll.u32 %v1661_v47, 16  ;;  %v10268_v1 = vld.sshfl [vmem:[#allocation2 + $0x2c] sm:$0x3 pattern:$0x75316420]  ;;  %v1689_v63 = vor.u32 %v1687_v29, %v1686_v62  ;;  %v1693_v51 = vrot.slane %v1691_v28, 7  ;;  %v2483_v52 = vcombine.high %v12776_v55, %v12801_v19 }
 0x178   : > { %v12816_v12 = vrot.slane %v2084_v44, %v12567_v36  ;;  %v2109_v23 = vcombine.high %v2108_v16, %v2108_v16  ;;  %v12823_v25 = vrot.slane %v2083_v37, %v12567_v36  ;;  %v1705_v34 = vshrl.u32 %v1668_v4, 16  ;;  %v10453_v11 = vld.sshfl [vmem:[#allocation2 + $0x34] sm:$0x3 pattern:$0x75316420] }
 0x179   : > { %v1708_v46 = vshll.u32 %v1668_v4, 16  ;;  %v1700_v43 = vrot.slane %v1698_v50, 7  ;;  %v12829_v44 = vrot.slane %v2108_v16, %v12567_v36  ;;  %v2036_v15 = vcombine.low %v10268_v1, %v12819_v18  ;;  %v1733_v4 = vld [vmem:[#allocation2 + $0x18] sm:$0xf] }
 0x17a   : > { %v12826_v3 = vrot.slane %v2109_v23, %v12567_v36  ;;  %v1696_v27 = vor.u32 %v1694_v17, %v1693_v51  ;;  %v1707_v47 = vrot.slane %v1705_v34, 7  ;;  %v1725_v37 = vsel %vm12708_vm1, %v1689_v63, %v1724_v49  ;;  %v12840_v28 = vld.sshfl [vmem:[#allocation2 + $0x4] sm:$0x3 pattern:$0x75316420] }
 0x17b   : > { %v1703_v29 = vor.u32 %v1701_v57, %v1700_v43  ;;  %1726 = vst [vmem:[#allocation2 + $0xc] sm:$0xf] %v1725_v37  ;;  %v3757_v16 = vcombine.low %v12823_v25, %v12829_v44  ;;  %v12843_v17 = vrot.slane %v2036_v15, %v12567_v36  ;;  %v11788_v57 = vld [vmem:[%s15047_s5 + $0x280] sm:$0xff]   ;;  %v12851_v63 = vrot.slane %v2483_v52, %v12567_v36 }
 0x17c   : > { %v3758_v62 = vcombine.low %v12816_v12, %v12826_v3  ;;  %v1710_v50 = vor.u32 %v1708_v46, %v1707_v47  ;;  %v1728_v49 = vsel %vm12708_vm1, %v1696_v27, %v1727_v13  ;;  %v10283_v23 = vld.sshfl [vmem:[#allocation2 + $0x4] sm:$0x33 pattern:$0x75316420]  ;;  %v3818_v51 = vcombine.low %v12738_v7, %v12767_v56  ;;  %v11791_v13 = vld [vmem:[%s15047_s5 + $0x2c8] sm:$0xff]  }
 0x17d   : > { %1729 = vst [vmem:[#allocation2 + $0x10] sm:$0xf] %v1728_v49  ;;  %v1731_v34 = vsel %vm12708_vm1, %v1703_v29, %v1730_v33  ;;  %v3877_v43 = vsel %vm2181_vm3, %v3757_v16, %v3759_v53  ;;  %v12868_v15 = vld.sshfl [vmem:[#allocation2 + $0x8] sm:$0x3 pattern:$0x75316420]  ;;  %v2266_v7 = vcombine.high %v10283_v23, %v10283_v23  ;;  %v2484_v27 = vcombine.high %v12843_v17, %v12843_v17 }
 0x17e   : > { %v3881_v46 = vsel %vm2181_vm3, %v3758_v62, %v3760_v42  ;;  %1732 = vst [vmem:[#allocation2 + $0x14] sm:$0xf] %v1731_v34  ;;  %v1734_v56 = vsel %vm12708_vm1, %v1710_v50, %v1733_v4  ;;  %v3761_v42 = vcombine.low %v12840_v28, %v12868_v15  ;;  %v2324_v33 = vshrl.u32 %v10283_v23, 16  ;;  %v11792_v29 = vld [vmem:[%s15047_s5 + $0x288] sm:$0xff]  }
 0x17f   : > { %4060 = vmatprep.mubr.bf16.mxu0 %v3881_v46  ;;  %1735 = vst [vmem:[#allocation2 + $0x18] sm:$0xf] %v1734_v56  ;;  %v2329_v53 = vshll.u32 %v2266_v7, 16  ;;  %v3819_v47 = vcombine.low %v12773_v61, %v10268_v1  ;;  %v3820_v37 = vcombine.low %v12819_v18, %v10453_v11  ;;  %v12879_v52 = vrot.slane %v3818_v51, %v12567_v36  ;;  %v11795_v18 = vld [vmem:[%s15047_s5 + $0x2d0] sm:$0xff]  }
 0x180   : > { %4061 = vmatmul.mubr.bf16.vlgmr.msra.gmra.mrb[48].mxu0 %v3877_v43  ;;  %v10284_v8 = vld.sshfl [vmem:[#allocation2 + $0x8] sm:$0x33 pattern:$0x75316420]  ;;  %v12885_v4 = vrot.slane %v3761_v42, %v12567_v36  ;;  %v2512_v62 = vrot.slane %v2484_v27, %v12567_v36  ;;  %v2482_v16 = vcombine.low %v12776_v55, %v12801_v19  ;;  %v2505_v61 = vrot.slane %v12843_v17, %v12567_v36 }
 0x181   : > { %11199 = vmatpush3.bf16.msra.mxu0 %v11788_v57  ;;  %v12897_v1 = vsel %vm12572_vm11, %v2324_v33, %v2329_v53  ;;  %v12900_v11 = vrot.slane %v3819_v47, %v12567_v36  ;;  %v12903_v50 = vrot.slane %v3820_v37, %v12567_v36  ;;  %v12907_v49 = vrot.slane %v12879_v52, %v12567_v36  ;;  %v12974_v45 = vld.sshfl [vmem:[#allocation2 + $0x38] sm:$0x33 pattern:$0x75316420] }
 0x182   : > { %11200 = vmatprep.subr.bf16.mxu0 %v11791_v13  ;;  %v12909_v57 = vld.sshfl [vmem:[#allocation2 + $0xc] sm:$0x3 pattern:$0x75316420]  ;;  %v2514_v23 = vcombine.low %v12851_v63, %v2512_v62  ;;  %v2515_v51 = vcombine.low %v12579_v48, %v12897_v1  ;;  %v2491_v34 = vrot.slane %v2482_v16, %v12567_v36  ;;  %v2274_v46 = vcombine.high %v10284_v8, %v10284_v8  ;;  %v11796_v48 = vld [vmem:[%s15047_s5 + $0x290] sm:$0xff]  }
 0x183   : > { %15129 = vst [vmem:[#allocation20_spill] sm:$0xff] %v12907_v49  ;;  %v3844_v43 = vcombine.high %v12900_v11, %v12903_v50  ;;  %v10285_v13 = vld.sshfl [vmem:[#allocation2 + $0xc] sm:$0x33 pattern:$0x75316420]  ;;  %v2333_v7 = vshrl.u32 %v10284_v8, 16  ;;  %v2573_v56 = vcombine.high %v12751_v59, %v12755_v32 }
 0x184   : > { %v12921_v33 = vld.sshfl [vmem:[#allocation2 + $0x10] sm:$0x3 pattern:$0x75316420]  ;;  %v12924_v63 = vrot.slane %v2515_v51, %v12567_v36  ;;  %v2513_v27 = vcombine.low %v2491_v34, %v2505_v61  ;;  %v2282_v53 = vcombine.high %v10285_v13, %v10285_v13  ;;  %v2338_v47 = vshll.u32 %v2274_v46, 16  ;;  %v11799_v51 = vld [vmem:[%s15047_s5 + $0x2d8] sm:$0xff]  }
 0x185   : > { %11201 = vmatpush3.bf16.msra.mxu0 %v11792_v29  ;;  %v3762_v37 = vcombine.low %v12909_v57, %v12921_v33  ;;  %v12931_v8 = vld.sshfl [vmem:[#allocation2 + $0x14] sm:$0x3 pattern:$0x75316420]  ;;  %v12934_v29 = vrot.slane %v3844_v43, %v12567_v36  ;;  %v2342_v62 = vshrl.u32 %v10285_v13, 16  ;;  %v12937_v16 = vrot.slane %v2573_v56, %v12567_v36 }
 0x186   : > { %11202 = vmatprep.subr.bf16.mxu0 %v11795_v18  ;;  %v2537_v61 = vrot.slane %v12924_v63, %v12567_v36  ;;  %v10447_v34 = vld.sshfl [vmem:[#allocation2 + $0x18] sm:$0x3 pattern:$0x75316420]  ;;  %v2523_v18 = vcombine.low %v12924_v63, %v12924_v63  ;;  %v12948_v46 = vsel %vm12572_vm11, %v2333_v7, %v2338_v47  ;;  %v2347_v43 = vshll.u32 %v2282_v53, 16 }
 0x187   : > { %15130 = vst [vmem:[#allocation21_spill] sm:$0xff] %v12934_v29  ;;  %v3776_v13 = vrot.slane %v3762_v37, %v12567_v36  ;;  %v3795_v56 = vcombine.low %v12931_v8, %v10447_v34  ;;  %v3874_v2 = vcombine.low %v12907_v49, %v12934_v29  ;;  %v10286_v42 = vld.sshfl [vmem:[#allocation2 + $0x10] sm:$0x33 pattern:$0x75316420]  ;;  %v11800_v53 = vld [vmem:[%s15047_s5 + $0x298] sm:$0xff]  }
 0x188   : > { %v2539_v24 = vcombine.low %v2537_v61, %v2537_v61  ;;  %v2530_v40 = vrot.slane %v2523_v18, %v12567_v36  ;;  %v10287_v35 = vld.sshfl [vmem:[#allocation2 + $0x14] sm:$0x33 pattern:$0x75316420]  ;;  %v2290_v20 = vcombine.high %v10286_v42, %v10286_v42  ;;  %v12959_v7 = vsel %vm12572_vm11, %v2342_v62, %v2347_v43  ;;  %v11803_v62 = vld [vmem:[%s15047_s5 + $0x2e0] sm:$0xff]  }
 0x189   : > { %11203 = vmatpush3.bf16.msra.mxu0 %v11796_v48  ;;  %v3778_v47 = vcombine.high %v12885_v4, %v3776_v13  ;;  %v3777_v37 = vcombine.low %v12885_v4, %v3776_v13  ;;  %v3802_v34 = vrot.slane %v3795_v56, %v12567_v36  ;;  %v11798_v48 = vld [vmem:[%s15047_s5] sm:$0xff]   ;;  %v2298_v61 = vcombine.high %v10287_v35, %v10287_v35  ;;  %v10299_v6 = vld.sshfl [vmem:[#allocation2 + $0x4c] sm:$0x33 pattern:$0x75316420] }
 0x18a   : > { %11204 = vmatprep.subr.bf16.mxu0 %v11799_v51  ;;  %v2668_v18 = vsel %vm2181_vm3, %v2514_v23, %v2539_v24  ;;  %v2538_v43 = vcombine.low %v2530_v40, %v2530_v40  ;;  %v2351_v38 = vshrl.u32 %v10286_v42, 16  ;;  %v2356_v60 = vshll.u32 %v2290_v20, 16  ;;  %v11804_v42 = vld [vmem:[%s15047_s5 + $0x2a0] sm:$0xff]  }
 0x18b   : > { %v12977_v4 = vrot.slane %v3778_v47, %v12567_v36  ;;  %2847 = vmatprep.mubr.bf16.mxu1 %v2668_v18  ;;  %v12980_v13 = vrot.slane %v3777_v37, %v12567_v36  ;;  %v3803_v56 = vcombine.high %v3802_v34, %v3802_v34  ;;  %v2360_v51 = vshrl.u32 %v10287_v35, 16  ;;  %v10295_v35 = vld.sshfl [vmem:[#allocation2 + $0x3c] sm:$0x33 pattern:$0x75316420]  ;;  %v11802_v18 = vld [vmem:[%s15047_s5 + $0x8] sm:$0xff]  }
 0x18c   : > { %v2664_v24 = vsel %vm2181_vm3, %v2513_v27, %v2538_v43  ;;  %v12988_v40 = vsel %vm12572_vm11, %v2351_v38, %v2356_v60  ;;  %v2365_v20 = vshll.u32 %v2298_v61, 16  ;;  %v2540_v23 = vcombine.low %v12948_v46, %v12959_v7  ;;  %v10296_v38 = vld.sshfl [vmem:[#allocation2 + $0x40] sm:$0x33 pattern:$0x75316420] }
 0x18d   : > { %15131 = vst [vmem:[#allocation22_spill] sm:$0xff] %v12977_v4  ;;  %15132 = vst [vmem:[#allocation23_spill] sm:$0xff] %v12980_v13  ;;  %11205 = vmatpush3.bf16.msra.mxu0 %v11800_v53  ;;  %v3794_v47 = vcombine.low %v12977_v4, %v12977_v4  ;;  %v3793_v27 = vcombine.low %v12980_v13, %v12980_v13  ;;  %v13000_v37 = vrot.slane %v3803_v56, %v12567_v36  ;;  %v10297_v56 = vld.sshfl [vmem:[#allocation2 + $0x44] sm:$0x33 pattern:$0x75316420] }
 0x18e   : > { %2848 = vmatmul.mubr.bf16.vlgmr.msra.gmra.mrb[0].mxu1 %v2664_v24  ;;  %11206 = vmatprep.subr.bf16.mxu0 %v11803_v62  ;;  %v2429_v60 = vshrl.u32 %v12974_v45, 16  ;;  %v13005_v53 = vsel %vm12572_vm11, %v2360_v51, %v2365_v20  ;;  %v13008_v61 = vrot.slane %v2540_v23, %v12567_v36  ;;  %v13014_v43 = vrot.slane %v3802_v34, %v12567_v36  ;;  %v11805_v34 = vld [vmem:[%s15047_s5 + $0x50] sm:$0xff]   ;;  %v10298_v23 = vld.sshfl [vmem:[#allocation2 + $0x48] sm:$0x33 pattern:$0x75316420] }
 0x18f   : > { %15133 = vst [vmem:[#allocation24_spill] sm:$0xff] %v13000_v37  ;;  %11063 = vmatpush3.bf16.msra.mxu1 %v11798_v48  ;;  %v3843_v62 = vcombine.low %v12900_v11, %v12903_v50  ;;  %v3889_v48 = vsel %vm2190_vm4, %v12798_v14, %v3794_v47  ;;  %v3885_v51 = vsel %vm2190_vm4, %v12805_v31, %v3793_v27  ;;  %v2438_v54 = vshrl.u32 %v10295_v35, 16  ;;  %v10382_v49 = vld.sshfl [vmem:[#allocation2 + $0x54] sm:$0x33 pattern:$0x75316420] }
 0x190   : > { %15134 = vst [vmem:[#allocation25_spill] sm:$0xff] %v13014_v43  ;;  %v3897_v24 = vsel %vm786_vm0, %v13000_v37, %v3874_v2  ;;  %v2541_v20 = vcombine.low %v12988_v40, %v13005_v53  ;;  %11064 = vmatprep.subr.bf16.mxu1 %v11801_v22  ;;  %4068 = vmatprep.mubr.bf16.mxu0 %v3889_v48  ;;  %v11811_v22 = vld [vmem:[%s15047_s5 + $0x2f0] sm:$0xff]  }
 0x191   : > { %v15135_v47 = vcombine.low %v12879_v52, %v12879_v52  ;;  %v13039_v2 = vrot.slane %v3843_v62, %v12567_v36  ;;  %11207 = vmatpush3.bf16.msra.mxu0 %v11804_v42  ;;  %v2395_v58 = vcombine.high %v10295_v35, %v10295_v35  ;;  %v2403_v62 = vcombine.high %v10296_v38, %v10296_v38  ;;  %v11812_v37 = vld [vmem:[%s15047_s5 + $0x2b0] sm:$0xff]  }
 0x192   : > { %4069 = vmatmul.mubr.bf16.gmra.mrb[52].mxu0 %v3885_v51  ;;  %v13047_v48 = vrot.slane %v2541_v20, %v12567_v36  ;;  %v2411_v21 = vcombine.high %v10297_v56, %v10297_v56  ;;  %v2419_v29 = vcombine.high %v10298_v23, %v10298_v23  ;;  %v2447_v51 = vshrl.u32 %v10296_v38, 16  ;;  %v11806_v20 = vld [vmem:[%s15047_s5 + $0x10] sm:$0xff]   ;;  %11208 = vmatprep.subr.bf16.mxu0 %v11807_v10 }
 0x193   : > { %v13036_v27 = vrot.slane %v15135_v47, %v12567_v36  ;;  %15137 = vst [vmem:[#allocation27_spill] sm:$0xff] %v13039_v2  ;;  %v2387_v47 = vcombine.high %v12974_v45, %v12974_v45  ;;  %4076 = vmatprep.mubr.bf16.mxu0 %v3897_v24  ;;  %11065 = vmatpush3.bf16.msra.mxu1 %v11802_v18  ;;  %v11809_v45 = vld [vmem:[%s15047_s5 + $0x58] sm:$0xff]   ;;  %v2443_v13 = vshll.u32 %v2395_v58, 16  ;;  %v2465_v10 = vshrl.u32 %v10298_v23, 16 }
 0x194   : > { %v2557_v35 = vcombine.high %v13008_v61, %v13047_v48  ;;  %11066 = vmatprep.subr.bf16.mxu1 %v11805_v34  ;;  %v2427_v24 = vcombine.high %v10299_v6, %v10299_v6  ;;  %v2461_v4 = vshll.u32 %v2411_v21, 16  ;;  %v11815_v21 = vld [vmem:[%s15047_s5 + $0x2f8] sm:$0xff]  }
 0x195   : > { %15136 = vst [vmem:[#allocation26_spill] sm:$0xff] %v13036_v27  ;;  %v3873_v42 = vcombine.low %v13036_v27, %v13039_v2  ;;  %v2434_v18 = vshll.u32 %v2387_v47, 16  ;;  %v2452_v2 = vshll.u32 %v2403_v62, 16  ;;  %v2456_v27 = vshrl.u32 %v10297_v56, 16  ;;  %11209 = vmatpush3.bf16.msra.mxu0 %v11808_v41 }
 0x196   : > { %v2571_v30 = vrot.slane %v2557_v35, %v12567_v36  ;;  %v2445_v58 = vsel %vm12572_vm11, %v2438_v54, %v2443_v13  ;;  %v10383_v47 = vld.sshfl [vmem:[#allocation2 + $0x58] sm:$0x33 pattern:$0x75316420]  ;;  %11210 = vmatprep.subr.bf16.mxu0 %v11811_v22  ;;  %v2470_v62 = vshll.u32 %v2419_v29, 16  ;;  %v15138_v13 = vcombine.low %v12937_v16, %v12937_v16 }
 0x197   : > { %v3893_v38 = vsel %vm786_vm0, %v13014_v43, %v3873_v42  ;;  %v2436_v34 = vsel %vm12572_vm11, %v2429_v60, %v2434_v18  ;;  %v2454_v41 = vsel %vm12572_vm11, %v2447_v51, %v2452_v2  ;;  %v2463_v56 = vsel %vm12572_vm11, %v2456_v27, %v2461_v4  ;;  %11067 = vmatpush3.bf16.msra.mxu1 %v11806_v20  ;;  %v11810_v54 = vld [vmem:[%s15047_s5 + $0x18] sm:$0xff]   ;;  %v11813_v4 = vld [vmem:[%s15047_s5 + $0x60] sm:$0xff]  }
 0x198   : > { %v2474_v42 = vshrl.u32 %v10299_v6, 16  ;;  %v2676_v60 = vsel %vm2190_vm4, %v2571_v30, %v15138_v13  ;;  %v2479_v23 = vshll.u32 %v2427_v24, 16  ;;  %v2605_v22 = vcombine.low %v2436_v34, %v2445_v58  ;;  %11068 = vmatprep.subr.bf16.mxu1 %v11809_v45  ;;  %v11816_v30 = vld [vmem:[%s15047_s5 + $0x2b8] sm:$0xff]   ;;  %v11814_v58 = vld [vmem:[%s15047_s5 + $0x20] sm:$0xff]  }
 0x199   : > { %v2606_v35 = vcombine.low %v2454_v41, %v2463_v56  ;;  %2855 = vmatprep.mubr.bf16.mxu1 %v2676_v60  ;;  %v2472_v6 = vsel %vm12572_vm11, %v2465_v10, %v2470_v62  ;;  %v3158_v29 = vcombine.high %v10382_v49, %v10382_v49  ;;  %v3166_v27 = vcombine.high %v10383_v47, %v10383_v47  ;;  %v11817_v56 = vld [vmem:[%s15047_s5 + $0x68] sm:$0xff]  }
 0x19a   : > { %v3200_v2 = vshrl.u32 %v10382_v49, 16  ;;  %11211 = vmatpush3.bf16.msra.mxu0 %v11812_v37  ;;  %v2481_v51 = vsel %vm12572_vm11, %v2474_v42, %v2479_v23  ;;  %v13099_v20 = vrot.slane %v2605_v22, %v12567_v36  ;;  %v3209_v24 = vshrl.u32 %v10383_v47, 16  ;;  %v11819_v49 = vld [vmem:[%s15047_s5 + $0x3c0] sm:$0xff]  }
 0x19b   : > { %4077 = vmatmul.mubr.bf16.gmra.mrb[56].mxu0 %v3893_v38  ;;  %v13102_v45 = vrot.slane %v2606_v35, %v12567_v36  ;;  %11212 = vmatprep.subr.bf16.mxu0 %v11815_v21  ;;  %v2607_v37 = vcombine.low %v2472_v6, %v2481_v51  ;;  %v3205_v18 = vshll.u32 %v3158_v29, 16  ;;  %v3214_v34 = vshll.u32 %v3166_v27, 16 }
 0x19c   : > { %v2556_v38 = vcombine.low %v13008_v61, %v13047_v48  ;;  %11069 = vmatpush3.bf16.msra.mxu1 %v11810_v54  ;;  %v2572_v47 = vcombine.low %v12751_v59, %v12755_v32  ;;  %v2590_v21 = vcombine.high %v12771_v5, %v12771_v5  ;;  %v13120_v41 = vrot.slane %v13099_v20, %v12567_v36  ;;  %v10258_v54 = vld.sshfl [vmem:[#allocation2] sm:$0x3 pattern:$0x75316420] }
 0x19d   : > { %v3344_v10 = vcombine.high %v13099_v20, %v13102_v45  ;;  %11070 = vmatprep.subr.bf16.mxu1 %v11813_v4  ;;  %v2628_v62 = vrot.slane %v2607_v37, %v12567_v36  ;;  %v3207_v42 = vsel %vm12572_vm11, %v3200_v2, %v3205_v18  ;;  %v3216_v59 = vsel %vm12572_vm11, %v3209_v24, %v3214_v34  ;;  %v11818_v24 = vld [vmem:[%s15047_s5 + $0x28] sm:$0xff]  }
 0x19e   : > { %15139 = vst [vmem:[#allocation28_spill] sm:$0xff] %v13120_v41  ;;  %v2564_v32 = vrot.slane %v2556_v38, %v12567_v36  ;;  %11213 = vmatpush3.bf16.msra.mxu0 %v11816_v30  ;;  %v3376_v60 = vcombine.low %v3207_v42, %v3216_v59  ;;  %v13135_v23 = vrot.slane %v2572_v47, %v12567_v36  ;;  %v10384_v59 = vld.sshfl [vmem:[#allocation2 + $0x5c] sm:$0x33 pattern:$0x75316420] }
 0x19f   : > { %v13132_v13 = vrot.slane %v3344_v10, %v12567_v36  ;;  %v13138_v22 = vrot.slane %v2590_v21, %v12567_v36  ;;  %11266 = vmatprep.subr.bf16.mxu0 %v11819_v49  ;;  %v3361_v35 = vcombine.high %v2628_v62, %v2628_v62  ;;  %v2631_v4 = vcombine.high %v13102_v45, %v2628_v62 }
 0x1a0   : > { %15140 = vst [vmem:[#allocation29_spill] sm:$0xff] %v13135_v23  ;;  %v13143_v6 = vrot.slane %v12771_v5, %v12567_v36  ;;  %v2629_v29 = vcombine.low %v13099_v20, %v13099_v20  ;;  %11071 = vmatpush3.bf16.msra.mxu1 %v11814_v58  ;;  %v3385_v27 = vrot.slane %v3376_v60, %v12567_v36  ;;  %v3218_v18 = vshrl.u32 %v10384_v59, 16 }
 0x1a1   : > { %v2588_v2 = vcombine.low %v13135_v23, %v13135_v23  ;;  %v2630_v30 = vcombine.low %v13102_v45, %v2628_v62  ;;  %v1953_v51 = vcombine.low %v10258_v54, %v12840_v28  ;;  %11072 = vmatprep.subr.bf16.mxu1 %v11817_v56  ;;  %v13156_v5 = vrot.slane %v3361_v35, %v12567_v36  ;;  %v11821_v28 = vld [vmem:[%s15047_s5 + $0x70] sm:$0xff]   ;;  %v10385_v54 = vld.sshfl [vmem:[#allocation2 + $0x60] sm:$0x33 pattern:$0x75316420] }
 0x1a2   : > { %15141 = vst [vmem:[#allocation30_spill] sm:$0xff] %v13143_v6  ;;  %v13159_v49 = vrot.slane %v2631_v4, %v12567_v36  ;;  %v13162_v37 = vrot.slane %v2629_v29, %v12567_v36  ;;  %v3400_v34 = vcombine.low %v3385_v27, %v3385_v27  ;;  %v13170_v38 = vrot.slane %v3385_v27, %v12567_v36  ;;  %v10386_v29 = vld.sshfl [vmem:[#allocation2 + $0x64] sm:$0x33 pattern:$0x75316420] }
 0x1a3   : > { %v2672_v58 = vsel %vm2190_vm4, %v2564_v32, %v2588_v2  ;;  %v13174_v10 = vrot.slane %v2630_v30, %v12567_v36  ;;  %v4630_v47 = vcombine.low %v13132_v13, %v13156_v5  ;;  %v1954_v56 = vcombine.low %v12868_v15, %v12909_v57  ;;  %v11822_v15 = vld [vmem:[%s15047_s5 + $0x30] sm:$0xff]   ;;  %v10387_v2 = vld.sshfl [vmem:[#allocation2 + $0x68] sm:$0x33 pattern:$0x75316420]  ;;  %v11825_v30 = vld [vmem:[%s15047_s5 + $0x78] sm:$0xff]  }
 0x1a4   : > { %15142 = vst [vmem:[#allocation31_spill] sm:$0xff] %v13159_v49  ;;  %15143 = vst [vmem:[#allocation32_spill] sm:$0xff] %v13162_v37  ;;  %2856 = vmatmul.mubr.bf16.gmra.mrb[4].mxu1 %v2672_v58  ;;  %v2661_v21 = vcombine.low %v13120_v41, %v13159_v49  ;;  %v1955_v42 = vcombine.low %v12921_v33, %v12931_v8  ;;  %v4632_v32 = vcombine.low %v13170_v38, %v13170_v38 }
 0x1a5   : > { %15144 = vst [vmem:[#allocation33_spill] sm:$0xff] %v13174_v10  ;;  %v2660_v60 = vcombine.low %v13162_v37, %v13174_v10  ;;  %v13189_v35 = vrot.slane %v1953_v51, %v12567_v36  ;;  %v2032_v4 = vrot.slane %v12776_v55, %v12567_v36  ;;  %11073 = vmatpush3.bf16.msra.mxu1 %v11818_v24  ;;  %v3227_v10 = vshrl.u32 %v10385_v54, 16 }
 0x1a6   : > { %v2684_v57 = vsel %vm786_vm0, %v13138_v22, %v2661_v21  ;;  %v13199_v33 = vrot.slane %v1954_v56, %v12567_v36  ;;  %v13202_v8 = vrot.slane %v1955_v42, %v12567_v36  ;;  %v3343_v27 = vcombine.low %v13099_v20, %v13102_v45  ;;  %11074 = vmatprep.subr.bf16.mxu1 %v11821_v28 }
 0x1a7   : > { %v4729_v51 = vsel %vm2181_vm3, %v4630_v47, %v4632_v32  ;;  %2863 = vmatprep.mubr.bf16.mxu1 %v2684_v57  ;;  %v2680_v24 = vsel %vm786_vm0, %v13143_v6, %v2660_v60  ;;  %v2034_v58 = vcombine.low %v2032_v4, %v2032_v4  ;;  %v13213_v21 = vrot.slane %v2628_v62, %v12567_v36  ;;  %v11826_v62 = vld [vmem:[%s15047_s5 + $0x38] sm:$0xff]  }
 0x1a8   : > { %4908 = vmatprep.mubr.bf16.mxu0 %v4729_v51  ;;  %v1978_v20 = vcombine.high %v13189_v35, %v13199_v33  ;;  %v1979_v45 = vcombine.high %v13202_v8, %v13202_v8  ;;  %v13220_v28 = vrot.slane %v3343_v27, %v12567_v36  ;;  %v13223_v47 = vrot.slane %v3400_v34, %v12567_v36  ;;  %v11820_v51 = vld [vmem:[%s15047_s5 + $0x380] sm:$0xff]  }
 0x1a9   : > { %15145 = vst [vmem:[#allocation34_spill] sm:$0xff] %v13213_v21  ;;  %v3174_v56 = vcombine.high %v10384_v59, %v10384_v59  ;;  %v3182_v42 = vcombine.high %v10385_v54, %v10385_v54  ;;  %v3190_v32 = vcombine.high %v10386_v29, %v10386_v29  ;;  %v3198_v60 = vcombine.high %v10387_v2, %v10387_v2  ;;  %v13246_v59 = vld.sshfl [vmem:[#allocation2 + $0x24] sm:$0x33 pattern:$0x75316420] }
 0x1aa   : > { %15146 = vst [vmem:[#allocation35_spill] sm:$0xff] %v13220_v28  ;;  %11075 = vmatpush3.bf16.msra.mxu1 %v11822_v15  ;;  %v1993_v4 = vrot.slane %v1978_v20, %v12567_v36  ;;  %v2007_v57 = vrot.slane %v1979_v45, %v12567_v36  ;;  %v4629_v27 = vcombine.low %v13220_v28, %v13213_v21  ;;  %v10507_v15 = vld.sshfl [vmem:[#allocation2 + $0x18] sm:$0x33 pattern:$0x75316420]  ;;  %v11823_v20 = vld [vmem:[%s15047_s5 + $0x3c8] sm:$0xff]  }
 0x1ab   : > { %v4631_v34 = vcombine.low %v13223_v47, %v13223_v47  ;;  %11076 = vmatprep.subr.bf16.mxu1 %v11825_v30  ;;  %v3223_v43 = vshll.u32 %v3174_v56, 16  ;;  %v3232_v49 = vshll.u32 %v3182_v42, 16  ;;  %v13240_v45 = vld.sshfl [vmem:[#allocation2 + $0x20] sm:$0x33 pattern:$0x75316420] }
 0x1ac   : > { %v11829_v28 = vld [vmem:[%s15047_s5 + $0x140] sm:$0xff]   ;;  %2864 = vmatmul.mubr.bf16.gmra.mrb[8].mxu1 %v2680_v24  ;;  %v2009_v6 = vcombine.low %v1993_v4, %v2007_v57  ;;  %v3236_v30 = vshrl.u32 %v10386_v29, 16  ;;  %v3241_v37 = vshll.u32 %v3190_v32, 16  ;;  %v3245_v21 = vshrl.u32 %v10387_v2, 16 }
 0x1ad   : > { %v4725_v23 = vsel %vm2181_vm3, %v4629_v27, %v4631_v34  ;;  %v13248_v54 = vld.sshfl [vmem:[#allocation2 + $0x28] sm:$0x33 pattern:$0x75316420]  ;;  %v3225_v56 = vsel %vm12572_vm11, %v3218_v18, %v3223_v43  ;;  %v3234_v42 = vsel %vm12572_vm11, %v3227_v10, %v3232_v49  ;;  %v3250_v41 = vshll.u32 %v3198_v60, 16 }
 0x1ae   : > { %4909 = vmatmul.mubr.bf16.vlgmr.msra.gmra.mrb[60].mxu0 %v4725_v23  ;;  %11077 = vmatpush3.bf16.msra.mxu1 %v11826_v62  ;;  %v13254_v24 = vld.sshfl [vmem:[#allocation2 + $0x2c] sm:$0x33 pattern:$0x75316420]  ;;  %v2188_v4 = vsel %vm2181_vm3, %v2009_v6, %v2034_v58  ;;  %v3243_v29 = vsel %vm12572_vm11, %v3236_v30, %v3241_v37  ;;  %v3377_v32 = vcombine.low %v3225_v56, %v3234_v42  ;;  %v11827_v37 = vld [vmem:[%s15047_s5 + $0x3d0] sm:$0xff]   ;;  %v4576_v56 = vshrl.u32 %v13240_v45, 16 }
 0x1af   : > { %v4242_v23 = vcombine.low %v12897_v1, %v12948_v46  ;;  %11267 = vmatpush3.bf16.msra.mxu0 %v11820_v51  ;;  %v11824_v43 = vld [vmem:[%s15047_s5 + $0x388] sm:$0xff]   ;;  %v13264_v49 = vld.sshfl [vmem:[#allocation2 + $0x30] sm:$0x33 pattern:$0x75316420]  ;;  %3000 = vmatprep.mubr.bf16.mxu1 %v2188_v4  ;;  %v3252_v18 = vsel %vm12572_vm11, %v3245_v21, %v3250_v41  ;;  %v4243_v6 = vcombine.low %v12959_v7, %v12988_v40  ;;  %v4197_v46 = vshrl.u32 %v10507_v15, 16 }
 0x1b0   : > { %11268 = vmatprep.subr.bf16.mxu0 %v11823_v20  ;;  %v4150_v1 = vcombine.high %v10507_v15, %v10507_v15  ;;  %v13273_v10 = vld.sshfl [vmem:[#allocation2 + $0x34] sm:$0x33 pattern:$0x75316420]  ;;  %v3378_v2 = vcombine.low %v3243_v29, %v3252_v18  ;;  %v3392_v58 = vrot.slane %v3377_v32, %v12567_v36  ;;  %v4534_v41 = vcombine.high %v13240_v45, %v13240_v45  ;;  %v11831_v42 = vld [vmem:[%s15047_s5 + $0x3d8] sm:$0xff]  }
 0x1b1   : > { %v13277_v60 = vrot.slane %v4242_v23, %v12567_v36  ;;  %11096 = vmatprep.subr.bf16.mxu1 %v11829_v28  ;;  %v13282_v7 = vrot.slane %v4243_v6, %v12567_v36  ;;  %v4542_v21 = vcombine.high %v13246_v59, %v13246_v59  ;;  %v4550_v62 = vcombine.high %v13248_v54, %v13248_v54  ;;  %v11828_v51 = vld [vmem:[%s15047_s5 + $0x390] sm:$0xff]  }
 0x1b2   : > { %v4202_v40 = vshll.u32 %v4150_v1, 16  ;;  %v3399_v57 = vrot.slane %v3378_v2, %v12567_v36  ;;  %v4558_v27 = vcombine.high %v13254_v24, %v13254_v24  ;;  %v4566_v34 = vcombine.high %v13264_v49, %v13264_v49  ;;  %v11832_v2 = vld [vmem:[%s15047_s5 + $0x398] sm:$0xff]  }
 0x1b3   : > { %11269 = vmatpush3.bf16.msra.mxu0 %v11824_v43  ;;  %v4574_v28 = vcombine.high %v13273_v10, %v13273_v10  ;;  %v4634_v15 = vcombine.high %v13277_v60, %v13282_v7  ;;  %v4633_v20 = vcombine.low %v13277_v60, %v13282_v7  ;;  %v4581_v23 = vshll.u32 %v4534_v41, 16 }
 0x1b4   : > { %11270 = vmatprep.subr.bf16.mxu0 %v11827_v37  ;;  %v4204_v30 = vsel %vm12572_vm11, %v4197_v46, %v4202_v40  ;;  %v3402_v4 = vcombine.high %v3392_v58, %v3399_v57  ;;  %v3401_v29 = vcombine.low %v3392_v58, %v3399_v57  ;;  %v4585_v6 = vshrl.u32 %v13246_v59, 16 }
 0x1b5   : > { %v4244_v32 = vcombine.low %v13005_v53, %v4204_v30  ;;  %v13310_v43 = vrot.slane %v4634_v15, %v12567_v36  ;;  %v13313_v18 = vrot.slane %v4633_v20, %v12567_v36  ;;  %v4590_v37 = vshll.u32 %v4542_v21, 16  ;;  %v11835_v20 = vld [vmem:[%s15047_s5 + $0x3e0] sm:$0xff]  }
 0x1b6   : > { %v13317_v45 = vrot.slane %v3402_v4, %v12567_v36  ;;  %v13320_v1 = vrot.slane %v3401_v29, %v12567_v36  ;;  %v13327_v53 = vsel %vm12572_vm11, %v4576_v56, %v4581_v23  ;;  %v4594_v40 = vshrl.u32 %v13248_v54, 16 }
 0x1b7   : > { %v13323_v46 = vrot.slane %v4244_v32, %v12567_v36  ;;  %11271 = vmatpush3.bf16.msra.mxu0 %v11828_v51  ;;  %v4650_v59 = vcombine.low %v13310_v43, %v13310_v43  ;;  %v4649_v58 = vcombine.low %v13313_v18, %v13313_v18  ;;  %v13338_v41 = vsel %vm12572_vm11, %v4585_v6, %v4590_v37  ;;  %v11839_v32 = vld [vmem:[%s15047_s5 + $0x3e8] sm:$0xff]  }
 0x1b8   : > { %11272 = vmatprep.subr.bf16.mxu0 %v11831_v42  ;;  %v4599_v21 = vshll.u32 %v4550_v62, 16  ;;  %v4603_v57 = vshrl.u32 %v13254_v24, 16  ;;  %v4608_v51 = vshll.u32 %v4558_v27, 16  ;;  %v4612_v15 = vshrl.u32 %v13264_v49, 16 }
 0x1b9   : > { %v4737_v30 = vsel %vm2190_vm4, %v13317_v45, %v4650_v59  ;;  %v4733_v56 = vsel %vm2190_vm4, %v13320_v1, %v4649_v58  ;;  %v4617_v4 = vshll.u32 %v4566_v34, 16  ;;  %v4621_v54 = vshrl.u32 %v13273_v10, 16  ;;  %v11836_v34 = vld [vmem:[%s15047_s5 + $0x3a0] sm:$0xff]  }
 0x1ba   : > { %4916 = vmatprep.mubr.bf16.mxu0 %v4737_v30  ;;  %v13353_v24 = vsel %vm12572_vm11, %v4594_v40, %v4599_v21  ;;  %v13357_v49 = vsel %vm12572_vm11, %v4603_v57, %v4608_v51  ;;  %v4626_v62 = vshll.u32 %v4574_v28, 16  ;;  %v4651_v27 = vcombine.high %v13323_v46, %v13323_v46  ;;  %v11840_v57 = vld [vmem:[%s15047_s5 + $0x3a8] sm:$0xff]  }
 0x1bb   : > { %11273 = vmatpush3.bf16.msra.mxu0 %v11832_v2  ;;  %v13366_v10 = vsel %vm12572_vm11, %v4612_v15, %v4617_v4  ;;  %v4666_v42 = vcombine.low %v13327_v53, %v13338_v41  ;;  %v4667_v29 = vcombine.low %v13353_v24, %v13357_v49  ;;  %v1977_v28 = vcombine.low %v13189_v35, %v13199_v33  ;;  %v11830_v4 = vld [vmem:[%s15047_s5 + $0x100] sm:$0xff]  }
 0x1bc   : > { %4917 = vmatmul.mubr.bf16.gmra.mrb[64].mxu0 %v4733_v56  ;;  %v4628_v23 = vsel %vm12572_vm11, %v4621_v54, %v4626_v62  ;;  %v13380_v6 = vrot.slane %v4651_v27, %v12567_v36  ;;  %v2000_v37 = vrot.slane %v13202_v8, %v12567_v36  ;;  %v2018_v2 = vcombine.low %v12776_v55, %v12776_v55 }
 0x1bd   : > { %11274 = vmatprep.subr.bf16.mxu0 %v11835_v20  ;;  %v4668_v59 = vcombine.low %v13366_v10, %v4628_v23  ;;  %v4675_v35 = vrot.slane %v4666_v42, %v12567_v36  ;;  %v4682_v33 = vrot.slane %v4667_v29, %v12567_v36  ;;  %v1986_v58 = vrot.slane %v1977_v28, %v12567_v36 }
 0x1be   : > { %v2025_v40 = vrot.slane %v2018_v2, %v12567_v36  ;;  %v2052_v21 = vcombine.high %v12801_v19, %v12843_v17  ;;  %v2100_v8 = vcombine.low %v12816_v12, %v12816_v12  ;;  %v13397_v55 = vrot.slane %v13323_v46, %v12567_v36 }
 0x1bf   : > { %11275 = vmatpush3.bf16.msra.mxu0 %v11836_v34  ;;  %v4689_v51 = vrot.slane %v4668_v59, %v12567_v36  ;;  %v13404_v15 = vrot.slane %v4675_v35, %v12567_v36  ;;  %v2008_v20 = vcombine.low %v1986_v58, %v2000_v37  ;;  %v4690_v30 = vcombine.low %v4675_v35, %v4675_v35  ;;  %v11833_v34 = vld [vmem:[%s15047_s5 + $0x148] sm:$0xff]   ;;  %v11843_v35 = vld [vmem:[%s15047_s5 + $0x3f0] sm:$0xff]  }
 0x1c0   : > { %11276 = vmatprep.subr.bf16.mxu0 %v11839_v32  ;;  %v2033_v56 = vcombine.low %v2025_v40, %v2025_v40  ;;  %v2066_v12 = vrot.slane %v2052_v21, %v12567_v36  ;;  %v4210_v62 = vcombine.high %v12879_v52, %v12900_v11  ;;  %v4227_v28 = vcombine.high %v12903_v50, %v12903_v50  ;;  %v1223_v32 = vld [vmem:[#allocation2 + $0x50] sm:$0xf] }
 0x1c1   : > { %v4692_v27 = vcombine.high %v4682_v33, %v4689_v51  ;;  %v4691_v42 = vcombine.low %v4682_v33, %v4689_v51  ;;  %v13418_v29 = vrot.slane %v4690_v30, %v12567_v36  ;;  %v13429_v59 = vrot.slane %v13277_v60, %v12567_v36 }
 0x1c2   : > { %v2184_v23 = vsel %vm2181_vm3, %v2008_v20, %v2033_v56  ;;  %v2197_v37 = vsel %vm2190_vm4, %v2066_v12, %v2100_v8  ;;  %v13425_v2 = vrot.slane %v4210_v62, %v12567_v36  ;;  %v13441_v40 = vrot.slane %v4227_v28, %v12567_v36  ;;  %v11844_v8 = vld [vmem:[%s15047_s5 + $0x3b0] sm:$0xff]   ;;  %v13480_v28 = vld.sshfl [vmem:[#allocation2 + $0x3c] sm:$0x33 pattern:$0x75316420] }
 0x1c3   : > { %11277 = vmatpush3.bf16.msra.mxu0 %v11840_v57  ;;  %v13435_v33 = vrot.slane %v4692_v27, %v12567_v36  ;;  %3001 = vmatmul.mubr.bf16.vlgmr.msra.gmra.mrb[12].mxu1 %v2184_v23  ;;  %v13438_v58 = vrot.slane %v4691_v42, %v12567_v36  ;;  %v2051_v21 = vcombine.low %v12801_v19, %v12843_v17  ;;  %v11834_v57 = vld [vmem:[%s15047_s5 + $0x108] sm:$0xff]   ;;  %v1224_v19 = vsel %vm12291_vm7, 0, %v1223_v32  ;;  %v11847_v27 = vld [vmem:[%s15047_s5 + $0x3f8] sm:$0xff]  }
 0x1c4   : > { %3008 = vmatprep.mubr.bf16.mxu1 %v2197_v37  ;;  %11097 = vmatpush3.bf16.msra.mxu1 %v11830_v4  ;;  %v5500_v51 = vcombine.low %v13429_v59, %v13429_v59  ;;  %v2099_v20 = vcombine.low %v12823_v25, %v12823_v25  ;;  %v2180_v30 = vcombine.low %v12763_v0, %v12798_v14  ;;  %v11837_v25 = vld [vmem:[%s15047_s5 + $0x150] sm:$0xff]   ;;  %v10629_v42 = vld.sshfl [vmem:[#allocation2 + $0x5c] sm:$0x3 pattern:$0x75316420]  ;;  %vm12100_vm7 = vmmov 0  }
 0x1c5   : > { %v4722_v17 = vcombine.low %v13404_v15, %v13435_v33  ;;  %11098 = vmatprep.subr.bf16.mxu1 %v11833_v34  ;;  %v4721_v56 = vcombine.low %v13418_v29, %v13438_v58  ;;  %v5498_v12 = vcombine.low %v13425_v2, %v13441_v40  ;;  %v2059_v4 = vrot.slane %v2051_v21, %v12567_v36  ;;  %v10628_v34 = vld.sshfl [vmem:[#allocation2 + $0x58] sm:$0x3 pattern:$0x75316420]  ;;  %v11838_v21 = vld [vmem:[%s15047_s5 + $0x110] sm:$0xff]  }
 0x1c6   : > { %1225 = vst [vmem:[#allocation2 + $0x50] sm:$0xf] %v1224_v19  ;;  %v2205_v26 = vsel %vm786_vm0, %v12826_v3, %v2180_v30  ;;  %11278 = vmatprep.subr.bf16.mxu0 %v11843_v35  ;;  %v2179_v0 = vcombine.low %v12784_v9, %v12805_v31  ;;  %v3254_v14 = vcombine.high %v12924_v63, %v13008_v61  ;;  %v11848_v23 = vld [vmem:[%s15047_s5 + $0x3b8] sm:$0xff]   ;;  %v15147_v19 = vld [vmem:[#allocation11_spill] sm:$0xff] }
 0x1c7   : > { %v3255_v62 = vcombine.high %v13047_v48, %v13047_v48  ;;  %v4745_v3 = vsel %vm786_vm0, %v13380_v6, %v4722_v17  ;;  %v4741_v9 = vsel %vm786_vm0, %v13397_v55, %v4721_v56  ;;  %v5597_v31 = vsel %vm2181_vm3, %v5498_v12, %v5500_v51  ;;  %11279 = vmatpush3.bf16.msra.mxu0 %v11844_v8  ;;  %v10630_v37 = vld.sshfl [vmem:[#allocation2 + $0x60] sm:$0x3 pattern:$0x75316420] }
 0x1c8   : > { %v2193_v32 = vsel %vm2190_vm4, %v2059_v4, %v2099_v20  ;;  %v13491_v35 = vld.sshfl [vmem:[#allocation2 + $0x40] sm:$0x33 pattern:$0x75316420]  ;;  %4924 = vmatprep.mubr.bf16.mxu0 %v4745_v3  ;;  %11099 = vmatpush3.bf16.msra.mxu1 %v11834_v57  ;;  %v13498_v30 = vsel %vm786_vm0, %v12829_v44, %v2179_v0  ;;  %v13501_v51 = vrot.slane %v3254_v14, %v12567_v36  ;;  %v11841_v57 = vld [vmem:[%s15047_s5 + $0x158] sm:$0xff]  }
 0x1c9   : > { %v13504_v8 = vrot.slane %v3255_v62, %v12567_v36  ;;  %v13506_v20 = vld.sshfl [vmem:[#allocation2 + $0x44] sm:$0x33 pattern:$0x75316420]  ;;  %4925 = vmatmul.mubr.bf16.gmra.mrb[68].mxu0 %v4741_v9  ;;  %11100 = vmatprep.subr.bf16.mxu1 %v11837_v25  ;;  %v3286_v17 = vcombine.low %v15147_v19, %v13327_v53  ;;  %v4209_v44 = vcombine.low %v12879_v52, %v12900_v11  ;;  %v11842_v11 = vld [vmem:[%s15047_s5 + $0x118] sm:$0xff]  }
 0x1ca   : > { %v13517_v56 = vrot.slane %v12903_v50, %v12567_v36  ;;  %v13519_v12 = vld.sshfl [vmem:[#allocation2 + $0x48] sm:$0x33 pattern:$0x75316420]  ;;  %5776 = vmatprep.mubr.bf16.mxu0 %v5597_v31  ;;  %11280 = vmatprep.subr.bf16.mxu0 %v11847_v27  ;;  %v4266_v25 = vcombine.low %v13277_v60, %v13277_v60  ;;  %v4268_v53 = vcombine.high %v13282_v7, %v13323_v46  ;;  %v5453_v27 = vshrl.u32 %v13491_v35, 16 }
 0x1cb   : > { %v3285_v4 = vcombine.low %v13501_v51, %v13504_v8  ;;  %v13527_v0 = vld.sshfl [vmem:[#allocation2 + $0x4c] sm:$0x33 pattern:$0x75316420]  ;;  %3009 = vmatmul.mubr.bf16.gmra.mrb[16].mxu1 %v2193_v32  ;;  %v13534_v50 = vrot.slane %v3286_v17, %v12567_v36  ;;  %11281 = vmatpush3.bf16.msra.mxu0 %v11848_v23  ;;  %v13537_v14 = vrot.slane %v4209_v44, %v12567_v36  ;;  %v5462_v32 = vshrl.u32 %v13506_v20, 16  ;;  %v11845_v23 = vld [vmem:[%s15047_s5 + $0x160] sm:$0xff]  }
 0x1cc   : > { %v10631_v60 = vld.sshfl [vmem:[#allocation2 + $0x64] sm:$0x3 pattern:$0x75316420]  ;;  %v5110_v62 = vcombine.low %v10628_v34, %v10629_v42  ;;  %3016 = vmatprep.mubr.bf16.mxu1 %v2205_v26  ;;  %11101 = vmatpush3.bf16.msra.mxu1 %v11838_v21  ;;  %v13541_v3 = vrot.slane %v4266_v25, %v12567_v36  ;;  %v5471_v51 = vshrl.u32 %v13519_v12, 16  ;;  %v13553_v42 = vrot.slane %v4268_v53, %v12567_v36 }
 0x1cd   : > { %15148 = vst [vmem:[#allocation11_spill] sm:$0xff] %v13537_v14  ;;  %v5111_v9 = vcombine.low %v10630_v37, %v10631_v60  ;;  %v10633_v31 = vld.sshfl [vmem:[#allocation2 + $0x6c] sm:$0x3 pattern:$0x75316420]  ;;  %11102 = vmatprep.subr.bf16.mxu1 %v11841_v57  ;;  %v3308_v34 = vrot.slane %v13534_v50, %v12567_v36  ;;  %v5497_v26 = vcombine.low %v13537_v14, %v13517_v56  ;;  %v5480_v21 = vshrl.u32 %v13527_v0, 16 }
 0x1ce   : > { %v10632_v37 = vld.sshfl [vmem:[#allocation2 + $0x68] sm:$0x3 pattern:$0x75316420]  ;;  %v5499_v8 = vcombine.low %v13541_v3, %v13541_v3  ;;  %v13559_v57 = vrot.slane %v5110_v62, %v12567_v36  ;;  %v4267_v17 = vcombine.low %v13282_v7, %v13323_v46  ;;  %v5402_v53 = vcombine.high %v13480_v28, %v13480_v28 }
 0x1cf   : > { %v13562_v19 = vrot.slane %v5111_v9, %v12567_v36  ;;  %v10687_v25 = vld.sshfl [vmem:[#allocation2 + $0x50] sm:$0x33 pattern:$0x75316420]  ;;  %v5410_v60 = vcombine.high %v13491_v35, %v13491_v35  ;;  %v5418_v62 = vcombine.high %v13506_v20, %v13506_v20  ;;  %v11846_v9 = vld [vmem:[%s15047_s5 + $0x120] sm:$0xff]   ;;  %v5112_v44 = vcombine.low %v10632_v37, %v10633_v31  ;;  %v11849_v35 = vld [vmem:[%s15047_s5 + $0x168] sm:$0xff]  }
 0x1d0   : > { %11103 = vmatpush3.bf16.msra.mxu1 %v11842_v11  ;;  %v5593_v7 = vsel %vm2181_vm3, %v5497_v26, %v5499_v8  ;;  %v3310_v52 = vcombine.low %v3308_v34, %v3308_v34  ;;  %v13586_v20 = vrot.slane %v4267_v17, %v12567_v36  ;;  %v5426_v11 = vcombine.high %v13519_v12, %v13519_v12  ;;  %v11850_v12 = vld [vmem:[%s15047_s5 + $0x128] sm:$0xff]  }
 0x1d1   : > { %v5502_v46 = vcombine.high %v13559_v57, %v13562_v19  ;;  %v5501_v54 = vcombine.low %v13559_v57, %v13562_v19  ;;  %11104 = vmatprep.subr.bf16.mxu1 %v11845_v23  ;;  %5777 = vmatmul.mubr.bf16.vlgmr.msra.gmra.mrb[72].mxu0 %v5593_v7  ;;  %v5449_v26 = vshll.u32 %v5402_v53, 16  ;;  %v5434_v31 = vcombine.high %v13527_v0, %v13527_v0 }
 0x1d2   : > { %v5442_v23 = vcombine.high %v10687_v25, %v10687_v25  ;;  %v3439_v34 = vsel %vm2181_vm3, %v3285_v4, %v3310_v52  ;;  %v5458_v37 = vshll.u32 %v5410_v60, 16  ;;  %v5467_v7 = vshll.u32 %v5418_v62, 16 }
 0x1d3   : > { %v5516_v8 = vrot.slane %v5502_v46, %v12567_v36  ;;  %v5509_v14 = vrot.slane %v5501_v54, %v12567_v36  ;;  %3017 = vmatmul.mubr.bf16.gmra.mrb[20].mxu1 %v13498_v30  ;;  %v5476_v17 = vshll.u32 %v5426_v11, 16  ;;  %v13600_v54 = vrot.slane %v5112_v44, %v12567_v36  ;;  %v11851_v30 = vld [vmem:[%s15047_s5 + $0x170] sm:$0xff]  }
 0x1d4   : > { %11105 = vmatpush3.bf16.msra.mxu1 %v11846_v9  ;;  %3618 = vmatprep.mubr.bf16.mxu1 %v3439_v34  ;;  %v5485_v46 = vshll.u32 %v5434_v31, 16  ;;  %v5489_v0 = vshrl.u32 %v10687_v25, 16  ;;  %v5460_v4 = vsel %vm12572_vm11, %v5453_v27, %v5458_v37  ;;  %v5469_v52 = vsel %vm12572_vm11, %v5462_v32, %v5467_v7 }
 0x1d5   : > { %v5518_v53 = vcombine.low %v5516_v8, %v5516_v8  ;;  %11106 = vmatprep.subr.bf16.mxu1 %v11849_v35  ;;  %v5478_v60 = vsel %vm12572_vm11, %v5471_v51, %v5476_v17  ;;  %v5494_v62 = vshll.u32 %v5442_v23, 16  ;;  %v5517_v9 = vcombine.low %v5509_v14, %v5509_v14 }
 0x1d6   : > { %v15149_v25 = vshrl.u32 %v13480_v28, 16  ;;  %v5487_v11 = vsel %vm12572_vm11, %v5480_v21, %v5485_v46  ;;  %v5535_v8 = vcombine.low %v5469_v52, %v5478_v60  ;;  %v3253_v51 = vcombine.low %v12924_v63, %v13008_v61  ;;  %v11852_v28 = vld [vmem:[%s15047_s5 + $0x130] sm:$0xff]   ;;  %v11853_v21 = vld [vmem:[%s15047_s5 + $0x178] sm:$0xff]  }
 0x1d7   : > { %v5605_v44 = vsel %vm2190_vm4, %v13553_v42, %v5518_v53  ;;  %v5496_v27 = vsel %vm12572_vm11, %v5489_v0, %v5494_v62  ;;  %v5601_v14 = vsel %vm2190_vm4, %v13586_v20, %v5517_v9  ;;  %v5519_v31 = vcombine.high %v13600_v54, %v13600_v54  ;;  %v11854_v46 = vld [vmem:[%s15047_s5 + $0x138] sm:$0xff]  }
 0x1d8   : > { %v5451_v35 = vsel %vm12572_vm11, %v15149_v25, %v5449_v26  ;;  %5784 = vmatprep.mubr.bf16.mxu0 %v5605_v44  ;;  %11107 = vmatpush3.bf16.msra.mxu1 %v11850_v12  ;;  %v5536_v26 = vcombine.low %v5487_v11, %v5496_v27  ;;  %v13637_v61 = vrot.slane %v5535_v8, %v12567_v36 }
 0x1d9   : > { %v5534_v32 = vcombine.low %v5451_v35, %v5460_v4  ;;  %11108 = vmatprep.subr.bf16.mxu1 %v11851_v30  ;;  %5785 = vmatmul.mubr.bf16.gmra.mrb[76].mxu0 %v5601_v14  ;;  %v3262_v34 = vrot.slane %v3253_v51, %v12567_v36  ;;  %v3311_v37 = vcombine.low %v13338_v41, %v13353_v24  ;;  %v15153_v14 = vld [vmem:[#allocation32_spill] sm:$0xff] }
 0x1da   : > { %v13640_v23 = vrot.slane %v5536_v26, %v12567_v36  ;;  %v3312_v7 = vcombine.low %v13357_v49, %v13366_v10  ;;  %v3276_v17 = vrot.slane %v13047_v48, %v12567_v36  ;;  %v15150_v12 = vcombine.low %v13534_v50, %v13534_v50  ;;  %v11855_v50 = vld [vmem:[%s15047_s5 + $0x240] sm:$0xff]  }
 0x1db   : > { %v13634_v63 = vrot.slane %v5534_v32, %v12567_v36  ;;  %v3319_v41 = vrot.slane %v3311_v37, %v12567_v36  ;;  %v5533_v49 = vrot.slane %v5519_v31, %v12567_v36  ;;  %v3432_v4 = vcombine.low %v13170_v38, %v13317_v45  ;;  %v11856_v45 = vld [vmem:[%s15047_s5 + $0x200] sm:$0xff]   ;;  %v15151_v32 = vld [vmem:[#allocation28_spill] sm:$0xff] }
 0x1dc   : > { %v3301_v53 = vrot.slane %v15150_v12, %v12567_v36  ;;  %11109 = vmatpush3.bf16.msra.mxu1 %v11852_v28  ;;  %v5560_v0 = vcombine.high %v13637_v61, %v13640_v23  ;;  %v3326_v24 = vrot.slane %v3312_v7, %v12567_v36  ;;  %v5559_v30 = vcombine.low %v13637_v61, %v13640_v23  ;;  %v15154_v7 = vld [vmem:[#allocation29_spill] sm:$0xff] }
 0x1dd   : > { %v5558_v48 = vcombine.low %v13634_v63, %v13634_v63  ;;  %11110 = vmatprep.subr.bf16.mxu1 %v11853_v21  ;;  %v5574_v10 = vrot.slane %v13634_v63, %v12567_v36  ;;  %v3284_v60 = vcombine.low %v3262_v34, %v3276_v17  ;;  %v3360_v44 = vcombine.low %v13132_v13, %v13132_v13  ;;  %v15155_v17 = vld [vmem:[#allocation30_spill] sm:$0xff] }
 0x1de   : > { %v5588_v52 = vrot.slane %v5560_v0, %v12567_v36  ;;  %v3328_v62 = vcombine.high %v3319_v41, %v3326_v24  ;;  %v5581_v25 = vrot.slane %v5559_v30, %v12567_v36  ;;  %v3455_v35 = vsel %vm786_vm0, %v13156_v5, %v3432_v4  ;;  %v11857_v5 = vld [vmem:[%s15047_s5 + $0x248] sm:$0xff]  }
 0x1df   : > { %v5567_v9 = vrot.slane %v5558_v48, %v12567_v36  ;;  %v3431_v11 = vcombine.low %v13223_v47, %v13320_v1  ;;  %v3309_v38 = vcombine.low %v3301_v53, %v3301_v53  ;;  %v4206_v13 = vcombine.low %v12937_v16, %v13138_v22  ;;  %v15152_v1 = vld [vmem:[#allocation34_spill] sm:$0xff] }
 0x1e0   : > { %11111 = vmatpush3.bf16.msra.mxu1 %v11854_v46  ;;  %v5590_v27 = vcombine.low %v5574_v10, %v5588_v52  ;;  %v4208_v8 = vcombine.low %v15151_v32, %v15151_v32  ;;  %v3342_v51 = vrot.slane %v3328_v62, %v12567_v36  ;;  %v4207_v26 = vcombine.low %v15153_v14, %v15153_v14  ;;  %v11858_v46 = vld [vmem:[%s15047_s5 + $0x208] sm:$0xff]  }
 0x1e1   : > { %11164 = vmatprep.subr.bf16.mxu1 %v11855_v50  ;;  %v5589_v47 = vcombine.low %v5567_v9, %v5581_v25  ;;  %v3451_v28 = vsel %vm786_vm0, %v15152_v1, %v3431_v11  ;;  %v3435_v16 = vsel %vm2181_vm3, %v3284_v60, %v3309_v38  ;;  %v5526_v22 = vrot.slane %v13600_v54, %v12567_v36  ;;  %v11864_v38 = vld [vmem:[%s15047_s5 + $0x220] sm:$0xff]   ;;  %v11873_v14 = vld [vmem:[%s15047_s5 + $0x348] sm:$0xff]  }
 0x1e2   : > { %v5613_v21 = vsel %vm786_vm0, %v5533_v49, %v5590_v27  ;;  %v4305_v31 = vsel %vm2181_vm3, %v4206_v13, %v4208_v8  ;;  %v3447_v34 = vsel %vm2190_vm4, %v3342_v51, %v3360_v44  ;;  %v3327_v37 = vcombine.low %v3319_v41, %v3326_v24  ;;  %v11859_v24 = vld [vmem:[%s15047_s5 + $0x250] sm:$0xff]   ;;  %v15157_v49 = vld [vmem:[#allocation35_spill] sm:$0xff] }
 0x1e3   : > { %5792 = vmatprep.mubr.bf16.mxu0 %v5613_v21  ;;  %3619 = vmatmul.mubr.bf16.vlgmr.msra.gmra.mrb[24].mxu1 %v3435_v16  ;;  %v15156_v12 = vcombine.low %v15154_v7, %v15155_v17  ;;  %v5609_v0 = vsel %vm786_vm0, %v5526_v22, %v5589_v47  ;;  %v4298_v48 = vcombine.low %v13429_v59, %v13553_v42  ;;  %v11867_v51 = vld [vmem:[%s15047_s5 + $0x270] sm:$0xff]   ;;  %v11871_v47 = vld [vmem:[%s15047_s5 + $0x340] sm:$0xff]   ;;  %v11874_v16 = vld [vmem:[%s15047_s5 + $0x308] sm:$0xff]  }
 0x1e4   : > { %3626 = vmatprep.mubr.bf16.mxu1 %v3447_v34  ;;  %11165 = vmatpush3.bf16.msra.mxu1 %v11856_v45  ;;  %v4297_v41 = vcombine.low %v13541_v3, %v13586_v20  ;;  %v3359_v10 = vcombine.low %v15157_v49, %v15157_v49  ;;  %v3335_v59 = vrot.slane %v3327_v37, %v12567_v36  ;;  %v11860_v3 = vld [vmem:[%s15047_s5 + $0x210] sm:$0xff]   ;;  %v11872_v1 = vld [vmem:[%s15047_s5 + $0x300] sm:$0xff]   ;;  %v11877_v37 = vld [vmem:[%s15047_s5 + $0x358] sm:$0xff]  }
 0x1e5   : > { %v13706_v53 = vsel %vm2181_vm3, %v15156_v12, %v4207_v26  ;;  %11166 = vmatprep.subr.bf16.mxu1 %v11857_v5  ;;  %5793 = vmatmul.mubr.bf16.gmra.mrb[80].mxu0 %v5609_v0  ;;  %v13723_v50 = vsel %vm786_vm0, %v13441_v40, %v4298_v48  ;;  %v5136_v42 = vcombine.high %v13562_v19, %v13600_v54  ;;  %v11861_v40 = vld [vmem:[%s15047_s5 + $0x258] sm:$0xff]   ;;  %v11868_v5 = vld [vmem:[%s15047_s5 + $0x230] sm:$0xff]   ;;  %v15159_v26 = vld [vmem:[#allocation31_spill] sm:$0xff] }
 0x1e6   : > { %v13727_v30 = vsel %vm786_vm0, %v13517_v56, %v4297_v41  ;;  %v5134_v20 = vcombine.low %v13559_v57, %v13559_v57  ;;  %v5135_v56 = vcombine.low %v13562_v19, %v13600_v54  ;;  %v5922_v4 = vcombine.low %v13310_v43, %v13380_v6  ;;  %v11862_v43 = vld [vmem:[%s15047_s5 + $0x218] sm:$0xff]   ;;  %v11863_v54 = vld [vmem:[%s15047_s5 + $0x260] sm:$0xff]   ;;  %v11876_v34 = vld [vmem:[%s15047_s5 + $0x310] sm:$0xff]  }
 0x1e7   : > { %v3443_v52 = vsel %vm2190_vm4, %v3335_v59, %v3359_v10  ;;  %v5150_v60 = vrot.slane %v13559_v57, %v12567_v36  ;;  %v5164_v62 = vrot.slane %v5136_v42, %v12567_v36  ;;  %v5924_v44 = vcombine.low %v13404_v15, %v13404_v15  ;;  %v15160_v22 = vld [vmem:[#allocation11_spill] sm:$0xff]  ;;  %v15161_v7 = vld [vmem:[#allocation33_spill] sm:$0xff]  ;;  %v10623_v48 = vld.sshfl [vmem:[#allocation2 + $0x40] sm:$0x3 pattern:$0x75316420] }
 0x1e8   : > { %11167 = vmatpush3.bf16.msra.mxu1 %v11858_v46  ;;  %v13751_v9 = vrot.slane %v5134_v20, %v12567_v36  ;;  %v5923_v19 = vcombine.low %v13418_v29, %v13418_v29  ;;  %v13761_v57 = vrot.slane %v5135_v56, %v12567_v36  ;;  %v15158_v29 = vcombine.low %v13313_v18, %v13397_v55  ;;  %v11865_v55 = vld [vmem:[%s15047_s5 + $0x268] sm:$0xff]   ;;  %v10624_v12 = vld.sshfl [vmem:[#allocation2 + $0x44] sm:$0x3 pattern:$0x75316420] }
 0x1e9   : > { %11168 = vmatprep.subr.bf16.mxu1 %v11859_v24  ;;  %v13758_v6 = vcombine.low %v5150_v60, %v5164_v62  ;;  %v13764_v15 = vsel %vm2181_vm3, %v5922_v4, %v5924_v44  ;;  %v5926_v11 = vcombine.high %v13634_v63, %v13637_v61  ;;  %v5925_v27 = vcombine.low %v13634_v63, %v13637_v61  ;;  %v11866_v63 = vld [vmem:[%s15047_s5 + $0x228] sm:$0xff]   ;;  %v11879_v0 = vld [vmem:[%s15047_s5 + $0x360] sm:$0xff]   ;;  %v10622_v59 = vld.sshfl [vmem:[#allocation2 + $0x3c] sm:$0x3 pattern:$0x75316420] }
 0x1ea   : > { %v13773_v25 = vsel %vm2181_vm3, %v15158_v29, %v5923_v19  ;;  %v10625_v46 = vld.sshfl [vmem:[#allocation2 + $0x48] sm:$0x3 pattern:$0x75316420]  ;;  %v15162_v41 = vld [vmem:[#allocation24_spill] sm:$0xff]  ;;  %v15163_v24 = vld [vmem:[#allocation22_spill] sm:$0xff] }
 0x1eb   : > { %3627 = vmatmul.mubr.bf16.gmra.mrb[28].mxu1 %v3443_v52  ;;  %v5940_v45 = vrot.slane %v5926_v11, %v12567_v36  ;;  %v5933_v18 = vrot.slane %v5925_v27, %v12567_v36  ;;  %v5050_v49 = vcombine.low %v15163_v24, %v15162_v41  ;;  %v5054_v10 = vcombine.low %v10624_v12, %v10625_v46  ;;  %v11881_v20 = vld [vmem:[%s15047_s5 + $0x368] sm:$0xff]   ;;  %v11883_v60 = vld [vmem:[%s15047_s5 + $0x370] sm:$0xff]   ;;  %v11886_v27 = vld [vmem:[%s15047_s5 + $0x338] sm:$0xff]  }
 0x1ec   : > { %3634 = vmatprep.mubr.bf16.mxu1 %v3455_v35  ;;  %11169 = vmatpush3.bf16.msra.mxu1 %v11860_v3  ;;  %v5165_v35 = vcombine.low %v13751_v9, %v13761_v57  ;;  %v15164_v3 = vld [vmem:[#allocation20_spill] sm:$0xff]  ;;  %v10746_v12 = vld.sshfl [vmem:[#allocation2 + $0x68] sm:$0x33 pattern:$0x75316420]  ;;  %v11895_v41 = vld [vmem:[%s15047_s5 + $0x460] sm:$0xff]  }
 0x1ed   : > { %11170 = vmatprep.subr.bf16.mxu1 %v11861_v40  ;;  %v5942_v13 = vcombine.low %v5940_v45, %v5940_v45  ;;  %v5941_v32 = vcombine.low %v5933_v18, %v5933_v18  ;;  %v5052_v42 = vcombine.low %v15164_v3, %v15164_v3  ;;  %v5053_v40 = vcombine.low %v10622_v59, %v10623_v48  ;;  %v11882_v52 = vld [vmem:[%s15047_s5 + $0x328] sm:$0xff]   ;;  %v10745_v24 = vld.sshfl [vmem:[#allocation2 + $0x64] sm:$0x33 pattern:$0x75316420] }
 0x1ee   : > { %v5068_v4 = vrot.slane %v5054_v10, %v12567_v36  ;;  %v10626_v19 = vld.sshfl [vmem:[#allocation2 + $0x4c] sm:$0x3 pattern:$0x75316420]  ;;  %v5858_v10 = vcombine.high %v10746_v12, %v10746_v12  ;;  %v5850_v3 = vcombine.high %v10745_v24, %v10745_v24 }
 0x1ef   : > { %v13794_v61 = vsel %vm2190_vm4, %v13435_v33, %v5942_v13  ;;  %v13798_v8 = vsel %vm2190_vm4, %v13438_v58, %v5941_v32  ;;  %v11869_v33 = vld [vmem:[%s15047_s5 + $0x278] sm:$0xff]   ;;  %v5173_v56 = vsel %vm2181_vm3, %v5050_v49, %v5052_v42  ;;  %v5061_v62 = vrot.slane %v5053_v40, %v12567_v36  ;;  %v10747_v46 = vld.sshfl [vmem:[#allocation2 + $0x6c] sm:$0x33 pattern:$0x75316420] }
 0x1f0   : > { %11171 = vmatpush3.bf16.msra.mxu1 %v11862_v43  ;;  %v11870_v58 = vld [vmem:[%s15047_s5 + $0x238] sm:$0xff]   ;;  %v10627_v43 = vld.sshfl [vmem:[#allocation2 + $0x50] sm:$0x3 pattern:$0x75316420]  ;;  %v11898_v9 = vld [vmem:[%s15047_s5 + $0x428] sm:$0xff]  }
 0x1f1   : > { %11172 = vmatprep.subr.bf16.mxu1 %v11863_v54  ;;  %v5070_v44 = vcombine.high %v5061_v62, %v5068_v4  ;;  %v11885_v54 = vld [vmem:[%s15047_s5 + $0x378] sm:$0xff]   ;;  %v5087_v11 = vcombine.low %v10626_v19, %v10627_v43  ;;  %v5069_v45 = vcombine.low %v5061_v62, %v5068_v4  ;;  %v5909_v4 = vshll.u32 %v5858_v10, 16 }
 0x1f2   : > { %v15165_v13 = vld [vmem:[#allocation26_spill] sm:$0xff]  ;;  %v10742_v59 = vld.sshfl [vmem:[#allocation2 + $0x58] sm:$0x33 pattern:$0x75316420]  ;;  %v5904_v19 = vshrl.u32 %v10746_v12, 16 }
 0x1f3   : > { %3635 = vmatmul.mubr.bf16.gmra.mrb[32].mxu1 %v3451_v28  ;;  %v4226_v28 = vcombine.low %v13425_v2, %v13425_v2  ;;  %v11875_v2 = vld [vmem:[%s15047_s5 + $0x350] sm:$0xff]   ;;  %v5084_v29 = vrot.slane %v5070_v44, %v12567_v36  ;;  %v5051_v32 = vcombine.low %v15165_v13, %v15165_v13  ;;  %v10743_v40 = vld.sshfl [vmem:[#allocation2 + $0x5c] sm:$0x33 pattern:$0x75316420]  ;;  %v5826_v57 = vcombine.high %v10742_v59, %v10742_v59 }
 0x1f4   : > { %11173 = vmatpush3.bf16.msra.mxu1 %v11864_v38  ;;  %4484 = vmatprep.mubr.bf16.mxu1 %v4305_v31  ;;  %v4225_v31 = vcombine.low %v15160_v22, %v15160_v22  ;;  %v11887_v38 = vld [vmem:[%s15047_s5 + $0x440] sm:$0xff]   ;;  %v5900_v44 = vshll.u32 %v5850_v3, 16 }
 0x1f5   : > { %11174 = vmatprep.subr.bf16.mxu1 %v11865_v55  ;;  %v4313_v21 = vsel %vm2190_vm4, %v15159_v26, %v4226_v28  ;;  %v5086_v18 = vcombine.low %v5084_v29, %v5084_v29  ;;  %v5094_v55 = vrot.slane %v5087_v11, %v12567_v36  ;;  %v15169_v28 = vld [vmem:[#allocation21_spill] sm:$0xff] }
 0x1f6   : > { %v4309_v17 = vsel %vm2190_vm4, %v15161_v7, %v4225_v31  ;;  %v11892_v31 = vld [vmem:[%s15047_s5 + $0x410] sm:$0xff]   ;;  %v15170_v7 = vld [vmem:[#allocation27_spill] sm:$0xff] }
 0x1f7   : > { %v5095_v26 = vcombine.high %v5094_v55, %v5094_v55  ;;  %v5102_v48 = vrot.slane %v5094_v55, %v12567_v36  ;;  %v11900_v11 = vld [vmem:[%s15047_s5 + $0x430] sm:$0xff]  }
 0x1f8   : > { %11175 = vmatpush3.bf16.msra.mxu1 %v11866_v63  ;;  %v11888_v63 = vld [vmem:[%s15047_s5 + $0x400] sm:$0xff]  }
 0x1f9   : > { %11176 = vmatprep.subr.bf16.mxu1 %v11867_v51  ;;  %v11889_v51 = vld [vmem:[%s15047_s5 + $0x448] sm:$0xff]   ;;  %v5109_v22 = vrot.slane %v5095_v26, %v12567_v36  ;;  %v5185_v42 = vsel %vm786_vm0, %v5102_v48, %v5165_v35  ;;  %v5834_v35 = vcombine.high %v10743_v40, %v10743_v40 }
 0x1fc   : > { %11177 = vmatpush3.bf16.msra.mxu1 %v11868_v5  ;;  %v15166_v5 = vld [vmem:[#allocation23_spill] sm:$0xff] }
 0x1fd   : > { %11178 = vmatprep.subr.bf16.mxu1 %v11869_v33  ;;  %v15167_v33 = vld [vmem:[#allocation25_spill] sm:$0xff] }
 0x200   : > { %11179 = vmatpush3.bf16.msra.mxu1 %v11870_v58  ;;  %v15168_v58 = vcombine.low %v15166_v5, %v15167_v33 }
 0x201   : > { %11232 = vmatprep.subr.bf16.mxu1 %v11871_v47 }
 0x202   : > { %v5169_v47 = vsel %vm2181_vm3, %v15168_v58, %v5051_v32  ;;  %v5868_v32 = vshrl.u32 %v10742_v59, 16 }
 0x203   : > { %4485 = vmatmul.mubr.bf16.vlgmr.msra.gmra.mrb[36].mxu1 %v13706_v53  ;;  %v11878_v53 = vld [vmem:[%s15047_s5 + $0x318] sm:$0xff]  }
 0x204   : > { %4492 = vmatprep.mubr.bf16.mxu1 %v4313_v21  ;;  %11233 = vmatpush3.bf16.msra.mxu1 %v11872_v1  ;;  %v5077_v1 = vrot.slane %v5069_v45, %v12567_v36  ;;  %v11890_v21 = vld [vmem:[%s15047_s5 + $0x408] sm:$0xff]  }
 0x205   : > { %11234 = vmatprep.subr.bf16.mxu1 %v11873_v14  ;;  %v5181_v14 = vsel %vm2190_vm4, %v15169_v28, %v5086_v18  ;;  %v11901_v18 = vld [vmem:[%s15047_s5 + $0x478] sm:$0xff]  }
 0x208   : > { %11235 = vmatpush3.bf16.msra.mxu1 %v11874_v16  ;;  %v11891_v16 = vld [vmem:[%s15047_s5 + $0x450] sm:$0xff]  }
 0x209   : > { %11236 = vmatprep.subr.bf16.mxu1 %v11875_v2  ;;  %v5085_v2 = vcombine.low %v5077_v1, %v5077_v1 }
 0x20b   : > { %4493 = vmatmul.mubr.bf16.gmra.mrb[40].mxu1 %v4309_v17  ;;  %v5177_v17 = vsel %vm2190_vm4, %v15170_v7, %v5085_v2  ;;  %v5950_v7 = vrot.slane %v13640_v23, %v12567_v36 }
 0x20c   : > { %4500 = vmatprep.mubr.bf16.mxu1 %v13723_v50  ;;  %11237 = vmatpush3.bf16.msra.mxu1 %v11876_v34  ;;  %v11880_v50 = vld [vmem:[%s15047_s5 + $0x320] sm:$0xff]   ;;  %v11893_v34 = vld [vmem:[%s15047_s5 + $0x458] sm:$0xff]  }
 0x20d   : > { %11238 = vmatprep.subr.bf16.mxu1 %v11877_v37  ;;  %v10744_v37 = vld.sshfl [vmem:[#allocation2 + $0x60] sm:$0x33 pattern:$0x75316420] }
 0x20e   : > { %v5842_v49 = vcombine.high %v10744_v37, %v10744_v37  ;;  %v5886_v62 = vshrl.u32 %v10744_v37, 16 }
 0x210   : > { %11239 = vmatpush3.bf16.msra.mxu1 %v11878_v53  ;;  %v5189_v53 = vsel %vm786_vm0, %v5109_v22, %v13758_v6  ;;  %v11896_v6 = vld [vmem:[%s15047_s5 + $0x420] sm:$0xff]  }
 0x211   : > { %11240 = vmatprep.subr.bf16.mxu1 %v11879_v0  ;;  %v11894_v0 = vld [vmem:[%s15047_s5 + $0x418] sm:$0xff]  }
 0x213   : > { %4501 = vmatmul.mubr.bf16.gmra.mrb[44].mxu1 %v13727_v30  ;;  %v11884_v30 = vld [vmem:[%s15047_s5 + $0x330] sm:$0xff]  }
 0x214   : > { %11241 = vmatpush3.bf16.msra.mxu1 %v11880_v50  ;;  %5352 = vmatprep.mubr.bf16.mxu1 %v5173_v56  ;;  %v5866_v50 = vcombine.high %v10747_v46, %v10747_v46  ;;  %v5891_v56 = vshll.u32 %v5842_v49, 16 }
 0x215   : > { %11242 = vmatprep.subr.bf16.mxu1 %v11881_v20  ;;  %v11897_v20 = vld [vmem:[%s15047_s5 + $0x468] sm:$0xff]  }
 0x216   : > { %v5893_v43 = vsel %vm12572_vm11, %v5886_v62, %v5891_v56 }
 0x218   : > { %11243 = vmatpush3.bf16.msra.mxu1 %v11882_v52  ;;  %v5913_v52 = vshrl.u32 %v10747_v46, 16  ;;  %v15171_v46 = vmov 0  }
 0x219   : > { %11244 = vmatprep.subr.bf16.mxu1 %v11883_v60  ;;  %v5918_v60 = vshll.u32 %v5866_v50, 16 }
 0x21b   : > { %v5920_v29 = vsel %vm12572_vm11, %v5913_v52, %v5918_v60 }
 0x21c   : > { %11245 = vmatpush3.bf16.msra.mxu1 %v11884_v30  ;;  %v11899_v30 = vld [vmem:[%s15047_s5 + $0x470] sm:$0xff]  }
 0x21d   : > { %11246 = vmatprep.subr.bf16.mxu1 %v11885_v54  ;;  %v5895_v54 = vshrl.u32 %v10745_v24, 16 }
 0x21f   : > { %v5902_v45 = vsel %vm12572_vm11, %v5895_v54, %v5900_v44 }
 0x220   : > { %11247 = vmatpush3.bf16.msra.mxu1 %v11886_v27  ;;  %v5873_v27 = vshll.u32 %v5826_v57, 16  ;;  %v5959_v55 = vcombine.low %v5893_v43, %v5902_v45 }
 0x221   : > { %11300 = vmatprep.subr.bf16.mxu1 %v11887_v38  ;;  %v5882_v38 = vshll.u32 %v5834_v35, 16 }
 0x222   : > { %v5875_v5 = vsel %vm12572_vm11, %v5868_v32, %v5873_v27  ;;  %v5974_v58 = vrot.slane %v5959_v55, %v12567_v36 }
 0x223   : > { %5353 = vmatmul.mubr.bf16.vlgmr.msra.gmra.mrb[48].mxu1 %v5169_v47 }
 0x224   : > { %5360 = vmatprep.mubr.bf16.mxu1 %v5181_v14  ;;  %11301 = vmatpush3.bf16.msra.mxu1 %v11888_v63  ;;  %v5877_v63 = vshrl.u32 %v10743_v40, 16  ;;  %v5943_v14 = vcombine.high %v13640_v23, %v13640_v23 }
 0x225   : > { %11302 = vmatprep.subr.bf16.mxu1 %v11889_v51  ;;  %v11902_v51 = vld [vmem:[%s15047_s5 + $0x438] sm:$0xff]  }
 0x226   : > { %v5884_v33 = vsel %vm12572_vm11, %v5877_v63, %v5882_v38 }
 0x227   : > { %v5958_v1 = vcombine.low %v5875_v5, %v5884_v33 }
 0x228   : > { %11303 = vmatpush3.bf16.msra.mxu1 %v11890_v21 }
 0x229   : > { %11304 = vmatprep.subr.bf16.mxu1 %v11891_v16  ;;  %v5967_v26 = vrot.slane %v5958_v1, %v12567_v36  ;;  %v5957_v16 = vrot.slane %v5943_v14, %v12567_v36 }
 0x22b   : > { %5361 = vmatmul.mubr.bf16.gmra.mrb[52].mxu1 %v5177_v17  ;;  %v5998_v2 = vrot.slane %v5967_v26, %v12567_v36 }
 0x22c   : > { %5368 = vmatprep.mubr.bf16.mxu1 %v5189_v53  ;;  %11305 = vmatpush3.bf16.msra.mxu1 %v11892_v31 }
 0x22d   : > { %11306 = vmatprep.subr.bf16.mxu1 %v11893_v34  ;;  %v5982_v34 = vcombine.low %v5967_v26, %v5967_v26 }
 0x230   : > { %11307 = vmatpush3.bf16.msra.mxu1 %v11894_v0 }
 0x231   : > { %11308 = vmatprep.subr.bf16.mxu1 %v11895_v41 }
 0x233   : > { %5369 = vmatmul.mubr.bf16.gmra.mrb[56].mxu1 %v5185_v42 }
 0x234   : > { %11309 = vmatpush3.bf16.msra.mxu1 %v11896_v6  ;;  %6200 = vmatprep.mubr.bf16.mxu1 %v13764_v15  ;;  %v5911_v15 = vsel %vm12572_vm11, %v5904_v19, %v5909_v4 }
 0x235   : > { %11310 = vmatprep.subr.bf16.mxu1 %v11897_v20  ;;  %v5960_v13 = vcombine.low %v5911_v15, %v5920_v29 }
 0x237   : > { %v5981_v47 = vrot.slane %v5960_v13, %v12567_v36 }
 0x238   : > { %11311 = vmatpush3.bf16.msra.mxu1 %v11898_v9 }
 0x239   : > { %11312 = vmatprep.subr.bf16.mxu1 %v11899_v30  ;;  %v5984_v28 = vcombine.high %v5974_v58, %v5981_v47  ;;  %v5983_v22 = vcombine.low %v5974_v58, %v5981_v47 }
 0x23b   : > { %v6012_v21 = vrot.slane %v5984_v28, %v12567_v36  ;;  %v6005_v37 = vrot.slane %v5983_v22, %v12567_v36 }
 0x23c   : > { %11313 = vmatpush3.bf16.msra.mxu1 %v11900_v11 }
 0x23d   : > { %11314 = vmatprep.subr.bf16.mxu1 %v11901_v18  ;;  %v6014_v31 = vcombine.low %v5998_v2, %v6012_v21 }
 0x240   : > { %11315 = vmatpush3.bf16.msra.mxu1 %v11902_v51 }
 0x243   : > { %6201 = vmatmul.mubr.bf16.vlgmr.msra.gmra.mrb[60].mxu1 %v13773_v25  ;;  %v6037_v25 = vsel %vm786_vm0, %v5957_v16, %v6014_v31 }
 0x244   : > { %6208 = vmatprep.mubr.bf16.mxu1 %v13794_v61  ;;  %v5991_v61 = vrot.slane %v5982_v34, %v12567_v36 }
 0x246   : > { %v6013_v17 = vcombine.low %v5991_v61, %v6005_v37 }
 0x248   : > { %v6033_v12 = vsel %vm786_vm0, %v5950_v7, %v6013_v17 }
 0x24b   : > { %6209 = vmatmul.mubr.bf16.gmra.mrb[64].mxu1 %v13798_v8 }
 0x24c   : > { %6216 = vmatprep.mubr.bf16.mxu1 %v6037_v25 }
 0x253   : > { %6217 = vmatmul.mubr.bf16.gmra.mrb[68].mxu1 %v6033_v12  ;;  %v11146_v53 = vpop.f32.mrb[48].mxu0 }
 0x254   : > { %6646 = vmatprep.mubr.bf16.mxu1 %v15171_v46  ;;  %v11147_v0 = vpop.f32.mrb[49].mxu0 }
 0x255   : > { %v13978_v48 = vadd.f32 %v11147_v0, %v11146_v53  ;;  %v11149_v8 = vpop.f32.mrb[50].mxu0 }
 0x256   : > { %v11150_v41 = vpop.f32.mrb[51].mxu0 }
 0x257   : > { %v13980_v24 = vadd.f32 %v11150_v41, %v11149_v8 }
 0x261   : > { %v11044_v49 = vpop.f32.mrb[0].mxu1 }
 0x262   : > { %v11045_v10 = vpop.f32.mrb[1].mxu1 }
 0x263   : > { %v11046_v50 = vadd.f32 %v11045_v10, %v11044_v49  ;;  %v11047_v23 = vpop.f32.mrb[2].mxu1 }
 0x264   : > { %v11048_v6 = vpop.f32.mrb[3].mxu1 }
 0x265   : > { %v11152_v59 = vpop.f32.mrb[52].mxu0  ;;  %v11049_v3 = vadd.f32 %v11048_v6, %v11047_v23 }
 0x266   : > { %v11153_v42 = vpop.f32.mrb[53].mxu0 }
 0x267   : > { %v13982_v20 = vadd.f32 %v11153_v42, %v11152_v59  ;;  %v11155_v40 = vpop.f32.mrb[54].mxu0 }
 0x268   : > { %v11156_v56 = vpop.f32.mrb[55].mxu0 }
 0x269   : > { %v13984_v4 = vadd.f32 %v11156_v56, %v11155_v40 }
 0x26e   : > { %v11158_v52 = vpop.f32.mrb[56].mxu0 }
 0x26f   : > { %v11159_v60 = vpop.f32.mrb[57].mxu0 }
 0x270   : > { %v13986_v62 = vadd.f32 %v11159_v60, %v11158_v52  ;;  %v11161_v9 = vpop.f32.mrb[58].mxu0 }
 0x271   : > { %v11162_v57 = vpop.f32.mrb[59].mxu0 }
 0x272   : > { %v13988_v35 = vadd.f32 %v11162_v57, %v11161_v9 }
 0x277   : > { %v11050_v44 = vpop.f32.mrb[4].mxu1 }
 0x278   : > { %v11051_v19 = vpop.f32.mrb[5].mxu1 }
 0x279   : > { %v11052_v30 = vadd.f32 %v11051_v19, %v11050_v44  ;;  %v11053_v43 = vpop.f32.mrb[6].mxu1 }
 0x27a   : > { %v11054_v54 = vpop.f32.mrb[7].mxu1 }
 0x27b   : > { %v11055_v15 = vadd.f32 %v11054_v54, %v11053_v43 }
 0x27f   : > { %v11056_v29 = vpop.f32.mrb[8].mxu1 }
 0x280   : > { %v11057_v11 = vpop.f32.mrb[9].mxu1 }
 0x281   : > { %v11214_v27 = vpop.f32.mrb[60].mxu0  ;;  %v11058_v38 = vadd.f32 %v11057_v11, %v11056_v29  ;;  %v11059_v45 = vpop.f32.mrb[10].mxu1 }
 0x282   : > { %v11215_v18 = vpop.f32.mrb[61].mxu0  ;;  %v11060_v55 = vpop.f32.mrb[11].mxu1 }
 0x283   : > { %v13990_v13 = vadd.f32 %v11215_v18, %v11214_v27  ;;  %v11217_v32 = vpop.f32.mrb[62].mxu0  ;;  %v11061_v63 = vadd.f32 %v11060_v55, %v11059_v45  ;;  %v12099_v18 = vmov 0.0  }
 0x284   : > { %v11218_v51 = vpop.f32.mrb[63].mxu0  ;;  %11441 = vmatprep.subr.bf16.mxu0 %v12099_v18  ;;  %11443 = vmatprep.mubr.msk.bf16.mxu0 %vm12100_vm7, %v12099_v18 }
 0x285   : > { %v13992_v5 = vadd.f32 %v11218_v51, %v11217_v32 }
 0x28f   : > { %v11220_v33 = vpop.f32.mrb[64].mxu0 }
 0x290   : > { %v11221_v58 = vpop.f32.mrb[65].mxu0 }
 0x291   : > { %v13994_v47 = vadd.f32 %v11221_v58, %v11220_v33  ;;  %v11223_v1 = vpop.f32.mrb[66].mxu0 }
 0x292   : > { %v11224_v28 = vpop.f32.mrb[67].mxu0 }
 0x293   : > { %v13996_v14 = vadd.f32 %v11224_v28, %v11223_v1 }
 0x296   : > { %v11078_v26 = vpop.f32.mrb[12].mxu1 }
 0x297   : > { %v11079_v21 = vpop.f32.mrb[13].mxu1 }
 0x298   : > { %v11080_v16 = vadd.f32 %v11079_v21, %v11078_v26  ;;  %v11081_v2 = vpop.f32.mrb[14].mxu1 }
 0x299   : > { %v11082_v22 = vpop.f32.mrb[15].mxu1 }
 0x29a   : > { %v3003_v31 = vadd.f32 %v11080_v16, %v11046_v50  ;;  %v11083_v34 = vadd.f32 %v11082_v22, %v11081_v2 }
 0x29c   : > { %v3006_v25 = vadd.f32 %v11083_v34, %v11049_v3  ;;  %v11226_v37 = vpop.f32.mrb[68].mxu0 }
 0x29d   : > { %v11227_v7 = vpop.f32.mrb[69].mxu0 }
 0x29e   : > { %v13998_v61 = vadd.f32 %v11227_v7, %v11226_v37  ;;  %v11084_v17 = vpop.f32.mrb[16].mxu1  ;;  %v11229_v12 = vpop.f32.mrb[70].mxu0 }
 0x29f   : > { %v11085_v53 = vpop.f32.mrb[17].mxu1  ;;  %v11230_v46 = vpop.f32.mrb[71].mxu0 }
 0x2a0   : > { %v11086_v0 = vadd.f32 %v11085_v53, %v11084_v17  ;;  %v14000_v8 = vadd.f32 %v11230_v46, %v11229_v12  ;;  %v11087_v41 = vpop.f32.mrb[18].mxu1  ;;  %v6286_v46 = vld [vmem:[%s15051_s9] sm:$0xff] }
 0x2a1   : > { %v11088_v49 = vpop.f32.mrb[19].mxu1  ;;  %6290 = vperm.xlu0 %11659, %v6286_v46  }
 0x2a2   : > { %v3011_v10 = vadd.f32 %v11086_v0, %v11052_v30  ;;  %v11089_v23 = vadd.f32 %v11088_v49, %v11087_v41 }
 0x2a4   : > { %v3014_v6 = vadd.f32 %v11089_v23, %v11055_v15  ;;  %v11282_v59 = vpop.f32.mrb[72].mxu0 }
 0x2a5   : > { %v11283_v50 = vpop.f32.mrb[73].mxu0 }
 0x2a6   : > { %v11090_v42 = vpop.f32.mrb[20].mxu1  ;;  %v14002_v3 = vadd.f32 %v11283_v50, %v11282_v59  ;;  %v11285_v40 = vpop.f32.mrb[74].mxu0 }
 0x2a7   : > { %v11091_v56 = vpop.f32.mrb[21].mxu1  ;;  %v11286_v52 = vpop.f32.mrb[75].mxu0 }
 0x2a8   : > { %v11092_v60 = vadd.f32 %v11091_v56, %v11090_v42  ;;  %v11093_v9 = vpop.f32.mrb[22].mxu1  ;;  %v14004_v57 = vadd.f32 %v11286_v52, %v11285_v40 }
 0x2a9   : > { %v11094_v44 = vpop.f32.mrb[23].mxu1 }
 0x2aa   : > { %v3019_v19 = vadd.f32 %v11092_v60, %v11058_v38  ;;  %v11095_v43 = vadd.f32 %v11094_v44, %v11093_v9 }
 0x2ac   : > { %v3022_v54 = vadd.f32 %v11095_v43, %v11061_v63  ;;  %v11288_v29 = vpop.f32.mrb[76].mxu0 }
 0x2ad   : > { %v11289_v30 = vpop.f32.mrb[77].mxu0 }
 0x2ae   : > { %v14006_v11 = vadd.f32 %v11289_v30, %v11288_v29  ;;  %v11291_v15 = vpop.f32.mrb[78].mxu0 }
 0x2af   : > { %v11292_v27 = vpop.f32.mrb[79].mxu0 }
 0x2b0   : > { %v14008_v45 = vadd.f32 %v11292_v27, %v11291_v15 }
 0x2b6   : > { %v11112_v55 = vpop.f32.mrb[24].mxu1 }
 0x2b7   : > { %v11113_v32 = vpop.f32.mrb[25].mxu1 }
 0x2b8   : > { %v11114_v51 = vadd.f32 %v11113_v32, %v11112_v55  ;;  %v11115_v33 = vpop.f32.mrb[26].mxu1  ;;  %v11294_v58 = vpop.f32.mrb[80].mxu0 }
 0x2b9   : > { %v11116_v1 = vpop.f32.mrb[27].mxu1  ;;  %v11295_v38 = vpop.f32.mrb[81].mxu0 }
 0x2ba   : > { %v3643_v28 = vadd.f32 %v11114_v51, %v3003_v31  ;;  %v11117_v63 = vadd.f32 %v11116_v1, %v11115_v33  ;;  %v14011_v26 = vadd.f32 %v11295_v38, %v11294_v58  ;;  %v11297_v21 = vpop.f32.mrb[82].mxu0 }
 0x2bb   : > { %v11298_v16 = vpop.f32.mrb[83].mxu0 }
 0x2bc   : > { %v3644_v2 = vadd.f32 %v11117_v63, %v3006_v25  ;;  %v14013_v22 = vadd.f32 %v11298_v16, %v11297_v21  ;;  %v4085_v34 = vadd.f32 %v13978_v48, %v3643_v28  ;;  %v6287_v48 = vld [vmem:[%s15051_s9 + $0x8] sm:$0xf] }
 0x2bd   : > { %6295 = vperm.xlu0 %11659, %v6287_v48  }
 0x2be   : > { %v11118_v37 = vpop.f32.mrb[28].mxu1  ;;  %v4086_v7 = vadd.f32 %v13980_v24, %v3644_v2 }
 0x2bf   : > { %v11119_v17 = vpop.f32.mrb[29].mxu1 }
 0x2c0   : > { %v11120_v12 = vadd.f32 %v11119_v17, %v11118_v37  ;;  %v11121_v31 = vpop.f32.mrb[30].mxu1 }
 0x2c1   : > { %v11122_v53 = vpop.f32.mrb[31].mxu1 }
 0x2c2   : > { %v3645_v25 = vadd.f32 %v11120_v12, %v3011_v10  ;;  %v11123_v0 = vadd.f32 %v11122_v53, %v11121_v31 }
 0x2c4   : > { %v3646_v24 = vadd.f32 %v11123_v0, %v3014_v6  ;;  %v4087_v41 = vadd.f32 %v13982_v20, %v3645_v25 }
 0x2c6   : > { %v11124_v49 = vpop.f32.mrb[32].mxu1  ;;  %v4088_v23 = vadd.f32 %v13984_v4, %v3646_v24 }
 0x2c7   : > { %v11125_v59 = vpop.f32.mrb[33].mxu1 }
 0x2c8   : > { %v11126_v50 = vadd.f32 %v11125_v59, %v11124_v49  ;;  %v11127_v42 = vpop.f32.mrb[34].mxu1 }
 0x2c9   : > { %v11128_v40 = vpop.f32.mrb[35].mxu1 }
 0x2ca   : > { %v3647_v56 = vadd.f32 %v11126_v50, %v3019_v19  ;;  %v11129_v52 = vadd.f32 %v11128_v40, %v11127_v42 }
 0x2cc   : > { %v3648_v10 = vadd.f32 %v11129_v52, %v3022_v54  ;;  %v4089_v60 = vadd.f32 %v13986_v62, %v3647_v56 }
 0x2ce   : > { %v4090_v9 = vadd.f32 %v13988_v35, %v3648_v10 }
 0x2d6   : > { %v11180_v44 = vpop.f32.mrb[36].mxu1 }
 0x2d7   : > { %v11181_v43 = vpop.f32.mrb[37].mxu1 }
 0x2d8   : > { %v11182_v6 = vadd.f32 %v11181_v43, %v11180_v44  ;;  %v11183_v29 = vpop.f32.mrb[38].mxu1 }
 0x2d9   : > { %v11184_v20 = vpop.f32.mrb[39].mxu1 }
 0x2da   : > { %v4509_v30 = vadd.f32 %v11182_v6, %v4085_v34  ;;  %v11185_v15 = vadd.f32 %v11184_v20, %v11183_v29 }
 0x2dc   : > { %v4510_v4 = vadd.f32 %v11185_v15, %v4086_v7  ;;  %v4933_v27 = vadd.f32 %v13990_v13, %v4509_v30 }
 0x2de   : > { %v11186_v55 = vpop.f32.mrb[40].mxu1  ;;  %v4934_v32 = vadd.f32 %v13992_v5, %v4510_v4 }
 0x2df   : > { %v11187_v19 = vpop.f32.mrb[41].mxu1 }
 0x2e0   : > { %v11188_v51 = vadd.f32 %v11187_v19, %v11186_v55  ;;  %v11189_v54 = vpop.f32.mrb[42].mxu1 }
 0x2e1   : > { %v11190_v33 = vpop.f32.mrb[43].mxu1 }
 0x2e2   : > { %v4511_v62 = vadd.f32 %v11188_v51, %v4087_v41  ;;  %v11191_v58 = vadd.f32 %v11190_v33, %v11189_v54 }
 0x2e4   : > { %v4512_v35 = vadd.f32 %v11191_v58, %v4088_v23  ;;  %v4935_v1 = vadd.f32 %v13994_v47, %v4511_v62 }
 0x2e6   : > { %v11192_v38 = vpop.f32.mrb[44].mxu1  ;;  %v4936_v28 = vadd.f32 %v13996_v14, %v4512_v35 }
 0x2e7   : > { %v11193_v63 = vpop.f32.mrb[45].mxu1 }
 0x2e8   : > { %v11194_v21 = vadd.f32 %v11193_v63, %v11192_v38  ;;  %v11195_v16 = vpop.f32.mrb[46].mxu1 }
 0x2e9   : > { %v11196_v2 = vpop.f32.mrb[47].mxu1 }
 0x2ea   : > { %v4513_v13 = vadd.f32 %v11194_v21, %v4089_v60  ;;  %v11197_v34 = vadd.f32 %v11196_v2, %v11195_v16 }
 0x2ec   : > { %v4514_v37 = vadd.f32 %v11197_v34, %v4090_v9  ;;  %v4937_v5 = vadd.f32 %v13998_v61, %v4513_v13 }
 0x2ee   : > { %v4938_v7 = vadd.f32 %v14000_v8, %v4514_v37 }
 0x2f6   : > { %v11248_v17 = vpop.f32.mrb[48].mxu1 }
 0x2f7   : > { %v11249_v12 = vpop.f32.mrb[49].mxu1 }
 0x2f8   : > { %v11250_v31 = vadd.f32 %v11249_v12, %v11248_v17  ;;  %v11251_v53 = vpop.f32.mrb[50].mxu1 }
 0x2f9   : > { %v11252_v46 = vpop.f32.mrb[51].mxu1 }
 0x2fa   : > { %v5377_v47 = vadd.f32 %v11250_v31, %v4933_v27  ;;  %v11253_v25 = vadd.f32 %v11252_v46, %v11251_v53 }
 0x2fc   : > { %v5378_v0 = vadd.f32 %v11253_v25, %v4934_v32  ;;  %v5801_v14 = vadd.f32 %v14002_v3, %v5377_v47 }
 0x2fe   : > { %v11254_v48 = vpop.f32.mrb[52].mxu1  ;;  %v5802_v24 = vadd.f32 %v14004_v57, %v5378_v0 }
 0x2ff   : > { %v11255_v41 = vpop.f32.mrb[53].mxu1 }
 0x300   : > { %v11256_v49 = vadd.f32 %v11255_v41, %v11254_v48  ;;  %v11257_v23 = vpop.f32.mrb[54].mxu1 }
 0x301   : > { %v11258_v59 = vpop.f32.mrb[55].mxu1 }
 0x302   : > { %v5379_v61 = vadd.f32 %v11256_v49, %v4935_v1  ;;  %v11259_v50 = vadd.f32 %v11258_v59, %v11257_v23 }
 0x304   : > { %v5380_v8 = vadd.f32 %v11259_v50, %v4936_v28  ;;  %v5803_v42 = vadd.f32 %v14006_v11, %v5379_v61 }
 0x306   : > { %v11260_v40 = vpop.f32.mrb[56].mxu1  ;;  %v5804_v56 = vadd.f32 %v14008_v45, %v5380_v8  ;;  %v10802_v45 = vld [vmem:[%s15048_s6] ss:$0 sm:$0xff] }
 0x307   : > { %v11261_v52 = vpop.f32.mrb[57].mxu1 }
 0x308   : > { %v11262_v10 = vadd.f32 %v11261_v52, %v11260_v40  ;;  %v11263_v60 = vpop.f32.mrb[58].mxu1 }
 0x309   : > { %v11264_v9 = vpop.f32.mrb[59].mxu1 }
 0x30a   : > { %v5381_v3 = vadd.f32 %v11262_v10, %v4937_v5  ;;  %v11265_v44 = vadd.f32 %v11264_v9, %v11263_v60 }
 0x30c   : > { %v5382_v43 = vadd.f32 %v11265_v44, %v4938_v7  ;;  %v5805_v57 = vadd.f32 %v14011_v26, %v5381_v3  ;;  %v10803_v26 = vld [vmem:[%s15049_s7] ss:$0 sm:$0xff] }
 0x30e   : > { %v5806_v6 = vadd.f32 %v14013_v22, %v5382_v43  ;;  %v11903_v43 = vld [vmem:[%s15050_s8] sm:$0x3f]  }
 0x316   : > { %v11316_v29 = vpop.f32.mrb[60].mxu1 }
 0x317   : > { %v11317_v20 = vpop.f32.mrb[61].mxu1 }
 0x318   : > { %v11318_v30 = vadd.f32 %v11317_v20, %v11316_v29  ;;  %v11319_v15 = vpop.f32.mrb[62].mxu1  ;;  %v6351_v29 = vld [vmem:[#allocation3] sm:$0x3]  ;;  %v6354_v20 = vld [vmem:[#allocation3 + $0x2] sm:$0x3] }
 0x319   : > { %v11320_v4 = vpop.f32.mrb[63].mxu1 }
 0x31a   : > { %v6225_v11 = vadd.f32 %v11318_v30, %v5801_v14  ;;  %v11321_v27 = vadd.f32 %v11320_v4, %v11319_v15  ;;  %v6357_v30 = vld [vmem:[#allocation3 + $0x4] sm:$0x3]  ;;  %v6352_v4 = vsel %vm12284_vm5, 0, %v6351_v29 }
 0x31b   : > { %6353 = vst [vmem:[#allocation3] sm:$0x3] %v6352_v4 }
 0x31c   : > { %v6226_v55 = vadd.f32 %v11321_v27, %v5802_v24  ;;  %v6238_v1 = vmul.f32 %v10802_v45, %v6225_v11  ;;  %v6355_v11 = vsel %vm12284_vm5, 0, %v6354_v20  ;;  %v6358_v27 = vsel %vm12284_vm5, 0, %v6357_v30 }
 0x31d   : > { %6356 = vst [vmem:[#allocation3 + $0x2] sm:$0x3] %v6355_v11  ;;  %6359 = vst [vmem:[#allocation3 + $0x4] sm:$0x3] %v6358_v27 }
 0x31e   : > { %v6239_v32 = vmul.f32 %v10802_v45, %v6226_v55  ;;  %v11322_v19 = vpop.f32.mrb[64].mxu1  ;;  %v6251_v2 = vadd.f32 %v10803_v26, %v6238_v1  ;;  %v6360_v55 = vld [vmem:[#allocation3 + $0x6] sm:$0x3]  ;;  %v11919_v1 = vld [vmem:[%s15052_s10 + $0x7c] ss:$20 sps:$4 sm:$0xff]  }
 0x31f   : > { %v11323_v51 = vpop.f32.mrb[65].mxu1 }
 0x320   : > { %v11324_v54 = vadd.f32 %v11323_v51, %v11322_v19  ;;  %v11325_v33 = vpop.f32.mrb[66].mxu1  ;;  %v6252_v62 = vadd.f32 %v10803_v26, %v6239_v32  ;;  %v6257_v46 = vmax.f32 %v6251_v2, 0.0  ;;  %v6363_v32 = vld [vmem:[#allocation3 + $0x8] sm:$0x3]  ;;  %v6366_v19 = vld [vmem:[#allocation3 + $0xa] sm:$0x3] }
 0x321   : > { %v11326_v22 = vpop.f32.mrb[67].mxu1  ;;  %v6364_v51 = vsel %vm12284_vm5, 0, %v6363_v32  ;;  %v11929_v2 = vld [vmem:[%s15052_s10 + $0xcc] ss:$20 sps:$4 sm:$0xff]  }
 0x322   : > { %v6227_v58 = vadd.f32 %v11324_v54, %v5803_v42  ;;  %v11327_v35 = vadd.f32 %v11326_v22, %v11325_v33  ;;  %v6258_v63 = vmax.f32 %v6252_v62, 0.0  ;;  %v6367_v54 = vsel %vm12284_vm5, 0, %v6366_v19  ;;  %6365 = vst [vmem:[#allocation3 + $0x8] sm:$0x3] %v6364_v51  ;;  %v11907_v33 = vld [vmem:[%s15052_s10 + $0x28] ss:$20 sps:$4 sm:$0xff]  }
 0x323   : > { %6368 = vst [vmem:[#allocation3 + $0xa] sm:$0x3] %v6367_v54  ;;  %v11910_v22 = vld [vmem:[%s15052_s10 + $0x8] ss:$20 sps:$4 sm:$0xff]  }
 0x324   : > { %v6240_v38 = vmul.f32 %v10802_v45, %v6227_v58  ;;  %v6228_v28 = vadd.f32 %v11327_v35, %v5804_v56  ;;  %v6265_v17 = vrot.slane %v6258_v63, 4  ;;  %v11914_v62 = vld [vmem:[%s15052_s10 + $0x54] ss:$20 sps:$4 sm:$0xff]   ;;  %v11915_v58 = vld [vmem:[%s15052_s10 + $0x30] ss:$20 sps:$4 sm:$0xff]  }
 0x325   : > { %v11912_v35 = vld [vmem:[%s15052_s10 + $0x50] ss:$20 sps:$4 sm:$0xff]  }
 0x326   : > { %v6253_v21 = vadd.f32 %v10803_v26, %v6240_v38  ;;  %v11328_v16 = vpop.f32.mrb[68].mxu1  ;;  %v6241_v48 = vmul.f32 %v10802_v45, %v6228_v28  ;;  %v11920_v38 = vld [vmem:[%s15052_s10 + $0x58] ss:$20 sps:$4 sm:$0xff]  }
 0x327   : > { %v11329_v13 = vpop.f32.mrb[69].mxu1  ;;  %v11917_v28 = vld [vmem:[%s15052_s10 + $0x78] ss:$20 sps:$4 sm:$0xff]  }
 0x328   : > { %v6259_v34 = vmax.f32 %v6253_v21, 0.0  ;;  %v11330_v37 = vadd.f32 %v11329_v13, %v11328_v16  ;;  %v11331_v5 = vpop.f32.mrb[70].mxu1  ;;  %v6254_v61 = vadd.f32 %v10803_v26, %v6241_v48  ;;  %v11925_v21 = vld [vmem:[%s15052_s10 + $0x80] ss:$20 sps:$4 sm:$0xff]   ;;  %v11930_v13 = vld [vmem:[%s15052_s10 + $0xa8] ss:$20 sps:$4 sm:$0xff]  }
 0x329   : > { %v11332_v7 = vpop.f32.mrb[71].mxu1  ;;  %v11922_v16 = vld [vmem:[%s15052_s10 + $0xa0] ss:$20 sps:$4 sm:$0xff]  }
 0x32a   : > { %v6266_v12 = vrot.slane %v6259_v34, 4  ;;  %v6229_v31 = vadd.f32 %v11330_v37, %v5805_v57  ;;  %v11333_v53 = vadd.f32 %v11332_v7, %v11331_v5  ;;  %v6260_v40 = vmax.f32 %v6254_v61, 0.0  ;;  %v11904_v57 = vld [vmem:[%s15052_s10] ss:$20 sps:$4 sm:$0xff]   ;;  %v11927_v34 = vld [vmem:[%s15052_s10 + $0xc8] ss:$20 sps:$4 sm:$0xff]  }
 0x32b   : > { %v11934_v37 = vld [vmem:[%s15052_s10 + $0xf4] ss:$20 sps:$4 sm:$0xff]   ;;  %v11935_v5 = vld [vmem:[%s15052_s10 + $0xd0] ss:$20 sps:$4 sm:$0xff]  }
 0x32c   : > { %v6242_v47 = vmul.f32 %v10802_v45, %v6229_v31  ;;  %v6230_v25 = vadd.f32 %v11333_v53, %v5806_v6  ;;  %v6267_v0 = vsel %vm2190_vm4, %v6265_v17, %v6266_v12  ;;  %v6271_v14 = vmax.f32 %v6258_v63, %v6266_v12  ;;  %v11906_v6 = vld [vmem:[%s15052_s10 + $0x4] ss:$20 sps:$4 sm:$0xff]   ;;  %v11939_v17 = vld [vmem:[%s15052_s10 + $0x11c] ss:$20 sps:$4 sm:$0xff]   ;;  %v11943_v53 = vld [vmem:[%s15052_s10 + $0x120] ss:$20 sps:$4 sm:$0xff]  }
 0x32d   : > { %v6270_v24 = vmax.f32 %v6257_v46, %v6267_v0  ;;  %6614 = vmatprep.subr.bf16.mxu1 %v11906_v6  ;;  %v11924_v63 = vld [vmem:[%s15052_s10 + $0xa4] ss:$20 sps:$4 sm:$0xff]   ;;  %v6369_v46 = vld [vmem:[#allocation3 + $0xc] sm:$0x3] }
 0x32e   : > { %v6255_v41 = vadd.f32 %v10803_v26, %v6242_v47  ;;  %v6243_v49 = vmul.f32 %v10802_v45, %v6230_v25  ;;  %6615 = vmatpush1.bf16.msra.mxu1 %v11904_v57  ;;  %v6361_v45 = vsel %vm12284_vm5, 0, %v6360_v55  ;;  %v11932_v7 = vld [vmem:[%s15052_s10 + $0xf0] ss:$20 sps:$4 sm:$0xff]   ;;  %v11940_v12 = vld [vmem:[%s15052_s10 + $0xf8] ss:$20 sps:$4 sm:$0xff]   ;;  %v6370_v47 = vsel %vm12284_vm5, 0, %v6369_v46  ;;  %v6291_v25 = vpop.permute.xlu0 %6290 }
 0x32f   : > { %6362 = vst [vmem:[#allocation3 + $0x6] sm:$0x3] %v6361_v45  ;;  %v11937_v31 = vld [vmem:[%s15052_s10 + $0x118] ss:$20 sps:$4 sm:$0xff]   ;;  %6371 = vst [vmem:[#allocation3 + $0xc] sm:$0x3] %v6370_v47 }
 0x330   : > { %v6261_v23 = vmax.f32 %v6255_v41, 0.0  ;;  %v6256_v59 = vadd.f32 %v10803_v26, %v6243_v49  ;;  %v11909_v26 = vld [vmem:[%s15052_s10 + $0x2c] ss:$20 sps:$4 sm:$0xff]   ;;  %vm7494_vm5 = vcmask 517120  }
 0x331   : > { %6616 = vmatprep.subr.bf16.mxu1 %v11909_v26  ;;  %vm14349_vm8 = vmand %vm7494_vm5, %vm1157_vm2  ;;  %vm7666_vm2 = vcmask 516096  }
 0x332   : > { %v6262_v50 = vmax.f32 %v6256_v59, 0.0  ;;  %v6274_v8 = vrot.slane %v6261_v23, 4  ;;  %6617 = vmatpush1.bf16.msra.mxu1 %v11907_v33 }
 0x333   : > { %6618 = vmatprep.subr.bf16.mxu1 %v11914_v62 }
 0x334   : > { %v6275_v42 = vrot.slane %v6262_v50, 4 }
 0x336   : > { %v6276_v56 = vsel %vm2190_vm4, %v6274_v8, %v6275_v42  ;;  %v6280_v52 = vmax.f32 %v6261_v23, %v6275_v42  ;;  %6619 = vmatpush1.bf16.msra.mxu1 %v11912_v35 }
 0x337   : > { %v6279_v10 = vmax.f32 %v6260_v40, %v6276_v56  ;;  %6620 = vmatprep.subr.bf16.mxu1 %v11919_v1 }
 0x338   : > { %v6282_v60 = vmax.f32 %v6271_v14, %v6280_v52 }
 0x339   : > { %v6281_v9 = vmax.f32 %v6270_v24, %v6279_v10 }
 0x33a   : > { %6621 = vmatpush1.bf16.msra.mxu1 %v11917_v28 }
 0x33b   : > { %v6285_v3 = vpack.c.bf16 %v6282_v60, %v6281_v9  ;;  %6622 = vmatprep.subr.bf16.mxu1 %v11924_v63 }
 0x33c   : > { %v6296_v48 = vpop.permute.xlu0 %6295 }
 0x33d   : > { %v6308_v44 = vsel %vm2181_vm3, %v6285_v3, 0 }
 0x33e   : > { %11442 = vmatpush3.bf16.msra.mxu0 %v6308_v44  ;;  %6623 = vmatpush1.bf16.msra.mxu1 %v11922_v16 }
 0x33f   : > { %11447 = vmatprep.subr.bf16.mxu0 %v12099_v18  ;;  %6624 = vmatprep.subr.bf16.mxu1 %v11929_v2 }
 0x341   : > { %11444 = vmatmul.mubr.msk.bf16.vlgmr.msra.gmra.mrb[84].mxu0 %vm6303_vm6, %v11903_v43 }
 0x342   : > { %11463 = vmatprep.mubr.msk.bf16.mxu0 %vm12100_vm7, %v12099_v18  ;;  %11448 = vmatpush3.bf16.msra.mxu0 %v11910_v22 }
 0x343   : > { %11449 = vmatprep.subr.bf16.mxu0 %v12099_v18  ;;  %6625 = vmatpush1.bf16.msra.mxu1 %v11927_v34 }
 0x344   : > { %6626 = vmatprep.subr.bf16.mxu1 %v11934_v37 }
 0x346   : > { %11450 = vmatpush3.bf16.msra.mxu0 %v11915_v58 }
 0x347   : > { %11451 = vmatprep.subr.bf16.mxu0 %v12099_v18  ;;  %6627 = vmatpush1.bf16.msra.mxu1 %v11932_v7 }
 0x348   : > { %6628 = vmatprep.subr.bf16.mxu1 %v11939_v17 }
 0x34a   : > { %11452 = vmatpush3.bf16.msra.mxu0 %v11920_v38 }
 0x34b   : > { %11453 = vmatprep.subr.bf16.mxu0 %v12099_v18  ;;  %6629 = vmatpush1.bf16.msra.mxu1 %v11937_v31 }
 0x34c   : > { %11467 = vmatprep.subr.bf16.mxu1 %v12099_v18 }
 0x34e   : > { %11454 = vmatpush3.bf16.msra.mxu0 %v11925_v21 }
 0x34f   : > { %11455 = vmatprep.subr.bf16.mxu0 %v12099_v18 }
 0x352   : > { %11456 = vmatpush3.bf16.msra.mxu0 %v11930_v13 }
 0x353   : > { %11457 = vmatprep.subr.bf16.mxu0 %v12099_v18 }
 0x356   : > { %11458 = vmatpush3.bf16.msra.mxu0 %v11935_v5 }
 0x357   : > { %11459 = vmatprep.subr.bf16.mxu0 %v12099_v18 }
 0x35a   : > { %11460 = vmatpush3.bf16.msra.mxu0 %v11940_v12 }
 0x35b   : > { %11461 = vmatprep.subr.bf16.mxu0 %v12099_v18 }
 0x35e   : > { %11462 = vmatpush3.bf16.msra.mxu0 %v11943_v53 }
 0x35f   : > { %11487 = vmatprep.subr.bf16.mxu0 %v12099_v18 }
 0x414   : > { %v6344_v0 = vpop.f32.mrb[84].mxu0 }
 0x415   : > { %v11445_v14 = vpop.f32.mrb[85].mxu0  ;;  %v6345_v41 = vadd.f32 %v6344_v0, %v6291_v25 }
 0x416   : > { %v6347_v24 = vpop.f32.mrb[86].mxu0 }
 0x417   : > { %v6348_v49 = vadd.f32 %v6347_v24, %v6296_v48  ;;  %v11446_v23 = vpop.f32.mrb[87].mxu0  ;;  %v11942_v24 = vld [vmem:[%s15052_s10 + $0xc] ss:$20 sps:$4 sm:$0xff]  }
 0x419   : > { %v6372_v59 = vpack.c.bf16 %v6348_v49, %v6345_v41  ;;  %v10806_v61 = vpack.c.bf16 %v6348_v49, %v6348_v49 }
 0x41b   : > { %v6381_v50 = vrot.slane %v6372_v59, %v12567_v36  ;;  %v6388_v8 = vrot.slane %v10806_v61, %v12567_v36 }
 0x41d   : > { %v6389_v42 = vcombine.high %v6381_v50, %v6381_v50  ;;  %v6390_v40 = vcombine.high %v6388_v8, %v6388_v8  ;;  %v6397_v56 = vrot.slane %v6381_v50, %v12567_v36  ;;  %10807 = vst.sshfl [vmem:[#allocation3] sm:$0x1 pattern:$0x73625140] %v6381_v50 }
 0x41e   : > { %10809 = vst.sshfl [vmem:[#allocation3 + $0x8] sm:$0x1 pattern:$0x73625140] %v6388_v8  ;;  %v11945_v8 = vld [vmem:[%s15052_s10 + $0x34] ss:$20 sps:$4 sm:$0xff]  }
 0x41f   : > { %v6411_v52 = vrot.slane %v6389_v42, %v12567_v36  ;;  %v6419_v10 = vcombine.high %v6397_v56, %v6397_v56  ;;  %10808 = vst.sshfl [vmem:[#allocation3 + $0x2] sm:$0x1 pattern:$0x73625140] %v6389_v42  ;;  %v11946_v56 = vld [vmem:[%s15052_s10 + $0x10] ss:$20 sps:$4 sm:$0xff]  }
 0x420   : > { %10810 = vst.sshfl [vmem:[#allocation3 + $0xa] sm:$0x1 pattern:$0x73625140] %v6390_v40 }
 0x421   : > { %v6420_v60 = vcombine.high %v6411_v52, %v6411_v52  ;;  %6429 = vst [vmem:[#allocation3 + $0x4] sm:$0x1] %v6419_v10  ;;  %v11947_v10 = vld [vmem:[%s15052_s10 + $0x5c] ss:$20 sps:$4 sm:$0xff]  }
 0x423   : > { %6430 = vst [vmem:[#allocation3 + $0x6] sm:$0x1] %v6420_v60  ;;  %v11948_v60 = vld [vmem:[%s15052_s10 + $0x38] ss:$20 sps:$4 sm:$0xff]  }
 0x424   : > { %v6481_v9 = vld [vmem:[#allocation3] sm:$0x1] }
 0x425   : > { %v10827_v3 = vld.sshfl [vmem:[#allocation3] sm:$0x11 pattern:$0x75316420]  ;;  %v6485_v43 = vld [vmem:[#allocation3 + $0x8] sm:$0x1] }
 0x426   : > { %v6482_v44 = vld [vmem:[#allocation3 + $0x2] sm:$0x1]  ;;  %v6680_v6 = vcombine.high %v10827_v3, %v10827_v3  ;;  %v10831_v27 = vld.sshfl [vmem:[#allocation3 + $0x8] sm:$0x11 pattern:$0x75316420] }
 0x427   : > { %v6486_v57 = vld [vmem:[#allocation3 + $0xa] sm:$0x1]  ;;  %v6493_v29 = vcombine.low %v6481_v9, %v6482_v44  ;;  %v10828_v30 = vld.sshfl [vmem:[#allocation3 + $0x2] sm:$0x11 pattern:$0x75316420]  ;;  %v6712_v33 = vcombine.high %v10831_v27, %v10831_v27 }
 0x428   : > { %v6495_v20 = vcombine.low %v6485_v43, %v6486_v57  ;;  %v6483_v15 = vld [vmem:[#allocation3 + $0x4] sm:$0x1]  ;;  %v6688_v11 = vcombine.high %v10828_v30, %v10828_v30  ;;  %v6722_v45 = vshrl.u32 %v10827_v3, 16  ;;  %v6727_v32 = vshll.u32 %v6680_v6, 16  ;;  %v11949_v9 = vld [vmem:[%s15052_s10 + $0x84] ss:$20 sps:$4 sm:$0xff]  }
 0x429   : > { %v10829_v4 = vld.sshfl [vmem:[#allocation3 + $0x4] sm:$0x11 pattern:$0x75316420]  ;;  %v6502_v51 = vrot.slane %v6493_v29, %v12567_v36  ;;  %v6731_v38 = vshrl.u32 %v10828_v30, 16  ;;  %v6758_v37 = vshrl.u32 %v10831_v27, 16 }
 0x42a   : > { %v6696_v55 = vcombine.high %v10829_v4, %v10829_v4  ;;  %v6484_v19 = vld [vmem:[#allocation3 + $0x6] sm:$0x1]  ;;  %v6516_v22 = vrot.slane %v6495_v20, %v12567_v36  ;;  %v10832_v62 = vld.sshfl [vmem:[#allocation3 + $0xa] sm:$0x11 pattern:$0x75316420]  ;;  %v6729_v35 = vsel %vm12572_vm11, %v6722_v45, %v6727_v32 }
 0x42b   : > { %v10830_v54 = vld.sshfl [vmem:[#allocation3 + $0x6] sm:$0x11 pattern:$0x75316420]  ;;  %v6494_v26 = vcombine.low %v6483_v15, %v6484_v19  ;;  %v6720_v1 = vcombine.high %v10832_v62, %v10832_v62  ;;  %v6736_v28 = vshll.u32 %v6688_v11, 16  ;;  %v6740_v63 = vshrl.u32 %v10829_v4, 16 }
 0x42c   : > { %v6704_v58 = vcombine.high %v10830_v54, %v10830_v54  ;;  %v6745_v16 = vshll.u32 %v6696_v55, 16  ;;  %v6749_v2 = vshrl.u32 %v10830_v54, 16  ;;  %v6763_v5 = vshll.u32 %v6712_v33, 16  ;;  %v11950_v3 = vld [vmem:[%s15052_s10 + $0x60] ss:$20 sps:$4 sm:$0xff]  }
 0x42d   : > { %v6509_v21 = vrot.slane %v6494_v26, %v12567_v36  ;;  %v14162_v34 = vsel %vm12572_vm11, %v6731_v38, %v6736_v28  ;;  %v6767_v7 = vshrl.u32 %v10832_v62, 16  ;;  %v6772_v53 = vshll.u32 %v6720_v1, 16  ;;  %v6920_v44 = vld [vmem:[#allocation3 + $0x6] sm:$0x1]  ;;  %v11951_v57 = vld [vmem:[%s15052_s10 + $0xac] ss:$20 sps:$4 sm:$0xff]  }
 0x42e   : > { %v6754_v13 = vshll.u32 %v6704_v58, 16  ;;  %v14166_v12 = vsel %vm12572_vm11, %v6740_v63, %v6745_v16  ;;  %v6775_v46 = vcombine.low %v6729_v35, %v14162_v34  ;;  %v6531_v0 = vrot.slane %v6516_v22, %v12567_v36  ;;  %v10860_v43 = vld.sshfl [vmem:[#allocation3 + $0xc] sm:$0x11 pattern:$0x75316420] }
 0x42f   : > { %v6517_v17 = vcombine.low %v6502_v51, %v6509_v21  ;;  %v14179_v14 = vsel %vm12572_vm11, %v6758_v37, %v6763_v5  ;;  %v14183_v48 = vsel %vm12572_vm11, %v6767_v7, %v6772_v53  ;;  %v6919_v6 = vld [vmem:[#allocation3 + $0x4] sm:$0x1]  ;;  %v6921_v29 = vld [vmem:[#allocation3 + $0x8] sm:$0x1]  ;;  %v11952_v20 = vld [vmem:[%s15052_s10 + $0x88] ss:$20 sps:$4 sm:$0xff]   ;;  %v7107_v15 = vcombine.high %v10860_v43, %v10860_v43 }
 0x430   : > { %v14170_v31 = vsel %vm12572_vm11, %v6749_v2, %v6754_v13  ;;  %v6777_v41 = vcombine.low %v14179_v14, %v14183_v48  ;;  %v6784_v49 = vrot.slane %v6775_v46, %v12567_v36  ;;  %v6931_v30 = vcombine.low %v6920_v44, %v6921_v29  ;;  %v6918_v4 = vld [vmem:[#allocation3 + $0x2] sm:$0x1]  ;;  %v11953_v27 = vld [vmem:[%s15052_s10 + $0xd4] ss:$20 sps:$4 sm:$0xff]   ;;  %v6922_v55 = vld [vmem:[#allocation3 + $0xa] sm:$0x1] }
 0x431   : > { %v6776_v47 = vcombine.low %v14166_v12, %v14170_v31  ;;  %v6524_v25 = vrot.slane %v6517_v17, %v12567_v36  ;;  %v6930_v11 = vcombine.low %v6918_v4, %v6919_v6  ;;  %v6923_v45 = vld [vmem:[#allocation3 + $0xc] sm:$0x1]  ;;  %v11954_v32 = vld [vmem:[%s15052_s10 + $0xb0] ss:$20 sps:$4 sm:$0xff]   ;;  %v7154_v51 = vshrl.u32 %v10860_v43, 16  ;;  %v11962_v46 = vld [vmem:[%s15054_s12 + $0x48] sm:$0xff]  }
 0x432   : > { %v6798_v61 = vrot.slane %v6777_v41, %v12567_v36  ;;  %v6946_v19 = vrot.slane %v6931_v30, %v12567_v36  ;;  %v7159_v54 = vshll.u32 %v7107_v15, 16  ;;  %v7163_v33 = vcombine.low %v14170_v31, %v14179_v14  ;;  %v11955_v62 = vld [vmem:[%s15052_s10 + $0xfc] ss:$20 sps:$4 sm:$0xff]   ;;  %v11956_v35 = vld [vmem:[%s15052_s10 + $0xd8] ss:$20 sps:$4 sm:$0xff]   ;;  %v11959_v37 = vld [vmem:[%s15054_s12 + $0x40] sm:$0xff]  }
 0x433   : > { %v6791_v23 = vrot.slane %v6776_v47, %v12567_v36  ;;  %v6532_v59 = vcombine.low %v6524_v25, %v6531_v0  ;;  %v6932_v26 = vcombine.low %v6922_v55, %v6923_v45  ;;  %v6939_v22 = vrot.slane %v6930_v11, %v12567_v36  ;;  %v11957_v21 = vld [vmem:[%s15052_s10 + $0x124] ss:$20 sps:$4 sm:$0xff]   ;;  %v11958_v13 = vld [vmem:[%s15052_s10 + $0x100] ss:$20 sps:$4 sm:$0xff]   ;;  %v11961_v53 = vld [vmem:[%s15052_s10 + $0x128] ss:$20 sps:$4 sm:$0xff]  }
 0x434   : > { %v6813_v40 = vrot.slane %v6798_v61, %v12567_v36  ;;  %v7162_v58 = vcombine.low %v14162_v34, %v14166_v12  ;;  %v7161_v38 = vsel %vm12572_vm11, %v7154_v51, %v7159_v54  ;;  %v7178_v28 = vrot.slane %v7163_v33, %v12567_v36  ;;  %v11960_v17 = vld [vmem:[%s15054_s12] sm:$0xff]   ;;  %v15173_v47 = vld [vmem:[#allocation8_spill] sm:$0xff]  ;;  %v11967_v61 = vld [vmem:[%s15054_s12 + $0x18] sm:$0xff]  }
 0x435   : > { %v6799_v50 = vcombine.low %v6784_v49, %v6791_v23  ;;  %6647 = vmatmul.mubr.bf16.vlgmr.msra.gmra.mrb[72].mxu1 %v6532_v59  ;;  %v6954_v1 = vcombine.low %v6939_v22, %v6946_v19  ;;  %v6953_v63 = vrot.slane %v6932_v26, %v12567_v36  ;;  %v7164_v16 = vcombine.low %v14183_v48, %v7161_v38  ;;  %v15174_v25 = vld [vmem:[#allocation10_spill] sm:$0xff]  ;;  %v11964_v41 = vld [vmem:[%s15054_s12 + $0x50] sm:$0xff]   ;;  %v15182_v4 = vld [vmem:[#allocation19_spill] sm:$0xff] }
 0x436   : > { %11468 = vmatpush3.bf16.msra.mxu1 %v11942_v24  ;;  %11483 = vmatprep.mubr.msk.bf16.mxu1 %vm12100_vm7, %v12099_v18  ;;  %v7171_v2 = vrot.slane %v7162_v58, %v12567_v36  ;;  %v1151_v0 = vpack.c.bf16 %v15174_v25, %v15173_v47  ;;  %v11963_v24 = vld [vmem:[%s15054_s12 + $0x8] sm:$0xff]   ;;  %v11965_v23 = vld [vmem:[%s15054_s12 + $0x10] sm:$0xff]   ;;  %v11966_v59 = vld [vmem:[%s15054_s12 + $0x58] sm:$0xff]  }
 0x437   : > { %v6806_v42 = vrot.slane %v6799_v50, %v12567_v36  ;;  %11469 = vmatprep.subr.bf16.mxu1 %v12099_v18  ;;  %v6961_v34 = vrot.slane %v6954_v1, %v12567_v36  ;;  %v6968_v7 = vrot.slane %v6953_v63, %v12567_v36  ;;  %v7185_v12 = vrot.slane %v7164_v16, %v12567_v36  ;;  %v11968_v50 = vld [vmem:[%s15054_s12 + $0x60] sm:$0xff]   ;;  %v15177_v43 = vld [vmem:[#allocation13_spill] sm:$0xff]  ;;  %v15179_v29 = vld [vmem:[#allocation12_spill] sm:$0xff] }
 0x438   : > { %v7186_v5 = vcombine.low %v7171_v2, %v7178_v28  ;;  %v15181_v15 = vld [vmem:[#allocation17_spill] sm:$0xff]  ;;  %v15184_v55 = vld [vmem:[#allocation18_spill] sm:$0xff]  ;;  %v7508_v1 = vld [vmem:[#allocation4 + $0x8] sm:$0x3] }
 0x439   : > { %v6814_v52 = vcombine.low %v6806_v42, %v6813_v40  ;;  %v6969_v31 = vcombine.low %v6961_v34, %v6968_v7  ;;  %v7200_v48 = vrot.slane %v7185_v12, %v12567_v36  ;;  %v11970_v42 = vld [vmem:[%s15054_s12 + $0x68] sm:$0xff]   ;;  %v1155_v11 = vpack.c.bf16 %v15182_v4, %v15181_v15  ;;  %v7496_v19 = vld [vmem:[#allocation4] sm:$0x3]  ;;  %v7499_v51 = vld [vmem:[#allocation4 + $0x2] sm:$0x3] }
 0x43a   : > { %11470 = vmatpush3.bf16.msra.mxu1 %v11945_v8  ;;  %v7193_v14 = vrot.slane %v7186_v5, %v12567_v36  ;;  %v11969_v8 = vld [vmem:[%s15054_s12 + $0x20] sm:$0xff]   ;;  %v11971_v40 = vld [vmem:[%s15054_s12 + $0x28] sm:$0xff]   ;;  %v7497_v22 = vsel %vm14349_vm8, 0, %v7496_v19  ;;  %v7509_v38 = vsel %vm14349_vm8, 0, %v7508_v1  ;;  %v7541_v16 = vld [vmem:[#allocation4 + $0x1e] sm:$0x3] }
 0x43b   : > { %11464 = vmatmul.mubr.bf16.vlgmr.msra.gmra.mrb[88].mxu0 %v6814_v52  ;;  %11471 = vmatprep.subr.bf16.mxu1 %v12099_v18  ;;  %v11973_v52 = vld [vmem:[%s15054_s12 + $0x30] sm:$0xff]   ;;  %v7502_v33 = vld [vmem:[#allocation4 + $0x4] sm:$0x3]  ;;  %v7505_v26 = vld [vmem:[#allocation4 + $0x6] sm:$0x3]  ;;  %v7542_v34 = vsel %vm14349_vm8, 0, %v7541_v16 }
 0x43c   : > { %11488 = vmatpush3.bf16.msra.mxu0 %v11946_v56  ;;  %11503 = vmatprep.mubr.msk.bf16.mxu0 %vm12100_vm7, %v12099_v18  ;;  %v7201_v49 = vcombine.low %v7193_v14, %v7200_v48  ;;  %v11972_v56 = vld [vmem:[%s15054_s12 + $0x70] sm:$0xff]   ;;  %v7503_v58 = vsel %vm14349_vm8, 0, %v7502_v33  ;;  %7498 = vst [vmem:[#allocation4] sm:$0x3] %v7497_v22  ;;  %v7511_v28 = vld [vmem:[#allocation4 + $0xa] sm:$0x3] }
 0x43d   : > { %11489 = vmatprep.subr.bf16.mxu0 %v12099_v18  ;;  %7504 = vst [vmem:[#allocation4 + $0x4] sm:$0x3] %v7503_v58  ;;  %7510 = vst [vmem:[#allocation4 + $0x8] sm:$0x3] %v7509_v38  ;;  %v7512_v63 = vsel %vm14349_vm8, 0, %v7511_v28 }
 0x43e   : > { %11472 = vmatpush3.bf16.msra.mxu1 %v11947_v10  ;;  %v11974_v10 = vld [vmem:[%s15054_s12 + $0x78] sm:$0xff]   ;;  %7513 = vst [vmem:[#allocation4 + $0xa] sm:$0x3] %v7512_v63  ;;  %v7547_v5 = vld [vmem:[#allocation4 + $0x22] sm:$0x3] }
 0x43f   : > { %11473 = vmatprep.subr.bf16.mxu1 %v12099_v18  ;;  %v7544_v2 = vld [vmem:[#allocation4 + $0x20] sm:$0x3]  ;;  %7543 = vst [vmem:[#allocation4 + $0x1e] sm:$0x3] %v7542_v34  ;;  %v7548_v7 = vsel %vm14349_vm8, 0, %v7547_v5 }
 0x440   : > { %11490 = vmatpush3.bf16.msra.mxu0 %v11948_v60  ;;  %v11975_v60 = vld [vmem:[%s15054_s12 + $0x38] sm:$0xff]   ;;  %v7553_v12 = vld [vmem:[#allocation4 + $0x26] sm:$0x3]  ;;  %7549 = vst [vmem:[#allocation4 + $0x22] sm:$0x3] %v7548_v7 }
 0x441   : > { %11491 = vmatprep.subr.bf16.mxu0 %v12099_v18  ;;  %v14412_v58 = vld [vmem:[%s15057_s15] ss:$0 sm:$0xff] }
 0x442   : > { %11474 = vmatpush3.bf16.msra.mxu1 %v11949_v9  ;;  %v15175_v9 = vld [vmem:[#allocation7_spill] sm:$0xff] }
 0x443   : > { %11475 = vmatprep.subr.bf16.mxu1 %v12099_v18 }
 0x444   : > { %11492 = vmatpush3.bf16.msra.mxu0 %v11950_v3  ;;  %v15176_v3 = vld [vmem:[#allocation9_spill] sm:$0xff] }
 0x445   : > { %11493 = vmatprep.subr.bf16.mxu0 %v12099_v18  ;;  %v1150_v44 = vpack.c.bf16 %v15176_v3, %v15175_v9 }
 0x446   : > { %11476 = vmatpush3.bf16.msra.mxu1 %v11951_v57  ;;  %v15178_v57 = vld [vmem:[#allocation15_spill] sm:$0xff] }
 0x447   : > { %11477 = vmatprep.subr.bf16.mxu1 %v12099_v18  ;;  %v1153_v6 = vpack.c.bf16 %v15178_v57, %v15177_v43  ;;  %v14396_v57 = vld [vmem:[%s15055_s13] ss:$0 sm:$0xff] }
 0x448   : > { %11494 = vmatpush3.bf16.msra.mxu0 %v11952_v20  ;;  %v15180_v20 = vld [vmem:[#allocation14_spill] sm:$0xff] }
 0x449   : > { %11495 = vmatprep.subr.bf16.mxu0 %v12099_v18  ;;  %v1152_v30 = vpack.c.bf16 %v15180_v20, %v15179_v29 }
 0x44a   : > { %11478 = vmatpush3.bf16.msra.mxu1 %v11953_v27  ;;  %v15183_v27 = vld [vmem:[#allocation16_spill] sm:$0xff] }
 0x44b   : > { %11479 = vmatprep.subr.bf16.mxu1 %v12099_v18  ;;  %v1154_v45 = vpack.c.bf16 %v15184_v55, %v15183_v27  ;;  %v14404_v55 = vld [vmem:[%s15056_s14] ss:$0 sm:$0xff] }
 0x44c   : > { %11496 = vmatpush3.bf16.msra.mxu0 %v11954_v32  ;;  %v14344_v32 = vld [vmem:[%s15053_s11] ss:$0 sm:$0xff] }
 0x44d   : > { %11497 = vmatprep.subr.bf16.mxu0 %v12099_v18  ;;  %7679 = vrot.lane.b32.xlu0 %v14344_v32, %s12101_s22 }
 0x44e   : > { %11480 = vmatpush3.bf16.msra.mxu1 %v11955_v62  ;;  %v7500_v62 = vsel %vm14349_vm8, 0, %v7499_v51 }
 0x44f   : > { %11481 = vmatprep.subr.bf16.mxu1 %v12099_v18  ;;  %7501 = vst [vmem:[#allocation4 + $0x2] sm:$0x3] %v7500_v62 }
 0x450   : > { %11498 = vmatpush3.bf16.msra.mxu0 %v11956_v35  ;;  %v7506_v35 = vsel %vm14349_vm8, 0, %v7505_v26 }
 0x451   : > { %11499 = vmatprep.subr.bf16.mxu0 %v12099_v18  ;;  %7507 = vst [vmem:[#allocation4 + $0x6] sm:$0x3] %v7506_v35 }
 0x452   : > { %11482 = vmatpush3.bf16.msra.mxu1 %v11957_v21  ;;  %v7538_v21 = vld [vmem:[#allocation4 + $0x1c] sm:$0x3] }
 0x453   : > { %11363 = vmatprep.subr.bf16.mxu1 %v11959_v37  ;;  %v7545_v37 = vsel %vm14349_vm8, 0, %v7544_v2 }
 0x454   : > { %11500 = vmatpush3.bf16.msra.mxu0 %v11958_v13  ;;  %v7539_v13 = vsel %vm14349_vm8, 0, %v7538_v21  ;;  %7546 = vst [vmem:[#allocation4 + $0x20] sm:$0x3] %v7545_v37 }
 0x455   : > { %11501 = vmatprep.subr.bf16.mxu0 %v12099_v18  ;;  %11484 = vmatmul.mubr.bf16.vlgmr.msra.gmra.mrb[76].mxu1 %v6969_v31  ;;  %7540 = vst [vmem:[#allocation4 + $0x1c] sm:$0x3] %v7539_v13 }
 0x456   : > { %11364 = vmatpush3.bf16.msra.mxu1 %v11960_v17  ;;  %7469 = vmatprep.mubr.bf16.mxu1 %v1151_v0  ;;  %v7550_v17 = vld [vmem:[#allocation4 + $0x24] sm:$0x3] }
 0x457   : > { %11365 = vmatprep.subr.bf16.mxu1 %v11962_v46  ;;  %v7551_v31 = vsel %vm14349_vm8, 0, %v7550_v17 }
 0x458   : > { %11502 = vmatpush3.bf16.msra.mxu0 %v11961_v53  ;;  %v7554_v53 = vsel %vm14349_vm8, 0, %v7553_v12  ;;  %7552 = vst [vmem:[#allocation4 + $0x24] sm:$0x3] %v7551_v31 }
 0x459   : > { %11507 = vmatprep.subr.bf16.mxu0 %v12099_v18  ;;  %7555 = vst [vmem:[#allocation4 + $0x26] sm:$0x3] %v7554_v53 }
 0x45a   : > { %11366 = vmatpush3.bf16.msra.mxu1 %v11963_v24 }
 0x45b   : > { %11504 = vmatmul.mubr.bf16.vlgmr.msra.gmra.mrb[92].mxu0 %v7201_v49  ;;  %11367 = vmatprep.subr.bf16.mxu1 %v11964_v41 }
 0x45c   : > { %11515 = vmatprep.mubr.msk.bf16.mxu0 %vm12100_vm7, %v12099_v18 }
 0x45e   : > { %11368 = vmatpush3.bf16.msra.mxu1 %v11965_v23 }
 0x45f   : > { %11369 = vmatprep.subr.bf16.mxu1 %v11966_v59 }
 0x462   : > { %11370 = vmatpush3.bf16.msra.mxu1 %v11967_v61 }
 0x463   : > { %11371 = vmatprep.subr.bf16.mxu1 %v11968_v50 }
 0x466   : > { %11372 = vmatpush3.bf16.msra.mxu1 %v11969_v8 }
 0x467   : > { %11373 = vmatprep.subr.bf16.mxu1 %v11970_v42 }
 0x46a   : > { %11374 = vmatpush3.bf16.msra.mxu1 %v11971_v40 }
 0x46b   : > { %11375 = vmatprep.subr.bf16.mxu1 %v11972_v56 }
 0x46e   : > { %11376 = vmatpush3.bf16.msra.mxu1 %v11973_v52 }
 0x46f   : > { %11377 = vmatprep.subr.bf16.mxu1 %v11974_v10 }
 0x472   : > { %11378 = vmatpush3.bf16.msra.mxu1 %v11975_v60 }
 0x473   : > { %11547 = vmatprep.subr.bf16.mxu1 %v12099_v18 }
 0x475   : > { %7470 = vmatmul.mubr.bf16.vlgmr.msra.gmra.mrb[80].mxu1 %v1150_v44 }
 0x476   : > { %7477 = vmatprep.mubr.bf16.mxu1 %v1153_v6 }
 0x47d   : > { %7478 = vmatmul.mubr.bf16.gmra.mrb[84].mxu1 %v1152_v30 }
 0x47e   : > { %7485 = vmatprep.mubr.bf16.mxu1 %v1155_v11 }
 0x485   : > { %7486 = vmatmul.mubr.bf16.gmra.mrb[88].mxu1 %v1154_v45 }
 0x486   : > { %11555 = vmatprep.mubr.msk.bf16.mxu1 %vm12100_vm7, %v12099_v18 }
 0x508   : > { %v14377_v46 = vpop.f32.mrb[72].mxu1 }
 0x509   : > { %v6650_v47 = vpop.f32.mrb[73].mxu1  ;;  %v7587_v44 = vadd.f32 %v14344_v32, %v14377_v46 }
 0x50a   : > { %v14379_v25 = vpop.f32.mrb[74].mxu1 }
 0x50b   : > { %v6654_v0 = vpop.f32.mrb[75].mxu1  ;;  %v7588_v29 = vadd.f32 %v14344_v32, %v14379_v25  ;;  %v7589_v4 = vmax.f32 %v7587_v44, 0.0 }
 0x50d   : > { %v7590_v45 = vmax.f32 %v7588_v29, 0.0 }
 0x50e   : > { %v6898_v14 = vpop.f32.mrb[88].mxu0 }
 0x50f   : > { %v6915_v48 = vadd.f32 %v6898_v14, %v6650_v47  ;;  %6907 = vrot.lane.b32.xlu1 %v6898_v14, %s12101_s22  ;;  %v11465_v24 = vpop.f32.mrb[89].mxu0 }
 0x510   : > { %v6901_v41 = vpop.f32.mrb[90].mxu0 }
 0x511   : > { %v6916_v49 = vadd.f32 %v6901_v41, %v6654_v0  ;;  %v11466_v23 = vpop.f32.mrb[91].mxu0 }
 0x513   : > { %6909 = vrot.lane.b32.xlu1 %v6901_v41, %s12101_s22 }
 0x528   : > { %v7037_v59 = vpop.f32.mrb[76].mxu1 }
 0x529   : > { %v7044_v61 = vadd.f32 %v7037_v59, %v6650_v47  ;;  %v14383_v50 = vadd.f32 %v7037_v59, %v6915_v48  ;;  %v11485_v8 = vpop.f32.mrb[77].mxu1 }
 0x52a   : > { %v7040_v42 = vpop.f32.mrb[78].mxu1 }
 0x52b   : > { %v7045_v40 = vadd.f32 %v7040_v42, %v6654_v0  ;;  %v14385_v56 = vadd.f32 %v7040_v42, %v6916_v49  ;;  %v11486_v52 = vpop.f32.mrb[79].mxu1  ;;  %v7844_v62 = vadd.f32 %v14344_v32, %v7044_v61 }
 0x52d   : > { %v7846_v34 = vmax.f32 %v7844_v62, 0.0  ;;  %v7845_v48 = vadd.f32 %v14344_v32, %v7045_v40 }
 0x52e   : > { %v14387_v10 = vpop.f32.mrb[92].mxu0 }
 0x52f   : > { %v11505_v60 = vpop.f32.mrb[93].mxu0  ;;  %v7847_v44 = vmax.f32 %v7845_v48, 0.0 }
 0x530   : > { %v14389_v9 = vpop.f32.mrb[94].mxu0 }
 0x531   : > { %v11506_v3 = vpop.f32.mrb[95].mxu0 }
 0x548   : > { %v11379_v43 = vpop.f32.mrb[80].mxu1 }
 0x549   : > { %v11380_v6 = vpop.f32.mrb[81].mxu1 }
 0x54a   : > { %v11381_v20 = vadd.f32 %v11380_v6, %v11379_v43  ;;  %v11382_v30 = vpop.f32.mrb[82].mxu1 }
 0x54b   : > { %v11383_v15 = vpop.f32.mrb[83].mxu1 }
 0x54c   : > { %v7472_v11 = vadd.f32 %v11381_v20, %v14396_v57  ;;  %v11384_v27 = vadd.f32 %v11383_v15, %v11382_v30 }
 0x54e   : > { %v7591_v19 = vadd.f32 %v7589_v4, %v7472_v11  ;;  %v7475_v51 = vadd.f32 %v11384_v27, %v14396_v57 }
 0x550   : > { %v7600_v33 = vmul.f32 %v14404_v55, %v7591_v19  ;;  %v7592_v26 = vadd.f32 %v7590_v45, %v7475_v51  ;;  %v11385_v22 = vpop.f32.mrb[84].mxu1  ;;  %v7688_v37 = vrot.slane %v7475_v51, 4 }
 0x551   : > { %v11386_v35 = vpop.f32.mrb[85].mxu1 }
 0x552   : > { %v7601_v1 = vmul.f32 %v14404_v55, %v7592_v26  ;;  %v11387_v38 = vadd.f32 %v11386_v35, %v11385_v22  ;;  %v11388_v28 = vpop.f32.mrb[86].mxu1  ;;  %v7609_v21 = vadd.f32 %v14412_v58, %v7600_v33  ;;  %v7514_v33 = vld [vmem:[#allocation4 + $0xc] sm:$0x3] }
 0x553   : > { %v11389_v63 = vpop.f32.mrb[87].mxu1 }
 0x554   : > { %v7610_v16 = vadd.f32 %v14412_v58, %v7601_v1  ;;  %v7480_v2 = vadd.f32 %v11387_v38, %v14396_v57  ;;  %v11390_v13 = vadd.f32 %v11389_v63, %v11388_v28 }
 0x556   : > { %v7611_v5 = vpack.c.bf16 %v7610_v16, %v7609_v21  ;;  %v10895_v7 = vpack.c.bf16 %v7610_v16, %v7610_v16  ;;  %v7689_v17 = vrot.slane %v7480_v2, 4  ;;  %v7483_v12 = vadd.f32 %v11390_v13, %v14396_v57  ;;  %v14482_v21 = vld [vmem:[%s15058_s16 + $0x8] sm:$0xff]   ;;  %v14496_v16 = vld [vmem:[%s15058_s16 + $0x18] sm:$0xff]   ;;  %v7529_v2 = vld [vmem:[#allocation4 + $0x16] sm:$0x3] }
 0x557   : > { %v7530_v13 = vsel %vm14349_vm8, 0, %v7529_v2 }
 0x558   : > { %v7620_v31 = vrot.slane %v7611_v5, %v12567_v36  ;;  %v7627_v53 = vrot.slane %v10895_v7, %v12567_v36  ;;  %v7848_v47 = vadd.f32 %v7846_v34, %v7483_v12  ;;  %7693 = vrot.lane.b32.xlu0 %v7689_v17, %s12101_s22  ;;  %v11391_v0 = vpop.f32.mrb[88].mxu1  ;;  %v7690_v14 = vsel %vm2190_vm4, %v7688_v37, %v7689_v17  ;;  %v7680_v17 = vpop.permute.xlu0 %7679 }
 0x559   : > { %7691 = vrot.lane.b32.xlu1 %v7690_v14, %s12101_s22  ;;  %v11392_v24 = vpop.f32.mrb[89].mxu1  ;;  %7531 = vst [vmem:[#allocation4 + $0x16] sm:$0x3] %v7530_v13 }
 0x55a   : > { %v7628_v41 = vcombine.high %v7620_v31, %v7620_v31  ;;  %v7629_v49 = vcombine.high %v7627_v53, %v7627_v53  ;;  %v7636_v23 = vrot.slane %v7620_v31, %v12567_v36  ;;  %v7643_v59 = vrot.slane %v7627_v53, %v12567_v36  ;;  %v11394_v61 = vpop.f32.mrb[90].mxu1 }
 0x55b   : > { %v11393_v8 = vadd.f32 %v11392_v24, %v11391_v0  ;;  %v11395_v42 = vpop.f32.mrb[91].mxu1  ;;  %v7857_v20 = vmul.f32 %v14404_v55, %v7848_v47 }
 0x55c   : > { %v7650_v52 = vrot.slane %v7628_v41, %v12567_v36  ;;  %v7657_v60 = vrot.slane %v7629_v49, %v12567_v36  ;;  %v7658_v3 = vcombine.high %v7636_v23, %v7636_v23  ;;  %7667 = vst.msk [vmem:[#allocation4] sm:$0x1] %vm7666_vm2, %v7636_v23  ;;  %7671 = vst.msk [vmem:[#allocation4 + $0x8] sm:$0x1] %vm7666_vm2, %v7643_v59  ;;  %7716 = vrot.lane.b32.xlu0 %v14412_v58, %s12101_s22  ;;  %v7532_v23 = vld [vmem:[#allocation4 + $0x18] sm:$0x3] }
 0x55d   : > { %v11396_v40 = vadd.f32 %v11395_v42, %v11394_v61  ;;  %v7488_v43 = vadd.f32 %v11393_v8, %v14396_v57  ;;  %7705 = vrot.lane.b32.xlu1 %v14404_v55, %s12101_s22  ;;  %v7866_v45 = vadd.f32 %v14412_v58, %v7857_v20  ;;  %v7533_v8 = vsel %vm14349_vm8, 0, %v7532_v23  ;;  %v7523_v20 = vld [vmem:[#allocation4 + $0x12] sm:$0x3] }
 0x55e   : > { %v7659_v6 = vcombine.high %v7650_v52, %v7650_v52  ;;  %7668 = vst.msk [vmem:[#allocation4 + $0x2] sm:$0x1] %vm7666_vm2, %v7650_v52  ;;  %7669 = vst.msk [vmem:[#allocation4 + $0x4] sm:$0x1] %vm7666_vm2, %v7658_v3 }
 0x55f   : > { %7672 = vst.msk [vmem:[#allocation4 + $0xa] sm:$0x1] %vm7666_vm2, %v7657_v60  ;;  %v7491_v29 = vadd.f32 %v11396_v40, %v14396_v57  ;;  %v7849_v30 = vadd.f32 %v7847_v44, %v7488_v43  ;;  %v7945_v15 = vrot.slane %v7488_v43, 4  ;;  %7534 = vst [vmem:[#allocation4 + $0x18] sm:$0x3] %v7533_v8 }
 0x560   : > { %7670 = vst.msk [vmem:[#allocation4 + $0x6] sm:$0x1] %vm7666_vm2, %v7659_v6  ;;  %7296 = vrot.lane.b32.xlu0 %v14389_v9, %s12101_s22  ;;  %v7520_v40 = vld [vmem:[#allocation4 + $0x10] sm:$0x3] }
 0x561   : > { %v7946_v4 = vrot.slane %v7491_v29, 4  ;;  %v7858_v11 = vmul.f32 %v14404_v55, %v7849_v30  ;;  %7294 = vrot.lane.b32.xlu1 %v14387_v10, %s12101_s22  ;;  %v7515_v10 = vsel %vm14349_vm8, 0, %v7514_v33  ;;  %v7521_v6 = vsel %vm14349_vm8, 0, %v7520_v40 }
 0x562   : > { %7516 = vst [vmem:[#allocation4 + $0xc] sm:$0x3] %v7515_v10  ;;  %7522 = vst [vmem:[#allocation4 + $0x10] sm:$0x3] %v7521_v6  ;;  %v7574_v6 = vld [vmem:[#allocation4 + $0x34] sm:$0x3] }
 0x563   : > { %v7947_v27 = vsel %vm2190_vm4, %v7945_v15, %v7946_v4  ;;  %v7867_v57 = vadd.f32 %v14412_v58, %v7858_v11  ;;  %v7524_v11 = vsel %vm14349_vm8, 0, %v7523_v20  ;;  %v8102_v54 = vld [vmem:[#allocation4] sm:$0x1] }
 0x564   : > { %7948 = vrot.lane.b32.xlu0 %v7947_v27, %s12101_s22  ;;  %7525 = vst [vmem:[#allocation4 + $0x12] sm:$0x3] %v7524_v11 }
 0x565   : > { %v7868_v19 = vpack.c.bf16 %v7867_v57, %v7866_v45  ;;  %v10903_v51 = vpack.c.bf16 %v7867_v57, %v7867_v57  ;;  %7936 = vrot.lane.b32.xlu1 %v14344_v32, %s12101_s22  ;;  %v7556_v57 = vld [vmem:[#allocation4 + $0x28] sm:$0x3] }
 0x567   : > { %v7877_v9 = vrot.slane %v7868_v19, %v12567_v36  ;;  %v7884_v26 = vrot.slane %v10903_v51, %v12567_v36  ;;  %v7577_v19 = vld [vmem:[#allocation4 + $0x36] sm:$0x3] }
 0x568   : > { %7962 = vrot.lane.b32.xlu0 %v14404_v55, %s12101_s22  ;;  %v14475_v55 = vld [vmem:[%s15058_s16] sm:$0xff]  }
 0x569   : > { %v7885_v22 = vcombine.high %v7877_v9, %v7877_v9  ;;  %v7886_v62 = vcombine.high %v7884_v26, %v7884_v26  ;;  %v7893_v35 = vrot.slane %v7877_v9, %v12567_v36  ;;  %v7900_v1 = vrot.slane %v7884_v26, %v12567_v36  ;;  %7950 = vrot.lane.b32.xlu1 %v7946_v4, %s12101_s22  ;;  %v7526_v26 = vld [vmem:[#allocation4 + $0x14] sm:$0x3] }
 0x56a   : > { %11508 = vmatpush3.bf16.msra.mxu0 %v14475_v55 }
 0x56b   : > { %v7907_v32 = vrot.slane %v7885_v22, %v12567_v36  ;;  %v7914_v38 = vrot.slane %v7886_v62, %v12567_v36  ;;  %v7915_v28 = vcombine.high %v7893_v35, %v7893_v35  ;;  %7924 = vst.msk [vmem:[#allocation4 + $0x1c] sm:$0x1] %vm7666_vm2, %v7893_v35  ;;  %7928 = vst.msk [vmem:[#allocation4 + $0x24] sm:$0x1] %vm7666_vm2, %v7900_v1  ;;  %11509 = vmatprep.subr.bf16.mxu0 %v12099_v18  ;;  %v7559_v35 = vld [vmem:[#allocation4 + $0x2a] sm:$0x3] }
 0x56c   : > { %v7578_v62 = vsel %vm14349_vm8, 0, %v7577_v19 }
 0x56d   : > { %v7916_v63 = vcombine.high %v7907_v32, %v7907_v32  ;;  %7925 = vst.msk [vmem:[#allocation4 + $0x1e] sm:$0x1] %vm7666_vm2, %v7907_v32  ;;  %7926 = vst.msk [vmem:[#allocation4 + $0x20] sm:$0x1] %vm7666_vm2, %v7915_v28  ;;  %7973 = vrot.lane.b32.xlu1 %v14412_v58, %s12101_s22  ;;  %v14489_v58 = vld [vmem:[%s15058_s16 + $0x10] sm:$0xff]  }
 0x56e   : > { %7929 = vst.msk [vmem:[#allocation4 + $0x26] sm:$0x1] %vm7666_vm2, %v7914_v38  ;;  %11510 = vmatpush3.bf16.msra.mxu0 %v14482_v21  ;;  %v15187_v38 = vld [vmem:[#allocation6_spill] sm:$0xff]  ;;  %7579 = vst [vmem:[#allocation4 + $0x36] sm:$0x3] %v7578_v62 }
 0x56f   : > { %7927 = vst.msk [vmem:[#allocation4 + $0x22] sm:$0x1] %vm7666_vm2, %v7916_v63  ;;  %11511 = vmatprep.subr.bf16.mxu0 %v12099_v18 }
 0x572   : > { %11512 = vmatpush3.bf16.msra.mxu0 %v14489_v58 }
 0x573   : > { %11513 = vmatprep.subr.bf16.mxu0 %v12099_v18 }
 0x576   : > { %11514 = vmatpush3.bf16.msra.mxu0 %v14496_v16 }
 0x577   : > { %11527 = vmatprep.subr.bf16.mxu0 %v12099_v18 }
 0x581   : > { %v6908_v34 = vpop.permute.xlu1 %6907 }
 0x582   : > { %v6913_v5 = vadd.f32 %v6908_v34, %v14377_v46  ;;  %v7517_v46 = vld [vmem:[#allocation4 + $0xe] sm:$0x3] }
 0x583   : > { %v7518_v60 = vsel %vm14349_vm8, 0, %v7517_v46  ;;  %v7568_v46 = vld [vmem:[#allocation4 + $0x30] sm:$0x3] }
 0x584   : > { %v7682_v12 = vadd.f32 %v7680_v17, %v6913_v5  ;;  %7519 = vst [vmem:[#allocation4 + $0xe] sm:$0x3] %v7518_v60  ;;  %v7569_v60 = vsel %vm14349_vm8, 0, %v7568_v46 }
 0x585   : > { %v6910_v37 = vpop.permute.xlu1 %6909  ;;  %7570 = vst [vmem:[#allocation4 + $0x30] sm:$0x3] %v7569_v60 }
 0x586   : > { %v6914_v7 = vadd.f32 %v6910_v37, %v14379_v25  ;;  %v7684_v0 = vmax.f32 %v7682_v12, 0.0  ;;  %v7527_v37 = vsel %vm14349_vm8, 0, %v7526_v26  ;;  %v7560_v12 = vsel %vm14349_vm8, 0, %v7559_v35 }
 0x587   : > { %7528 = vst [vmem:[#allocation4 + $0x14] sm:$0x3] %v7527_v37  ;;  %7561 = vst [vmem:[#allocation4 + $0x2a] sm:$0x3] %v7560_v12 }
 0x588   : > { %v7683_v31 = vadd.f32 %v7680_v17, %v6914_v7  ;;  %v14594_v12 = vld.sshfl [vmem:[#allocation4] sm:$0x11 pattern:$0x75316420] }
 0x58a   : > { %v7685_v14 = vmax.f32 %v7683_v31, 0.0 }
 0x5ca   : > { %v7694_v53 = vpop.permute.xlu0 %7693 }
 0x5cb   : > { %v7692_v47 = vpop.permute.xlu1 %7691  ;;  %v7698_v48 = vadd.f32 %v7694_v53, %v7685_v14  ;;  %v7562_v53 = vld [vmem:[#allocation4 + $0x2c] sm:$0x3] }
 0x5cc   : > { %v7697_v24 = vadd.f32 %v7692_v47, %v7684_v0 }
 0x5ce   : > { %v7717_v41 = vpop.permute.xlu0 %7716 }
 0x5cf   : > { %v7706_v49 = vpop.permute.xlu1 %7705 }
 0x5d0   : > { %v7708_v59 = vmul.f32 %v7706_v49, %v7697_v24  ;;  %v7709_v61 = vmul.f32 %v7706_v49, %v7698_v48  ;;  %v7563_v48 = vsel %vm14349_vm8, 0, %v7562_v53  ;;  %v7565_v49 = vld [vmem:[#allocation4 + $0x2e] sm:$0x3] }
 0x5d1   : > { %7564 = vst [vmem:[#allocation4 + $0x2c] sm:$0x3] %v7563_v48  ;;  %v7566_v8 = vsel %vm14349_vm8, 0, %v7565_v49 }
 0x5d2   : > { %v7719_v25 = vadd.f32 %v7717_v41, %v7708_v59  ;;  %v7720_v42 = vadd.f32 %v7717_v41, %v7709_v61  ;;  %v7297_v52 = vpop.permute.xlu0 %7296  ;;  %7567 = vst [vmem:[#allocation4 + $0x2e] sm:$0x3] %v7566_v8 }
 0x5d3   : > { %v7295_v3 = vpop.permute.xlu1 %7294  ;;  %v7301_v29 = vadd.f32 %v7297_v52, %v14385_v56 }
 0x5d4   : > { %v7721_v44 = vpack.c.bf16 %v7720_v42, %v7719_v25  ;;  %v10899_v43 = vpack.c.bf16 %v7720_v42, %v7720_v42  ;;  %v7300_v4 = vadd.f32 %v7295_v3, %v14383_v50  ;;  %v7557_v50 = vsel %vm14349_vm8, 0, %v7556_v57  ;;  %v7571_v3 = vld [vmem:[#allocation4 + $0x32] sm:$0x3] }
 0x5d5   : > { %7558 = vst [vmem:[#allocation4 + $0x28] sm:$0x3] %v7557_v50 }
 0x5d6   : > { %v7730_v30 = vrot.slane %v7721_v44, %v12567_v36  ;;  %v7737_v15 = vrot.slane %v10899_v43, %v12567_v36  ;;  %v7949_v27 = vpop.permute.xlu0 %7948  ;;  %v7572_v43 = vsel %vm14349_vm8, 0, %v7571_v3 }
 0x5d7   : > { %v7937_v45 = vpop.permute.xlu1 %7936  ;;  %7573 = vst [vmem:[#allocation4 + $0x32] sm:$0x3] %v7572_v43 }
 0x5d8   : > { %v7939_v51 = vadd.f32 %v7937_v45, %v7300_v4  ;;  %v7940_v33 = vadd.f32 %v7937_v45, %v7301_v29  ;;  %v7753_v56 = vrot.slane %v7737_v15, %v12567_v36  ;;  %v7739_v9 = vcombine.high %v7737_v15, %v7737_v15 }
 0x5d9   : > { %v7746_v10 = vrot.slane %v7730_v30, %v12567_v36  ;;  %v7738_v22 = vcombine.high %v7730_v30, %v7730_v30  ;;  %v7575_v15 = vsel %vm14349_vm8, 0, %v7574_v6 }
 0x5da   : > { %v7941_v1 = vmax.f32 %v7939_v51, 0.0  ;;  %v7942_v32 = vmax.f32 %v7940_v33, 0.0  ;;  %v7804_v28 = vrot.slane %v7753_v56, %v15187_v38  ;;  %v7767_v63 = vrot.slane %v7739_v9, %v12567_v36  ;;  %v7963_v13 = vpop.permute.xlu0 %7962  ;;  %7576 = vst [vmem:[#allocation4 + $0x34] sm:$0x3] %v7575_v15 }
 0x5db   : > { %v7951_v2 = vpop.permute.xlu1 %7950  ;;  %v7760_v34 = vrot.slane %v7738_v22, %v12567_v36  ;;  %v7776_v31 = vrot.slane %v7746_v10, %v15187_v38  ;;  %v7768_v14 = vcombine.high %v7746_v10, %v7746_v10  ;;  %v7535_v22 = vld [vmem:[#allocation4 + $0x1a] sm:$0x3] }
 0x5dc   : > { %v7955_v5 = vadd.f32 %v7951_v2, %v7942_v32  ;;  %7820 = vrot.lane.b32.xlu0 %v7804_v28, %s12101_s22  ;;  %v7954_v7 = vadd.f32 %v7949_v27, %v7941_v1  ;;  %v7811_v17 = vrot.slane %v7767_v63, %v15187_v38  ;;  %v7536_v50 = vsel %vm14349_vm8, 0, %v7535_v22  ;;  %v8107_v63 = vld [vmem:[#allocation4 + $0xa] sm:$0x1] }
 0x5dd   : > { %v7783_v41 = vrot.slane %v7760_v34, %v15187_v38  ;;  %v7769_v61 = vcombine.high %v7760_v34, %v7760_v34  ;;  %v7790_v52 = vrot.slane %v7768_v14, %v15187_v38  ;;  %7537 = vst [vmem:[#allocation4 + $0x1a] sm:$0x3] %v7536_v50  ;;  %v8106_v34 = vld [vmem:[#allocation4 + $0x8] sm:$0x1]  ;;  %v8116_v14 = vld [vmem:[#allocation4 + $0x20] sm:$0x1] }
 0x5de   : > { %v7965_v47 = vmul.f32 %v7963_v13, %v7954_v7  ;;  %v7966_v0 = vmul.f32 %v7963_v13, %v7955_v5  ;;  %7822 = vrot.lane.b32.xlu1 %v7811_v17, %s12101_s22  ;;  %v8134_v37 = vcombine.low %v8106_v34, %v8107_v63  ;;  %v8117_v7 = vld [vmem:[#allocation4 + $0x22] sm:$0x1]  ;;  %v8115_v17 = vld [vmem:[#allocation4 + $0x1e] sm:$0x1] }
 0x5df   : > { %v7974_v24 = vpop.permute.xlu1 %7973  ;;  %v7797_v44 = vrot.slane %v7769_v61, %v15187_v38  ;;  %v8114_v61 = vld [vmem:[#allocation4 + $0x1c] sm:$0x1]  ;;  %v10917_v22 = vld.sshfl [vmem:[#allocation4 + $0x4] sm:$0x11 pattern:$0x75316420] }
 0x5e0   : > { %v7976_v23 = vadd.f32 %v7974_v24, %v7965_v47  ;;  %v7977_v59 = vadd.f32 %v7974_v24, %v7966_v0  ;;  %7812 = vrot.lane.b32.xlu0 %v7776_v31, %s12101_s22  ;;  %v8226_v24 = vcombine.low %v8116_v14, %v8117_v7  ;;  %v8225_v46 = vcombine.low %v8114_v61, %v8115_v17 }
 0x5e2   : > { %v7978_v25 = vpack.c.bf16 %v7977_v59, %v7976_v23  ;;  %v10907_v42 = vpack.c.bf16 %v7977_v59, %v7977_v59  ;;  %7814 = vrot.lane.b32.xlu1 %v7783_v41, %s12101_s22  ;;  %v10916_v41 = vld.sshfl [vmem:[#allocation4 + $0x2] sm:$0x11 pattern:$0x75316420]  ;;  %v8155_v23 = vrot.slane %v8134_v37, %v12567_v36 }
 0x5e3   : > { %v14637_v37 = vld.sshfl [vmem:[#allocation4 + $0x8] sm:$0x11 pattern:$0x75316420] }
 0x5e4   : > { %v7987_v40 = vrot.slane %v7978_v25, %v12567_v36  ;;  %7816 = vrot.lane.b32.xlu0 %v7790_v52, %s12101_s22  ;;  %v7994_v29 = vrot.slane %v10907_v42, %v12567_v36  ;;  %v8170_v15 = vrot.slane %v8155_v23, %v12567_v36  ;;  %v8494_v23 = vshrl.u32 %v10917_v22, 16 }
 0x5e6   : > { %v7995_v20 = vcombine.high %v7987_v40, %v7987_v40  ;;  %7818 = vrot.lane.b32.xlu1 %v7797_v44, %s12101_s22  ;;  %v8003_v30 = vrot.slane %v7987_v40, %v12567_v36  ;;  %v7996_v45 = vcombine.high %v7994_v29, %v7994_v29  ;;  %v8010_v33 = vrot.slane %v7994_v29, %v12567_v36 }
 0x5e7   : > { %v8434_v40 = vcombine.high %v14594_v12, %v14594_v12  ;;  %v8442_v44 = vcombine.high %v10916_v41, %v10916_v41 }
 0x5e8   : > { %v8033_v4 = vrot.slane %v8003_v30, %v15187_v38  ;;  %v8017_v11 = vrot.slane %v7995_v20, %v12567_v36  ;;  %v8025_v27 = vcombine.high %v8003_v30, %v8003_v30  ;;  %v8024_v9 = vrot.slane %v7996_v45, %v12567_v36 }
 0x5e9   : > { %v8061_v26 = vrot.slane %v8010_v33, %v15187_v38  ;;  %v8240_v20 = vrot.slane %v8226_v24, %v12567_v36  ;;  %v8490_v33 = vshll.u32 %v8442_v44, 16 }
 0x5ea   : > { %8069 = vrot.lane.b32.xlu0 %v8033_v4, %s12101_s22  ;;  %v8040_v57 = vrot.slane %v8017_v11, %v15187_v38  ;;  %v8026_v19 = vcombine.high %v8017_v11, %v8017_v11  ;;  %v8047_v51 = vrot.slane %v8025_v27, %v15187_v38  ;;  %v8068_v10 = vrot.slane %v8024_v9, %v15187_v38 }
 0x5eb   : > { %v8233_v27 = vrot.slane %v8225_v46, %v12567_v36 }
 0x5ec   : > { %8071 = vrot.lane.b32.xlu1 %v8040_v57, %s12101_s22  ;;  %v8054_v56 = vrot.slane %v8026_v19, %v15187_v38  ;;  %v8481_v19 = vshll.u32 %v8434_v40, 16  ;;  %v8118_v40 = vld [vmem:[#allocation4 + $0x24] sm:$0x1] }
 0x5ee   : > { %8073 = vrot.lane.b32.xlu0 %v8047_v51, %s12101_s22  ;;  %v8485_v51 = vshrl.u32 %v10916_v41, 16 }
 0x5f0   : > { %8075 = vrot.lane.b32.xlu1 %v8054_v56, %s12101_s22  ;;  %v8898_v56 = vld [vmem:[#allocation4 + $0x6] sm:$0x1] }
 0x5f2   : > { %8077 = vrot.lane.b32.xlu0 %v8061_v26, %s12101_s22 }
 0x5f4   : > { %8079 = vrot.lane.b32.xlu1 %v8068_v10, %s12101_s22  ;;  %v8241_v10 = vcombine.low %v8233_v27, %v8240_v20  ;;  %v14672_v27 = vld.sshfl [vmem:[#allocation4 + $0x20] sm:$0x11 pattern:$0x75316420] }
 0x5f6   : > { %8766 = vrot.lane.b32.xlu0 %v14475_v55, %s12102_s3 }
 0x5f8   : > { %8768 = vrot.lane.b32.xlu1 %v14482_v21, %s12102_s3 }
 0x5fa   : > { %8770 = vrot.lane.b32.xlu0 %v14489_v58, %s12102_s3 }
 0x5fc   : > { %8772 = vrot.lane.b32.xlu1 %v14496_v16, %s12102_s3 }
 0x5fe   : > { %9013 = vrot.lane.b32.xlu0 %v14475_v55, %s12103_s26 }
 0x600   : > { %9015 = vrot.lane.b32.xlu1 %v14482_v21, %s12103_s26 }
 0x602   : > { %9017 = vrot.lane.b32.xlu0 %v14489_v58, %s12103_s26 }
 0x604   : > { %9019 = vrot.lane.b32.xlu1 %v14496_v16, %s12103_s26  ;;  %s15188_s26 = sld [smem:[#allocation37_spill]] }
 0x606   : > { %9306 = vrot.lane.b32.xlu0 %v14475_v55, %s12101_s22  ;;  %v8105_v55 = vld [vmem:[#allocation4 + $0x6] sm:$0x1] }
 0x608   : > { %9308 = vrot.lane.b32.xlu1 %v14482_v21, %s12101_s22  ;;  %v8103_v21 = vld [vmem:[#allocation4 + $0x2] sm:$0x1] }
 0x60a   : > { %9310 = vrot.lane.b32.xlu0 %v14489_v58, %s12101_s22  ;;  %v8104_v58 = vld [vmem:[#allocation4 + $0x4] sm:$0x1] }
 0x60b   : > { %v8133_v38 = vcombine.low %v8104_v58, %v8105_v55  ;;  %v8897_v58 = vld [vmem:[#allocation4 + $0x4] sm:$0x1] }
 0x60c   : > { %9312 = vrot.lane.b32.xlu1 %v14496_v16, %s12101_s22  ;;  %v8132_v16 = vcombine.low %v8102_v54, %v8103_v21  ;;  %v8896_v21 = vld [vmem:[#allocation4 + $0x2] sm:$0x1]  ;;  %s14977_s22 = scalar_lea.vmem %s15188_s26, %s11636_s28  ;;  %s11027_s28 = sshll.u32 %s15190_s30, 4 }
 0x60d   : > { %v8148_v13 = vrot.slane %v8133_v38, %v12567_v36 }
 0x60e   : > { %v8141_v5 = vrot.slane %v8132_v16, %v12567_v36  ;;  %v14630_v16 = vsel %vm12572_vm11, %v8485_v51, %v8490_v33 }
 0x610   : > { %v8156_v0 = vcombine.low %v8141_v5, %v8148_v13  ;;  %v14635_v13 = vrot.slane %v8241_v10, %v12567_v36 }
 0x612   : > { %v8163_v42 = vrot.slane %v8156_v0, %v12567_v36  ;;  %v14646_v0 = vld.sshfl [vmem:[#allocation4 + $0xa] sm:$0x11 pattern:$0x75316420]  ;;  %v8249_v61 = vcombine.low %v14635_v13, %v14635_v13 }
 0x614   : > { %v8171_v57 = vcombine.low %v8163_v42, %v8170_v15 }
 0x64e   : > { %v7821_v62 = vpop.permute.xlu0 %7820 }
 0x64f   : > { %7835 = vst.msk [vmem:[#allocation4 + $0x16] sm:$0x1] %vm7666_vm2, %v7821_v62 }
 0x650   : > { %v7823_v35 = vpop.permute.xlu1 %7822 }
 0x651   : > { %7836 = vst.msk [vmem:[#allocation4 + $0x18] sm:$0x1] %vm7666_vm2, %v7823_v35  ;;  %v14620_v35 = vld.sshfl [vmem:[#allocation4 + $0x6] sm:$0x11 pattern:$0x75316420] }
 0x652   : > { %v7813_v1 = vpop.permute.xlu0 %7812  ;;  %v8458_v5 = vcombine.high %v14620_v35, %v14620_v35  ;;  %v8503_v51 = vshrl.u32 %v14620_v35, 16 }
 0x653   : > { %7831 = vst.msk [vmem:[#allocation4 + $0xe] sm:$0x1] %vm7666_vm2, %v7813_v1 }
 0x654   : > { %v7815_v32 = vpop.permute.xlu1 %7814  ;;  %v8508_v42 = vshll.u32 %v8458_v5, 16 }
 0x655   : > { %7832 = vst.msk [vmem:[#allocation4 + $0x10] sm:$0x1] %vm7666_vm2, %v7815_v32  ;;  %v8899_v32 = vld [vmem:[#allocation4 + $0x8] sm:$0x1] }
 0x656   : > { %v7817_v28 = vpop.permute.xlu0 %7816  ;;  %v8112_v3 = vld [vmem:[#allocation4 + $0x16] sm:$0x1]  ;;  %v8918_v63 = vcombine.low %v8898_v56, %v8899_v32  ;;  %v14682_v56 = vld.sshfl [vmem:[#allocation4 + $0x22] sm:$0x11 pattern:$0x75316420] }
 0x657   : > { %7833 = vst.msk [vmem:[#allocation4 + $0x12] sm:$0x1] %vm7666_vm2, %v7817_v28  ;;  %v8476_v28 = vshrl.u32 %v14594_v12, 16 }
 0x658   : > { %v7819_v2 = vpop.permute.xlu1 %7818  ;;  %v8113_v59 = vld [vmem:[#allocation4 + $0x18] sm:$0x1]  ;;  %v14649_v41 = vrot.slane %v8918_v63, %v12567_v36 }
 0x659   : > { %7834 = vst.msk [vmem:[#allocation4 + $0x14] sm:$0x1] %vm7666_vm2, %v7819_v2  ;;  %v8196_v29 = vcombine.low %v8112_v3, %v8113_v59  ;;  %v8450_v2 = vcombine.high %v10917_v22, %v10917_v22  ;;  %v8483_v12 = vsel %vm12572_vm11, %v8476_v28, %v8481_v19  ;;  %v8521_v28 = vshrl.u32 %v14646_v0, 16 }
 0x65a   : > { %v8108_v53 = vld [vmem:[#allocation4 + $0xe] sm:$0x1] }
 0x65b   : > { %v14618_v26 = vrot.slane %v8196_v29, %v12567_v36  ;;  %v8499_v59 = vshll.u32 %v8450_v2, 16  ;;  %v8474_v29 = vcombine.high %v14646_v0, %v14646_v0  ;;  %v14717_v2 = vld.sshfl [vmem:[#allocation4 + $0x24] sm:$0x11 pattern:$0x75316420] }
 0x65c   : > { %v8070_v31 = vpop.permute.xlu0 %8069  ;;  %v8109_v47 = vld [vmem:[#allocation4 + $0x10] sm:$0x1] }
 0x65d   : > { %8088 = vst.msk [vmem:[#allocation4 + $0x2a] sm:$0x1] %vm7666_vm2, %v8070_v31  ;;  %v8178_v48 = vcombine.low %v8108_v53, %v8109_v47  ;;  %v8917_v31 = vcombine.low %v8896_v21, %v8897_v58  ;;  %v8659_v47 = vcombine.low %v8483_v12, %v14630_v16  ;;  %v14679_v19 = vsel %vm12572_vm11, %v8494_v23, %v8499_v59 }
 0x65e   : > { %v8072_v49 = vpop.permute.xlu1 %8071  ;;  %v8110_v52 = vld [vmem:[#allocation4 + $0x12] sm:$0x1]  ;;  %v8608_v59 = vshrl.u32 %v14672_v27, 16 }
 0x65f   : > { %8089 = vst.msk [vmem:[#allocation4 + $0x2c] sm:$0x1] %vm7666_vm2, %v8072_v49  ;;  %v14600_v8 = vrot.slane %v8178_v48, %v12567_v36  ;;  %v8119_v48 = vld [vmem:[#allocation4 + $0x26] sm:$0x1]  ;;  %v8466_v49 = vcombine.high %v14637_v37, %v14637_v37 }
 0x660   : > { %v8074_v25 = vpop.permute.xlu0 %8073  ;;  %v8111_v60 = vld [vmem:[#allocation4 + $0x14] sm:$0x1] }
 0x661   : > { %8090 = vst.msk [vmem:[#allocation4 + $0x2e] sm:$0x1] %vm7666_vm2, %v8074_v25  ;;  %v8186_v43 = vcombine.low %v14600_v8, %v14600_v8  ;;  %v8195_v6 = vcombine.low %v8110_v52, %v8111_v60  ;;  %v14658_v52 = vld.sshfl [vmem:[#allocation4 + $0x1c] sm:$0x11 pattern:$0x75316420] }
 0x662   : > { %v8076_v30 = vpop.permute.xlu1 %8075  ;;  %v14660_v60 = vld.sshfl [vmem:[#allocation4 + $0x1e] sm:$0x11 pattern:$0x75316420]  ;;  %v8517_v33 = vshll.u32 %v8466_v49, 16  ;;  %v8548_v21 = vcombine.high %v14658_v52, %v14658_v52  ;;  %v8590_v0 = vshrl.u32 %v14658_v52, 16 }
 0x663   : > { %8091 = vst.msk [vmem:[#allocation4 + $0x30] sm:$0x1] %vm7666_vm2, %v8076_v30  ;;  %v8193_v4 = vrot.slane %v8186_v43, %v12567_v36  ;;  %v14613_v11 = vrot.slane %v8195_v6, %v12567_v36  ;;  %v14664_v6 = vrot.slane %v8917_v31, %v12567_v36  ;;  %v8250_v30 = vcombine.low %v8118_v40, %v8119_v48  ;;  %v8905_v23 = vld [vmem:[#allocation4 + $0x14] sm:$0x1]  ;;  %v8908_v40 = vld [vmem:[#allocation4 + $0x1a] sm:$0x1] }
 0x664   : > { %v8078_v45 = vpop.permute.xlu0 %8077  ;;  %v8120_v54 = vld [vmem:[#allocation4 + $0x2a] sm:$0x1]  ;;  %v8556_v58 = vcombine.high %v14660_v60, %v14660_v60  ;;  %v8599_v49 = vshrl.u32 %v14660_v60, 16 }
 0x665   : > { %8092 = vst.msk [vmem:[#allocation4 + $0x32] sm:$0x1] %vm7666_vm2, %v8078_v45  ;;  %v8194_v9 = vcombine.low %v8193_v4, %v8193_v4  ;;  %v8211_v1 = vcombine.low %v14613_v11, %v14618_v26  ;;  %v14670_v4 = vrot.slane %v8659_v47, %v12567_v36  ;;  %v8257_v32 = vrot.slane %v8250_v30, %v12567_v36  ;;  %v8904_v30 = vld [vmem:[#allocation4 + $0x12] sm:$0x1] }
 0x666   : > { %v8080_v50 = vpop.permute.xlu1 %8079  ;;  %v8121_v62 = vld [vmem:[#allocation4 + $0x2c] sm:$0x1] }
 0x667   : > { %8093 = vst.msk [vmem:[#allocation4 + $0x34] sm:$0x1] %vm7666_vm2, %v8080_v50  ;;  %v8314_v55 = vsel %vm2181_vm3, %v8171_v57, %v8194_v9  ;;  %v8271_v34 = vcombine.low %v8120_v54, %v8121_v62  ;;  %v8218_v53 = vrot.slane %v8211_v1, %v12567_v36  ;;  %v8933_v57 = vcombine.low %v14664_v6, %v14649_v41  ;;  %v14695_v62 = vld.sshfl [vmem:[#allocation4 + $0x26] sm:$0x11 pattern:$0x75316420] }
 0x668   : > { %11516 = vmatmul.mubr.msk.bf16.vlgmr.msra.gmra.mrb[96].mxu0 %vm8345_vm9, %v8314_v55  ;;  %v8767_v38 = vpop.permute.xlu0 %8766  ;;  %v8122_v24 = vld [vmem:[#allocation4 + $0x2e] sm:$0x1]  ;;  %v8512_v50 = vshrl.u32 %v14637_v37, 16  ;;  %v14700_v55 = vsel %vm12572_vm11, %v8503_v51, %v8508_v42  ;;  %v8526_v1 = vshll.u32 %v8474_v29, 16  ;;  %v8667_v54 = vcombine.low %v14670_v4, %v14670_v4  ;;  %v8907_v4 = vld [vmem:[#allocation4 + $0x18] sm:$0x1] }
 0x669   : > { %11519 = vmatprep.mubr.msk.bf16.mxu0 %vm12100_vm7, %v12099_v18  ;;  %11528 = vmatpush3.bf16.msra.mxu0 %v8767_v38  ;;  %v14656_v25 = vrot.slane %v8271_v34, %v12567_v36  ;;  %v8317_v20 = vsel %vm2190_vm4, %v8218_v53, %v8249_v61  ;;  %v8564_v34 = vcombine.high %v14672_v27, %v14672_v27 }
 0x66a   : > { %v8769_v7 = vpop.permute.xlu1 %8768  ;;  %11529 = vmatprep.subr.bf16.mxu0 %v12099_v18  ;;  %v8123_v17 = vld [vmem:[#allocation4 + $0x30] sm:$0x1]  ;;  %v14715_v63 = vsel %vm12572_vm11, %v8512_v50, %v8517_v33  ;;  %v8572_v37 = vcombine.high %v14682_v56, %v14682_v56  ;;  %v8588_v5 = vcombine.high %v14695_v62, %v14695_v62  ;;  %v8676_v31 = vcombine.low %v14679_v19, %v14700_v55 }
 0x66b   : > { %v8272_v46 = vcombine.low %v8122_v24, %v8123_v17  ;;  %v8295_v22 = vcombine.low %v14656_v25, %v14656_v25  ;;  %v14736_v47 = vsel %vm12572_vm11, %v8521_v28, %v8526_v1  ;;  %v8580_v24 = vcombine.high %v14717_v2, %v14717_v2  ;;  %v8903_v50 = vld [vmem:[#allocation4 + $0x10] sm:$0x1] }
 0x66c   : > { %v8771_v14 = vpop.permute.xlu0 %8770  ;;  %v8124_v44 = vld [vmem:[#allocation4 + $0x32] sm:$0x1]  ;;  %v8613_v61 = vshll.u32 %v8564_v34, 16  ;;  %v8640_v42 = vshll.u32 %v8588_v5, 16  ;;  %v8674_v60 = vrot.slane %v8667_v54, %v12567_v36  ;;  %v8684_v54 = vrot.slane %v8676_v31, %v12567_v36 }
 0x66d   : > { %11530 = vmatpush3.bf16.msra.mxu0 %v8769_v7  ;;  %v14687_v9 = vrot.slane %v8272_v46, %v12567_v36  ;;  %v8643_v7 = vcombine.low %v14600_v8, %v14613_v11  ;;  %v8303_v17 = vrot.slane %v8295_v22, %v12567_v36  ;;  %v8595_v8 = vshll.u32 %v8548_v21, 16 }
 0x66e   : > { %v8773_v3 = vpop.permute.xlu1 %8772  ;;  %11531 = vmatprep.subr.bf16.mxu0 %v12099_v18  ;;  %v8125_v43 = vld [vmem:[#allocation4 + $0x34] sm:$0x1]  ;;  %v8604_v11 = vshll.u32 %v8556_v58, 16  ;;  %v8622_v46 = vshll.u32 %v8572_v37, 16  ;;  %v8963_v58 = vcombine.low %v8903_v50, %v8904_v30  ;;  %v8615_v28 = vsel %vm12572_vm11, %v8608_v59, %v8613_v61 }
 0x66f   : > { %v8273_v15 = vcombine.low %v8124_v44, %v8125_v43  ;;  %v8617_v44 = vshrl.u32 %v14682_v56, 16  ;;  %v8635_v43 = vshrl.u32 %v14695_v62, 16  ;;  %v8910_v51 = vcombine.low %v8303_v17, %v8303_v17 }
 0x670   : > { %v9014_v45 = vpop.permute.xlu0 %9013  ;;  %11520 = vmatmul.mubr.msk.bf16.gmra.mrb[100].mxu0 %vm8345_vm9, %v8317_v20  ;;  %v8677_v20 = vcombine.low %v14715_v63, %v14736_v47  ;;  %v8606_v27 = vsel %vm12572_vm11, %v8599_v49, %v8604_v11  ;;  %v8631_v56 = vshll.u32 %v8580_v24, 16  ;;  %v8940_v37 = vrot.slane %v8933_v57, %v12567_v36  ;;  %v8901_v11 = vld [vmem:[#allocation4 + $0xc] sm:$0x1] }
 0x671   : > { %11548 = vmatpush3.bf16.msra.mxu1 %v9014_v45  ;;  %11523 = vmatprep.mubr.msk.bf16.mxu0 %vm12100_vm7, %v12099_v18  ;;  %v14690_v10 = vrot.slane %v8273_v15, %v12567_v36  ;;  %v8906_v15 = vld [vmem:[#allocation4 + $0x16] sm:$0x1]  ;;  %v8657_v45 = vrot.slane %v14618_v26, %v12567_v36  ;;  %v8624_v62 = vsel %vm12572_vm11, %v8617_v44, %v8622_v46 }
 0x672   : > { %v9016_v35 = vpop.permute.xlu1 %9015  ;;  %11549 = vmatprep.subr.bf16.mxu1 %v12099_v18  ;;  %11532 = vmatpush3.bf16.msra.mxu0 %v8771_v14  ;;  %v8264_v14 = vrot.slane %v8257_v32, %v12567_v36  ;;  %v8964_v33 = vcombine.low %v8905_v23, %v8906_v15  ;;  %v8642_v1 = vsel %vm12572_vm11, %v8635_v43, %v8640_v42 }
 0x673   : > { %v8296_v38 = vcombine.low %v14687_v9, %v14690_v10  ;;  %11533 = vmatprep.subr.bf16.mxu0 %v12099_v18  ;;  %v8700_v26 = vcombine.low %v14656_v25, %v14687_v9  ;;  %v8965_v32 = vcombine.low %v8907_v4, %v8908_v40  ;;  %v8717_v9 = vcombine.low %v8615_v28, %v8624_v62  ;;  %v10950_v4 = vld.sshfl [vmem:[#allocation4 + $0xc] sm:$0x11 pattern:$0x75316420] }
 0x674   : > { %v9018_v53 = vpop.permute.xlu0 %9017  ;;  %v8909_v22 = vcombine.low %v14635_v13, %v8264_v14  ;;  %v8597_v13 = vsel %vm12572_vm11, %v8590_v0, %v8595_v8  ;;  %v14777_v34 = vrot.slane %v8964_v33, %v12567_v36  ;;  %v8900_v8 = vld [vmem:[#allocation4 + $0xa] sm:$0x1]  ;;  %v8941_v24 = vcombine.low %v8940_v37, %v8940_v37 }
 0x675   : > { %11550 = vmatpush3.bf16.msra.mxu1 %v9016_v35  ;;  %v14729_v12 = vrot.slane %v8296_v38, %v12567_v36  ;;  %v8626_v35 = vshrl.u32 %v14717_v2, 16  ;;  %v8675_v38 = vcombine.low %v8674_v60, %v8674_v60  ;;  %v8707_v0 = vrot.slane %v8700_v26, %v12567_v36 }
 0x676   : > { %11551 = vmatprep.subr.bf16.mxu1 %v12099_v18  ;;  %11534 = vmatpush3.bf16.msra.mxu0 %v8773_v3  ;;  %v8650_v3 = vrot.slane %v8643_v7, %v12567_v36  ;;  %v9020_v29 = vpop.permute.xlu1 %9019  ;;  %v9006_v2 = vsel %vm2181_vm3, %v8909_v22, %v8910_v51  ;;  %v8691_v7 = vrot.slane %v8677_v20, %v12567_v36 }
 0x677   : > { %v8311_v48 = vcombine.low %v8303_v17, %v14729_v12  ;;  %11567 = vmatprep.subr.bf16.mxu0 %v12099_v18  ;;  %v8633_v25 = vsel %vm12572_vm11, %v8626_v35, %v8631_v56  ;;  %v8716_v17 = vcombine.low %v8597_v13, %v8606_v27  ;;  %v8732_v57 = vrot.slane %v8717_v9, %v12567_v36 }
 0x678   : > { %v8658_v21 = vcombine.low %v8650_v3, %v8657_v45  ;;  %v9307_v5 = vpop.permute.xlu0 %9306  ;;  %v8718_v31 = vcombine.low %v8633_v25, %v8642_v1  ;;  %v8692_v41 = vcombine.low %v8684_v54, %v8691_v7  ;;  %v8942_v23 = vcombine.low %v8900_v8, %v8901_v11  ;;  %v14864_v7 = vld [vmem:[%s15059_s17] ss:$0 sm:$0xff] }
 0x679   : > { %11552 = vmatpush3.bf16.msra.mxu1 %v9018_v53  ;;  %v8320_v52 = vsel %vm786_vm0, %v8264_v14, %v8311_v48  ;;  %v8972_v14 = vrot.slane %v8963_v58, %v12567_v36  ;;  %v14793_v48 = vrot.slane %v8965_v32, %v12567_v36  ;;  %v8708_v59 = vcombine.low %v8707_v0, %v8707_v0 }
 0x67a   : > { %11524 = vmatmul.mubr.msk.bf16.gmra.mrb[104].mxu0 %vm8345_vm9, %v8320_v52  ;;  %11553 = vmatprep.subr.bf16.mxu1 %v12099_v18  ;;  %v8759_v53 = vsel %vm2181_vm3, %v8658_v21, %v8675_v38  ;;  %v9309_v49 = vpop.permute.xlu1 %9308  ;;  %v8725_v46 = vrot.slane %v8716_v17, %v12567_v36  ;;  %v8739_v42 = vrot.slane %v8718_v31, %v12567_v36  ;;  %v9230_v35 = vshrl.u32 %v10950_v4, 16 }
 0x67b   : > { %11535 = vmatprep.mubr.msk.bf16.mxu0 %vm12100_vm7, %v12099_v18  ;;  %v8988_v6 = vcombine.low %v14777_v34, %v14793_v48  ;;  %v8987_v61 = vcombine.low %v8972_v14, %v8972_v14  ;;  %v9009_v52 = vsel %vm2190_vm4, %v14729_v12, %v8941_v24  ;;  %v8699_v3 = vrot.slane %v8692_v41, %v12567_v36 }
 0x67c   : > { %v8741_v44 = vcombine.low %v8732_v57, %v8739_v42  ;;  %v9311_v43 = vpop.permute.xlu0 %9310  ;;  %v8949_v60 = vrot.slane %v8942_v23, %v12567_v36  ;;  %v8740_v20 = vcombine.low %v8725_v46, %v8725_v46  ;;  %v8715_v51 = vrot.slane %v14690_v10, %v12567_v36  ;;  %9747 = vrot.lane.b32.xlu0 %v14864_v7, %s12104_s29 }
 0x67d   : > { %11554 = vmatpush3.bf16.msra.mxu1 %v9020_v29  ;;  %v9002_v40 = vrot.slane %v8988_v6, %v12567_v36  ;;  %v8762_v29 = vsel %vm2190_vm4, %v8699_v3, %v8708_v59  ;;  %v8995_v12 = vrot.slane %v8987_v61, %v12567_v36  ;;  %v9183_v56 = vcombine.high %v10950_v4, %v10950_v4 }
 0x67e   : > { %11597 = vmatprep.subr.bf16.mxu1 %v12099_v18  ;;  %v8755_v15 = vrot.slane %v8741_v44, %v12567_v36  ;;  %v9313_v27 = vpop.permute.xlu1 %9312  ;;  %v8956_v45 = vrot.slane %v8949_v60, %v12567_v36  ;;  %v8748_v33 = vrot.slane %v8740_v20, %v12567_v36  ;;  %v9238_v1 = vcombine.low %v8707_v0, %v8715_v51 }
 0x67f   : > { %v9003_v30 = vcombine.low %v8995_v12, %v9002_v40  ;;  %v9235_v10 = vshll.u32 %v9183_v56, 16  ;;  %v9240_v21 = vcombine.low %v8972_v14, %v14777_v34  ;;  %v9257_v32 = vcombine.low %v14700_v55, %v14715_v63  ;;  %9507 = vrot.lane.b32.xlu1 %v14864_v7, %s12106_s21 }
 0x680   : > { %11556 = vmatmul.mubr.msk.bf16.vlgmr.msra.gmra.mrb[92].mxu1 %vm8345_vm9, %v9006_v2  ;;  %v8756_v50 = vcombine.low %v8748_v33, %v8755_v15  ;;  %v9239_v58 = vcombine.low %v8748_v33, %v8748_v33  ;;  %v9256_v13 = vcombine.low %v14630_v16, %v14679_v19  ;;  %v9255_v19 = vrot.slane %v14793_v48, %v12567_v36 }
 0x681   : > { %11559 = vmatprep.mubr.msk.bf16.mxu1 %vm12100_vm7, %v12099_v18  ;;  %v9012_v22 = vsel %vm786_vm0, %v8956_v45, %v9003_v30  ;;  %v9237_v26 = vsel %vm12572_vm11, %v9230_v35, %v9235_v10  ;;  %v9247_v54 = vrot.slane %v9240_v21, %v12567_v36  ;;  %v9272_v39 = vrot.slane %v9257_v32, %v12567_v36 }
 0x682   : > { %11536 = vmatmul.mubr.msk.bf16.vlgmr.msra.gmra.mrb[108].mxu0 %vm8345_vm9, %v8759_v53  ;;  %v8765_v62 = vsel %vm786_vm0, %v8715_v51, %v8756_v50  ;;  %v9299_v38 = vsel %vm2181_vm3, %v9238_v1, %v9239_v58  ;;  %v9258_v28 = vcombine.low %v14736_v47, %v9237_v26  ;;  %v9265_v34 = vrot.slane %v9256_v13, %v12567_v36 }
 0x683   : > { %11539 = vmatprep.mubr.msk.bf16.mxu0 %vm12100_vm7, %v12099_v18  ;;  %11568 = vmatpush3.bf16.msra.mxu0 %v9307_v5  ;;  %v9248_v2 = vcombine.low %v9247_v54, %v9247_v54  ;;  %vm10099_vm11 = vcmask 31744  }
 0x684   : > { %11569 = vmatprep.subr.bf16.mxu0 %v12099_v18  ;;  %v9279_v55 = vrot.slane %v9258_v28, %v12567_v36  ;;  %v9280_v9 = vcombine.low %v9265_v34, %v9265_v34  ;;  %9926 = vrot.lane.b32.xlu0 %v14864_v7, %s12105_s20 }
 0x685   : > { %v9302_v25 = vsel %vm2190_vm4, %v8755_v15, %v9248_v2 }
 0x686   : > { %v9281_v63 = vcombine.low %v9272_v39, %v9279_v55  ;;  %v9288_v47 = vrot.slane %v9280_v9, %v12567_v36 }
 0x687   : > { %11570 = vmatpush3.bf16.msra.mxu0 %v9309_v49 }
 0x688   : > { %11560 = vmatmul.mubr.msk.bf16.gmra.mrb[96].mxu1 %vm8345_vm9, %v9009_v52  ;;  %11571 = vmatprep.subr.bf16.mxu0 %v12099_v18  ;;  %v9295_v16 = vrot.slane %v9281_v63, %v12567_v36 }
 0x689   : > { %11563 = vmatprep.mubr.msk.bf16.mxu1 %vm12100_vm7, %v12099_v18 }
 0x68a   : > { %11540 = vmatmul.mubr.msk.bf16.gmra.mrb[112].mxu0 %vm8345_vm9, %v8762_v29  ;;  %v9296_v37 = vcombine.low %v9288_v47, %v9295_v16 }
 0x68b   : > { %11543 = vmatprep.mubr.msk.bf16.mxu0 %vm12100_vm7, %v12099_v18  ;;  %11572 = vmatpush3.bf16.msra.mxu0 %v9311_v43 }
 0x68c   : > { %11573 = vmatprep.subr.bf16.mxu0 %v12099_v18  ;;  %v9305_v5 = vsel %vm786_vm0, %v9255_v19, %v9296_v37  ;;  %vm9493_vm0 = vcmask 388096  }
 0x68f   : > { %11574 = vmatpush3.bf16.msra.mxu0 %v9313_v27 }
 0x690   : > { %11564 = vmatmul.mubr.msk.bf16.gmra.mrb[100].mxu1 %vm8345_vm9, %v9012_v22  ;;  %11587 = vmatprep.subr.bf16.mxu0 %v12099_v18 }
 0x691   : > { %11603 = vmatprep.mubr.msk.bf16.mxu1 %vm12100_vm7, %v12099_v18 }
 0x692   : > { %11544 = vmatmul.mubr.msk.bf16.gmra.mrb[116].mxu0 %vm8345_vm9, %v8765_v62 }
 0x693   : > { %11575 = vmatprep.mubr.msk.bf16.mxu0 %vm12100_vm7, %v12099_v18 }
 0x69a   : > { %11576 = vmatmul.mubr.msk.bf16.vlgmr.msra.gmra.mrb[120].mxu0 %vm8345_vm9, %v9299_v38 }
 0x69b   : > { %11579 = vmatprep.mubr.msk.bf16.mxu0 %vm12100_vm7, %v12099_v18 }
 0x6a2   : > { %11580 = vmatmul.mubr.msk.bf16.gmra.mrb[124].mxu0 %vm8345_vm9, %v9302_v25 }
 0x6a3   : > { %11583 = vmatprep.mubr.msk.bf16.mxu0 %vm12100_vm7, %v12099_v18 }
 0x6aa   : > { %11584 = vmatmul.mubr.msk.bf16.gmra.mrb[128].mxu0 %vm8345_vm9, %v9305_v5 }
 0x6ab   : > { %11593 = vmatprep.mubr.msk.bf16.mxu0 %vm12100_vm7, %v12099_v18 }
 0x6ee   : > { %v9748_v13 = vpop.permute.xlu0 %9747 }
 0x6f1   : > { %v14910_v39 = vpop.permute.xlu1 %9507 }
 0x6f6   : > { %v14908_v28 = vpop.permute.xlu0 %9926 }
 0x73b   : > { %v14872_v36 = vpop.f32.mrb[96].mxu0 }
 0x73c   : > { %v11517_v17 = vpop.f32.mrb[97].mxu0 }
 0x73d   : > { %v14874_v31 = vpop.f32.mrb[98].mxu0 }
 0x73e   : > { %v11518_v53 = vpop.f32.mrb[99].mxu0 }
 0x743   : > { %v14876_v0 = vpop.f32.mrb[100].mxu0 }
 0x744   : > { %v11521_v8 = vpop.f32.mrb[101].mxu0 }
 0x745   : > { %v14878_v11 = vpop.f32.mrb[102].mxu0 }
 0x746   : > { %v11522_v14 = vpop.f32.mrb[103].mxu0 }
 0x74d   : > { %v14880_v48 = vpop.f32.mrb[104].mxu0 }
 0x74e   : > { %v11525_v41 = vpop.f32.mrb[105].mxu0 }
 0x74f   : > { %v14882_v6 = vpop.f32.mrb[106].mxu0 }
 0x750   : > { %v11526_v57 = vpop.f32.mrb[107].mxu0 }
 0x753   : > { %v9065_v24 = vpop.f32.mrb[92].mxu1 }
 0x754   : > { %9094 = vrot.lane.b32.xlu0 %v9065_v24, %s12104_s29  ;;  %v11557_v49 = vpop.f32.mrb[93].mxu1 }
 0x755   : > { %v8818_v23 = vpop.f32.mrb[108].mxu0  ;;  %v9068_v59 = vpop.f32.mrb[94].mxu1 }
 0x756   : > { %9096 = vrot.lane.b32.xlu1 %v9068_v59, %s12104_s29  ;;  %v11537_v61 = vpop.f32.mrb[109].mxu0  ;;  %v11558_v46 = vpop.f32.mrb[95].mxu1 }
 0x757   : > { %v8821_v42 = vpop.f32.mrb[110].mxu0 }
 0x758   : > { %v11538_v52 = vpop.f32.mrb[111].mxu0 }
 0x75b   : > { %v9073_v3 = vpop.f32.mrb[96].mxu1 }
 0x75c   : > { %9098 = vrot.lane.b32.xlu1 %v9073_v3, %s12104_s29  ;;  %v11561_v40 = vpop.f32.mrb[97].mxu1 }
 0x75d   : > { %v8826_v44 = vpop.f32.mrb[112].mxu0  ;;  %v9076_v43 = vpop.f32.mrb[98].mxu1 }
 0x75e   : > { %9100 = vrot.lane.b32.xlu0 %v9076_v43, %s12104_s29  ;;  %v11541_v29 = vpop.f32.mrb[113].mxu0  ;;  %v11562_v60 = vpop.f32.mrb[99].mxu1 }
 0x75f   : > { %v8829_v12 = vpop.f32.mrb[114].mxu0 }
 0x760   : > { %8871 = vrot.lane.b32.xlu1 %v8818_v23, %s12104_s29  ;;  %v11542_v20 = vpop.f32.mrb[115].mxu0 }
 0x763   : > { %v9081_v30 = vpop.f32.mrb[100].mxu1 }
 0x764   : > { %9102 = vrot.lane.b32.xlu0 %v9081_v30, %s12104_s29  ;;  %v11565_v15 = vpop.f32.mrb[101].mxu1  ;;  %8847 = vrot.lane.b32.xlu1 %v8818_v23, %s12106_s21 }
 0x765   : > { %v8834_v4 = vpop.f32.mrb[116].mxu0  ;;  %v9084_v27 = vpop.f32.mrb[102].mxu1 }
 0x766   : > { %v11545_v45 = vpop.f32.mrb[117].mxu0  ;;  %v11566_v51 = vpop.f32.mrb[103].mxu1 }
 0x767   : > { %v8837_v33 = vpop.f32.mrb[118].mxu0 }
 0x768   : > { %8849 = vrot.lane.b32.xlu0 %v8821_v42, %s12106_s21  ;;  %8873 = vrot.lane.b32.xlu1 %v8821_v42, %s12104_s29  ;;  %v11546_v56 = vpop.f32.mrb[119].mxu0 }
 0x76c   : > { %9104 = vrot.lane.b32.xlu0 %v9084_v27, %s12104_s29  ;;  %8851 = vrot.lane.b32.xlu1 %v8826_v44, %s12106_s21 }
 0x76d   : > { %v9358_v22 = vpop.f32.mrb[120].mxu0 }
 0x76e   : > { %v11577_v50 = vpop.f32.mrb[121].mxu0 }
 0x76f   : > { %v9361_v62 = vpop.f32.mrb[122].mxu0 }
 0x770   : > { %8875 = vrot.lane.b32.xlu0 %v8826_v44, %s12104_s29  ;;  %8877 = vrot.lane.b32.xlu1 %v8829_v12, %s12104_s29  ;;  %v11578_v35 = vpop.f32.mrb[123].mxu0 }
 0x774   : > { %8853 = vrot.lane.b32.xlu0 %v8829_v12, %s12106_s21  ;;  %8881 = vrot.lane.b32.xlu1 %v8837_v33, %s12104_s29 }
 0x775   : > { %v9366_v10 = vpop.f32.mrb[124].mxu0 }
 0x776   : > { %v11581_v1 = vpop.f32.mrb[125].mxu0 }
 0x777   : > { %v9369_v21 = vpop.f32.mrb[126].mxu0 }
 0x778   : > { %8879 = vrot.lane.b32.xlu0 %v8834_v4, %s12104_s29  ;;  %9387 = vrot.lane.b32.xlu1 %v9358_v22, %s12105_s20  ;;  %v11582_v26 = vpop.f32.mrb[127].mxu0 }
 0x77c   : > { %9389 = vrot.lane.b32.xlu0 %v9361_v62, %s12105_s20  ;;  %9391 = vrot.lane.b32.xlu1 %v9366_v10, %s12105_s20 }
 0x77d   : > { %v9374_v58 = vpop.f32.mrb[128].mxu0 }
 0x77e   : > { %v11585_v32 = vpop.f32.mrb[129].mxu0 }
 0x77f   : > { %v9377_v38 = vpop.f32.mrb[130].mxu0 }
 0x780   : > { %8855 = vrot.lane.b32.xlu1 %v8834_v4, %s12106_s21  ;;  %9393 = vrot.lane.b32.xlu0 %v9369_v21, %s12105_s20  ;;  %v11586_v54 = vpop.f32.mrb[131].mxu0 }
 0x784   : > { %8857 = vrot.lane.b32.xlu1 %v8837_v33, %s12106_s21  ;;  %9395 = vrot.lane.b32.xlu0 %v9374_v58, %s12105_s20  ;;  %s10208_s21 = sshll.u32 %s15190_s30, 3 }
 0x788   : > { %9397 = vrot.lane.b32.xlu0 %v9377_v38, %s12105_s20  ;;  %s15006_s20 = scalar_lea.vmem %s15060_s18, %s11027_s28 }
 0x7c6   : > { %v14912_v2 = vpop.permute.xlu0 %9094 }
 0x7c7   : > { %v9112_v34 = vadd.f32 %v14912_v2, %v14872_v36 }
 0x7c8   : > { %v14916_v55 = vpop.permute.xlu1 %9096 }
 0x7c9   : > { %v9750_v63 = vadd.f32 %v9748_v13, %v9112_v34  ;;  %v9113_v25 = vadd.f32 %v14916_v55, %v14874_v31 }
 0x7cb   : > { %v10990_v9 = vmul.f32 -1.442695, %v9750_v63  ;;  %v9751_v16 = vadd.f32 %v9748_v13, %v9113_v25 }
 0x7cd   : > { %11992 = vpow2.f32 %v10990_v9  ;;  %v10991_v19 = vmul.f32 -1.442695, %v9751_v16 }
 0x7ce   : > { %v14920_v47 = vpop.permute.xlu1 %9098 }
 0x7cf   : > { %11994 = vpow2.f32 %v10991_v19  ;;  %v9114_v37 = vadd.f32 %v14920_v47, %v14876_v0 }
 0x7d0   : > { %v14924_v5 = vpop.permute.xlu0 %9100 }
 0x7d1   : > { %v9752_v17 = vadd.f32 %v9748_v13, %v9114_v37  ;;  %v9115_v53 = vadd.f32 %v14924_v5, %v14878_v11 }
 0x7d2   : > { %v8872_v8 = vpop.permute.xlu1 %8871 }
 0x7d3   : > { %v10992_v14 = vmul.f32 -1.442695, %v9752_v17  ;;  %v9753_v41 = vadd.f32 %v9748_v13, %v9115_v53  ;;  %v8889_v26 = vadd.f32 %v8872_v8, %v14872_v36 }
 0x7d5   : > { %11996 = vpow2.f32 %v10992_v14  ;;  %v10993_v57 = vmul.f32 -1.442695, %v9753_v41  ;;  %v9118_v25 = vadd.f32 %v14912_v2, %v8889_v26 }
 0x7d6   : > { %v14928_v24 = vpop.permute.xlu0 %9102  ;;  %v8848_v49 = vpop.permute.xlu1 %8847 }
 0x7d7   : > { %v11993_v23 = vpop.eup %11992  ;;  %11998 = vpow2.f32 %v10993_v57  ;;  %v9116_v59 = vadd.f32 %v14928_v24, %v14880_v48  ;;  %v8865_v61 = vadd.f32 %v8848_v49, %v14872_v36 }
 0x7d8   : > { %v9774_v46 = vadd.f32 1.0, %v11993_v23 }
 0x7d9   : > { %v11995_v42 = vpop.eup %11994  ;;  %v9754_v52 = vadd.f32 %v9748_v13, %v9116_v59  ;;  %v9510_v3 = vadd.f32 %v14910_v39, %v8865_v61 }
 0x7da   : > { %v9775_v40 = vadd.f32 1.0, %v11995_v42  ;;  %v8850_v44 = vpop.permute.xlu0 %8849  ;;  %v8874_v43 = vpop.permute.xlu1 %8873  ;;  %12000 = vrcp.f32 %v9774_v46 }
 0x7db   : > { %v10994_v29 = vmul.f32 -1.442695, %v9754_v52  ;;  %v10968_v60 = vmul.f32 -1.442695, %v9510_v3  ;;  %v8866_v12 = vadd.f32 %v8850_v44, %v14874_v31  ;;  %v8890_v19 = vadd.f32 %v8874_v43, %v14874_v31 }
 0x7dc   : > { %12002 = vrcp.f32 %v9775_v40 }
 0x7dd   : > { %v9511_v20 = vadd.f32 %v14910_v39, %v8866_v12  ;;  %12004 = vpow2.f32 %v10968_v60  ;;  %v9119_v61 = vadd.f32 %v14916_v55, %v8890_v19 }
 0x7de   : > { %v14936_v30 = vpop.permute.xlu0 %9104  ;;  %v8852_v15 = vpop.permute.xlu1 %8851  ;;  %12006 = vpow2.f32 %v10994_v29 }
 0x7df   : > { %v11997_v4 = vpop.eup %11996  ;;  %v10969_v27 = vmul.f32 -1.442695, %v9511_v20  ;;  %v9117_v45 = vadd.f32 %v14936_v30, %v14882_v6  ;;  %v8867_v51 = vadd.f32 %v8852_v15, %v14876_v0 }
 0x7e0   : > { %v9776_v33 = vadd.f32 1.0, %v11997_v4 }
 0x7e1   : > { %v11999_v56 = vpop.eup %11998  ;;  %12008 = vpow2.f32 %v10969_v27  ;;  %v9755_v22 = vadd.f32 %v9748_v13, %v9117_v45  ;;  %v9512_v50 = vadd.f32 %v14910_v39, %v8867_v51 }
 0x7e2   : > { %v9777_v62 = vadd.f32 1.0, %v11999_v56  ;;  %v8876_v35 = vpop.permute.xlu0 %8875  ;;  %v8878_v10 = vpop.permute.xlu1 %8877  ;;  %12010 = vrcp.f32 %v9776_v33 }
 0x7e3   : > { %v10995_v1 = vmul.f32 -1.442695, %v9755_v22  ;;  %v10970_v21 = vmul.f32 -1.442695, %v9512_v50  ;;  %v8891_v37 = vadd.f32 %v8876_v35, %v14876_v0  ;;  %v8892_v52 = vadd.f32 %v8878_v10, %v14878_v11 }
 0x7e4   : > { %12012 = vrcp.f32 %v9777_v62  ;;  %v12001_v58 = vpop.eup %12000 }
 0x7e5   : > { %12014 = vpow2.f32 %v10995_v1  ;;  %v9120_v46 = vadd.f32 %v14920_v47, %v8891_v37  ;;  %v9121_v45 = vadd.f32 %v14924_v5, %v8892_v52 }
 0x7e6   : > { %v12003_v32 = vpop.eup %12002  ;;  %v8854_v38 = vpop.permute.xlu0 %8853  ;;  %12016 = vpow2.f32 %v10970_v21 }
 0x7e7   : > { %v8882_v54 = vpop.permute.xlu1 %8881  ;;  %v8868_v34 = vadd.f32 %v8854_v38, %v14878_v11  ;;  %v11660_v13 = vpack.i.bf16 %v12003_v32, %v12001_v58  ;;  %v12005_v63 = vpop.eup %12004 }
 0x7e8   : > { %v12007_v9 = vpop.eup %12006  ;;  %v9534_v16 = vadd.f32 1.0, %v12005_v63  ;;  %v8894_v62 = vadd.f32 %v8882_v54, %v14882_v6 }
 0x7e9   : > { %v9513_v17 = vadd.f32 %v14910_v39, %v8868_v34  ;;  %11661 = vrot.lane.b32.xlu1 %v11660_v13, %s12107_s2  ;;  %v9778_v49 = vadd.f32 1.0, %v12007_v9 }
 0x7ea   : > { %v8880_v53 = vpop.permute.xlu0 %8879  ;;  %12018 = vrcp.f32 %v9534_v16  ;;  %v9123_v9 = vadd.f32 %v14936_v30, %v8894_v62 }
 0x7eb   : > { %v9388_v8 = vpop.permute.xlu1 %9387  ;;  %v12009_v14 = vpop.eup %12008  ;;  %v10971_v41 = vmul.f32 -1.442695, %v9513_v17  ;;  %v8893_v4 = vadd.f32 %v8880_v53, %v14880_v48 }
 0x7ec   : > { %v9405_v57 = vadd.f32 %v9388_v8, %v9118_v25  ;;  %v9535_v23 = vadd.f32 1.0, %v12009_v14  ;;  %v12011_v2 = vpop.eup %12010 }
 0x7ed   : > { %12020 = vpow2.f32 %v10971_v41  ;;  %v9122_v1 = vadd.f32 %v14928_v24, %v8893_v4 }
 0x7ee   : > { %v9929_v59 = vadd.f32 %v14908_v28, %v9405_v57  ;;  %v12013_v42 = vpop.eup %12012  ;;  %12022 = vrcp.f32 %v9535_v23  ;;  %v9390_v3 = vpop.permute.xlu0 %9389 }
 0x7ef   : > { %v9392_v40 = vpop.permute.xlu1 %9391  ;;  %v12015_v44 = vpop.eup %12014  ;;  %v9406_v29 = vadd.f32 %v9390_v3, %v9119_v61  ;;  %v11665_v12 = vpack.i.bf16 %v12013_v42, %v12011_v2  ;;  %12024 = vrcp.f32 %v9778_v49 }
 0x7f0   : > { %v11008_v43 = vmul.f32 -1.442695, %v9929_v59  ;;  %v9407_v60 = vadd.f32 %v9392_v40, %v9120_v46  ;;  %v9779_v20 = vadd.f32 1.0, %v12015_v44  ;;  %v12017_v15 = vpop.eup %12016 }
 0x7f1   : > { %v9930_v55 = vadd.f32 %v14908_v28, %v9406_v29  ;;  %11666 = vrot.lane.b32.xlu0 %v11665_v12, %s12107_s2  ;;  %v9536_v50 = vadd.f32 1.0, %v12017_v15 }
 0x7f2   : > { %12026 = vpow2.f32 %v11008_v43  ;;  %v9931_v47 = vadd.f32 %v14908_v28, %v9407_v60  ;;  %v9394_v51 = vpop.permute.xlu0 %9393 }
 0x7f3   : > { %12028 = vrcp.f32 %v9779_v20  ;;  %v8856_v27 = vpop.permute.xlu1 %8855  ;;  %v11009_v33 = vmul.f32 -1.442695, %v9930_v55  ;;  %v9408_v35 = vadd.f32 %v9394_v51, %v9121_v45 }
 0x7f4   : > { %v11010_v56 = vmul.f32 -1.442695, %v9931_v47  ;;  %v8869_v22 = vadd.f32 %v8856_v27, %v14880_v48  ;;  %v12019_v21 = vpop.eup %12018 }
 0x7f5   : > { %12030 = vpow2.f32 %v11009_v33  ;;  %v9932_v26 = vadd.f32 %v14908_v28, %v9408_v35 }
 0x7f6   : > { %v9514_v10 = vadd.f32 %v14910_v39, %v8869_v22  ;;  %12032 = vpow2.f32 %v11010_v56  ;;  %v9396_v5 = vpop.permute.xlu0 %9395 }
 0x7f7   : > { %v8858_v58 = vpop.permute.xlu1 %8857  ;;  %v12021_v32 = vpop.eup %12020  ;;  %v9409_v13 = vadd.f32 %v9396_v5, %v9122_v1  ;;  %12034 = vrcp.f32 %v9536_v50  ;;  %v11011_v25 = vmul.f32 -1.442695, %v9932_v26  ;;  %v11980_v1 = vld [vmem:[%s14977_s22] sm:$0xff]   ;;  %v9418_v26 = vadd.f32 %v14864_v7, %v14872_v36 }
 0x7f8   : > { %v10972_v38 = vmul.f32 -1.442695, %v9514_v10  ;;  %v8870_v34 = vadd.f32 %v8858_v58, %v14882_v6  ;;  %v12023_v63 = vpop.eup %12022  ;;  %v9537_v54 = vadd.f32 1.0, %v12021_v32  ;;  %11598 = vmatpush3.bf16.msra.mxu1 %v11980_v1  ;;  %v9419_v5 = vadd.f32 %v14864_v7, %v14874_v31 }
 0x7f9   : > { %v9933_v16 = vadd.f32 %v14908_v28, %v9409_v13  ;;  %v11670_v19 = vpack.i.bf16 %v12023_v63, %v12019_v21  ;;  %v12025_v37 = vpop.eup %12024  ;;  %v11981_v21 = vld [vmem:[%s14977_s22 + $0x8] sm:$0xff]   ;;  %11599 = vmatprep.subr.bf16.mxu1 %v12099_v18  ;;  %v10961_v58 = vmul.f32 -1.442695, %v9418_v26  ;;  %v9421_v13 = vadd.f32 %v14864_v7, %v14878_v11 }
 0x7fa   : > { %12036 = vpow2.f32 %v10972_v38  ;;  %v9515_v24 = vadd.f32 %v14910_v39, %v8870_v34  ;;  %v9398_v17 = vpop.permute.xlu0 %9397  ;;  %v10962_v32 = vmul.f32 -1.442695, %v9419_v5  ;;  %v9420_v38 = vadd.f32 %v14864_v7, %v14876_v0 }
 0x7fb   : > { %12038 = vrcp.f32 %v9537_v54  ;;  %v11012_v14 = vmul.f32 -1.442695, %v9933_v16  ;;  %v9410_v41 = vadd.f32 %v9398_v17, %v9123_v9  ;;  %11671 = vrot.lane.b32.xlu0 %v11670_v19, %s12108_s23  ;;  %v10964_v63 = vmul.f32 -1.442695, %v9421_v13 }
 0x7fc   : > { %v12027_v53 = vpop.eup %12026  ;;  %12040 = vpow2.f32 %v11011_v25  ;;  %v10973_v8 = vmul.f32 -1.442695, %v9515_v24  ;;  %11600 = vmatpush3.bf16.msra.mxu1 %v11981_v21  ;;  %v10963_v34 = vmul.f32 -1.442695, %v9420_v38  ;;  %v9422_v9 = vadd.f32 %v14864_v7, %v14880_v48 }
 0x7fd   : > { %v12029_v57 = vpop.eup %12028  ;;  %v9953_v49 = vadd.f32 1.0, %v12027_v53  ;;  %v9934_v30 = vadd.f32 %v14908_v28, %v9410_v41  ;;  %11601 = vmatprep.subr.bf16.mxu1 %v12099_v18  ;;  %v9423_v0 = vadd.f32 %v14864_v7, %v14882_v6 }
 0x7fe   : > { %12042 = vpow2.f32 %v10973_v8  ;;  %v11675_v39 = vpack.i.bf16 %v12029_v57, %v12025_v37  ;;  %v10965_v16 = vmul.f32 -1.442695, %v9422_v9 }
 0x7ff   : > { %v12031_v23 = vpop.eup %12030  ;;  %12044 = vpow2.f32 %v11012_v14  ;;  %v11013_v2 = vmul.f32 -1.442695, %v9934_v30  ;;  %v10966_v11 = vmul.f32 -1.442695, %v9423_v0 }
 0x800   : > { %11676 = vrot.lane.b32.xlu1 %v11675_v39, %s12107_s2  ;;  %v12033_v59 = vpop.eup %12032  ;;  %12046 = vrcp.f32 %v9953_v49  ;;  %v9954_v61 = vadd.f32 1.0, %v12031_v23 }
 0x801   : > { %12048 = vpow2.f32 %v11013_v2  ;;  %v12035_v46 = vpop.eup %12034  ;;  %v9955_v52 = vadd.f32 1.0, %v12033_v59 }
 0x802   : > { %12050 = vrcp.f32 %v9954_v61 }
 0x803   : > { %12052 = vrcp.f32 %v9955_v52 }
 0x804   : > { %v12037_v42 = vpop.eup %12036 }
 0x805   : > { %v12039_v3 = vpop.eup %12038  ;;  %v9538_v44 = vadd.f32 1.0, %v12037_v42 }
 0x806   : > { %v12041_v40 = vpop.eup %12040  ;;  %v11680_v43 = vpack.i.bf16 %v12039_v3, %v12035_v46  ;;  %v11982_v3 = vld [vmem:[%s14977_s22 + $0x10] sm:$0xff]  }
 0x807   : > { %v9956_v29 = vadd.f32 1.0, %v12041_v40  ;;  %11602 = vmatpush3.bf16.msra.mxu1 %v11982_v3 }
 0x808   : > { %v12043_v28 = vpop.eup %12042  ;;  %11681 = vrot.lane.b32.xlu0 %v11680_v43, %s12108_s23  ;;  %11607 = vmatprep.subr.bf16.mxu1 %v12099_v18 }
 0x809   : > { %12054 = vrcp.f32 %v9956_v29  ;;  %v9539_v60 = vadd.f32 1.0, %v12043_v28  ;;  %v12045_v12 = vpop.eup %12044 }
 0x80a   : > { %12056 = vrcp.f32 %v9538_v44  ;;  %v12047_v20 = vpop.eup %12046  ;;  %v9957_v15 = vadd.f32 1.0, %v12045_v12  ;;  %v11986_v12 = vld [vmem:[%s14977_s22 + $0x18] sm:$0xff]  }
 0x80b   : > { %12058 = vrcp.f32 %v9539_v60  ;;  %v12049_v4 = vpop.eup %12048  ;;  %11588 = vmatpush3.bf16.msra.mxu0 %v11986_v12 }
 0x80c   : > { %v12051_v55 = vpop.eup %12050  ;;  %v9958_v47 = vadd.f32 1.0, %v12049_v4  ;;  %12060 = vrcp.f32 %v9957_v15  ;;  %v11988_v15 = vld [vmem:[%s14977_s22 + $0x20] sm:$0xff]   ;;  %11589 = vmatprep.subr.bf16.mxu0 %v12099_v18 }
 0x80d   : > { %v11690_v27 = vpack.i.bf16 %v12051_v55, %v12047_v20  ;;  %v12053_v45 = vpop.eup %12052 }
 0x80e   : > { %12062 = vrcp.f32 %v9958_v47 }
 0x80f   : > { %11691 = vrot.lane.b32.xlu1 %v11690_v27, %s12109_s24  ;;  %12064 = vpow2.f32 %v10961_v58  ;;  %11590 = vmatpush3.bf16.msra.mxu0 %v11988_v15 }
 0x810   : > { %12066 = vpow2.f32 %v10962_v32  ;;  %11591 = vmatprep.subr.bf16.mxu0 %v12099_v18 }
 0x811   : > { %12068 = vpow2.f32 %v10963_v34 }
 0x812   : > { %12070 = vpow2.f32 %v10964_v63 }
 0x813   : > { %v12055_v51 = vpop.eup %12054 }
 0x814   : > { %v12057_v33 = vpop.eup %12056  ;;  %v11695_v56 = vpack.i.bf16 %v12055_v51, %v12053_v45 }
 0x815   : > { %v12059_v22 = vpop.eup %12058 }
 0x816   : > { %11696 = vrot.lane.b32.xlu1 %v11695_v56, %s12109_s24  ;;  %v11685_v50 = vpack.i.bf16 %v12059_v22, %v12057_v33  ;;  %v12061_v62 = vpop.eup %12060 }
 0x818   : > { %11686 = vrot.lane.b32.xlu0 %v11685_v50, %s12108_s23  ;;  %v12063_v35 = vpop.eup %12062 }
 0x819   : > { %v11700_v10 = vpack.i.bf16 %v12063_v35, %v12061_v62  ;;  %v12065_v54 = vpop.eup %12064 }
 0x81a   : > { %v9442_v25 = vadd.f32 1.0, %v12065_v54  ;;  %v12067_v36 = vpop.eup %12066 }
 0x81b   : > { %11701 = vrot.lane.b32.xlu1 %v11700_v10, %s12109_s24  ;;  %v9443_v31 = vadd.f32 1.0, %v12067_v36  ;;  %v12069_v24 = vpop.eup %12068  ;;  %v11990_v10 = vld [vmem:[%s14977_s22 + $0x28] sm:$0xff]   ;;  %s633_s24 = scalar_lea.vmem %s15061_s19, %s10208_s21 }
 0x81c   : > { %12072 = vrcp.f32 %v9442_v25  ;;  %v9444_v19 = vadd.f32 1.0, %v12069_v24  ;;  %v12071_v37 = vpop.eup %12070  ;;  %11592 = vmatpush3.bf16.msra.mxu0 %v11990_v10  ;;  %v11983_v24 = vld [vmem:[%s14977_s22 + $0x30] sm:$0xff]  }
 0x81d   : > { %12074 = vrcp.f32 %v9443_v31  ;;  %v9445_v17 = vadd.f32 1.0, %v12071_v37  ;;  %v11985_v37 = vld [vmem:[%s14977_s22 + $0x40] sm:$0xff]  }
 0x81e   : > { %12076 = vpow2.f32 %v10965_v16 }
 0x81f   : > { %12078 = vrcp.f32 %v9444_v19  ;;  %v11984_v19 = vld [vmem:[%s14977_s22 + $0x38] sm:$0xff]  }
 0x820   : > { %12080 = vpow2.f32 %v10966_v11  ;;  %v11987_v11 = vld [vmem:[%s14977_s22 + $0x48] sm:$0xff]  }
 0x821   : > { %12082 = vrcp.f32 %v9445_v17  ;;  %v11989_v17 = vld [vmem:[%s14977_s22 + $0x50] sm:$0xff]  }
 0x826   : > { %v12073_v14 = vpop.eup %12072 }
 0x827   : > { %v12075_v57 = vpop.eup %12074 }
 0x828   : > { %v12077_v49 = vpop.eup %12076 }
 0x829   : > { %v12079_v39 = vpop.eup %12078  ;;  %v9446_v23 = vadd.f32 1.0, %v12077_v49 }
 0x82a   : > { %v12081_v2 = vpop.eup %12080 }
 0x82b   : > { %v12083_v46 = vpop.eup %12082  ;;  %12084 = vrcp.f32 %v9446_v23  ;;  %v9447_v42 = vadd.f32 1.0, %v12081_v2 }
 0x82d   : > { %12086 = vrcp.f32 %v9447_v42 }
 0x835   : > { %v12085_v43 = vpop.eup %12084 }
 0x837   : > { %v12087_v60 = vpop.eup %12086 }
 0x85b   : > { %v11662_v53 = vpop.permute.xlu1 %11661 }
 0x85c   : > { %v11663_v8 = vunpack.i.l.bf16 %v11662_v53  ;;  %v11664_v41 = vunpack.i.h.bf16 %v11662_v53  ;;  %v11991_v53 = vld [vmem:[%s14977_s22 + $0x58] sm:$0xff]  }
 0x85e   : > { %v11705_v48 = vpack.i.bf16 %v11663_v8, %v12073_v14  ;;  %v11707_v30 = vpack.i.bf16 %v11664_v41, %v12075_v57 }
 0x860   : > { %11706 = vxpose.xlu0.b32.start [1/6] (short) (narrow) %v11705_v48, 8 }
 0x863   : > { %v11667_v7 = vpop.permute.xlu0 %11666 }
 0x864   : > { %v11668_v6 = vunpack.i.l.bf16 %v11667_v7  ;;  %11708 = vxpose.xlu0.b32.cont [2/6] (short) (narrow) %v11707_v30, 8  ;;  %v11669_v59 = vunpack.i.h.bf16 %v11667_v7 }
 0x866   : > { %v11709_v61 = vpack.i.bf16 %v11668_v6, %v12079_v39  ;;  %v11711_v52 = vpack.i.bf16 %v11669_v59, %v12083_v46 }
 0x868   : > { %11710 = vxpose.xlu0.b32.cont [3/6] (short) (narrow) %v11709_v61, 8 }
 0x86c   : > { %11712 = vxpose.xlu0.b32.cont [4/6] (short) (narrow) %v11711_v52, 8 }
 0x86d   : > { %v11672_v4 = vpop.permute.xlu0 %11671 }
 0x86e   : > { %v11673_v47 = vunpack.i.l.bf16 %v11672_v4  ;;  %v11674_v33 = vunpack.i.h.bf16 %v11672_v4 }
 0x872   : > { %v11677_v40 = vpop.permute.xlu1 %11676 }
 0x873   : > { %v11678_v44 = vunpack.i.l.bf16 %v11677_v40  ;;  %v11679_v29 = vunpack.i.h.bf16 %v11677_v40 }
 0x875   : > { %v11713_v28 = vpack.i.bf16 %v11678_v44, %v12085_v43  ;;  %v11715_v20 = vpack.i.bf16 %v11679_v29, %v12087_v60 }
 0x877   : > { %11714 = vxpose.xlu0.b32.cont [5/6] (short) (narrow) %v11713_v28, 8 }
 0x87a   : > { %v11682_v56 = vpop.permute.xlu0 %11681 }
 0x87b   : > { %11716 = vxpose.xlu0.b32.end [6/6] (short) (narrow) %v11715_v20, 8  ;;  %v11683_v35 = vunpack.i.l.bf16 %v11682_v56  ;;  %v11684_v58 = vunpack.i.h.bf16 %v11682_v56 }
 0x881   : > { %v11692_v55 = vpop.permute.xlu1 %11691 }
 0x882   : > { %v11693_v27 = vunpack.i.l.bf16 %v11692_v55  ;;  %v11694_v45 = vunpack.i.h.bf16 %v11692_v55 }
 0x884   : > { %v11722_v51 = vpack.i.bf16 %v11693_v27, %v11673_v47  ;;  %v11724_v50 = vpack.i.bf16 %v11694_v45, %v11674_v33 }
 0x886   : > { %11723 = vxpose.xlu1.b32.start [1/6] (short) (narrow) %v11722_v51, 8 }
 0x888   : > { %v11697_v22 = vpop.permute.xlu1 %11696 }
 0x889   : > { %v11698_v62 = vunpack.i.l.bf16 %v11697_v22  ;;  %v11699_v1 = vunpack.i.h.bf16 %v11697_v22 }
 0x88a   : > { %11725 = vxpose.xlu1.b32.cont [2/6] (short) (narrow) %v11724_v50, 8  ;;  %v11687_v5 = vpop.permute.xlu0 %11686 }
 0x88b   : > { %v11726_v21 = vpack.i.bf16 %v11698_v62, %v11683_v35  ;;  %v11728_v32 = vpack.i.bf16 %v11699_v1, %v11684_v58  ;;  %v11688_v34 = vunpack.i.l.bf16 %v11687_v5  ;;  %v11689_v54 = vunpack.i.h.bf16 %v11687_v5 }
 0x88d   : > { %v11702_v26 = vpop.permute.xlu1 %11701 }
 0x88e   : > { %11727 = vxpose.xlu1.b32.cont [3/6] (short) (narrow) %v11726_v21, 8  ;;  %v11703_v38 = vunpack.i.l.bf16 %v11702_v26  ;;  %v11704_v13 = vunpack.i.h.bf16 %v11702_v26 }
 0x890   : > { %v11730_v63 = vpack.i.bf16 %v11703_v38, %v11688_v34  ;;  %v11732_v25 = vpack.i.bf16 %v11704_v13, %v11689_v54 }
 0x892   : > { %11729 = vxpose.xlu1.b32.cont [4/6] (short) (narrow) %v11728_v32, 8 }
 0x896   : > { %11731 = vxpose.xlu1.b32.cont [5/6] (short) (narrow) %v11730_v63, 8 }
 0x89a   : > { %11733 = vxpose.xlu1.b32.end [6/6] (short) (narrow) %v11732_v25, 8 }
 0x8e7   : > { %v11717_v36 = vpop.trf.xlu0 }
 0x8e8   : > { %v11721_v9 = vunpack.i.h.bf16 %v11717_v36  ;;  %v11718_v31 = vunpack.i.l.bf16 %v11717_v36 }
 0x8ea   : > { %v9848_v16 = vpack.c.bf16 %v11721_v9, %v11721_v9  ;;  %v9492_v0 = vpack.c.bf16 %v11718_v31, %v11718_v31 }
 0x8ec   : > { %10996 = vst.msk [vmem:[%s15006_s20 + $0x8] sm:$0xf] %vm9493_vm0, %v9848_v16  ;;  %9494 = vst.msk [vmem:[%s15006_s20] sm:$0xf] %vm9493_vm0, %v9492_v0  ;;  %11604 = vmatmul.mubr.msk.bf16.vlgmr.msra.gmra.mrb[104].mxu1 %vm9636_vm10, %v9492_v0 }
 0x8ed   : > { %11608 = vmatpush3.bf16.msra.mxu1 %v11983_v24  ;;  %11613 = vmatprep.mubr.msk.bf16.mxu1 %vm12100_vm7, %v12099_v18 }
 0x8ee   : > { %11609 = vmatprep.subr.bf16.mxu1 %v12099_v18 }
 0x8f1   : > { %11610 = vmatpush3.bf16.msra.mxu1 %v11984_v19 }
 0x8f2   : > { %11611 = vmatprep.subr.bf16.mxu1 %v12099_v18 }
 0x8f5   : > { %11612 = vmatpush3.bf16.msra.mxu1 %v11985_v37 }
 0x8f6   : > { %11617 = vmatprep.subr.bf16.mxu1 %v12099_v18 }
 0x8f8   : > { %11614 = vmatmul.mubr.msk.bf16.vlgmr.msra.gmra.mrb[104].mxu1 %vm9636_vm10, %v9848_v16 }
 0x8f9   : > { %11618 = vmatpush3.bf16.msra.mxu1 %v11987_v11  ;;  %11623 = vmatprep.mubr.msk.bf16.mxu1 %vm12100_vm7, %v12099_v18 }
 0x8fa   : > { %11619 = vmatprep.subr.bf16.mxu1 %v12099_v18 }
 0x8fd   : > { %11620 = vmatpush3.bf16.msra.mxu1 %v11989_v17 }
 0x8fe   : > { %11621 = vmatprep.subr.bf16.mxu1 %v12099_v18 }
 0x901   : > { %11622 = vmatpush3.bf16.msra.mxu1 %v11991_v53 }
 0x906   : > { %v11734_v8 = vpop.trf.xlu1 }
 0x907   : > { %v11738_v14 = vunpack.i.h.bf16 %v11734_v8  ;;  %v11735_v41 = vunpack.i.l.bf16 %v11734_v8 }
 0x909   : > { %v10027_v48 = vpack.c.bf16 %v11738_v14, %v11738_v14  ;;  %v9608_v57 = vpack.c.bf16 %v11735_v41, %v11735_v41 }
 0x90b   : > { %11014 = vst.msk [vmem:[%s15006_s20 + $0xc] sm:$0xf] %vm9493_vm0, %v10027_v48  ;;  %10974 = vst.msk [vmem:[%s15006_s20 + $0x4] sm:$0xf] %vm9493_vm0, %v9608_v57  ;;  %11594 = vmatmul.mubr.msk.bf16.vlgmr.msra.gmra.mrb[132].mxu0 %vm9636_vm10, %v9608_v57  ;;  %11624 = vmatmul.mubr.msk.bf16.vlgmr.msra.gmra.mrb[104].mxu1 %vm9636_vm10, %v10027_v48 }
 0x9de   : > { %v9674_v49 = vpop.f32.mrb[132].mxu0  ;;  %v10092_v18 = vpop.f32.mrb[104].mxu1 }
 0x9df   : > { %v11627_v30 = vadd.f32 %v10092_v18, %v9674_v49  ;;  %v11625_v7 = vpop.f32.mrb[105].mxu1  ;;  %v11595_v6 = vpop.f32.mrb[133].mxu0 }
 0x9e0   : > { %v10095_v39 = vpop.f32.mrb[106].mxu1  ;;  %v9677_v23 = vpop.f32.mrb[134].mxu0 }
 0x9e1   : > { %10100 = vst.msk [vmem:[%s633_s24] sm:$0xff] %vm10099_vm11, %v11627_v30  ;;  %v11626_v2 = vpop.f32.mrb[107].mxu1  ;;  %v11596_v59 = vpop.f32.mrb[135].mxu0 }
 0x9e2 PF: > { %s30_s0 = sadd.s32 1, %s12094_s0  }
 0x9e3   : > { %p27_p4 = scmp.ge.s32.totalorder %s30_s0, 4  }
 0x9e5   :  { %29 = sbr.rel (!%p27_p4) target bundleno = 5 (0x5), region = 164 }

</bundles_post_ra>
